<compile_context>
chip_gen: v7x
topology: tpu7x:2x2x1
jax: 0.10.0
libtpu: 0.0.40
codegen_flags: <defaults>
</compile_context>

<pallas_src>
import jax
import jax.numpy as jnp
from jax import lax
from jax.experimental import pallas as pl
from jax.experimental.pallas import tpu as pltpu

EPS = 1e-5  # nn.BatchNorm2d default eps


def _bn_fold(y, g, b):
    """Training-mode BN folded to y*scale + shift (single-pass stats, all f32)."""
    mean = jnp.mean(y, axis=0, keepdims=True)
    var = jnp.maximum(jnp.mean(y * y, axis=0, keepdims=True) - mean * mean, 0.0)
    scale = g * lax.rsqrt(var + EPS)
    shift = b - mean * scale
    return y * scale + shift


def _bottleneck_kernel(x_ref, w1_ref, w2_ref, w3_ref,
                       g1_ref, b1_ref, g2_ref, b2_ref, g3_ref, b3_ref,
                       o_ref, h1p_ref):
    # x_ref  : (M, Cin)  f32   flattened NHWC input (M = N*H*W); also the residual
    # w1_ref : (Cin, P)  bf16  1x1 conv
    # w2_ref : (9, P, P) bf16  3x3 conv, one (Cin, Cout) matrix per tap (row-major taps)
    # w3_ref : (P, Cout) bf16  1x1 conv (Cout == Cin == 4*P)
    # g*/b*  : (1, C)    f32   BatchNorm affine params
    # o_ref  : (M, Cout) f32
    # h1p_ref: (N, H+2, W+2, P) f32 VMEM scratch -- zero-padded stage-1 activation
    N, Hp2, Wp2, P = h1p_ref.shape
    H, W = Hp2 - 2, Wp2 - 2
    M = x_ref.shape[0]

    x = x_ref[...]                                               # f32 residual, stays resident

    # ---- stage 1: 1x1 conv + BN + ReLU (result stays in VMEM) ----
    y1 = jnp.dot(x.astype(jnp.bfloat16), w1_ref[...],
                 preferred_element_type=jnp.float32)             # (M, P)
    h1 = jnp.maximum(_bn_fold(y1, g1_ref[...], b1_ref[...]), 0.0)

    # ---- stage 2: 3x3 conv (pad=1) as 9 shifted MXU accumulations + BN + ReLU ----
    h1p_ref[...] = jnp.zeros_like(h1p_ref)                       # zero halo
    h1p_ref[:, 1:H + 1, 1:W + 1, :] = h1.reshape(N, H, W, P)
    y2 = jnp.zeros((M, P), jnp.float32)
    for t in range(9):                                           # static unroll over taps
        di, dj = t // 3, t % 3
        patch = h1p_ref[:, di:di + H, dj:dj + W, :].reshape(M, P)
        y2 = y2 + jnp.dot(patch.astype(jnp.bfloat16), w2_ref[t],
                          preferred_element_type=jnp.float32)
    h2 = jnp.maximum(_bn_fold(y2, g2_ref[...], b2_ref[...]), 0.0)

    # ---- stage 3: 1x1 conv + BN + residual add + ReLU ----
    y3 = jnp.dot(h2.astype(jnp.bfloat16), w3_ref[...],
                 preferred_element_type=jnp.float32)             # (M, Cout)
    y3 = _bn_fold(y3, g3_ref[...], b3_ref[...])
    o_ref[...] = jnp.maximum(y3 + x, 0.0)


def _fused_bottleneck(x2d, w1_b, w2_b, w3_b, bn, N, H, W):
    g1, b1, g2, b2, g3, b3 = bn
    M, _ = x2d.shape
    P = w1_b.shape[1]
    Cout = w3_b.shape[1]
    return pl.pallas_call(
        _bottleneck_kernel,
        out_shape=jax.ShapeDtypeStruct((M, Cout), jnp.float32),
        in_specs=[pl.BlockSpec(memory_space=pltpu.MemorySpace.VMEM) for _ in range(10)],
        out_specs=pl.BlockSpec(memory_space=pltpu.MemorySpace.VMEM),
        scratch_shapes=[pltpu.VMEM((N, H + 2, W + 2, P), jnp.float32)],
        compiler_params=pltpu.CompilerParams(vmem_limit_bytes=32 * 1024 * 1024),
    )(x2d, w1_b, w2_b, w3_b,
      g1.reshape(1, -1), b1.reshape(1, -1),
      g2.reshape(1, -1), b2.reshape(1, -1),
      g3.reshape(1, -1), b3.reshape(1, -1))


# ---------------- BottleneckBlock forward (thin JAX glue) ---------------------------

def bottleneck_forward(x_nchw, params):
    # stride=1, downsample=None path (module defaults); identity == x.
    # TODO(synk): stride>1 / downsample branch not implemented (not exercised by defaults).
    w1, g1, b1, w2_pt, g2, b2, w3, g3, b3 = params
    N, C, H, W = x_nchw.shape
    M = N * H * W
    P = w1.shape[1]

    # NCHW -> NHWC rows (the reshape is layout-preserving). In an NHWC end-to-end model
    # these two transposes disappear entirely.
    x2d = jnp.transpose(x_nchw, (0, 2, 3, 1)).reshape(M, C)

    # bf16 matmul operands (weights are tiny; prepared once under jit)
    w1_b = w1.astype(jnp.bfloat16)                                       # (Cin, P)
    w2_b = jnp.transpose(w2_pt, (2, 3, 1, 0)).reshape(9, P, P).astype(jnp.bfloat16)
    w3_b = w3.astype(jnp.bfloat16)                                       # (P, 4P)

    out2d = _fused_bottleneck(x2d, w1_b, w2_b, w3_b, (g1, b1, g2, b2, g3, b3), N, H, W)
    return jnp.transpose(out2d.reshape(N, H, W, C), (0, 3, 1, 2))        # back to NCHW


# ---------------- deterministic parameter construction ------------------------------

def make_params(key, inplanes, planes):
    expansion = 4
    k1, k2, k3 = jax.random.split(key, 3)
    # conv1: matmul layout (Cin, Cout)
    w1 = 0.1 * jax.random.normal(k1, (inplanes, planes), jnp.float32)
    # conv2: PyTorch OIHW layout (planes, planes, 3, 3)
    w2_pt = 0.1 * jax.random.normal(k2, (planes, planes, 3, 3), jnp.float32)
    # conv3: matmul layout (Cin, Cout)
    w3 = 0.1 * jax.random.normal(k3, (planes, planes * expansion), jnp.float32)
    # BatchNorm affine params (PyTorch init: gamma=1, beta=0)
    g1 = jnp.ones((planes,), jnp.float32);  b1 = jnp.zeros((planes,), jnp.float32)
    g2 = jnp.ones((planes,), jnp.float32);  b2 = jnp.zeros((planes,), jnp.float32)
    g3 = jnp.ones((planes * expansion,), jnp.float32)
    b3 = jnp.zeros((planes * expansion,), jnp.float32)
    return (w1, g1, b1, w2_pt, g2, b2, w3, g3, b3)


# ---------------- pure-JAX reference (same bf16-operand / f32-accumulate numerics) --

def _bn_train(y_nchw, gamma, beta):
    mean = jnp.mean(y_nchw, axis=(0, 2, 3), keepdims=True)
    var = jnp.mean(jnp.square(y_nchw - mean), axis=(0, 2, 3), keepdims=True)
    return (y_nchw - mean) * lax.rsqrt(var + EPS) * gamma.reshape(1, -1, 1, 1) \
        + beta.reshape(1, -1, 1, 1)


def reference_forward(x, params):
    w1, g1, b1, w2_pt, g2, b2, w3, g3, b3 = params
    dn = ('NCHW', 'OIHW', 'NCHW')
    w1_oihw = jnp.transpose(w1, (1, 0))[:, :, None, None].astype(jnp.bfloat16)
    w3_oihw = jnp.transpose(w3, (1, 0))[:, :, None, None].astype(jnp.bfloat16)
    w2_b = w2_pt.astype(jnp.bfloat16)

    out = lax.conv_general_dilated(x.astype(jnp.bfloat16), w1_oihw, (1, 1), 'VALID',
                                   dimension_numbers=dn, preferred_element_type=jnp.float32)
    out = jnp.maximum(_bn_train(out, g1, b1), 0.0)
    out = lax.conv_general_dilated(out.astype(jnp.bfloat16), w2_b, (1, 1), ((1, 1), (1, 1)),
                                   dimension_numbers=dn, preferred_element_type=jnp.float32)
    out = jnp.maximum(_bn_train(out, g2, b2), 0.0)
    out = lax.conv_general_dilated(out.astype(jnp.bfloat16), w3_oihw, (1, 1), 'VALID',
                                   dimension_numbers=dn, preferred_element_type=jnp.float32)
    out = _bn_train(out, g3, b3) + x
    return jnp.maximum(out, 0.0)


if __name__ == "__main__":
    key = jax.random.PRNGKey(0)
    kx, kp = jax.random.split(key)

    N, planes, H, W = 2, 4, 16, 16
    inplanes = planes * 4          # 16, so identity add works without downsample
    x = jax.random.normal(kx, (N, inplanes, H, W), jnp.float32)
    params = make_params(kp, inplanes, planes)

    fwd = jax.jit(bottleneck_forward)
    out = jax.block_until_ready(fwd(x, params))

    ref = reference_forward(x, params)
    assert out.shape == ref.shape == (N, inplanes, H, W)
    err = float(jnp.max(jnp.abs(out - ref)))
    # bf16 matmul operands -> small, bounded mismatch vs. the bf16-matched reference
    assert err < 2e-2, f"max abs err {err}"

    print("KERNEL_OK")
</pallas_src>

<mosaic_0001>
module attributes {stable_mosaic.version = 11 : i64} {
  func.func @_bottleneck_kernel(%arg0: memref<512x16xf32, #tpu.memory_space<vmem>>, %arg1: memref<16x4xbf16, #tpu.memory_space<vmem>>, %arg2: memref<9x4x4xbf16, #tpu.memory_space<vmem>>, %arg3: memref<4x16xbf16, #tpu.memory_space<vmem>>, %arg4: memref<1x4xf32, #tpu.memory_space<vmem>>, %arg5: memref<1x4xf32, #tpu.memory_space<vmem>>, %arg6: memref<1x4xf32, #tpu.memory_space<vmem>>, %arg7: memref<1x4xf32, #tpu.memory_space<vmem>>, %arg8: memref<1x16xf32, #tpu.memory_space<vmem>>, %arg9: memref<1x16xf32, #tpu.memory_space<vmem>>, %arg10: memref<512x16xf32, #tpu.memory_space<vmem>>, %arg11: memref<2x18x18x4xf32, #tpu.memory_space<vmem>>) attributes {dimension_semantics = [], scalar_prefetch = 0 : i64, scratch_operands = 1 : i64, tpu.core_type = #tpu.core_type<tc>} {
    %c0 = arith.constant 0 : index
    %c0_0 = arith.constant 0 : index
    %0 = vector.load %arg0[%c0, %c0_0] : memref<512x16xf32, #tpu.memory_space<vmem>>, vector<512x16xf32>
    %1 = arith.truncf %0 : vector<512x16xf32> to vector<512x16xbf16>
    %c0_1 = arith.constant 0 : index
    %c0_2 = arith.constant 0 : index
    %2 = vector.load %arg1[%c0_1, %c0_2] : memref<16x4xbf16, #tpu.memory_space<vmem>>, vector<16x4xbf16>
    %cst = arith.constant dense<0.000000e+00> : vector<512x4xf32>
    %3 = tpu.matmul %1, %2, %cst {dimension_numbers = #tpu.dot_dimension_numbers<[1], [0], [0], [1], [0, 0, 1, 1], [], []>} : vector<512x16xbf16>, vector<16x4xbf16>, vector<512x4xf32> -> vector<512x4xf32>
    %c0_3 = arith.constant 0 : index
    %c0_4 = arith.constant 0 : index
    %4 = vector.load %arg4[%c0_3, %c0_4] : memref<1x4xf32, #tpu.memory_space<vmem>>, vector<1x4xf32>
    %c0_5 = arith.constant 0 : index
    %c0_6 = arith.constant 0 : index
    %5 = vector.load %arg5[%c0_5, %c0_6] : memref<1x4xf32, #tpu.memory_space<vmem>>, vector<1x4xf32>
    %cst_7 = arith.constant dense<0.000000e+00> : vector<4xf32>
    %6 = vector.multi_reduction <add>, %3, %cst_7 [0] : vector<512x4xf32> to vector<4xf32>
    %7 = vector.shape_cast %6 : vector<4xf32> to vector<1x4xf32>
    %cst_8 = arith.constant 5.120000e+02 : f32
    %8 = vector.broadcast %cst_8 : f32 to vector<1x4xf32>
    %9 = arith.divf %7, %8 : vector<1x4xf32>
    %10 = arith.mulf %3, %3 : vector<512x4xf32>
    %cst_9 = arith.constant dense<0.000000e+00> : vector<4xf32>
    %11 = vector.multi_reduction <add>, %10, %cst_9 [0] : vector<512x4xf32> to vector<4xf32>
    %12 = vector.shape_cast %11 : vector<4xf32> to vector<1x4xf32>
    %cst_10 = arith.constant 5.120000e+02 : f32
    %13 = vector.broadcast %cst_10 : f32 to vector<1x4xf32>
    %14 = arith.divf %12, %13 : vector<1x4xf32>
    %15 = arith.mulf %9, %9 : vector<1x4xf32>
    %16 = arith.subf %14, %15 : vector<1x4xf32>
    %cst_11 = arith.constant 0.000000e+00 : f32
    %17 = vector.broadcast %cst_11 : f32 to vector<1x4xf32>
    %18 = arith.maximumf %16, %17 : vector<1x4xf32>
    %cst_12 = arith.constant 9.99999974E-6 : f32
    %19 = vector.broadcast %cst_12 : f32 to vector<1x4xf32>
    %20 = arith.addf %18, %19 : vector<1x4xf32>
    %21 = math.rsqrt %20 : vector<1x4xf32>
    %22 = arith.mulf %4, %21 : vector<1x4xf32>
    %23 = arith.mulf %9, %22 : vector<1x4xf32>
    %24 = arith.subf %5, %23 : vector<1x4xf32>
    %25 = vector.broadcast %22 : vector<1x4xf32> to vector<512x4xf32>
    %26 = arith.mulf %3, %25 : vector<512x4xf32>
    %27 = vector.broadcast %24 : vector<1x4xf32> to vector<512x4xf32>
    %28 = arith.addf %26, %27 : vector<512x4xf32>
    %cst_13 = arith.constant 0.000000e+00 : f32
    %29 = vector.broadcast %cst_13 : f32 to vector<512x4xf32>
    %30 = arith.maximumf %28, %29 : vector<512x4xf32>
    %cst_14 = arith.constant 0.000000e+00 : f32
    %31 = vector.broadcast %cst_14 : f32 to vector<2x18x18x4xf32>
    %c0_15 = arith.constant 0 : index
    %c0_16 = arith.constant 0 : index
    %c0_17 = arith.constant 0 : index
    %c0_18 = arith.constant 0 : index
    %32 = vector.load %arg11[%c0_15, %c0_16, %c0_17, %c0_18] : memref<2x18x18x4xf32, #tpu.memory_space<vmem>>, vector<2x18x18x4xf32>
    tpu.vector_store %arg11[%c0_15, %c0_16, %c0_17, %c0_18], %31 {strides = array<i32>} : memref<2x18x18x4xf32, #tpu.memory_space<vmem>>, vector<2x18x18x4xf32>,
    %33 = vector.shape_cast %30 : vector<512x4xf32> to vector<2x16x16x4xf32>
    %c0_19 = arith.constant 0 : index
    %c1 = arith.constant 1 : index
    %c1_20 = arith.constant 1 : index
    %c0_21 = arith.constant 0 : index
    %34 = vector.load %arg11[%c0_19, %c1, %c1_20, %c0_21] : memref<2x18x18x4xf32, #tpu.memory_space<vmem>>, vector<2x16x16x4xf32>
    tpu.vector_store %arg11[%c0_19, %c1, %c1_20, %c0_21], %33 {strides = array<i32>} : memref<2x18x18x4xf32, #tpu.memory_space<vmem>>, vector<2x16x16x4xf32>,
    %cst_22 = arith.constant 0.000000e+00 : f32
    %35 = vector.broadcast %cst_22 : f32 to vector<512x4xf32>
    %c0_23 = arith.constant 0 : index
    %c0_24 = arith.constant 0 : index
    %c0_25 = arith.constant 0 : index
    %c0_26 = arith.constant 0 : index
    %36 = vector.load %arg11[%c0_23, %c0_24, %c0_25, %c0_26] : memref<2x18x18x4xf32, #tpu.memory_space<vmem>>, vector<2x16x16x4xf32>
    %37 = vector.shape_cast %36 : vector<2x16x16x4xf32> to vector<512x4xf32>
    %38 = arith.truncf %37 : vector<512x4xf32> to vector<512x4xbf16>
    %c0_27 = arith.constant 0 : index
    %c0_28 = arith.constant 0 : index
    %c0_29 = arith.constant 0 : index
    %39 = vector.load %arg2[%c0_27, %c0_28, %c0_29] : memref<9x4x4xbf16, #tpu.memory_space<vmem>>, vector<1x4x4xbf16>
    %40 = vector.shape_cast %39 : vector<1x4x4xbf16> to vector<4x4xbf16>
    %cst_30 = arith.constant dense<0.000000e+00> : vector<512x4xf32>
    %41 = tpu.matmul %38, %40, %cst_30 {dimension_numbers = #tpu.dot_dimension_numbers<[1], [0], [0], [1], [0, 0, 1, 1], [], []>} : vector<512x4xbf16>, vector<4x4xbf16>, vector<512x4xf32> -> vector<512x4xf32>
    %42 = arith.addf %35, %41 : vector<512x4xf32>
    %c0_31 = arith.constant 0 : index
    %c0_32 = arith.constant 0 : index
    %c1_33 = arith.constant 1 : index
    %c0_34 = arith.constant 0 : index
    %43 = vector.load %arg11[%c0_31, %c0_32, %c1_33, %c0_34] : memref<2x18x18x4xf32, #tpu.memory_space<vmem>>, vector<2x16x16x4xf32>
    %44 = vector.shape_cast %43 : vector<2x16x16x4xf32> to vector<512x4xf32>
    %45 = arith.truncf %44 : vector<512x4xf32> to vector<512x4xbf16>
    %c1_35 = arith.constant 1 : index
    %c0_36 = arith.constant 0 : index
    %c0_37 = arith.constant 0 : index
    %46 = vector.load %arg2[%c1_35, %c0_36, %c0_37] : memref<9x4x4xbf16, #tpu.memory_space<vmem>>, vector<1x4x4xbf16>
    %47 = vector.shape_cast %46 : vector<1x4x4xbf16> to vector<4x4xbf16>
    %cst_38 = arith.constant dense<0.000000e+00> : vector<512x4xf32>
    %48 = tpu.matmul %45, %47, %cst_38 {dimension_numbers = #tpu.dot_dimension_numbers<[1], [0], [0], [1], [0, 0, 1, 1], [], []>} : vector<512x4xbf16>, vector<4x4xbf16>, vector<512x4xf32> -> vector<512x4xf32>
    %49 = arith.addf %42, %48 : vector<512x4xf32>
    %c0_39 = arith.constant 0 : index
    %c0_40 = arith.constant 0 : index
    %c2 = arith.constant 2 : index
    %c0_41 = arith.constant 0 : index
    %50 = vector.load %arg11[%c0_39, %c0_40, %c2, %c0_41] : memref<2x18x18x4xf32, #tpu.memory_space<vmem>>, vector<2x16x16x4xf32>
    %51 = vector.shape_cast %50 : vector<2x16x16x4xf32> to vector<512x4xf32>
    %52 = arith.truncf %51 : vector<512x4xf32> to vector<512x4xbf16>
    %c2_42 = arith.constant 2 : index
    %c0_43 = arith.constant 0 : index
    %c0_44 = arith.constant 0 : index
    %53 = vector.load %arg2[%c2_42, %c0_43, %c0_44] : memref<9x4x4xbf16, #tpu.memory_space<vmem>>, vector<1x4x4xbf16>
    %54 = vector.shape_cast %53 : vector<1x4x4xbf16> to vector<4x4xbf16>
    %cst_45 = arith.constant dense<0.000000e+00> : vector<512x4xf32>
    %55 = tpu.matmul %52, %54, %cst_45 {dimension_numbers = #tpu.dot_dimension_numbers<[1], [0], [0], [1], [0, 0, 1, 1], [], []>} : vector<512x4xbf16>, vector<4x4xbf16>, vector<512x4xf32> -> vector<512x4xf32>
    %56 = arith.addf %49, %55 : vector<512x4xf32>
    %c0_46 = arith.constant 0 : index
    %c1_47 = arith.constant 1 : index
    %c0_48 = arith.constant 0 : index
    %c0_49 = arith.constant 0 : index
    %57 = vector.load %arg11[%c0_46, %c1_47, %c0_48, %c0_49] : memref<2x18x18x4xf32, #tpu.memory_space<vmem>>, vector<2x16x16x4xf32>
    %58 = vector.shape_cast %57 : vector<2x16x16x4xf32> to vector<512x4xf32>
    %59 = arith.truncf %58 : vector<512x4xf32> to vector<512x4xbf16>
    %c3 = arith.constant 3 : index
    %c0_50 = arith.constant 0 : index
    %c0_51 = arith.constant 0 : index
    %60 = vector.load %arg2[%c3, %c0_50, %c0_51] : memref<9x4x4xbf16, #tpu.memory_space<vmem>>, vector<1x4x4xbf16>
    %61 = vector.shape_cast %60 : vector<1x4x4xbf16> to vector<4x4xbf16>
    %cst_52 = arith.constant dense<0.000000e+00> : vector<512x4xf32>
    %62 = tpu.matmul %59, %61, %cst_52 {dimension_numbers = #tpu.dot_dimension_numbers<[1], [0], [0], [1], [0, 0, 1, 1], [], []>} : vector<512x4xbf16>, vector<4x4xbf16>, vector<512x4xf32> -> vector<512x4xf32>
    %63 = arith.addf %56, %62 : vector<512x4xf32>
    %c0_53 = arith.constant 0 : index
    %c1_54 = arith.constant 1 : index
    %c1_55 = arith.constant 1 : index
    %c0_56 = arith.constant 0 : index
    %64 = vector.load %arg11[%c0_53, %c1_54, %c1_55, %c0_56] : memref<2x18x18x4xf32, #tpu.memory_space<vmem>>, vector<2x16x16x4xf32>
    %65 = vector.shape_cast %64 : vector<2x16x16x4xf32> to vector<512x4xf32>
    %66 = arith.truncf %65 : vector<512x4xf32> to vector<512x4xbf16>
    %c4 = arith.constant 4 : index
    %c0_57 = arith.constant 0 : index
    %c0_58 = arith.constant 0 : index
    %67 = vector.load %arg2[%c4, %c0_57, %c0_58] : memref<9x4x4xbf16, #tpu.memory_space<vmem>>, vector<1x4x4xbf16>
    %68 = vector.shape_cast %67 : vector<1x4x4xbf16> to vector<4x4xbf16>
    %cst_59 = arith.constant dense<0.000000e+00> : vector<512x4xf32>
    %69 = tpu.matmul %66, %68, %cst_59 {dimension_numbers = #tpu.dot_dimension_numbers<[1], [0], [0], [1], [0, 0, 1, 1], [], []>} : vector<512x4xbf16>, vector<4x4xbf16>, vector<512x4xf32> -> vector<512x4xf32>
    %70 = arith.addf %63, %69 : vector<512x4xf32>
    %c0_60 = arith.constant 0 : index
    %c1_61 = arith.constant 1 : index
    %c2_62 = arith.constant 2 : index
    %c0_63 = arith.constant 0 : index
    %71 = vector.load %arg11[%c0_60, %c1_61, %c2_62, %c0_63] : memref<2x18x18x4xf32, #tpu.memory_space<vmem>>, vector<2x16x16x4xf32>
    %72 = vector.shape_cast %71 : vector<2x16x16x4xf32> to vector<512x4xf32>
    %73 = arith.truncf %72 : vector<512x4xf32> to vector<512x4xbf16>
    %c5 = arith.constant 5 : index
    %c0_64 = arith.constant 0 : index
    %c0_65 = arith.constant 0 : index
    %74 = vector.load %arg2[%c5, %c0_64, %c0_65] : memref<9x4x4xbf16, #tpu.memory_space<vmem>>, vector<1x4x4xbf16>
    %75 = vector.shape_cast %74 : vector<1x4x4xbf16> to vector<4x4xbf16>
    %cst_66 = arith.constant dense<0.000000e+00> : vector<512x4xf32>
    %76 = tpu.matmul %73, %75, %cst_66 {dimension_numbers = #tpu.dot_dimension_numbers<[1], [0], [0], [1], [0, 0, 1, 1], [], []>} : vector<512x4xbf16>, vector<4x4xbf16>, vector<512x4xf32> -> vector<512x4xf32>
    %77 = arith.addf %70, %76 : vector<512x4xf32>
    %c0_67 = arith.constant 0 : index
    %c2_68 = arith.constant 2 : index
    %c0_69 = arith.constant 0 : index
    %c0_70 = arith.constant 0 : index
    %78 = vector.load %arg11[%c0_67, %c2_68, %c0_69, %c0_70] : memref<2x18x18x4xf32, #tpu.memory_space<vmem>>, vector<2x16x16x4xf32>
    %79 = vector.shape_cast %78 : vector<2x16x16x4xf32> to vector<512x4xf32>
    %80 = arith.truncf %79 : vector<512x4xf32> to vector<512x4xbf16>
    %c6 = arith.constant 6 : index
    %c0_71 = arith.constant 0 : index
    %c0_72 = arith.constant 0 : index
    %81 = vector.load %arg2[%c6, %c0_71, %c0_72] : memref<9x4x4xbf16, #tpu.memory_space<vmem>>, vector<1x4x4xbf16>
    %82 = vector.shape_cast %81 : vector<1x4x4xbf16> to vector<4x4xbf16>
    %cst_73 = arith.constant dense<0.000000e+00> : vector<512x4xf32>
    %83 = tpu.matmul %80, %82, %cst_73 {dimension_numbers = #tpu.dot_dimension_numbers<[1], [0], [0], [1], [0, 0, 1, 1], [], []>} : vector<512x4xbf16>, vector<4x4xbf16>, vector<512x4xf32> -> vector<512x4xf32>
    %84 = arith.addf %77, %83 : vector<512x4xf32>
    %c0_74 = arith.constant 0 : index
    %c2_75 = arith.constant 2 : index
    %c1_76 = arith.constant 1 : index
    %c0_77 = arith.constant 0 : index
    %85 = vector.load %arg11[%c0_74, %c2_75, %c1_76, %c0_77] : memref<2x18x18x4xf32, #tpu.memory_space<vmem>>, vector<2x16x16x4xf32>
    %86 = vector.shape_cast %85 : vector<2x16x16x4xf32> to vector<512x4xf32>
    %87 = arith.truncf %86 : vector<512x4xf32> to vector<512x4xbf16>
    %c7 = arith.constant 7 : index
    %c0_78 = arith.constant 0 : index
    %c0_79 = arith.constant 0 : index
    %88 = vector.load %arg2[%c7, %c0_78, %c0_79] : memref<9x4x4xbf16, #tpu.memory_space<vmem>>, vector<1x4x4xbf16>
    %89 = vector.shape_cast %88 : vector<1x4x4xbf16> to vector<4x4xbf16>
    %cst_80 = arith.constant dense<0.000000e+00> : vector<512x4xf32>
    %90 = tpu.matmul %87, %89, %cst_80 {dimension_numbers = #tpu.dot_dimension_numbers<[1], [0], [0], [1], [0, 0, 1, 1], [], []>} : vector<512x4xbf16>, vector<4x4xbf16>, vector<512x4xf32> -> vector<512x4xf32>
    %91 = arith.addf %84, %90 : vector<512x4xf32>
    %c0_81 = arith.constant 0 : index
    %c2_82 = arith.constant 2 : index
    %c2_83 = arith.constant 2 : index
    %c0_84 = arith.constant 0 : index
    %92 = vector.load %arg11[%c0_81, %c2_82, %c2_83, %c0_84] : memref<2x18x18x4xf32, #tpu.memory_space<vmem>>, vector<2x16x16x4xf32>
    %93 = vector.shape_cast %92 : vector<2x16x16x4xf32> to vector<512x4xf32>
    %94 = arith.truncf %93 : vector<512x4xf32> to vector<512x4xbf16>
    %c8 = arith.constant 8 : index
    %c0_85 = arith.constant 0 : index
    %c0_86 = arith.constant 0 : index
    %95 = vector.load %arg2[%c8, %c0_85, %c0_86] : memref<9x4x4xbf16, #tpu.memory_space<vmem>>, vector<1x4x4xbf16>
    %96 = vector.shape_cast %95 : vector<1x4x4xbf16> to vector<4x4xbf16>
    %cst_87 = arith.constant dense<0.000000e+00> : vector<512x4xf32>
    %97 = tpu.matmul %94, %96, %cst_87 {dimension_numbers = #tpu.dot_dimension_numbers<[1], [0], [0], [1], [0, 0, 1, 1], [], []>} : vector<512x4xbf16>, vector<4x4xbf16>, vector<512x4xf32> -> vector<512x4xf32>
    %98 = arith.addf %91, %97 : vector<512x4xf32>
    %c0_88 = arith.constant 0 : index
    %c0_89 = arith.constant 0 : index
    %99 = vector.load %arg6[%c0_88, %c0_89] : memref<1x4xf32, #tpu.memory_space<vmem>>, vector<1x4xf32>
    %c0_90 = arith.constant 0 : index
    %c0_91 = arith.constant 0 : index
    %100 = vector.load %arg7[%c0_90, %c0_91] : memref<1x4xf32, #tpu.memory_space<vmem>>, vector<1x4xf32>
    %cst_92 = arith.constant dense<0.000000e+00> : vector<4xf32>
    %101 = vector.multi_reduction <add>, %98, %cst_92 [0] : vector<512x4xf32> to vector<4xf32>
    %102 = vector.shape_cast %101 : vector<4xf32> to vector<1x4xf32>
    %cst_93 = arith.constant 5.120000e+02 : f32
    %103 = vector.broadcast %cst_93 : f32 to vector<1x4xf32>
    %104 = arith.divf %102, %103 : vector<1x4xf32>
    %105 = arith.mulf %98, %98 : vector<512x4xf32>
    %cst_94 = arith.constant dense<0.000000e+00> : vector<4xf32>
    %106 = vector.multi_reduction <add>, %105, %cst_94 [0] : vector<512x4xf32> to vector<4xf32>
    %107 = vector.shape_cast %106 : vector<4xf32> to vector<1x4xf32>
    %cst_95 = arith.constant 5.120000e+02 : f32
    %108 = vector.broadcast %cst_95 : f32 to vector<1x4xf32>
    %109 = arith.divf %107, %108 : vector<1x4xf32>
    %110 = arith.mulf %104, %104 : vector<1x4xf32>
    %111 = arith.subf %109, %110 : vector<1x4xf32>
    %cst_96 = arith.constant 0.000000e+00 : f32
    %112 = vector.broadcast %cst_96 : f32 to vector<1x4xf32>
    %113 = arith.maximumf %111, %112 : vector<1x4xf32>
    %cst_97 = arith.constant 9.99999974E-6 : f32
    %114 = vector.broadcast %cst_97 : f32 to vector<1x4xf32>
    %115 = arith.addf %113, %114 : vector<1x4xf32>
    %116 = math.rsqrt %115 : vector<1x4xf32>
    %117 = arith.mulf %99, %116 : vector<1x4xf32>
    %118 = arith.mulf %104, %117 : vector<1x4xf32>
    %119 = arith.subf %100, %118 : vector<1x4xf32>
    %120 = vector.broadcast %117 : vector<1x4xf32> to vector<512x4xf32>
    %121 = arith.mulf %98, %120 : vector<512x4xf32>
    %122 = vector.broadcast %119 : vector<1x4xf32> to vector<512x4xf32>
    %123 = arith.addf %121, %122 : vector<512x4xf32>
    %cst_98 = arith.constant 0.000000e+00 : f32
    %124 = vector.broadcast %cst_98 : f32 to vector<512x4xf32>
    %125 = arith.maximumf %123, %124 : vector<512x4xf32>
    %126 = arith.truncf %125 : vector<512x4xf32> to vector<512x4xbf16>
    %c0_99 = arith.constant 0 : index
    %c0_100 = arith.constant 0 : index
    %127 = vector.load %arg3[%c0_99, %c0_100] : memref<4x16xbf16, #tpu.memory_space<vmem>>, vector<4x16xbf16>
    %cst_101 = arith.constant dense<0.000000e+00> : vector<512x16xf32>
    %128 = tpu.matmul %126, %127, %cst_101 {dimension_numbers = #tpu.dot_dimension_numbers<[1], [0], [0], [1], [0, 0, 1, 1], [], []>} : vector<512x4xbf16>, vector<4x16xbf16>, vector<512x16xf32> -> vector<512x16xf32>
    %c0_102 = arith.constant 0 : index
    %c0_103 = arith.constant 0 : index
    %129 = vector.load %arg8[%c0_102, %c0_103] : memref<1x16xf32, #tpu.memory_space<vmem>>, vector<1x16xf32>
    %c0_104 = arith.constant 0 : index
    %c0_105 = arith.constant 0 : index
    %130 = vector.load %arg9[%c0_104, %c0_105] : memref<1x16xf32, #tpu.memory_space<vmem>>, vector<1x16xf32>
    %cst_106 = arith.constant dense<0.000000e+00> : vector<16xf32>
    %131 = vector.multi_reduction <add>, %128, %cst_106 [0] : vector<512x16xf32> to vector<16xf32>
    %132 = vector.shape_cast %131 : vector<16xf32> to vector<1x16xf32>
    %cst_107 = arith.constant 5.120000e+02 : f32
    %133 = vector.broadcast %cst_107 : f32 to vector<1x16xf32>
    %134 = arith.divf %132, %133 : vector<1x16xf32>
    %135 = arith.mulf %128, %128 : vector<512x16xf32>
    %cst_108 = arith.constant dense<0.000000e+00> : vector<16xf32>
    %136 = vector.multi_reduction <add>, %135, %cst_108 [0] : vector<512x16xf32> to vector<16xf32>
    %137 = vector.shape_cast %136 : vector<16xf32> to vector<1x16xf32>
    %cst_109 = arith.constant 5.120000e+02 : f32
    %138 = vector.broadcast %cst_109 : f32 to vector<1x16xf32>
    %139 = arith.divf %137, %138 : vector<1x16xf32>
    %140 = arith.mulf %134, %134 : vector<1x16xf32>
    %141 = arith.subf %139, %140 : vector<1x16xf32>
    %cst_110 = arith.constant 0.000000e+00 : f32
    %142 = vector.broadcast %cst_110 : f32 to vector<1x16xf32>
    %143 = arith.maximumf %141, %142 : vector<1x16xf32>
    %cst_111 = arith.constant 9.99999974E-6 : f32
    %144 = vector.broadcast %cst_111 : f32 to vector<1x16xf32>
    %145 = arith.addf %143, %144 : vector<1x16xf32>
    %146 = math.rsqrt %145 : vector<1x16xf32>
    %147 = arith.mulf %129, %146 : vector<1x16xf32>
    %148 = arith.mulf %134, %147 : vector<1x16xf32>
    %149 = arith.subf %130, %148 : vector<1x16xf32>
    %150 = vector.broadcast %147 : vector<1x16xf32> to vector<512x16xf32>
    %151 = arith.mulf %128, %150 : vector<512x16xf32>
    %152 = vector.broadcast %149 : vector<1x16xf32> to vector<512x16xf32>
    %153 = arith.addf %151, %152 : vector<512x16xf32>
    %154 = arith.addf %153, %0 : vector<512x16xf32>
    %cst_112 = arith.constant 0.000000e+00 : f32
    %155 = vector.broadcast %cst_112 : f32 to vector<512x16xf32>
    %156 = arith.maximumf %154, %155 : vector<512x16xf32>
    %c0_113 = arith.constant 0 : index
    %c0_114 = arith.constant 0 : index
    %157 = vector.load %arg10[%c0_113, %c0_114] : memref<512x16xf32, #tpu.memory_space<vmem>>, vector<512x16xf32>
    tpu.vector_store %arg10[%c0_113, %c0_114], %156 {strides = array<i32>} : memref<512x16xf32, #tpu.memory_space<vmem>>, vector<512x16xf32>,
    return
  }
}

</mosaic_0001>

<bundles_post_ra>
// kernel: bottleneck_forward.1
= control target key start
LH: loop header
LB: loop body
LE: loop exit
PB: predicated region body
PF: predicated region fallthrough
CT: control target
= control target key end

     0   :  { %vm140_vm0 = vcmask 130048   ;;  %vm528_vm1 = vcmask 31744   ;;  %vm1076_vm2 = vcmask 25600   ;;  %vm1539_vm3 = vcmask 1041408   ;;  %s15013_s1 = inlined_call_operand.vmem [shape: bf16[16,4], index: 1, kind: input, shape index: {}]   ;;  %s15014_s0 = inlined_call_operand.vmem [shape: f32[512,16], index: 0, kind: input, shape index: {}]   ;;  %s15015_s2 = inlined_call_operand.vmem [shape: bf16[9,4,4], index: 2, kind: input, shape index: {}]   ;;  %s15016_s4 = inlined_call_operand.vmem [shape: f32[1,4], index: 4, kind: input, shape index: {}]   ;;  %s15017_s5 = inlined_call_operand.vmem [shape: f32[1,4], index: 5, kind: input, shape index: {}]   ;;  %s15018_s3 = inlined_call_operand.vmem [shape: bf16[4,16], index: 3, kind: input, shape index: {}]   ;;  %s15019_s6 = inlined_call_operand.vmem [shape: f32[1,4], index: 6, kind: input, shape index: {}]   ;;  %s15020_s7 = inlined_call_operand.vmem [shape: f32[1,4], index: 7, kind: input, shape index: {}]   ;;  %s15021_s8 = inlined_call_operand.vmem [shape: f32[1,16], index: 8, kind: input, shape index: {}]   ;;  %s15022_s9 = inlined_call_operand.vmem [shape: f32[1,16], index: 9, kind: input, shape index: {}]   ;;  %s15023_s10 = inlined_call_operand.vmem [shape: f32[512,16], index: 10, kind: output, shape index: {}]  }
   0x1   :  { %v9692_v0 = vld [vmem:[%s15013_s1] sm:$0xff]   ;;  %v37_v2 = vld [vmem:[%s15014_s0 + $0x8] sm:$0xff]  ;;  %v38_v3 = vld [vmem:[%s15014_s0 + $0x10] sm:$0xff] }
   0x2   :  { %v36_v1 = vld [vmem:[%s15014_s0] sm:$0xff]  ;;  %8440 = vmatprep.subr.bf16.mxu0 %v9692_v0  ;;  %v39_v5 = vld [vmem:[%s15014_s0 + $0x18] sm:$0xff]  ;;  %v41_v7 = vld [vmem:[%s15014_s0 + $0x28] sm:$0xff] }
   0x3   :  { %v100_v4 = vpack.c.bf16 %v37_v2, %v36_v1  ;;  %v40_v6 = vld [vmem:[%s15014_s0 + $0x20] sm:$0xff]  ;;  %8441 = vmatpush3.bf16.msra.mxu0 %v9692_v0  ;;  %v101_v8 = vpack.c.bf16 %v39_v5, %v38_v3  ;;  %v42_v10 = vld [vmem:[%s15014_s0 + $0x30] sm:$0xff]  ;;  %v43_v11 = vld [vmem:[%s15014_s0 + $0x38] sm:$0xff] }
   0x4   :  { %v102_v9 = vpack.c.bf16 %v41_v7, %v40_v6  ;;  %v44_v12 = vld [vmem:[%s15014_s0 + $0x40] sm:$0xff]  ;;  %v45_v13 = vld [vmem:[%s15014_s0 + $0x48] sm:$0xff]  ;;  %v103_v14 = vpack.c.bf16 %v43_v11, %v42_v10  ;;  %v46_v16 = vld [vmem:[%s15014_s0 + $0x50] sm:$0xff] }
   0x5   :  { %8442 = vmatprep.mubr.msk.bf16.mxu0 %vm140_vm0, %v100_v4  ;;  %v104_v15 = vpack.c.bf16 %v45_v13, %v44_v12  ;;  %v47_v17 = vld [vmem:[%s15014_s0 + $0x58] sm:$0xff]  ;;  %v48_v18 = vld [vmem:[%s15014_s0 + $0x60] sm:$0xff]  ;;  %v49_v19 = vld [vmem:[%s15014_s0 + $0x68] sm:$0xff]  ;;  %v9764_v12 = vmov 0.0  }
   0x6   :  { %8443 = vmatmul.mubr.msk.bf16.vlgmr.msra.gmra.mrb[0].mxu0 %vm140_vm0, %v101_v8  ;;  %v105_v20 = vpack.c.bf16 %v47_v17, %v46_v16  ;;  %v106_v21 = vpack.c.bf16 %v49_v19, %v48_v18  ;;  %v50_v22 = vld [vmem:[%s15014_s0 + $0x70] sm:$0xff]  ;;  %v51_v23 = vld [vmem:[%s15014_s0 + $0x78] sm:$0xff]  ;;  %v52_v24 = vld [vmem:[%s15014_s0 + $0x80] sm:$0xff]  ;;  %1081 = vst.msk [vmem:[#allocation2 + $0x30] sm:$0xff] %vm528_vm1, %v9764_v12 }
   0x7   :  { %8446 = vmatprep.mubr.msk.bf16.mxu0 %vm140_vm0, %v102_v9  ;;  %v53_v25 = vld [vmem:[%s15014_s0 + $0x88] sm:$0xff]  ;;  %v107_v26 = vpack.c.bf16 %v51_v23, %v50_v22  ;;  %v54_v28 = vld [vmem:[%s15014_s0 + $0x90] sm:$0xff]  ;;  %v55_v29 = vld [vmem:[%s15014_s0 + $0x98] sm:$0xff]  ;;  %1082 = vst.msk [vmem:[#allocation2 + $0x38] sm:$0xff] %vm528_vm1, %v9764_v12 }
   0x8   :  { %v108_v27 = vpack.c.bf16 %v53_v25, %v52_v24  ;;  %v56_v30 = vld [vmem:[%s15014_s0 + $0xa0] sm:$0xff]  ;;  %v57_v31 = vld [vmem:[%s15014_s0 + $0xa8] sm:$0xff]  ;;  %v109_v32 = vpack.c.bf16 %v55_v29, %v54_v28  ;;  %v58_v34 = vld [vmem:[%s15014_s0 + $0xb0] sm:$0xff]  ;;  %1074 = vst.msk [vmem:[#allocation2] sm:$0xff] %vm528_vm1, %v9764_v12 }
   0x9   :  { %v110_v33 = vpack.c.bf16 %v57_v31, %v56_v30  ;;  %v59_v35 = vld [vmem:[%s15014_s0 + $0xb8] sm:$0xff]  ;;  %v60_v36 = vld [vmem:[%s15014_s0 + $0xc0] sm:$0xff]  ;;  %v61_v37 = vld [vmem:[%s15014_s0 + $0xc8] sm:$0xff]  ;;  %1075 = vst.msk [vmem:[#allocation2 + $0x8] sm:$0xff] %vm528_vm1, %v9764_v12 }
   0xa   :  { %v111_v38 = vpack.c.bf16 %v59_v35, %v58_v34  ;;  %v112_v39 = vpack.c.bf16 %v61_v37, %v60_v36  ;;  %v62_v40 = vld [vmem:[%s15014_s0 + $0xd0] sm:$0xff]  ;;  %v63_v41 = vld [vmem:[%s15014_s0 + $0xd8] sm:$0xff]  ;;  %v64_v42 = vld [vmem:[%s15014_s0 + $0xe0] sm:$0xff]  ;;  %1078 = vst.msk [vmem:[#allocation2 + $0x18] sm:$0xff] %vm528_vm1, %v9764_v12 }
   0xb   :  { %v65_v43 = vld [vmem:[%s15014_s0 + $0xe8] sm:$0xff]  ;;  %v113_v44 = vpack.c.bf16 %v63_v41, %v62_v40  ;;  %v66_v46 = vld [vmem:[%s15014_s0 + $0xf0] sm:$0xff]  ;;  %v67_v47 = vld [vmem:[%s15014_s0 + $0xf8] sm:$0xff]  ;;  %1079 = vst.msk [vmem:[#allocation2 + $0x20] sm:$0xff] %vm528_vm1, %v9764_v12 }
   0xc   :  { %v114_v45 = vpack.c.bf16 %v65_v43, %v64_v42  ;;  %v68_v48 = vld [vmem:[%s15014_s0 + $0x100] sm:$0xff]  ;;  %v69_v49 = vld [vmem:[%s15014_s0 + $0x108] sm:$0xff]  ;;  %v115_v50 = vpack.c.bf16 %v67_v47, %v66_v46  ;;  %v70_v52 = vld [vmem:[%s15014_s0 + $0x110] sm:$0xff]  ;;  %1084 = vst.msk [vmem:[#allocation2 + $0x48] sm:$0xff] %vm528_vm1, %v9764_v12 }
   0xd   :  { %v116_v51 = vpack.c.bf16 %v69_v49, %v68_v48  ;;  %v71_v53 = vld [vmem:[%s15014_s0 + $0x118] sm:$0xff]  ;;  %v72_v54 = vld [vmem:[%s15014_s0 + $0x120] sm:$0xff]  ;;  %v73_v55 = vld [vmem:[%s15014_s0 + $0x128] sm:$0xff]  ;;  %1085 = vst.msk [vmem:[#allocation2 + $0x50] sm:$0xff] %vm528_vm1, %v9764_v12 }
   0xe   :  { %8447 = vmatmul.mubr.msk.bf16.gmra.mrb[4].mxu0 %vm140_vm0, %v103_v14  ;;  %v117_v56 = vpack.c.bf16 %v71_v53, %v70_v52  ;;  %v118_v57 = vpack.c.bf16 %v73_v55, %v72_v54  ;;  %v74_v58 = vld [vmem:[%s15014_s0 + $0x130] sm:$0xff]  ;;  %v75_v59 = vld [vmem:[%s15014_s0 + $0x138] sm:$0xff]  ;;  %v76_v60 = vld [vmem:[%s15014_s0 + $0x140] sm:$0xff]  ;;  %1087 = vst.msk [vmem:[#allocation2 + $0x60] sm:$0xff] %vm528_vm1, %v9764_v12 }
   0xf   :  { %8450 = vmatprep.mubr.msk.bf16.mxu0 %vm140_vm0, %v104_v15  ;;  %v77_v61 = vld [vmem:[%s15014_s0 + $0x148] sm:$0xff]  ;;  %v119_v62 = vpack.c.bf16 %v75_v59, %v74_v58  ;;  %v78_v0 = vld [vmem:[%s15014_s0 + $0x150] sm:$0xff]  ;;  %v79_v1 = vld [vmem:[%s15014_s0 + $0x158] sm:$0xff]  ;;  %1088 = vst.msk [vmem:[#allocation2 + $0x68] sm:$0xff] %vm528_vm1, %v9764_v12 }
  0x10   :  { %v120_v63 = vpack.c.bf16 %v77_v61, %v76_v60  ;;  %v80_v2 = vld [vmem:[%s15014_s0 + $0x160] sm:$0xff]  ;;  %v81_v3 = vld [vmem:[%s15014_s0 + $0x168] sm:$0xff]  ;;  %v121_v4 = vpack.c.bf16 %v79_v1, %v78_v0  ;;  %v9987_v6 = vld [vmem:[%s15014_s0 + $0x170] sm:$0xff]  ;;  %1090 = vst.msk [vmem:[#allocation2 + $0x78] sm:$0xff] %vm528_vm1, %v9764_v12 }
  0x11   :  { %v122_v5 = vpack.c.bf16 %v81_v3, %v80_v2  ;;  %v9992_v7 = vld [vmem:[%s15014_s0 + $0x178] sm:$0xff]  ;;  %v9997_v8 = vld [vmem:[%s15014_s0 + $0x180] sm:$0xff]  ;;  %v10002_v9 = vld [vmem:[%s15014_s0 + $0x188] sm:$0xff]  ;;  %1091 = vst.msk [vmem:[#allocation2 + $0x80] sm:$0xff] %vm528_vm1, %v9764_v12 }
  0x12   :  { %v123_v10 = vpack.c.bf16 %v9992_v7, %v9987_v6  ;;  %v124_v11 = vpack.c.bf16 %v10002_v9, %v9997_v8  ;;  %1093 = vst.msk [vmem:[#allocation2 + $0x90] sm:$0xff] %vm528_vm1, %v9764_v12  ;;  %1094 = vst.msk [vmem:[#allocation2 + $0x98] sm:$0xff] %vm528_vm1, %v9764_v12  ;;  %v86_v13 = vld [vmem:[%s15014_s0 + $0x190] sm:$0xff]  ;;  %v87_v14 = vld [vmem:[%s15014_s0 + $0x198] sm:$0xff] }
  0x13   :  { %1096 = vst.msk [vmem:[#allocation2 + $0xa8] sm:$0xff] %vm528_vm1, %v9764_v12  ;;  %1097 = vst.msk [vmem:[#allocation2 + $0xb0] sm:$0xff] %vm528_vm1, %v9764_v12  ;;  %v88_v15 = vld [vmem:[%s15014_s0 + $0x1a0] sm:$0xff]  ;;  %v89_v16 = vld [vmem:[%s15014_s0 + $0x1a8] sm:$0xff]  ;;  %v125_v17 = vpack.c.bf16 %v87_v14, %v86_v13 }
  0x14   :  { %1099 = vst.msk [vmem:[#allocation2 + $0xc0] sm:$0xff] %vm528_vm1, %v9764_v12  ;;  %1100 = vst.msk [vmem:[#allocation2 + $0xc8] sm:$0xff] %vm528_vm1, %v9764_v12  ;;  %v126_v18 = vpack.c.bf16 %v89_v16, %v88_v15  ;;  %v90_v19 = vld [vmem:[%s15014_s0 + $0x1b0] sm:$0xff]  ;;  %v93_v22 = vld [vmem:[%s15014_s0 + $0x1c8] sm:$0xff] }
  0x15   :  { %1102 = vst.msk [vmem:[#allocation2 + $0xd8] sm:$0xff] %vm528_vm1, %v9764_v12  ;;  %1103 = vst.msk [vmem:[#allocation2 + $0xe0] sm:$0xff] %vm528_vm1, %v9764_v12  ;;  %v94_v25 = vld [vmem:[%s15014_s0 + $0x1d0] sm:$0xff]  ;;  %v97_v28 = vld [vmem:[%s15014_s0 + $0x1e8] sm:$0xff] }
  0x16   :  { %8451 = vmatmul.mubr.msk.bf16.gmra.mrb[8].mxu0 %vm140_vm0, %v105_v20  ;;  %1105 = vst.msk [vmem:[#allocation2 + $0xf0] sm:$0xff] %vm528_vm1, %v9764_v12  ;;  %1106 = vst.msk [vmem:[#allocation2 + $0xf8] sm:$0xff] %vm528_vm1, %v9764_v12  ;;  %v91_v20 = vld [vmem:[%s15014_s0 + $0x1b8] sm:$0xff]  ;;  %v98_v31 = vld [vmem:[%s15014_s0 + $0x1f0] sm:$0xff] }
  0x17   :  { %8454 = vmatprep.mubr.msk.bf16.mxu0 %vm140_vm0, %v106_v21  ;;  %1108 = vst.msk [vmem:[#allocation2 + $0x108] sm:$0xff] %vm528_vm1, %v9764_v12  ;;  %1109 = vst.msk [vmem:[#allocation2 + $0x110] sm:$0xff] %vm528_vm1, %v9764_v12  ;;  %v92_v21 = vld [vmem:[%s15014_s0 + $0x1c0] sm:$0xff]  ;;  %v127_v23 = vpack.c.bf16 %v91_v20, %v90_v19 }
  0x18   :  { %1111 = vst.msk [vmem:[#allocation2 + $0x120] sm:$0xff] %vm528_vm1, %v9764_v12  ;;  %1112 = vst.msk [vmem:[#allocation2 + $0x128] sm:$0xff] %vm528_vm1, %v9764_v12  ;;  %v128_v24 = vpack.c.bf16 %v93_v22, %v92_v21 }
  0x19   :  { %1114 = vst.msk [vmem:[#allocation2 + $0x138] sm:$0xff] %vm528_vm1, %v9764_v12  ;;  %1115 = vst.msk [vmem:[#allocation2 + $0x140] sm:$0xff] %vm528_vm1, %v9764_v12 }
  0x1a   :  { %1117 = vst.msk [vmem:[#allocation2 + $0x150] sm:$0xff] %vm528_vm1, %v9764_v12  ;;  %1118 = vst.msk [vmem:[#allocation2 + $0x158] sm:$0xff] %vm528_vm1, %v9764_v12 }
  0x1b   :  { %1120 = vst.msk [vmem:[#allocation2 + $0x168] sm:$0xff] %vm528_vm1, %v9764_v12  ;;  %1121 = vst.msk [vmem:[#allocation2 + $0x170] sm:$0xff] %vm528_vm1, %v9764_v12 }
  0x1c   :  { %1123 = vst.msk [vmem:[#allocation2 + $0x180] sm:$0xff] %vm528_vm1, %v9764_v12  ;;  %1124 = vst.msk [vmem:[#allocation2 + $0x188] sm:$0xff] %vm528_vm1, %v9764_v12 }
  0x1d   :  { %1126 = vst.msk [vmem:[#allocation2 + $0x198] sm:$0xff] %vm528_vm1, %v9764_v12  ;;  %1127 = vst.msk [vmem:[#allocation2 + $0x1a0] sm:$0xff] %vm528_vm1, %v9764_v12 }
  0x1e   :  { %8455 = vmatmul.mubr.msk.bf16.gmra.mrb[12].mxu0 %vm140_vm0, %v107_v26  ;;  %1129 = vst.msk [vmem:[#allocation2 + $0x1b0] sm:$0xff] %vm528_vm1, %v9764_v12  ;;  %1130 = vst.msk [vmem:[#allocation2 + $0x1b8] sm:$0xff] %vm528_vm1, %v9764_v12  ;;  %v95_v26 = vld [vmem:[%s15014_s0 + $0x1d8] sm:$0xff] }
  0x1f   :  { %8458 = vmatprep.mubr.msk.bf16.mxu0 %vm140_vm0, %v108_v27  ;;  %1132 = vst.msk [vmem:[#allocation2 + $0x1c8] sm:$0xff] %vm528_vm1, %v9764_v12  ;;  %1133 = vst.msk [vmem:[#allocation2 + $0x1d0] sm:$0xff] %vm528_vm1, %v9764_v12  ;;  %v96_v27 = vld [vmem:[%s15014_s0 + $0x1e0] sm:$0xff]  ;;  %v129_v29 = vpack.c.bf16 %v95_v26, %v94_v25 }
  0x20   :  { %1135 = vst.msk [vmem:[#allocation2 + $0x1e0] sm:$0xff] %vm528_vm1, %v9764_v12  ;;  %1136 = vst.msk [vmem:[#allocation2 + $0x1e8] sm:$0xff] %vm528_vm1, %v9764_v12  ;;  %v130_v30 = vpack.c.bf16 %v97_v28, %v96_v27 }
  0x21   :  { %1138 = vst.msk [vmem:[#allocation2 + $0x1f8] sm:$0xff] %vm528_vm1, %v9764_v12  ;;  %1139 = vst.msk [vmem:[#allocation2 + $0x200] sm:$0xff] %vm528_vm1, %v9764_v12 }
  0x22   :  { %1141 = vst.msk [vmem:[#allocation2 + $0x210] sm:$0xff] %vm528_vm1, %v9764_v12  ;;  %1142 = vst.msk [vmem:[#allocation2 + $0x218] sm:$0xff] %vm528_vm1, %v9764_v12 }
  0x23   :  { %1144 = vst.msk [vmem:[#allocation2 + $0x228] sm:$0xff] %vm528_vm1, %v9764_v12  ;;  %1145 = vst.msk [vmem:[#allocation2 + $0x230] sm:$0xff] %vm528_vm1, %v9764_v12 }
  0x24   :  { %1147 = vst.msk [vmem:[#allocation2 + $0x240] sm:$0xff] %vm528_vm1, %v9764_v12  ;;  %1148 = vst.msk [vmem:[#allocation2 + $0x248] sm:$0xff] %vm528_vm1, %v9764_v12 }
  0x25   :  { %1150 = vst.msk [vmem:[#allocation2 + $0x258] sm:$0xff] %vm528_vm1, %v9764_v12  ;;  %1151 = vst.msk [vmem:[#allocation2 + $0x260] sm:$0xff] %vm528_vm1, %v9764_v12 }
  0x26   :  { %8459 = vmatmul.mubr.msk.bf16.gmra.mrb[16].mxu0 %vm140_vm0, %v109_v32  ;;  %1153 = vst.msk [vmem:[#allocation2 + $0x270] sm:$0xff] %vm528_vm1, %v9764_v12  ;;  %1154 = vst.msk [vmem:[#allocation2 + $0x278] sm:$0xff] %vm528_vm1, %v9764_v12  ;;  %v99_v32 = vld [vmem:[%s15014_s0 + $0x1f8] sm:$0xff] }
  0x27   :  { %8462 = vmatprep.mubr.msk.bf16.mxu0 %vm140_vm0, %v110_v33  ;;  %1156 = vst.msk [vmem:[#allocation2 + $0x288] sm:$0xff] %vm528_vm1, %v9764_v12  ;;  %1157 = vst.msk [vmem:[#allocation2 + $0x290] sm:$0xff] %vm528_vm1, %v9764_v12  ;;  %v131_v33 = vpack.c.bf16 %v99_v32, %v98_v31 }
  0x28   :  { %1159 = vst.msk [vmem:[#allocation2 + $0x2a0] sm:$0xff] %vm528_vm1, %v9764_v12  ;;  %1160 = vst.msk [vmem:[#allocation2 + $0x2a8] sm:$0xff] %vm528_vm1, %v9764_v12 }
  0x29   :  { %1162 = vst.msk [vmem:[#allocation2 + $0x2b8] sm:$0xff] %vm528_vm1, %v9764_v12  ;;  %1163 = vst.msk [vmem:[#allocation2 + $0x2c0] sm:$0xff] %vm528_vm1, %v9764_v12 }
  0x2a   :  { %1165 = vst.msk [vmem:[#allocation2 + $0x2d0] sm:$0xff] %vm528_vm1, %v9764_v12  ;;  %1166 = vst.msk [vmem:[#allocation2 + $0x2d8] sm:$0xff] %vm528_vm1, %v9764_v12 }
  0x2b   :  { %1168 = vst.msk [vmem:[#allocation2 + $0x2e8] sm:$0xff] %vm528_vm1, %v9764_v12  ;;  %1169 = vst.msk [vmem:[#allocation2 + $0x2f0] sm:$0xff] %vm528_vm1, %v9764_v12 }
  0x2c   :  { %1171 = vst.msk [vmem:[#allocation2 + $0x300] sm:$0xff] %vm528_vm1, %v9764_v12  ;;  %1172 = vst.msk [vmem:[#allocation2 + $0x308] sm:$0xff] %vm528_vm1, %v9764_v12 }
  0x2d   :  { %1174 = vst.msk [vmem:[#allocation2 + $0x318] sm:$0xff] %vm528_vm1, %v9764_v12  ;;  %1175 = vst.msk [vmem:[#allocation2 + $0x320] sm:$0xff] %vm528_vm1, %v9764_v12 }
  0x2e   :  { %8463 = vmatmul.mubr.msk.bf16.gmra.mrb[20].mxu0 %vm140_vm0, %v111_v38  ;;  %1177 = vst.msk [vmem:[#allocation2 + $0x330] sm:$0xff] %vm528_vm1, %v9764_v12  ;;  %1178 = vst.msk [vmem:[#allocation2 + $0x338] sm:$0xff] %vm528_vm1, %v9764_v12 }
  0x2f   :  { %8466 = vmatprep.mubr.msk.bf16.mxu0 %vm140_vm0, %v112_v39  ;;  %1180 = vst.msk [vmem:[#allocation2 + $0x348] sm:$0xff] %vm528_vm1, %v9764_v12  ;;  %1181 = vst.msk [vmem:[#allocation2 + $0x350] sm:$0xff] %vm528_vm1, %v9764_v12 }
  0x30   :  { %1083 = vst.msk [vmem:[#allocation2 + $0x40] sm:$0x3] %vm1076_vm2, %v9764_v12  ;;  %1077 = vst.msk [vmem:[#allocation2 + $0x10] sm:$0x3] %vm1076_vm2, %v9764_v12 }
  0x31   :  { %1080 = vst.msk [vmem:[#allocation2 + $0x28] sm:$0x3] %vm1076_vm2, %v9764_v12  ;;  %1086 = vst.msk [vmem:[#allocation2 + $0x58] sm:$0x3] %vm1076_vm2, %v9764_v12 }
  0x32   :  { %1089 = vst.msk [vmem:[#allocation2 + $0x70] sm:$0x3] %vm1076_vm2, %v9764_v12  ;;  %1092 = vst.msk [vmem:[#allocation2 + $0x88] sm:$0x3] %vm1076_vm2, %v9764_v12 }
  0x33   :  { %1095 = vst.msk [vmem:[#allocation2 + $0xa0] sm:$0x3] %vm1076_vm2, %v9764_v12  ;;  %1098 = vst.msk [vmem:[#allocation2 + $0xb8] sm:$0x3] %vm1076_vm2, %v9764_v12 }
  0x34   :  { %1101 = vst.msk [vmem:[#allocation2 + $0xd0] sm:$0x3] %vm1076_vm2, %v9764_v12  ;;  %1104 = vst.msk [vmem:[#allocation2 + $0xe8] sm:$0x3] %vm1076_vm2, %v9764_v12 }
  0x35   :  { %1107 = vst.msk [vmem:[#allocation2 + $0x100] sm:$0x3] %vm1076_vm2, %v9764_v12  ;;  %1110 = vst.msk [vmem:[#allocation2 + $0x118] sm:$0x3] %vm1076_vm2, %v9764_v12 }
  0x36   :  { %8467 = vmatmul.mubr.msk.bf16.gmra.mrb[24].mxu0 %vm140_vm0, %v113_v44  ;;  %1113 = vst.msk [vmem:[#allocation2 + $0x130] sm:$0x3] %vm1076_vm2, %v9764_v12  ;;  %1116 = vst.msk [vmem:[#allocation2 + $0x148] sm:$0x3] %vm1076_vm2, %v9764_v12 }
  0x37   :  { %8470 = vmatprep.mubr.msk.bf16.mxu0 %vm140_vm0, %v114_v45  ;;  %1119 = vst.msk [vmem:[#allocation2 + $0x160] sm:$0x3] %vm1076_vm2, %v9764_v12  ;;  %1122 = vst.msk [vmem:[#allocation2 + $0x178] sm:$0x3] %vm1076_vm2, %v9764_v12 }
  0x38   :  { %1125 = vst.msk [vmem:[#allocation2 + $0x190] sm:$0x3] %vm1076_vm2, %v9764_v12  ;;  %1128 = vst.msk [vmem:[#allocation2 + $0x1a8] sm:$0x3] %vm1076_vm2, %v9764_v12 }
  0x39   :  { %1131 = vst.msk [vmem:[#allocation2 + $0x1c0] sm:$0x3] %vm1076_vm2, %v9764_v12  ;;  %1134 = vst.msk [vmem:[#allocation2 + $0x1d8] sm:$0x3] %vm1076_vm2, %v9764_v12 }
  0x3a   :  { %1137 = vst.msk [vmem:[#allocation2 + $0x1f0] sm:$0x3] %vm1076_vm2, %v9764_v12  ;;  %1140 = vst.msk [vmem:[#allocation2 + $0x208] sm:$0x3] %vm1076_vm2, %v9764_v12 }
  0x3b   :  { %1143 = vst.msk [vmem:[#allocation2 + $0x220] sm:$0x3] %vm1076_vm2, %v9764_v12  ;;  %1146 = vst.msk [vmem:[#allocation2 + $0x238] sm:$0x3] %vm1076_vm2, %v9764_v12 }
  0x3c   :  { %1149 = vst.msk [vmem:[#allocation2 + $0x250] sm:$0x3] %vm1076_vm2, %v9764_v12  ;;  %1152 = vst.msk [vmem:[#allocation2 + $0x268] sm:$0x3] %vm1076_vm2, %v9764_v12 }
  0x3d   :  { %1155 = vst.msk [vmem:[#allocation2 + $0x280] sm:$0x3] %vm1076_vm2, %v9764_v12  ;;  %1158 = vst.msk [vmem:[#allocation2 + $0x298] sm:$0x3] %vm1076_vm2, %v9764_v12 }
  0x3e   :  { %8471 = vmatmul.mubr.msk.bf16.gmra.mrb[28].mxu0 %vm140_vm0, %v115_v50  ;;  %1161 = vst.msk [vmem:[#allocation2 + $0x2b0] sm:$0x3] %vm1076_vm2, %v9764_v12  ;;  %1164 = vst.msk [vmem:[#allocation2 + $0x2c8] sm:$0x3] %vm1076_vm2, %v9764_v12 }
  0x3f   :  { %8474 = vmatprep.mubr.msk.bf16.mxu0 %vm140_vm0, %v116_v51  ;;  %1167 = vst.msk [vmem:[#allocation2 + $0x2e0] sm:$0x3] %vm1076_vm2, %v9764_v12  ;;  %1170 = vst.msk [vmem:[#allocation2 + $0x2f8] sm:$0x3] %vm1076_vm2, %v9764_v12 }
  0x40   :  { %1173 = vst.msk [vmem:[#allocation2 + $0x310] sm:$0x3] %vm1076_vm2, %v9764_v12  ;;  %1176 = vst.msk [vmem:[#allocation2 + $0x328] sm:$0x3] %vm1076_vm2, %v9764_v12 }
  0x41   :  { %1179 = vst.msk [vmem:[#allocation2 + $0x340] sm:$0x3] %vm1076_vm2, %v9764_v12  ;;  %1182 = vst.msk [vmem:[#allocation2 + $0x358] sm:$0x3] %vm1076_vm2, %v9764_v12 }
  0x46   :  { %8475 = vmatmul.mubr.msk.bf16.gmra.mrb[32].mxu0 %vm140_vm0, %v117_v56 }
  0x47   :  { %8478 = vmatprep.mubr.msk.bf16.mxu0 %vm140_vm0, %v118_v57 }
  0x4e   :  { %8479 = vmatmul.mubr.msk.bf16.gmra.mrb[36].mxu0 %vm140_vm0, %v119_v62 }
  0x4f   :  { %8482 = vmatprep.mubr.msk.bf16.mxu0 %vm140_vm0, %v120_v63 }
  0x56   :  { %8483 = vmatmul.mubr.msk.bf16.gmra.mrb[40].mxu0 %vm140_vm0, %v121_v4 }
  0x57   :  { %8486 = vmatprep.mubr.msk.bf16.mxu0 %vm140_vm0, %v122_v5 }
  0x5e   :  { %8487 = vmatmul.mubr.msk.bf16.gmra.mrb[44].mxu0 %vm140_vm0, %v123_v10 }
  0x5f   :  { %8490 = vmatprep.mubr.msk.bf16.mxu0 %vm140_vm0, %v124_v11 }
  0x66   :  { %8491 = vmatmul.mubr.msk.bf16.gmra.mrb[48].mxu0 %vm140_vm0, %v125_v17 }
  0x67   :  { %8494 = vmatprep.mubr.msk.bf16.mxu0 %vm140_vm0, %v126_v18 }
  0x6e   :  { %8495 = vmatmul.mubr.msk.bf16.gmra.mrb[52].mxu0 %vm140_vm0, %v127_v23 }
  0x6f   :  { %8498 = vmatprep.mubr.msk.bf16.mxu0 %vm140_vm0, %v128_v24 }
  0x76   :  { %8499 = vmatmul.mubr.msk.bf16.gmra.mrb[56].mxu0 %vm140_vm0, %v129_v29 }
  0x77   :  { %8502 = vmatprep.mubr.msk.bf16.mxu0 %vm140_vm0, %v130_v30 }
  0x7e   :  { %8503 = vmatmul.mubr.msk.bf16.gmra.mrb[60].mxu0 %vm140_vm0, %v131_v33 }
  0xd9   :  { %v10281_v34 = vpop.f32.mrb[0].mxu0 }
  0xda   :  { %v10283_v35 = vpop.f32.mrb[1].mxu0  ;;  %v666_v39 = vmul.f32 %v10281_v34, %v10281_v34  ;;  %v532_v44 = vsel %vm528_vm1, %v10281_v34, 0.0 }
  0xdb   :  { %v664_v36 = vmul.f32 %v10283_v35, %v10283_v35  ;;  %v10287_v37 = vpop.f32.mrb[2].mxu0  ;;  %v529_v40 = vsel %vm528_vm1, %v10283_v35, 0.0 }
  0xdc   :  { %v10289_v38 = vpop.f32.mrb[3].mxu0  ;;  %v667_v46 = vmul.f32 %v10287_v37, %v10287_v37  ;;  %v731_v50 = vsel %vm528_vm1, %v666_v39, 0.0  ;;  %v534_v51 = vsel %vm528_vm1, %v10287_v37, 0.0 }
  0xdd   :  { %v530_v41 = vsel %vm528_vm1, %v10289_v38, 0.0  ;;  %v665_v42 = vmul.f32 %v10289_v38, %v10289_v38  ;;  %v728_v45 = vsel %vm528_vm1, %v664_v36, 0.0 }
  0xde   :  { %v531_v43 = vadd.f32 %v530_v41, %v529_v40  ;;  %v733_v56 = vsel %vm528_vm1, %v667_v46, 0.0 }
  0xdf   :  { %v729_v47 = vsel %vm528_vm1, %v665_v42, 0.0 }
  0xe0   :  { %v533_v48 = vadd.f32 %v532_v44, %v531_v43  ;;  %v730_v49 = vadd.f32 %v729_v47, %v728_v45 }
  0xe1   :  { %v10308_v52 = vpop.f32.mrb[4].mxu0 }
  0xe2   :  { %v732_v53 = vadd.f32 %v731_v50, %v730_v49  ;;  %v10310_v54 = vpop.f32.mrb[5].mxu0  ;;  %v535_v55 = vadd.f32 %v534_v51, %v533_v48  ;;  %v670_v63 = vmul.f32 %v10308_v52, %v10308_v52  ;;  %v540_v5 = vsel %vm528_vm1, %v10308_v52, 0.0 }
  0xe3   :  { %v536_v57 = vsel %vm528_vm1, %v10310_v54, 0.0  ;;  %v668_v58 = vmul.f32 %v10310_v54, %v10310_v54  ;;  %v10317_v59 = vpop.f32.mrb[6].mxu0 }
  0xe4   :  { %v537_v60 = vadd.f32 %v536_v57, %v535_v55  ;;  %v734_v61 = vadd.f32 %v733_v56, %v732_v53  ;;  %v10319_v62 = vpop.f32.mrb[7].mxu0  ;;  %v671_v6 = vmul.f32 %v10317_v59, %v10317_v59  ;;  %v739_v10 = vsel %vm528_vm1, %v670_v63, 0.0 }
  0xe5   :  { %v735_v0 = vsel %vm528_vm1, %v668_v58, 0.0  ;;  %v538_v1 = vsel %vm528_vm1, %v10319_v62, 0.0  ;;  %v669_v2 = vmul.f32 %v10319_v62, %v10319_v62  ;;  %v542_v11 = vsel %vm528_vm1, %v10317_v59, 0.0 }
  0xe6   :  { %v736_v3 = vadd.f32 %v735_v0, %v734_v61  ;;  %v539_v4 = vadd.f32 %v538_v1, %v537_v60  ;;  %v741_v16 = vsel %vm528_vm1, %v671_v6, 0.0 }
  0xe7   :  { %v737_v7 = vsel %vm528_vm1, %v669_v2, 0.0 }
  0xe8   :  { %v541_v8 = vadd.f32 %v540_v5, %v539_v4  ;;  %v738_v9 = vadd.f32 %v737_v7, %v736_v3 }
  0xe9   :  { %v10336_v12 = vpop.f32.mrb[8].mxu0 }
  0xea   :  { %v740_v13 = vadd.f32 %v739_v10, %v738_v9  ;;  %v10338_v14 = vpop.f32.mrb[9].mxu0  ;;  %v543_v15 = vadd.f32 %v542_v11, %v541_v8  ;;  %v674_v23 = vmul.f32 %v10336_v12, %v10336_v12  ;;  %v548_v29 = vsel %vm528_vm1, %v10336_v12, 0.0 }
  0xeb   :  { %v544_v17 = vsel %vm528_vm1, %v10338_v14, 0.0  ;;  %v672_v18 = vmul.f32 %v10338_v14, %v10338_v14  ;;  %v10345_v19 = vpop.f32.mrb[10].mxu0 }
  0xec   :  { %v545_v20 = vadd.f32 %v544_v17, %v543_v15  ;;  %v742_v21 = vadd.f32 %v741_v16, %v740_v13  ;;  %v10347_v22 = vpop.f32.mrb[11].mxu0  ;;  %v675_v30 = vmul.f32 %v10345_v19, %v10345_v19  ;;  %v747_v36 = vsel %vm528_vm1, %v674_v23, 0.0 }
  0xed   :  { %v743_v24 = vsel %vm528_vm1, %v672_v18, 0.0  ;;  %v546_v25 = vsel %vm528_vm1, %v10347_v22, 0.0  ;;  %v673_v26 = vmul.f32 %v10347_v22, %v10347_v22  ;;  %v550_v39 = vsel %vm528_vm1, %v10345_v19, 0.0 }
  0xee   :  { %v744_v27 = vadd.f32 %v743_v24, %v742_v21  ;;  %v547_v28 = vadd.f32 %v546_v25, %v545_v20  ;;  %v749_v44 = vsel %vm528_vm1, %v675_v30, 0.0 }
  0xef   :  { %v745_v31 = vsel %vm528_vm1, %v673_v26, 0.0 }
  0xf0   :  { %v549_v32 = vadd.f32 %v548_v29, %v547_v28  ;;  %v746_v33 = vadd.f32 %v745_v31, %v744_v27 }
  0xf1   :  { %v10364_v40 = vpop.f32.mrb[12].mxu0 }
  0xf2   :  { %v748_v41 = vadd.f32 %v747_v36, %v746_v33  ;;  %v10366_v42 = vpop.f32.mrb[13].mxu0  ;;  %v551_v43 = vadd.f32 %v550_v39, %v549_v32  ;;  %v678_v51 = vmul.f32 %v10364_v40, %v10364_v40  ;;  %v556_v60 = vsel %vm528_vm1, %v10364_v40, 0.0 }
  0xf3   :  { %v552_v45 = vsel %vm528_vm1, %v10366_v42, 0.0  ;;  %v676_v46 = vmul.f32 %v10366_v42, %v10366_v42  ;;  %v10373_v47 = vpop.f32.mrb[14].mxu0 }
  0xf4   :  { %v553_v48 = vadd.f32 %v552_v45, %v551_v43  ;;  %v750_v49 = vadd.f32 %v749_v44, %v748_v41  ;;  %v10375_v50 = vpop.f32.mrb[15].mxu0  ;;  %v679_v61 = vmul.f32 %v10373_v47, %v10373_v47  ;;  %v755_v2 = vsel %vm528_vm1, %v678_v51, 0.0 }
  0xf5   :  { %v751_v53 = vsel %vm528_vm1, %v676_v46, 0.0  ;;  %v554_v55 = vsel %vm528_vm1, %v10375_v50, 0.0  ;;  %v677_v56 = vmul.f32 %v10375_v50, %v10375_v50  ;;  %v558_v3 = vsel %vm528_vm1, %v10373_v47, 0.0 }
  0xf6   :  { %v752_v57 = vadd.f32 %v751_v53, %v750_v49  ;;  %v555_v58 = vadd.f32 %v554_v55, %v553_v48  ;;  %v757_v8 = vsel %vm528_vm1, %v679_v61, 0.0 }
  0xf7   :  { %v753_v63 = vsel %vm528_vm1, %v677_v56, 0.0 }
  0xf8   :  { %v557_v0 = vadd.f32 %v556_v60, %v555_v58  ;;  %v754_v1 = vadd.f32 %v753_v63, %v752_v57 }
  0xf9   :  { %v10392_v4 = vpop.f32.mrb[16].mxu0 }
  0xfa   :  { %v756_v5 = vadd.f32 %v755_v2, %v754_v1  ;;  %v10394_v6 = vpop.f32.mrb[17].mxu0  ;;  %v559_v7 = vadd.f32 %v558_v3, %v557_v0  ;;  %v682_v17 = vmul.f32 %v10392_v4, %v10392_v4  ;;  %v564_v25 = vsel %vm528_vm1, %v10392_v4, 0.0 }
  0xfb   :  { %v560_v9 = vsel %vm528_vm1, %v10394_v6, 0.0  ;;  %v680_v10 = vmul.f32 %v10394_v6, %v10394_v6  ;;  %v10401_v11 = vpop.f32.mrb[18].mxu0 }
  0xfc   :  { %v561_v13 = vadd.f32 %v560_v9, %v559_v7  ;;  %v758_v15 = vadd.f32 %v757_v8, %v756_v5  ;;  %v10403_v16 = vpop.f32.mrb[19].mxu0  ;;  %v683_v26 = vmul.f32 %v10401_v11, %v10401_v11  ;;  %v763_v30 = vsel %vm528_vm1, %v682_v17, 0.0 }
  0xfd   :  { %v759_v18 = vsel %vm528_vm1, %v680_v10, 0.0  ;;  %v562_v20 = vsel %vm528_vm1, %v10403_v16, 0.0  ;;  %v681_v21 = vmul.f32 %v10403_v16, %v10403_v16  ;;  %v566_v31 = vsel %vm528_vm1, %v10401_v11, 0.0 }
  0xfe   :  { %v760_v23 = vadd.f32 %v759_v18, %v758_v15  ;;  %v563_v24 = vadd.f32 %v562_v20, %v561_v13  ;;  %v765_v41 = vsel %vm528_vm1, %v683_v26, 0.0 }
  0xff   :  { %v761_v27 = vsel %vm528_vm1, %v681_v21, 0.0 }
 0x100   :  { %v565_v28 = vadd.f32 %v564_v25, %v563_v24  ;;  %v762_v29 = vadd.f32 %v761_v27, %v760_v23 }
 0x101   :  { %v10420_v32 = vpop.f32.mrb[20].mxu0 }
 0x102   :  { %v764_v33 = vadd.f32 %v763_v30, %v762_v29  ;;  %v10422_v36 = vpop.f32.mrb[21].mxu0  ;;  %v567_v39 = vadd.f32 %v566_v31, %v565_v28  ;;  %v686_v51 = vmul.f32 %v10420_v32, %v10420_v32  ;;  %v572_v60 = vsel %vm528_vm1, %v10420_v32, 0.0 }
 0x103   :  { %v568_v43 = vsel %vm528_vm1, %v10422_v36, 0.0  ;;  %v684_v44 = vmul.f32 %v10422_v36, %v10422_v36  ;;  %v10429_v45 = vpop.f32.mrb[22].mxu0 }
 0x104   :  { %v569_v46 = vadd.f32 %v568_v43, %v567_v39  ;;  %v766_v48 = vadd.f32 %v765_v41, %v764_v33  ;;  %v10431_v49 = vpop.f32.mrb[23].mxu0  ;;  %v687_v61 = vmul.f32 %v10429_v45, %v10429_v45  ;;  %v771_v2 = vsel %vm528_vm1, %v686_v51, 0.0 }
 0x105   :  { %v767_v53 = vsel %vm528_vm1, %v684_v44, 0.0  ;;  %v570_v55 = vsel %vm528_vm1, %v10431_v49, 0.0  ;;  %v685_v56 = vmul.f32 %v10431_v49, %v10431_v49  ;;  %v574_v3 = vsel %vm528_vm1, %v10429_v45, 0.0 }
 0x106   :  { %v768_v57 = vadd.f32 %v767_v53, %v766_v48  ;;  %v571_v58 = vadd.f32 %v570_v55, %v569_v46  ;;  %v773_v10 = vsel %vm528_vm1, %v687_v61, 0.0 }
 0x107   :  { %v769_v63 = vsel %vm528_vm1, %v685_v56, 0.0 }
 0x108   :  { %v573_v0 = vadd.f32 %v572_v60, %v571_v58  ;;  %v770_v1 = vadd.f32 %v769_v63, %v768_v57 }
 0x109   :  { %v10448_v5 = vpop.f32.mrb[24].mxu0 }
 0x10a   :  { %v772_v7 = vadd.f32 %v771_v2, %v770_v1  ;;  %v10450_v8 = vpop.f32.mrb[25].mxu0  ;;  %v575_v9 = vadd.f32 %v574_v3, %v573_v0  ;;  %v690_v23 = vmul.f32 %v10448_v5, %v10448_v5  ;;  %v580_v29 = vsel %vm528_vm1, %v10448_v5, 0.0 }
 0x10b   :  { %v576_v13 = vsel %vm528_vm1, %v10450_v8, 0.0  ;;  %v688_v15 = vmul.f32 %v10450_v8, %v10450_v8  ;;  %v10457_v17 = vpop.f32.mrb[26].mxu0 }
 0x10c   :  { %v577_v18 = vadd.f32 %v576_v13, %v575_v9  ;;  %v774_v20 = vadd.f32 %v773_v10, %v772_v7  ;;  %v10459_v21 = vpop.f32.mrb[27].mxu0  ;;  %v691_v30 = vmul.f32 %v10457_v17, %v10457_v17  ;;  %v779_v41 = vsel %vm528_vm1, %v690_v23, 0.0 }
 0x10d   :  { %v775_v24 = vsel %vm528_vm1, %v688_v15, 0.0  ;;  %v578_v25 = vsel %vm528_vm1, %v10459_v21, 0.0  ;;  %v689_v26 = vmul.f32 %v10459_v21, %v10459_v21  ;;  %v582_v43 = vsel %vm528_vm1, %v10457_v17, 0.0 }
 0x10e   :  { %v776_v27 = vadd.f32 %v775_v24, %v774_v20  ;;  %v579_v28 = vadd.f32 %v578_v25, %v577_v18  ;;  %v781_v53 = vsel %vm528_vm1, %v691_v30, 0.0 }
 0x10f   :  { %v777_v31 = vsel %vm528_vm1, %v689_v26, 0.0 }
 0x110   :  { %v581_v33 = vadd.f32 %v580_v29, %v579_v28  ;;  %v778_v39 = vadd.f32 %v777_v31, %v776_v27 }
 0x111   :  { %v10476_v44 = vpop.f32.mrb[28].mxu0 }
 0x112   :  { %v780_v46 = vadd.f32 %v779_v41, %v778_v39  ;;  %v10478_v48 = vpop.f32.mrb[29].mxu0  ;;  %v583_v51 = vadd.f32 %v582_v43, %v581_v33  ;;  %v694_v63 = vmul.f32 %v10476_v44, %v10476_v44  ;;  %v588_v9 = vsel %vm528_vm1, %v10476_v44, 0.0 }
 0x113   :  { %v584_v55 = vsel %vm528_vm1, %v10478_v48, 0.0  ;;  %v692_v56 = vmul.f32 %v10478_v48, %v10478_v48  ;;  %v10485_v57 = vpop.f32.mrb[30].mxu0 }
 0x114   :  { %v585_v58 = vadd.f32 %v584_v55, %v583_v51  ;;  %v782_v60 = vadd.f32 %v781_v53, %v780_v46  ;;  %v10487_v61 = vpop.f32.mrb[31].mxu0  ;;  %v695_v10 = vmul.f32 %v10485_v57, %v10485_v57  ;;  %v787_v20 = vsel %vm528_vm1, %v694_v63, 0.0 }
 0x115   :  { %v783_v0 = vsel %vm528_vm1, %v692_v56, 0.0  ;;  %v586_v1 = vsel %vm528_vm1, %v10487_v61, 0.0  ;;  %v693_v2 = vmul.f32 %v10487_v61, %v10487_v61  ;;  %v590_v23 = vsel %vm528_vm1, %v10485_v57, 0.0 }
 0x116   :  { %v784_v3 = vadd.f32 %v783_v0, %v782_v60  ;;  %v587_v7 = vadd.f32 %v586_v1, %v585_v58  ;;  %v789_v28 = vsel %vm528_vm1, %v695_v10, 0.0 }
 0x117   :  { %v785_v13 = vsel %vm528_vm1, %v693_v2, 0.0 }
 0x118   :  { %v589_v15 = vadd.f32 %v588_v9, %v587_v7  ;;  %v786_v18 = vadd.f32 %v785_v13, %v784_v3 }
 0x119   :  { %v10504_v24 = vpop.f32.mrb[32].mxu0 }
 0x11a   :  { %v788_v25 = vadd.f32 %v787_v20, %v786_v18  ;;  %v10506_v26 = vpop.f32.mrb[33].mxu0  ;;  %v591_v27 = vadd.f32 %v590_v23, %v589_v15  ;;  %v698_v43 = vmul.f32 %v10504_v24, %v10504_v24  ;;  %v596_v58 = vsel %vm528_vm1, %v10504_v24, 0.0 }
 0x11b   :  { %v592_v29 = vsel %vm528_vm1, %v10506_v26, 0.0  ;;  %v696_v30 = vmul.f32 %v10506_v26, %v10506_v26  ;;  %v10513_v31 = vpop.f32.mrb[34].mxu0 }
 0x11c   :  { %v593_v33 = vadd.f32 %v592_v29, %v591_v27  ;;  %v790_v39 = vadd.f32 %v789_v28, %v788_v25  ;;  %v10515_v41 = vpop.f32.mrb[35].mxu0  ;;  %v699_v60 = vmul.f32 %v10513_v31, %v10513_v31  ;;  %v795_v2 = vsel %vm528_vm1, %v698_v43, 0.0 }
 0x11d   :  { %v791_v46 = vsel %vm528_vm1, %v696_v30, 0.0  ;;  %v594_v51 = vsel %vm528_vm1, %v10515_v41, 0.0  ;;  %v697_v53 = vmul.f32 %v10515_v41, %v10515_v41  ;;  %v598_v3 = vsel %vm528_vm1, %v10513_v31, 0.0 }
 0x11e   :  { %v792_v55 = vadd.f32 %v791_v46, %v790_v39  ;;  %v595_v56 = vadd.f32 %v594_v51, %v593_v33  ;;  %v797_v15 = vsel %vm528_vm1, %v699_v60, 0.0 }
 0x11f   :  { %v793_v63 = vsel %vm528_vm1, %v697_v53, 0.0 }
 0x120   :  { %v597_v0 = vadd.f32 %v596_v58, %v595_v56  ;;  %v794_v1 = vadd.f32 %v793_v63, %v792_v55 }
 0x121   :  { %v10532_v7 = vpop.f32.mrb[36].mxu0 }
 0x122   :  { %v796_v9 = vadd.f32 %v795_v2, %v794_v1  ;;  %v10534_v10 = vpop.f32.mrb[37].mxu0  ;;  %v599_v13 = vadd.f32 %v598_v3, %v597_v0  ;;  %v702_v29 = vmul.f32 %v10532_v7, %v10532_v7  ;;  %v604_v51 = vsel %vm528_vm1, %v10532_v7, 0.0 }
 0x123   :  { %v600_v18 = vsel %vm528_vm1, %v10534_v10, 0.0  ;;  %v700_v20 = vmul.f32 %v10534_v10, %v10534_v10  ;;  %v10541_v23 = vpop.f32.mrb[38].mxu0 }
 0x124   :  { %15103 = vst [vmem:[#allocation3_spill] sm:$0xff] %v10541_v23  ;;  %v601_v25 = vadd.f32 %v600_v18, %v599_v13  ;;  %v798_v27 = vadd.f32 %v797_v15, %v796_v9  ;;  %v10543_v28 = vpop.f32.mrb[39].mxu0  ;;  %v703_v53 = vmul.f32 %v10541_v23, %v10541_v23  ;;  %v803_v60 = vsel %vm528_vm1, %v702_v29, 0.0 }
 0x125   :  { %v799_v30 = vsel %vm528_vm1, %v700_v20, 0.0  ;;  %v602_v33 = vsel %vm528_vm1, %v10543_v28, 0.0  ;;  %v701_v39 = vmul.f32 %v10543_v28, %v10543_v28  ;;  %v606_v63 = vsel %vm528_vm1, %v10541_v23, 0.0 }
 0x126   :  { %v800_v43 = vadd.f32 %v799_v30, %v798_v27  ;;  %v603_v46 = vadd.f32 %v602_v33, %v601_v25  ;;  %v805_v9 = vsel %vm528_vm1, %v703_v53, 0.0 }
 0x127   :  { %v801_v55 = vsel %vm528_vm1, %v701_v39, 0.0 }
 0x128   :  { %v605_v56 = vadd.f32 %v604_v51, %v603_v46  ;;  %v802_v58 = vadd.f32 %v801_v55, %v800_v43 }
 0x129   :  { %v10560_v0 = vpop.f32.mrb[40].mxu0 }
 0x12a   :  { %15104 = vst [vmem:[#allocation4_spill] sm:$0xff] %v10560_v0  ;;  %v804_v1 = vadd.f32 %v803_v60, %v802_v58  ;;  %v10562_v2 = vpop.f32.mrb[41].mxu0  ;;  %v607_v3 = vadd.f32 %v606_v63, %v605_v56  ;;  %v706_v29 = vmul.f32 %v10560_v0, %v10560_v0  ;;  %v612_v51 = vsel %vm528_vm1, %v10560_v0, 0.0 }
 0x12b   :  { %15105 = vst [vmem:[#allocation5_spill] sm:$0xff] %v10562_v2  ;;  %v608_v13 = vsel %vm528_vm1, %v10562_v2, 0.0  ;;  %v704_v15 = vmul.f32 %v10562_v2, %v10562_v2  ;;  %v10569_v18 = vpop.f32.mrb[42].mxu0 }
 0x12c   :  { %15106 = vst [vmem:[#allocation6_spill] sm:$0xff] %v10569_v18  ;;  %v609_v20 = vadd.f32 %v608_v13, %v607_v3  ;;  %v806_v25 = vadd.f32 %v805_v9, %v804_v1  ;;  %v10571_v27 = vpop.f32.mrb[43].mxu0  ;;  %v707_v53 = vmul.f32 %v10569_v18, %v10569_v18  ;;  %v811_v60 = vsel %vm528_vm1, %v706_v29, 0.0  ;;  %v7749_v29 = vld [vmem:[%s15015_s2 + $0x2] sm:$0x3] }
 0x12d   :  { %15107 = vst [vmem:[#allocation7_spill] sm:$0xff] %v10571_v27  ;;  %v807_v30 = vsel %vm528_vm1, %v704_v15, 0.0  ;;  %v610_v33 = vsel %vm528_vm1, %v10571_v27, 0.0  ;;  %v705_v39 = vmul.f32 %v10571_v27, %v10571_v27  ;;  %v614_v63 = vsel %vm528_vm1, %v10569_v18, 0.0  ;;  %9680 = vmatprep.subr.msk.bf16.mxu0 %vm1539_vm3, %v7749_v29 }
 0x12e   :  { %v808_v43 = vadd.f32 %v807_v30, %v806_v25  ;;  %v611_v46 = vadd.f32 %v610_v33, %v609_v20  ;;  %v813_v15 = vsel %vm528_vm1, %v707_v53, 0.0  ;;  %v1346_v53 = vld [vmem:[#allocation2 + $0x9] sm:$0xff] }
 0x12f   :  { %v809_v55 = vsel %vm528_vm1, %v705_v39, 0.0 }
 0x130   :  { %v613_v56 = vadd.f32 %v612_v51, %v611_v46  ;;  %v810_v58 = vadd.f32 %v809_v55, %v808_v43  ;;  %v7847_v46 = vld [vmem:[%s15015_s2 + $0x6] sm:$0x3] }
 0x131   :  { %v10588_v1 = vpop.f32.mrb[44].mxu0  ;;  %v1345_v51 = vld [vmem:[#allocation2 + $0x1] sm:$0xff]  ;;  %9684 = vmatprep.subr.msk.bf16.mxu1 %vm1539_vm3, %v7847_v46 }
 0x132   :  { %15108 = vst [vmem:[#allocation8_spill] sm:$0xff] %v10588_v1  ;;  %v812_v3 = vadd.f32 %v811_v60, %v810_v58  ;;  %v10590_v9 = vpop.f32.mrb[45].mxu0  ;;  %v615_v13 = vadd.f32 %v614_v63, %v613_v56  ;;  %v710_v55 = vmul.f32 %v10588_v1, %v10588_v1 }
 0x133   :  { %15109 = vst [vmem:[#allocation9_spill] sm:$0xff] %v10590_v9  ;;  %v616_v20 = vsel %vm528_vm1, %v10590_v9, 0.0  ;;  %v708_v25 = vmul.f32 %v10590_v9, %v10590_v9  ;;  %v10597_v30 = vpop.f32.mrb[46].mxu0 }
 0x134   :  { %15110 = vst [vmem:[#allocation10_spill] sm:$0xff] %v10597_v30  ;;  %v617_v33 = vadd.f32 %v616_v20, %v615_v13  ;;  %v814_v39 = vadd.f32 %v813_v15, %v812_v3  ;;  %v10602_v43 = vpop.f32.mrb[47].mxu0  ;;  %v1541_v13 = vsel %vm1539_vm3, %v7749_v29, 0  ;;  %v10618_v15 = vsel %vm1539_vm3, %v7847_v46, 0  ;;  %v10623_v20 = vld [vmem:[%s15015_s2 + $0x8] sm:$0x3] }
 0x135   :  { %15111 = vst [vmem:[#allocation11_spill] sm:$0xff] %v10602_v43  ;;  %v815_v56 = vsel %vm528_vm1, %v708_v25, 0.0  ;;  %v618_v58 = vsel %vm528_vm1, %v10602_v43, 0.0  ;;  %v709_v60 = vmul.f32 %v10602_v43, %v10602_v43  ;;  %15112 = vst [vmem:[#allocation12_spill] sm:$0xff] %v10618_v15  ;;  %v620_v25 = vsel %vm528_vm1, %v10588_v1, 0.0  ;;  %8507 = vmatpush3.bf16.msra.mxu0 %v1541_v13  ;;  %9167 = vmatpush3.bf16.msra.mxu1 %v10618_v15 }
 0x136   :  { %v816_v63 = vadd.f32 %v815_v56, %v814_v39  ;;  %v619_v3 = vadd.f32 %v618_v58, %v617_v33  ;;  %15113 = vst [vmem:[#allocation13_spill] sm:$0xff] %v10623_v20  ;;  %v711_v43 = vmul.f32 %v10597_v30, %v10597_v30  ;;  %v1409_v29 = vpack.c.bf16 %v1346_v53, %v1345_v51 }
 0x137   :  { %v817_v9 = vsel %vm528_vm1, %v709_v60, 0.0  ;;  %9685 = vmatprep.subr.msk.bf16.mxu1 %vm1539_vm3, %v10623_v20  ;;  %v819_v46 = vsel %vm528_vm1, %v710_v55, 0.0  ;;  %v622_v56 = vsel %vm528_vm1, %v10597_v30, 0.0 }
 0x138   :  { %v621_v33 = vadd.f32 %v620_v25, %v619_v3  ;;  %v818_v39 = vadd.f32 %v817_v9, %v816_v63  ;;  %8508 = vmatprep.mubr.msk.bf16.mxu0 %vm528_vm1, %v1409_v29  ;;  %v821_v51 = vsel %vm528_vm1, %v711_v43, 0.0 }
 0x139   :  { %v10636_v58 = vpop.f32.mrb[48].mxu0 }
 0x13a   :  { %15114 = vst [vmem:[#allocation14_spill] sm:$0xff] %v10636_v58  ;;  %v820_v1 = vadd.f32 %v819_v46, %v818_v39  ;;  %v10639_v60 = vpop.f32.mrb[49].mxu0  ;;  %v623_v13 = vadd.f32 %v622_v56, %v621_v33  ;;  %v714_v29 = vmul.f32 %v10636_v58, %v10636_v58  ;;  %v628_v15 = vsel %vm528_vm1, %v10636_v58, 0.0 }
 0x13b   :  { %15115 = vst [vmem:[#allocation15_spill] sm:$0xff] %v10639_v60  ;;  %v624_v9 = vsel %vm528_vm1, %v10639_v60, 0.0  ;;  %v712_v53 = vmul.f32 %v10639_v60, %v10639_v60  ;;  %v10646_v55 = vpop.f32.mrb[50].mxu0 }
 0x13c   :  { %15116 = vst [vmem:[#allocation16_spill] sm:$0xff] %v10646_v55  ;;  %v625_v63 = vadd.f32 %v624_v9, %v623_v13  ;;  %v822_v3 = vadd.f32 %v821_v51, %v820_v1  ;;  %v10648_v25 = vpop.f32.mrb[51].mxu0  ;;  %v715_v1 = vmul.f32 %v10646_v55, %v10646_v55  ;;  %v630_v20 = vsel %vm528_vm1, %v10646_v55, 0.0 }
 0x13d   :  { %15117 = vst [vmem:[#allocation17_spill] sm:$0xff] %v10648_v25  ;;  %v823_v39 = vsel %vm528_vm1, %v712_v53, 0.0  ;;  %v626_v43 = vsel %vm528_vm1, %v10648_v25, 0.0  ;;  %v713_v33 = vmul.f32 %v10648_v25, %v10648_v25  ;;  %v827_v53 = vsel %vm528_vm1, %v714_v29, 0.0 }
 0x13e   :  { %v824_v46 = vadd.f32 %v823_v39, %v822_v3  ;;  %v627_v56 = vadd.f32 %v626_v43, %v625_v63  ;;  %v829_v39 = vsel %vm528_vm1, %v715_v1, 0.0 }
 0x13f   :  { %v825_v13 = vsel %vm528_vm1, %v713_v33, 0.0 }
 0x140   :  { %v629_v51 = vadd.f32 %v628_v15, %v627_v56  ;;  %v826_v9 = vadd.f32 %v825_v13, %v824_v46 }
 0x141   :  { %v10665_v60 = vpop.f32.mrb[52].mxu0 }
 0x142   :  { %15118 = vst [vmem:[#allocation18_spill] sm:$0xff] %v10665_v60  ;;  %v828_v25 = vadd.f32 %v827_v53, %v826_v9  ;;  %v10667_v3 = vpop.f32.mrb[53].mxu0  ;;  %v631_v63 = vadd.f32 %v630_v20, %v629_v51  ;;  %v718_v13 = vmul.f32 %v10665_v60, %v10665_v60 }
 0x143   :  { %15119 = vst [vmem:[#allocation19_spill] sm:$0xff] %v10667_v3  ;;  %v632_v43 = vsel %vm528_vm1, %v10667_v3, 0.0  ;;  %v716_v15 = vmul.f32 %v10667_v3, %v10667_v3  ;;  %v10674_v33 = vpop.f32.mrb[54].mxu0  ;;  %v636_v3 = vsel %vm528_vm1, %v10665_v60, 0.0 }
 0x144   :  { %15120 = vst [vmem:[#allocation20_spill] sm:$0xff] %v10674_v33  ;;  %v633_v29 = vadd.f32 %v632_v43, %v631_v63  ;;  %v830_v46 = vadd.f32 %v829_v39, %v828_v25  ;;  %v10676_v56 = vpop.f32.mrb[55].mxu0  ;;  %v719_v25 = vmul.f32 %v10674_v33, %v10674_v33  ;;  %v638_v55 = vsel %vm528_vm1, %v10674_v33, 0.0 }
 0x145   :  { %15121 = vst [vmem:[#allocation21_spill] sm:$0xff] %v10676_v56  ;;  %v831_v9 = vsel %vm528_vm1, %v716_v15, 0.0  ;;  %v634_v20 = vsel %vm528_vm1, %v10676_v56, 0.0  ;;  %v717_v1 = vmul.f32 %v10676_v56, %v10676_v56  ;;  %v835_v15 = vsel %vm528_vm1, %v718_v13, 0.0 }
 0x146   :  { %v832_v51 = vadd.f32 %v831_v9, %v830_v46  ;;  %v635_v53 = vadd.f32 %v634_v20, %v633_v29  ;;  %v837_v9 = vsel %vm528_vm1, %v719_v25, 0.0 }
 0x147   :  { %v833_v63 = vsel %vm528_vm1, %v717_v1, 0.0 }
 0x148   :  { %v637_v39 = vadd.f32 %v636_v3, %v635_v53  ;;  %v834_v43 = vadd.f32 %v833_v63, %v832_v51 }
 0x149   :  { %v10693_v58 = vpop.f32.mrb[56].mxu0 }
 0x14a   :  { %15122 = vst [vmem:[#allocation22_spill] sm:$0xff] %v10693_v58  ;;  %v836_v56 = vadd.f32 %v835_v15, %v834_v43  ;;  %v10695_v46 = vpop.f32.mrb[57].mxu0  ;;  %v639_v29 = vadd.f32 %v638_v55, %v637_v39  ;;  %v722_v63 = vmul.f32 %v10693_v58, %v10693_v58 }
 0x14b   :  { %15123 = vst [vmem:[#allocation23_spill] sm:$0xff] %v10695_v46  ;;  %v640_v20 = vsel %vm528_vm1, %v10695_v46, 0.0  ;;  %v720_v3 = vmul.f32 %v10695_v46, %v10695_v46  ;;  %v10702_v1 = vpop.f32.mrb[58].mxu0  ;;  %v644_v46 = vsel %vm528_vm1, %v10693_v58, 0.0 }
 0x14c   :  { %15124 = vst [vmem:[#allocation24_spill] sm:$0xff] %v10702_v1  ;;  %v641_v13 = vadd.f32 %v640_v20, %v639_v29  ;;  %v838_v51 = vadd.f32 %v837_v9, %v836_v56  ;;  %v10704_v53 = vpop.f32.mrb[59].mxu0  ;;  %v723_v56 = vmul.f32 %v10702_v1, %v10702_v1  ;;  %v646_v33 = vsel %vm528_vm1, %v10702_v1, 0.0 }
 0x14d   :  { %15125 = vst [vmem:[#allocation25_spill] sm:$0xff] %v10704_v53  ;;  %v839_v43 = vsel %vm528_vm1, %v720_v3, 0.0  ;;  %v642_v55 = vsel %vm528_vm1, %v10704_v53, 0.0  ;;  %v721_v25 = vmul.f32 %v10704_v53, %v10704_v53  ;;  %v843_v3 = vsel %vm528_vm1, %v722_v63, 0.0 }
 0x14e   :  { %v840_v39 = vadd.f32 %v839_v43, %v838_v51  ;;  %v643_v15 = vadd.f32 %v642_v55, %v641_v13  ;;  %v845_v43 = vsel %vm528_vm1, %v723_v56, 0.0 }
 0x14f   :  { %v841_v29 = vsel %vm528_vm1, %v721_v25, 0.0 }
 0x150   :  { %v645_v9 = vadd.f32 %v644_v46, %v643_v15  ;;  %v842_v20 = vadd.f32 %v841_v29, %v840_v39 }
 0x151   :  { %v10721_v60 = vpop.f32.mrb[60].mxu0 }
 0x152   :  { %15126 = vst [vmem:[#allocation26_spill] sm:$0xff] %v10721_v60  ;;  %v844_v53 = vadd.f32 %v843_v3, %v842_v20  ;;  %v10723_v51 = vpop.f32.mrb[61].mxu0  ;;  %v647_v13 = vadd.f32 %v646_v33, %v645_v9  ;;  %v726_v29 = vmul.f32 %v10721_v60, %v10721_v60  ;;  %v652_v1 = vsel %vm528_vm1, %v10721_v60, 0.0 }
 0x153   :  { %15127 = vst [vmem:[#allocation27_spill] sm:$0xff] %v10723_v51  ;;  %v648_v55 = vsel %vm528_vm1, %v10723_v51, 0.0  ;;  %v724_v46 = vmul.f32 %v10723_v51, %v10723_v51  ;;  %v10730_v25 = vpop.f32.mrb[62].mxu0 }
 0x154   :  { %15128 = vst [vmem:[#allocation28_spill] sm:$0xff] %v10730_v25  ;;  %v649_v63 = vadd.f32 %v648_v55, %v647_v13  ;;  %v846_v39 = vadd.f32 %v845_v43, %v844_v53  ;;  %v514_v15 = vpop.f32.mrb[63].mxu0  ;;  %v727_v51 = vmul.f32 %v10730_v25, %v10730_v25  ;;  %v851_v55 = vsel %vm528_vm1, %v726_v29, 0.0 }
 0x155   :  { %v847_v20 = vsel %vm528_vm1, %v724_v46, 0.0  ;;  %v650_v33 = vsel %vm528_vm1, %v514_v15, 0.0  ;;  %v725_v9 = vmul.f32 %v514_v15, %v514_v15  ;;  %v654_v46 = vsel %vm528_vm1, %v10730_v25, 0.0 }
 0x156   :  { %v848_v56 = vadd.f32 %v847_v20, %v846_v39  ;;  %v651_v3 = vadd.f32 %v650_v33, %v649_v63  ;;  %v853_v39 = vsel %vm528_vm1, %v727_v51, 0.0  ;;  %v871_v51 = vlaneseq }
 0x157   :  { %v849_v13 = vsel %vm528_vm1, %v725_v9, 0.0 }
 0x158   :  { %v653_v53 = vadd.f32 %v652_v1, %v651_v3  ;;  %v850_v43 = vadd.f32 %v849_v13, %v848_v56 }
 0x15a   :  { %v655_v58 = vadd.f32 %v654_v46, %v653_v53  ;;  %v852_v30 = vadd.f32 %v851_v55, %v850_v43 }
 0x15c   :  { %v656_v63 = vrot.slane %v655_v58, 4  ;;  %v854_v20 = vadd.f32 %v853_v39, %v852_v30  ;;  %v872_v30 = vshrl.u32 %v871_v51, 7 }
 0x15e   :  { %v657_v33 = vadd.f32 %v656_v63, %v655_v58  ;;  %v855_v60 = vrot.slane %v854_v20, 4  ;;  %v526_v58 = vld [vmem:[%s15016_s4] sm:$0x1] }
 0x160   :  { %v658_v18 = vrot.slane %v657_v33, 2  ;;  %v856_v0 = vadd.f32 %v855_v60, %v854_v20 }
 0x162   :  { %v659_v27 = vadd.f32 %v658_v18, %v657_v33  ;;  %v857_v2 = vrot.slane %v856_v0, 2  ;;  %v10748_v18 = vsub.s32 0, %v872_v30  ;;  %v15136_v30 = vld [vmem:[#allocation11_spill] sm:$0xff] }
 0x164   :  { %v660_v9 = vrot.slane %v659_v27, 1  ;;  %v858_v1 = vadd.f32 %v857_v2, %v856_v0  ;;  %15129 = vst [vmem:[#allocation29_spill] sm:$0xff] %v10748_v18  ;;  %v527_v2 = vld [vmem:[%s15017_s5] sm:$0x1] }
 0x166   :  { %v661_v56 = vadd.f32 %v660_v9, %v659_v27  ;;  %v859_v3 = vrot.slane %v858_v1, 1 }
 0x168   :  { %v663_v29 = vmul.f32 0.001953125, %v661_v56  ;;  %v860_v13 = vadd.f32 %v859_v3, %v858_v1  ;;  %v15130_v3 = vld [vmem:[#allocation3_spill] sm:$0xff] }
 0x16a   :  { %v861_v23 = vmul.f32 0.001953125, %v860_v13  ;;  %v862_v25 = vmul.f32 %v663_v29, %v663_v29  ;;  %v15132_v13 = vld [vmem:[#allocation7_spill] sm:$0xff] }
 0x16c   :  { %v863_v53 = vsub.f32 %v861_v23, %v862_v25 }
 0x16e   :  { %v864_v43 = vmax.f32 %v863_v53, 0.0  ;;  %v15133_v53 = vld [vmem:[#allocation4_spill] sm:$0xff] }
 0x170   :  { %v865_v55 = vadd.f32 1e-05, %v864_v43  ;;  %v15134_v43 = vld [vmem:[#allocation6_spill] sm:$0xff] }
 0x172   :  { %9693 = vrsqrt.f32 %v865_v55  ;;  %v15135_v55 = vld [vmem:[#allocation9_spill] sm:$0xff] }
 0x17c   :  { %v9694_v60 = vpop.eup %9693 }
 0x17d   :  { %v867_v0 = vmul.f32 %v9694_v60, %v526_v58  ;;  %v15137_v60 = vld [vmem:[#allocation8_spill] sm:$0xff] }
 0x17f   :  { %v868_v27 = vmul.f32 %v867_v0, %v663_v29  ;;  %v10754_v23 = vrot.slane %v867_v0, %v10748_v18  ;;  %v15131_v29 = vld [vmem:[#allocation5_spill] sm:$0xff] }
 0x181   :  { %v869_v25 = vsub.f32 %v527_v2, %v868_v27  ;;  %v937_v46 = vmul.f32 %v10754_v23, %v514_v15  ;;  %v10759_v39 = vmul.f32 %v10754_v23, %v10283_v35  ;;  %v10763_v63 = vmul.f32 %v10754_v23, %v10289_v38  ;;  %v15138_v2 = vld [vmem:[#allocation10_spill] sm:$0xff] }
 0x182   :  { %v10767_v20 = vmul.f32 %v10281_v34, %v10754_v23  ;;  %v10771_v33 = vmul.f32 %v10287_v37, %v10754_v23  ;;  %v10775_v9 = vmul.f32 %v10754_v23, %v10310_v54  ;;  %v10779_v35 = vmul.f32 %v10754_v23, %v10319_v62 }
 0x183   :  { %v10782_v15 = vrot.slane %v869_v25, %v10748_v18  ;;  %v10786_v38 = vmul.f32 %v10308_v52, %v10754_v23  ;;  %v10790_v34 = vmul.f32 %v10317_v59, %v10754_v23  ;;  %v10794_v37 = vmul.f32 %v10754_v23, %v10338_v14  ;;  %v15139_v25 = vld [vmem:[#allocation15_spill] sm:$0xff] }
 0x184   :  { %v10798_v54 = vmul.f32 %v10754_v23, %v10347_v22  ;;  %v10802_v62 = vmul.f32 %v10336_v12, %v10754_v23  ;;  %v10806_v52 = vmul.f32 %v10345_v19, %v10754_v23  ;;  %v10810_v59 = vmul.f32 %v10754_v23, %v10366_v42  ;;  %v15152_v18 = vld [vmem:[#allocation23_spill] sm:$0xff] }
 0x185   :  { %v1007_v1 = vadd.f32 %v10782_v15, %v937_v46  ;;  %v10815_v14 = vmul.f32 %v10754_v23, %v10375_v50  ;;  %v10819_v22 = vmul.f32 %v10364_v40, %v10754_v23  ;;  %v10823_v12 = vmul.f32 %v10373_v47, %v10754_v23 }
 0x186   :  { %v10827_v19 = vmul.f32 %v10754_v23, %v10394_v6  ;;  %v10831_v42 = vmul.f32 %v10754_v23, %v10403_v16  ;;  %v10835_v50 = vmul.f32 %v10392_v4, %v10754_v23  ;;  %v10839_v40 = vmul.f32 %v10401_v11, %v10754_v23 }
 0x187   :  { %v1071_v56 = vmax.f32 %v1007_v1, 0.0  ;;  %v10843_v47 = vmul.f32 %v10754_v23, %v10422_v36  ;;  %v10847_v6 = vmul.f32 %v10754_v23, %v10431_v49  ;;  %v10851_v16 = vmul.f32 %v10420_v32, %v10754_v23  ;;  %v15140_v1 = vld [vmem:[#allocation17_spill] sm:$0xff] }
 0x188   :  { %v10855_v4 = vmul.f32 %v10429_v45, %v10754_v23  ;;  %v10859_v11 = vmul.f32 %v10754_v23, %v10450_v8  ;;  %v10863_v36 = vmul.f32 %v10754_v23, %v10459_v21  ;;  %v10867_v49 = vmul.f32 %v10448_v5, %v10754_v23 }
 0x189   :  { %1245 = vst.msk [vmem:[#allocation2 + $0x321] sm:$0xff] %vm528_vm1, %v1071_v56  ;;  %v10872_v32 = vmul.f32 %v10457_v17, %v10754_v23  ;;  %v10876_v45 = vmul.f32 %v10754_v23, %v10478_v48  ;;  %v10880_v8 = vmul.f32 %v10754_v23, %v10487_v61  ;;  %v10884_v21 = vmul.f32 %v10476_v44, %v10754_v23 }
 0x18a   :  { %v10888_v5 = vmul.f32 %v10485_v57, %v10754_v23  ;;  %v10892_v17 = vmul.f32 %v10754_v23, %v10506_v26  ;;  %v10896_v48 = vmul.f32 %v10754_v23, %v10515_v41  ;;  %v10900_v61 = vmul.f32 %v10504_v24, %v10754_v23 }
 0x18b   :  { %v10904_v44 = vmul.f32 %v10513_v31, %v10754_v23  ;;  %v10908_v57 = vmul.f32 %v10754_v23, %v10534_v10  ;;  %v10912_v26 = vmul.f32 %v10754_v23, %v10543_v28  ;;  %v10916_v41 = vmul.f32 %v10532_v7, %v10754_v23 }
 0x18c   :  { %v10920_v24 = vmul.f32 %v15130_v3, %v10754_v23  ;;  %v10924_v31 = vmul.f32 %v10754_v23, %v15131_v29  ;;  %v10928_v10 = vmul.f32 %v10754_v23, %v15132_v13  ;;  %v10932_v28 = vmul.f32 %v15133_v53, %v10754_v23  ;;  %v15141_v3 = vld [vmem:[#allocation14_spill] sm:$0xff]  ;;  %v15142_v13 = vld [vmem:[#allocation16_spill] sm:$0xff] }
 0x18d   :  { %v10936_v7 = vmul.f32 %v15134_v43, %v10754_v23  ;;  %v10940_v51 = vmul.f32 %v10754_v23, %v15135_v55  ;;  %v10944_v58 = vmul.f32 %v10754_v23, %v15136_v30  ;;  %v10948_v0 = vmul.f32 %v15137_v60, %v10754_v23  ;;  %v15144_v43 = vld [vmem:[#allocation19_spill] sm:$0xff]  ;;  %v15146_v30 = vld [vmem:[#allocation21_spill] sm:$0xff] }
 0x18e   :  { %v10952_v27 = vmul.f32 %v15138_v2, %v10754_v23  ;;  %v10956_v46 = vmul.f32 %v10754_v23, %v15139_v25  ;;  %v10960_v56 = vmul.f32 %v10754_v23, %v15140_v1  ;;  %v10964_v29 = vmul.f32 %v15141_v3, %v10754_v23  ;;  %v15148_v2 = vld [vmem:[#allocation18_spill] sm:$0xff]  ;;  %v15150_v1 = vld [vmem:[#allocation20_spill] sm:$0xff] }
 0x18f   :  { %v10968_v53 = vmul.f32 %v15142_v13, %v10754_v23  ;;  %v10972_v55 = vmul.f32 %v10754_v23, %v15144_v43  ;;  %v10976_v60 = vmul.f32 %v10754_v23, %v15146_v30  ;;  %v10980_v25 = vmul.f32 %v15148_v2, %v10754_v23 }
 0x190   :  { %v10984_v3 = vmul.f32 %v15150_v1, %v10754_v23  ;;  %v10988_v13 = vmul.f32 %v10754_v23, %v15152_v18 }
 0x191   :  { %15143 = vst [vmem:[#allocation3_spill] sm:$0xff] %v10968_v53  ;;  %15145 = vst [vmem:[#allocation5_spill] sm:$0xff] %v10972_v55  ;;  %v15154_v53 = vld [vmem:[#allocation25_spill] sm:$0xff]  ;;  %v15155_v55 = vld [vmem:[#allocation22_spill] sm:$0xff] }
 0x192   :  { %15147 = vst [vmem:[#allocation7_spill] sm:$0xff] %v10976_v60  ;;  %15149 = vst [vmem:[#allocation4_spill] sm:$0xff] %v10980_v25  ;;  %v10992_v43 = vmul.f32 %v10754_v23, %v15154_v53  ;;  %v10996_v30 = vmul.f32 %v15155_v55, %v10754_v23  ;;  %v15156_v60 = vld [vmem:[#allocation24_spill] sm:$0xff]  ;;  %v15157_v25 = vld [vmem:[#allocation27_spill] sm:$0xff]  ;;  %v11016_v55 = vadd.f32 %v10782_v15, %v10759_v39 }
 0x193   :  { %15151 = vst [vmem:[#allocation6_spill] sm:$0xff] %v10984_v3  ;;  %15153 = vst [vmem:[#allocation9_spill] sm:$0xff] %v10988_v13  ;;  %v11000_v2 = vmul.f32 %v15156_v60, %v10754_v23  ;;  %v11004_v1 = vmul.f32 %v10754_v23, %v15157_v25  ;;  %v15158_v3 = vld [vmem:[#allocation26_spill] sm:$0xff]  ;;  %v15159_v13 = vld [vmem:[#allocation28_spill] sm:$0xff]  ;;  %v11020_v60 = vadd.f32 %v10782_v15, %v10763_v63 }
 0x194   :  { %v11008_v18 = vmul.f32 %v15158_v3, %v10754_v23  ;;  %v11012_v53 = vmul.f32 %v15159_v13, %v10754_v23  ;;  %v11024_v25 = vadd.f32 %v10782_v15, %v10767_v20  ;;  %v11028_v3 = vadd.f32 %v10782_v15, %v10771_v33 }
 0x195   :  { %v11032_v23 = vadd.f32 %v10782_v15, %v10775_v9  ;;  %v11036_v39 = vadd.f32 %v10782_v15, %v10779_v35  ;;  %v11040_v63 = vadd.f32 %v10782_v15, %v10786_v38  ;;  %v11044_v20 = vadd.f32 %v10782_v15, %v10790_v34 }
 0x196   :  { %v11048_v33 = vadd.f32 %v10782_v15, %v10794_v37  ;;  %v11052_v9 = vadd.f32 %v10782_v15, %v10798_v54  ;;  %v11056_v35 = vadd.f32 %v10782_v15, %v10802_v62  ;;  %v11060_v38 = vadd.f32 %v10782_v15, %v10806_v52 }
 0x197   :  { %v11064_v34 = vadd.f32 %v10782_v15, %v10810_v59  ;;  %v11068_v37 = vadd.f32 %v10782_v15, %v10815_v14  ;;  %v11072_v54 = vadd.f32 %v10782_v15, %v10819_v22  ;;  %v11076_v62 = vadd.f32 %v10782_v15, %v10823_v12 }
 0x198   :  { %v11080_v52 = vadd.f32 %v10782_v15, %v10827_v19  ;;  %v11084_v59 = vadd.f32 %v10782_v15, %v10831_v42  ;;  %v11088_v14 = vadd.f32 %v10782_v15, %v10835_v50  ;;  %v11092_v22 = vadd.f32 %v10782_v15, %v10839_v40  ;;  %v15165_v13 = vld [vmem:[#allocation3_spill] sm:$0xff] }
 0x199   :  { %v11096_v12 = vadd.f32 %v10782_v15, %v10843_v47  ;;  %v11100_v19 = vadd.f32 %v10782_v15, %v10847_v6  ;;  %v11104_v42 = vadd.f32 %v10782_v15, %v10851_v16  ;;  %v11108_v50 = vadd.f32 %v10782_v15, %v10855_v4 }
 0x19a   :  { %v11112_v40 = vadd.f32 %v10782_v15, %v10859_v11  ;;  %v11116_v47 = vadd.f32 %v10782_v15, %v10863_v36  ;;  %v11120_v6 = vadd.f32 %v10782_v15, %v10867_v49  ;;  %v11124_v16 = vadd.f32 %v10782_v15, %v10872_v32 }
 0x19b   :  { %v11128_v4 = vadd.f32 %v10782_v15, %v10876_v45  ;;  %v11132_v11 = vadd.f32 %v10782_v15, %v10880_v8  ;;  %v11136_v36 = vadd.f32 %v10782_v15, %v10884_v21  ;;  %v11140_v49 = vadd.f32 %v10782_v15, %v10888_v5 }
 0x19c   :  { %v11144_v32 = vadd.f32 %v10782_v15, %v10892_v17  ;;  %v11148_v45 = vadd.f32 %v10782_v15, %v10896_v48  ;;  %v11152_v8 = vadd.f32 %v10782_v15, %v10900_v61  ;;  %v11156_v21 = vadd.f32 %v10782_v15, %v10904_v44 }
 0x19d   :  { %v11160_v5 = vadd.f32 %v10782_v15, %v10908_v57  ;;  %v11164_v17 = vadd.f32 %v10782_v15, %v10912_v26  ;;  %v11168_v48 = vadd.f32 %v10782_v15, %v10916_v41  ;;  %v11172_v61 = vadd.f32 %v10782_v15, %v10920_v24 }
 0x19e   :  { %v11176_v44 = vadd.f32 %v10782_v15, %v10924_v31  ;;  %v11180_v57 = vadd.f32 %v10782_v15, %v10928_v10  ;;  %v11184_v26 = vadd.f32 %v10782_v15, %v10932_v28  ;;  %v11188_v41 = vadd.f32 %v10782_v15, %v10936_v7 }
 0x19f   :  { %v11192_v24 = vadd.f32 %v10782_v15, %v10940_v51  ;;  %v11196_v31 = vadd.f32 %v10782_v15, %v10944_v58  ;;  %v11200_v10 = vadd.f32 %v10782_v15, %v10948_v0  ;;  %v11204_v28 = vadd.f32 %v10782_v15, %v10952_v27 }
 0x1a0   :  { %v11208_v7 = vadd.f32 %v10782_v15, %v10956_v46  ;;  %v11212_v51 = vadd.f32 %v10782_v15, %v10960_v56  ;;  %v11216_v58 = vadd.f32 %v10782_v15, %v10964_v29  ;;  %v11220_v0 = vadd.f32 %v10782_v15, %v15165_v13 }
 0x1a1   :  { %15160 = vst [vmem:[#allocation11_spill] sm:$0xff] %v11200_v10  ;;  %15161 = vst [vmem:[#allocation8_spill] sm:$0xff] %v11204_v28  ;;  %v15166_v10 = vld [vmem:[#allocation5_spill] sm:$0xff]  ;;  %v15167_v28 = vld [vmem:[#allocation7_spill] sm:$0xff] }
 0x1a2   :  { %15162 = vst [vmem:[#allocation10_spill] sm:$0xff] %v11208_v7  ;;  %15163 = vst [vmem:[#allocation15_spill] sm:$0xff] %v11212_v51  ;;  %v11224_v27 = vadd.f32 %v10782_v15, %v15166_v10  ;;  %v11228_v46 = vadd.f32 %v10782_v15, %v15167_v28  ;;  %v15168_v7 = vld [vmem:[#allocation4_spill] sm:$0xff]  ;;  %v15169_v51 = vld [vmem:[#allocation6_spill] sm:$0xff]  ;;  %v11244_v10 = vadd.f32 %v10782_v15, %v10992_v43 }
 0x1a3   :  { %15164 = vst [vmem:[#allocation17_spill] sm:$0xff] %v11216_v58  ;;  %v11232_v56 = vadd.f32 %v10782_v15, %v15168_v7  ;;  %v11236_v29 = vadd.f32 %v10782_v15, %v15169_v51  ;;  %v15170_v58 = vld [vmem:[#allocation9_spill] sm:$0xff]  ;;  %v11248_v28 = vadd.f32 %v10782_v15, %v10996_v30  ;;  %v11252_v7 = vadd.f32 %v10782_v15, %v11000_v2 }
 0x1a4   :  { %v11240_v13 = vadd.f32 %v10782_v15, %v15170_v58  ;;  %15171 = vst [vmem:[#allocation14_spill] sm:$0xff] %v11244_v10  ;;  %v11256_v51 = vadd.f32 %v10782_v15, %v11004_v1  ;;  %v11260_v58 = vadd.f32 %v10782_v15, %v11008_v18  ;;  %v11264_v43 = vadd.f32 %v10782_v15, %v11012_v53 }
 0x1a5   :  { %15172 = vst [vmem:[#allocation16_spill] sm:$0xff] %v11248_v28  ;;  %15173 = vst [vmem:[#allocation19_spill] sm:$0xff] %v11252_v7  ;;  %v1010_v10 = vmax.f32 %v11016_v55, 0.0  ;;  %v1011_v30 = vmax.f32 %v11020_v60, 0.0  ;;  %v1012_v28 = vmax.f32 %v11024_v25, 0.0  ;;  %v1013_v2 = vmax.f32 %v11028_v3, 0.0 }
 0x1a6   :  { %15174 = vst [vmem:[#allocation21_spill] sm:$0xff] %v11256_v51  ;;  %15175 = vst [vmem:[#allocation18_spill] sm:$0xff] %v11260_v58  ;;  %v1014_v7 = vmax.f32 %v11032_v23, 0.0  ;;  %v1015_v1 = vmax.f32 %v11036_v39, 0.0  ;;  %v1016_v51 = vmax.f32 %v11040_v63, 0.0  ;;  %v1017_v18 = vmax.f32 %v11044_v20, 0.0 }
 0x1a7   :  { %v1018_v58 = vmax.f32 %v11048_v33, 0.0  ;;  %1184 = vst.msk [vmem:[#allocation2 + $0x19] sm:$0xff] %vm528_vm1, %v1010_v10  ;;  %v1019_v15 = vmax.f32 %v11052_v9, 0.0  ;;  %v1020_v53 = vmax.f32 %v11056_v35, 0.0  ;;  %v1021_v55 = vmax.f32 %v11060_v38, 0.0  ;;  %1185 = vst.msk [vmem:[#allocation2 + $0x21] sm:$0xff] %vm528_vm1, %v1011_v30 }
 0x1a8   :  { %v1022_v60 = vmax.f32 %v11064_v34, 0.0  ;;  %1186 = vst.msk [vmem:[#allocation2 + $0x31] sm:$0xff] %vm528_vm1, %v1012_v28  ;;  %1187 = vst.msk [vmem:[#allocation2 + $0x39] sm:$0xff] %vm528_vm1, %v1013_v2  ;;  %v1023_v25 = vmax.f32 %v11068_v37, 0.0  ;;  %v1024_v3 = vmax.f32 %v11072_v54, 0.0  ;;  %v1025_v23 = vmax.f32 %v11076_v62, 0.0 }
 0x1a9   :  { %1188 = vst.msk [vmem:[#allocation2 + $0x49] sm:$0xff] %vm528_vm1, %v1014_v7  ;;  %v1026_v39 = vmax.f32 %v11080_v52, 0.0  ;;  %1189 = vst.msk [vmem:[#allocation2 + $0x51] sm:$0xff] %vm528_vm1, %v1015_v1  ;;  %v1027_v63 = vmax.f32 %v11084_v59, 0.0  ;;  %v1028_v20 = vmax.f32 %v11088_v14, 0.0  ;;  %v1029_v33 = vmax.f32 %v11092_v22, 0.0 }
 0x1aa   :  { %1190 = vst.msk [vmem:[#allocation2 + $0x61] sm:$0xff] %vm528_vm1, %v1016_v51  ;;  %1191 = vst.msk [vmem:[#allocation2 + $0x69] sm:$0xff] %vm528_vm1, %v1017_v18  ;;  %v1030_v9 = vmax.f32 %v11096_v12, 0.0  ;;  %v1031_v35 = vmax.f32 %v11100_v19, 0.0  ;;  %v1032_v38 = vmax.f32 %v11104_v42, 0.0  ;;  %v1033_v34 = vmax.f32 %v11108_v50, 0.0 }
 0x1ab   :  { %1192 = vst.msk [vmem:[#allocation2 + $0x79] sm:$0xff] %vm528_vm1, %v1018_v58  ;;  %1193 = vst.msk [vmem:[#allocation2 + $0x81] sm:$0xff] %vm528_vm1, %v1019_v15  ;;  %v1034_v37 = vmax.f32 %v11112_v40, 0.0  ;;  %v1035_v54 = vmax.f32 %v11116_v47, 0.0  ;;  %v1036_v62 = vmax.f32 %v11120_v6, 0.0  ;;  %v1037_v52 = vmax.f32 %v11124_v16, 0.0 }
 0x1ac   :  { %1194 = vst.msk [vmem:[#allocation2 + $0x91] sm:$0xff] %vm528_vm1, %v1020_v53  ;;  %1195 = vst.msk [vmem:[#allocation2 + $0x99] sm:$0xff] %vm528_vm1, %v1021_v55  ;;  %v1038_v59 = vmax.f32 %v11128_v4, 0.0  ;;  %v1039_v14 = vmax.f32 %v11132_v11, 0.0  ;;  %v1040_v22 = vmax.f32 %v11136_v36, 0.0  ;;  %v1041_v12 = vmax.f32 %v11140_v49, 0.0 }
 0x1ad   :  { %1196 = vst.msk [vmem:[#allocation2 + $0xa9] sm:$0xff] %vm528_vm1, %v1022_v60  ;;  %1197 = vst.msk [vmem:[#allocation2 + $0xb1] sm:$0xff] %vm528_vm1, %v1023_v25  ;;  %v1042_v19 = vmax.f32 %v11144_v32, 0.0  ;;  %v1043_v42 = vmax.f32 %v11148_v45, 0.0  ;;  %v1044_v50 = vmax.f32 %v11152_v8, 0.0  ;;  %v1045_v40 = vmax.f32 %v11156_v21, 0.0 }
 0x1ae   :  { %1198 = vst.msk [vmem:[#allocation2 + $0xc1] sm:$0xff] %vm528_vm1, %v1024_v3  ;;  %1199 = vst.msk [vmem:[#allocation2 + $0xc9] sm:$0xff] %vm528_vm1, %v1025_v23  ;;  %v1046_v47 = vmax.f32 %v11160_v5, 0.0  ;;  %v1047_v6 = vmax.f32 %v11164_v17, 0.0  ;;  %v1048_v16 = vmax.f32 %v11168_v48, 0.0  ;;  %v1049_v4 = vmax.f32 %v11172_v61, 0.0 }
 0x1af   :  { %1200 = vst.msk [vmem:[#allocation2 + $0xd9] sm:$0xff] %vm528_vm1, %v1026_v39  ;;  %1201 = vst.msk [vmem:[#allocation2 + $0xe1] sm:$0xff] %vm528_vm1, %v1027_v63  ;;  %v1050_v11 = vmax.f32 %v11176_v44, 0.0  ;;  %v1051_v36 = vmax.f32 %v11180_v57, 0.0  ;;  %v1052_v49 = vmax.f32 %v11184_v26, 0.0  ;;  %v1053_v32 = vmax.f32 %v11188_v41, 0.0 }
 0x1b0   :  { %1202 = vst.msk [vmem:[#allocation2 + $0xf1] sm:$0xff] %vm528_vm1, %v1028_v20  ;;  %1203 = vst.msk [vmem:[#allocation2 + $0xf9] sm:$0xff] %vm528_vm1, %v1029_v33  ;;  %v1054_v45 = vmax.f32 %v11192_v24, 0.0  ;;  %v1055_v8 = vmax.f32 %v11196_v31, 0.0  ;;  %v15176_v21 = vld [vmem:[#allocation11_spill] sm:$0xff]  ;;  %v15177_v17 = vld [vmem:[#allocation8_spill] sm:$0xff] }
 0x1b1   :  { %1204 = vst.msk [vmem:[#allocation2 + $0x109] sm:$0xff] %vm528_vm1, %v1030_v9  ;;  %1205 = vst.msk [vmem:[#allocation2 + $0x111] sm:$0xff] %vm528_vm1, %v1031_v35  ;;  %v1056_v5 = vmax.f32 %v15176_v21, 0.0  ;;  %v1057_v48 = vmax.f32 %v15177_v17, 0.0  ;;  %v15178_v61 = vld [vmem:[#allocation10_spill] sm:$0xff]  ;;  %v1348_v26 = vld [vmem:[#allocation2 + $0x21] sm:$0xff] }
 0x1b2   :  { %1206 = vst.msk [vmem:[#allocation2 + $0x121] sm:$0xff] %vm528_vm1, %v1032_v38  ;;  %1207 = vst.msk [vmem:[#allocation2 + $0x129] sm:$0xff] %vm528_vm1, %v1033_v34  ;;  %v1058_v44 = vmax.f32 %v15178_v61, 0.0  ;;  %v1347_v57 = vld [vmem:[#allocation2 + $0x19] sm:$0xff]  ;;  %v15180_v10 = vld [vmem:[#allocation17_spill] sm:$0xff]  ;;  %v1061_v28 = vmax.f32 %v11220_v0, 0.0 }
 0x1b3   :  { %1208 = vst.msk [vmem:[#allocation2 + $0x139] sm:$0xff] %vm528_vm1, %v1034_v37  ;;  %1209 = vst.msk [vmem:[#allocation2 + $0x141] sm:$0xff] %vm528_vm1, %v1035_v54  ;;  %v15179_v41 = vld [vmem:[#allocation15_spill] sm:$0xff]  ;;  %v1060_v31 = vmax.f32 %v15180_v10, 0.0  ;;  %v1062_v7 = vmax.f32 %v11224_v27, 0.0  ;;  %v1349_v51 = vld [vmem:[#allocation2 + $0x31] sm:$0xff]  ;;  %v11386_v3 = vpack.c.bf16 %v1348_v26, %v1347_v57 }
 0x1b4   :  { %1210 = vst.msk [vmem:[#allocation2 + $0x151] sm:$0xff] %vm528_vm1, %v1036_v62  ;;  %1211 = vst.msk [vmem:[#allocation2 + $0x159] sm:$0xff] %vm528_vm1, %v1037_v52  ;;  %v1059_v24 = vmax.f32 %v15179_v41, 0.0  ;;  %v1350_v58 = vld [vmem:[#allocation2 + $0x39] sm:$0xff]  ;;  %v1063_v30 = vmax.f32 %v11228_v46, 0.0  ;;  %v1064_v2 = vmax.f32 %v11232_v56, 0.0 }
 0x1b5   :  { %1212 = vst.msk [vmem:[#allocation2 + $0x169] sm:$0xff] %vm528_vm1, %v1038_v59  ;;  %1213 = vst.msk [vmem:[#allocation2 + $0x171] sm:$0xff] %vm528_vm1, %v1039_v14  ;;  %v1065_v1 = vmax.f32 %v11236_v29, 0.0  ;;  %v1066_v0 = vmax.f32 %v11240_v13, 0.0  ;;  %v15181_v27 = vld [vmem:[#allocation14_spill] sm:$0xff]  ;;  %v15182_v15 = vld [vmem:[#allocation16_spill] sm:$0xff]  ;;  %v11388_v23 = vpack.c.bf16 %v1350_v58, %v1349_v51  ;;  %8509 = vmatmul.mubr.msk.bf16.vlgmr.msra.gmra.mrb[64].mxu0 %vm528_vm1, %v11386_v3 }
 0x1b6   :  { %1214 = vst.msk [vmem:[#allocation2 + $0x181] sm:$0xff] %vm528_vm1, %v1040_v22  ;;  %1215 = vst.msk [vmem:[#allocation2 + $0x189] sm:$0xff] %vm528_vm1, %v1041_v12  ;;  %v1067_v18 = vmax.f32 %v15181_v27, 0.0  ;;  %v1068_v53 = vmax.f32 %v15182_v15, 0.0  ;;  %v15183_v55 = vld [vmem:[#allocation19_spill] sm:$0xff]  ;;  %v15184_v60 = vld [vmem:[#allocation21_spill] sm:$0xff] }
 0x1b7   :  { %1216 = vst.msk [vmem:[#allocation2 + $0x1c9] sm:$0xff] %vm528_vm1, %v1042_v19  ;;  %1217 = vst.msk [vmem:[#allocation2 + $0x1d1] sm:$0xff] %vm528_vm1, %v1043_v42  ;;  %v1069_v46 = vmax.f32 %v15183_v55, 0.0  ;;  %v1070_v56 = vmax.f32 %v15184_v60, 0.0  ;;  %v15185_v29 = vld [vmem:[#allocation18_spill] sm:$0xff]  ;;  %v1073_v25 = vmax.f32 %v11264_v43, 0.0  ;;  %8512 = vmatprep.mubr.msk.bf16.mxu0 %vm528_vm1, %v11388_v23 }
 0x1b8   :  { %1218 = vst.msk [vmem:[#allocation2 + $0x1e1] sm:$0xff] %vm528_vm1, %v1044_v50  ;;  %1219 = vst.msk [vmem:[#allocation2 + $0x1e9] sm:$0xff] %vm528_vm1, %v1045_v40  ;;  %v1072_v13 = vmax.f32 %v15185_v29, 0.0  ;;  %v15186_v34 = vld [vmem:[#allocation13_spill] sm:$0xff]  ;;  %v11413_v59 = vld [vmem:[%s15015_s2 + $0xa] sm:$0x3] }
 0x1b9   :  { %1220 = vst.msk [vmem:[#allocation2 + $0x1f9] sm:$0xff] %vm528_vm1, %v1046_v47  ;;  %1221 = vst.msk [vmem:[#allocation2 + $0x201] sm:$0xff] %vm528_vm1, %v1047_v6  ;;  %v3515_v37 = vsel %vm1539_vm3, %v15186_v34, 0  ;;  %v1351_v62 = vld [vmem:[#allocation2 + $0x49] sm:$0xff]  ;;  %v1352_v52 = vld [vmem:[#allocation2 + $0x51] sm:$0xff] }
 0x1ba   :  { %1222 = vst.msk [vmem:[#allocation2 + $0x211] sm:$0xff] %vm528_vm1, %v1048_v16  ;;  %1223 = vst.msk [vmem:[#allocation2 + $0x219] sm:$0xff] %vm528_vm1, %v1049_v4  ;;  %v1353_v14 = vld [vmem:[#allocation2 + $0x61] sm:$0xff]  ;;  %v1354_v22 = vld [vmem:[#allocation2 + $0x69] sm:$0xff]  ;;  %v11419_v12 = vpack.c.bf16 %v1352_v52, %v1351_v62 }
 0x1bb   :  { %1224 = vst.msk [vmem:[#allocation2 + $0x229] sm:$0xff] %vm528_vm1, %v1050_v11  ;;  %1225 = vst.msk [vmem:[#allocation2 + $0x231] sm:$0xff] %vm528_vm1, %v1051_v36  ;;  %v11423_v19 = vpack.c.bf16 %v1354_v22, %v1353_v14  ;;  %v1355_v4 = vld [vmem:[#allocation2 + $0x79] sm:$0xff]  ;;  %v1356_v11 = vld [vmem:[#allocation2 + $0x81] sm:$0xff] }
 0x1bc   :  { %1226 = vst.msk [vmem:[#allocation2 + $0x241] sm:$0xff] %vm528_vm1, %v1052_v49  ;;  %1227 = vst.msk [vmem:[#allocation2 + $0x249] sm:$0xff] %vm528_vm1, %v1053_v32  ;;  %v1357_v36 = vld [vmem:[#allocation2 + $0x91] sm:$0xff]  ;;  %v1358_v49 = vld [vmem:[#allocation2 + $0x99] sm:$0xff]  ;;  %v11437_v32 = vpack.c.bf16 %v1356_v11, %v1355_v4 }
 0x1bd   :  { %1228 = vst.msk [vmem:[#allocation2 + $0x259] sm:$0xff] %vm528_vm1, %v1054_v45  ;;  %1229 = vst.msk [vmem:[#allocation2 + $0x261] sm:$0xff] %vm528_vm1, %v1055_v8  ;;  %8513 = vmatmul.mubr.msk.bf16.gmra.mrb[68].mxu0 %vm528_vm1, %v11419_v12  ;;  %v11439_v45 = vpack.c.bf16 %v1358_v49, %v1357_v36  ;;  %v1360_v57 = vld [vmem:[#allocation2 + $0xb1] sm:$0xff]  ;;  %v1361_v26 = vld [vmem:[#allocation2 + $0xc1] sm:$0xff] }
 0x1be   :  { %1230 = vst.msk [vmem:[#allocation2 + $0x271] sm:$0xff] %vm528_vm1, %v1056_v5  ;;  %1231 = vst.msk [vmem:[#allocation2 + $0x279] sm:$0xff] %vm528_vm1, %v1057_v48  ;;  %v2802_v43 = vld [vmem:[#allocation2 + $0x1c8] sm:$0xff]  ;;  %v2803_v39 = vld [vmem:[#allocation2 + $0x1d0] sm:$0xff]  ;;  %8516 = vmatprep.mubr.msk.bf16.mxu0 %vm528_vm1, %v11423_v19 }
 0x1bf   :  { %1232 = vst.msk [vmem:[#allocation2 + $0x289] sm:$0xff] %vm528_vm1, %v1058_v44  ;;  %1233 = vst.msk [vmem:[#allocation2 + $0x291] sm:$0xff] %vm528_vm1, %v1059_v24  ;;  %v2804_v63 = vld [vmem:[#allocation2 + $0x1e0] sm:$0xff]  ;;  %v2805_v20 = vld [vmem:[#allocation2 + $0x1e8] sm:$0xff]  ;;  %v11398_v33 = vpack.c.bf16 %v2803_v39, %v2802_v43 }
 0x1c0   :  { %1234 = vst.msk [vmem:[#allocation2 + $0x2a1] sm:$0xff] %vm528_vm1, %v1060_v31  ;;  %1235 = vst.msk [vmem:[#allocation2 + $0x2a9] sm:$0xff] %vm528_vm1, %v1061_v28  ;;  %v11402_v9 = vpack.c.bf16 %v2805_v20, %v2804_v63  ;;  %v2806_v35 = vld [vmem:[#allocation2 + $0x1f8] sm:$0xff]  ;;  %v2807_v38 = vld [vmem:[#allocation2 + $0x200] sm:$0xff] }
 0x1c1   :  { %1236 = vst.msk [vmem:[#allocation2 + $0x2b9] sm:$0xff] %vm528_vm1, %v1062_v7  ;;  %1237 = vst.msk [vmem:[#allocation2 + $0x2c1] sm:$0xff] %vm528_vm1, %v1063_v30  ;;  %8738 = vmatprep.mubr.msk.bf16.mxu1 %vm528_vm1, %v11398_v33  ;;  %v11408_v54 = vpack.c.bf16 %v2807_v38, %v2806_v35  ;;  %v2808_v42 = vld [vmem:[#allocation2 + $0x210] sm:$0xff]  ;;  %v2809_v50 = vld [vmem:[#allocation2 + $0x218] sm:$0xff] }
 0x1c2   :  { %1238 = vst.msk [vmem:[#allocation2 + $0x2d1] sm:$0xff] %vm528_vm1, %v1064_v2  ;;  %1239 = vst.msk [vmem:[#allocation2 + $0x2d9] sm:$0xff] %vm528_vm1, %v1065_v1  ;;  %8739 = vmatmul.mubr.msk.bf16.vlgmr.msra.gmra.mrb[0].mxu1 %vm528_vm1, %v11402_v9  ;;  %v2810_v40 = vld [vmem:[#allocation2 + $0x228] sm:$0xff]  ;;  %v2811_v47 = vld [vmem:[#allocation2 + $0x230] sm:$0xff]  ;;  %v11429_v6 = vpack.c.bf16 %v2809_v50, %v2808_v42 }
 0x1c3   :  { %1240 = vst.msk [vmem:[#allocation2 + $0x2e9] sm:$0xff] %vm528_vm1, %v1066_v0  ;;  %1241 = vst.msk [vmem:[#allocation2 + $0x2f1] sm:$0xff] %vm528_vm1, %v1067_v18  ;;  %8771 = vmatpush3.bf16.msra.mxu1 %v3515_v37  ;;  %8742 = vmatprep.mubr.msk.bf16.mxu1 %vm528_vm1, %v11408_v54  ;;  %v11431_v16 = vpack.c.bf16 %v2811_v47, %v2810_v40  ;;  %v2812_v8 = vld [vmem:[#allocation2 + $0x240] sm:$0xff]  ;;  %v2813_v21 = vld [vmem:[#allocation2 + $0x248] sm:$0xff] }
 0x1c4   :  { %1242 = vst.msk [vmem:[#allocation2 + $0x301] sm:$0xff] %vm528_vm1, %v1068_v53  ;;  %1243 = vst.msk [vmem:[#allocation2 + $0x309] sm:$0xff] %vm528_vm1, %v1069_v46  ;;  %9686 = vmatprep.subr.msk.bf16.mxu1 %vm1539_vm3, %v11413_v59  ;;  %v2814_v5 = vld [vmem:[#allocation2 + $0x258] sm:$0xff]  ;;  %v2815_v17 = vld [vmem:[#allocation2 + $0x260] sm:$0xff]  ;;  %v11445_v48 = vpack.c.bf16 %v2813_v21, %v2812_v8 }
 0x1c5   :  { %1244 = vst.msk [vmem:[#allocation2 + $0x319] sm:$0xff] %vm528_vm1, %v1070_v56  ;;  %1246 = vst.msk [vmem:[#allocation2 + $0x331] sm:$0xff] %vm528_vm1, %v1072_v13  ;;  %8517 = vmatmul.mubr.msk.bf16.gmra.mrb[72].mxu0 %vm528_vm1, %v11437_v32  ;;  %v11447_v61 = vpack.c.bf16 %v2815_v17, %v2814_v5  ;;  %v1359_v44 = vld [vmem:[#allocation2 + $0xa9] sm:$0xff]  ;;  %v2817_v28 = vld [vmem:[#allocation2 + $0x278] sm:$0xff] }
 0x1c6   :  { %1247 = vst.msk [vmem:[#allocation2 + $0x339] sm:$0xff] %vm528_vm1, %v1073_v25  ;;  %8520 = vmatprep.mubr.msk.bf16.mxu0 %vm528_vm1, %v11439_v45  ;;  %v1362_v41 = vld [vmem:[#allocation2 + $0xc9] sm:$0xff]  ;;  %v11453_v24 = vpack.c.bf16 %v1360_v57, %v1359_v44  ;;  %v1344_v58 = vld [vmem:[%s15015_s2] sm:$0x3]  ;;  %v1365_v18 = vld [vmem:[#allocation2 + $0xf1] sm:$0xff] }
 0x1c7   :  { %v11455_v10 = vpack.c.bf16 %v1362_v41, %v1361_v26  ;;  %v2816_v31 = vld [vmem:[#allocation2 + $0x270] sm:$0xff]  ;;  %v2818_v7 = vld [vmem:[#allocation2 + $0x288] sm:$0xff]  ;;  %9681 = vmatprep.subr.msk.bf16.mxu0 %vm1539_vm3, %v1344_v58  ;;  %v1929_v30 = vsel %vm1539_vm3, %v1344_v58, 0  ;;  %v1363_v0 = vld [vmem:[#allocation2 + $0xd9] sm:$0xff] }
 0x1c8   :  { %v2819_v51 = vld [vmem:[#allocation2 + $0x290] sm:$0xff]  ;;  %v11466_v2 = vpack.c.bf16 %v2817_v28, %v2816_v31  ;;  %8573 = vmatpush3.bf16.msra.mxu0 %v1929_v30  ;;  %v1364_v27 = vld [vmem:[#allocation2 + $0xe1] sm:$0xff]  ;;  %v1366_v15 = vld [vmem:[#allocation2 + $0xf9] sm:$0xff] }
 0x1c9   :  { %v11468_v1 = vpack.c.bf16 %v2819_v51, %v2818_v7  ;;  %v11474_v53 = vpack.c.bf16 %v1364_v27, %v1363_v0  ;;  %v11476_v55 = vpack.c.bf16 %v1366_v15, %v1365_v18  ;;  %v2820_v46 = vld [vmem:[#allocation2 + $0x2a0] sm:$0xff]  ;;  %v2821_v60 = vld [vmem:[#allocation2 + $0x2a8] sm:$0xff]  ;;  %v2822_v56 = vld [vmem:[#allocation2 + $0x2b8] sm:$0xff] }
 0x1ca   :  { %8743 = vmatmul.mubr.msk.bf16.gmra.mrb[4].mxu1 %vm528_vm1, %v11429_v6  ;;  %v2823_v29 = vld [vmem:[#allocation2 + $0x2c0] sm:$0xff]  ;;  %v11482_v13 = vpack.c.bf16 %v2821_v60, %v2820_v46  ;;  %v1367_v43 = vld [vmem:[#allocation2 + $0x109] sm:$0xff]  ;;  %v1368_v39 = vld [vmem:[#allocation2 + $0x111] sm:$0xff]  ;;  %v4065_v60 = vsel %vm1539_vm3, %v11413_v59, 0 }
 0x1cb   :  { %8746 = vmatprep.mubr.msk.bf16.mxu1 %vm528_vm1, %v11431_v16  ;;  %v11484_v25 = vpack.c.bf16 %v2823_v29, %v2822_v56  ;;  %v1369_v63 = vld [vmem:[#allocation2 + $0x121] sm:$0xff]  ;;  %v1370_v20 = vld [vmem:[#allocation2 + $0x129] sm:$0xff]  ;;  %v11490_v35 = vpack.c.bf16 %v1368_v39, %v1367_v43  ;;  %v2825_v37 = vld [vmem:[#allocation2 + $0x2d8] sm:$0xff] }
 0x1cc   :  { %v11492_v38 = vpack.c.bf16 %v1370_v20, %v1369_v63  ;;  %v2824_v34 = vld [vmem:[#allocation2 + $0x2d0] sm:$0xff]  ;;  %v2826_v62 = vld [vmem:[#allocation2 + $0x2e8] sm:$0xff]  ;;  %v1371_v42 = vld [vmem:[#allocation2 + $0x139] sm:$0xff] }
 0x1cd   :  { %8521 = vmatmul.mubr.msk.bf16.gmra.mrb[76].mxu0 %vm528_vm1, %v11453_v24  ;;  %v2827_v52 = vld [vmem:[#allocation2 + $0x2f0] sm:$0xff]  ;;  %v11498_v14 = vpack.c.bf16 %v2825_v37, %v2824_v34  ;;  %v1372_v50 = vld [vmem:[#allocation2 + $0x141] sm:$0xff]  ;;  %v1374_v47 = vld [vmem:[#allocation2 + $0x159] sm:$0xff] }
 0x1ce   :  { %8524 = vmatprep.mubr.msk.bf16.mxu0 %vm528_vm1, %v11455_v10  ;;  %v11500_v22 = vpack.c.bf16 %v2827_v52, %v2826_v62  ;;  %v1373_v40 = vld [vmem:[#allocation2 + $0x151] sm:$0xff]  ;;  %v11506_v4 = vpack.c.bf16 %v1372_v50, %v1371_v42  ;;  %v2828_v36 = vld [vmem:[#allocation2 + $0x300] sm:$0xff]  ;;  %v2829_v49 = vld [vmem:[#allocation2 + $0x308] sm:$0xff] }
 0x1cf   :  { %v11508_v11 = vpack.c.bf16 %v1374_v47, %v1373_v40  ;;  %v2830_v8 = vld [vmem:[#allocation2 + $0x318] sm:$0xff]  ;;  %v2831_v21 = vld [vmem:[#allocation2 + $0x320] sm:$0xff]  ;;  %v11514_v5 = vpack.c.bf16 %v2829_v49, %v2828_v36  ;;  %v1375_v26 = vld [vmem:[#allocation2 + $0x169] sm:$0xff] }
 0x1d0   :  { %v1377_v17 = vld [vmem:[#allocation2 + $0x1b1] sm:$0xff]  ;;  %v1378_v44 = vld [vmem:[#allocation2 + $0x1b9] sm:$0xff]  ;;  %v11516_v57 = vpack.c.bf16 %v2831_v21, %v2830_v8  ;;  %v1379_v30 = vld [vmem:[#allocation2 + $0x1c9] sm:$0xff] }
 0x1d1   :  { %v1376_v41 = vld [vmem:[#allocation2 + $0x171] sm:$0xff]  ;;  %v1425_v31 = vpack.c.bf16 %v1378_v44, %v1377_v17  ;;  %v1381_v27 = vld [vmem:[#allocation2 + $0x1e1] sm:$0xff]  ;;  %v1382_v18 = vld [vmem:[#allocation2 + $0x1e9] sm:$0xff] }
 0x1d2   :  { %8747 = vmatmul.mubr.msk.bf16.gmra.mrb[8].mxu1 %vm528_vm1, %v11445_v48  ;;  %v11522_v28 = vpack.c.bf16 %v1376_v41, %v1375_v26  ;;  %v2832_v7 = vld [vmem:[#allocation2 + $0x330] sm:$0xff]  ;;  %v2833_v51 = vld [vmem:[#allocation2 + $0x338] sm:$0xff]  ;;  %v11532_v46 = vpack.c.bf16 %v1382_v18, %v1381_v27  ;;  %v1384_v29 = vld [vmem:[#allocation2 + $0x201] sm:$0xff] }
 0x1d3   :  { %8750 = vmatprep.mubr.msk.bf16.mxu1 %vm528_vm1, %v11447_v61  ;;  %v2865_v58 = vpack.c.bf16 %v2833_v51, %v2832_v7  ;;  %v1380_v0 = vld [vmem:[#allocation2 + $0x1d1] sm:$0xff]  ;;  %v1383_v56 = vld [vmem:[#allocation2 + $0x1f9] sm:$0xff]  ;;  %v11543_v43 = vld [vmem:[%s15015_s2 + $0xc] sm:$0x3] }
 0x1d4   :  { %v11530_v15 = vpack.c.bf16 %v1380_v0, %v1379_v30  ;;  %v1386_v39 = vld [vmem:[#allocation2 + $0x219] sm:$0xff]  ;;  %v11549_v63 = vpack.c.bf16 %v1384_v29, %v1383_v56  ;;  %v1388_v20 = vld [vmem:[#allocation2 + $0x231] sm:$0xff]  ;;  %v1389_v34 = vld [vmem:[#allocation2 + $0x241] sm:$0xff] }
 0x1d5   :  { %8525 = vmatmul.mubr.msk.bf16.gmra.mrb[80].mxu0 %vm528_vm1, %v11474_v53  ;;  %v1391_v52 = vld [vmem:[#allocation2 + $0x259] sm:$0xff]  ;;  %v1392_v42 = vld [vmem:[#allocation2 + $0x261] sm:$0xff]  ;;  %v1395_v47 = vld [vmem:[#allocation2 + $0x289] sm:$0xff] }
 0x1d6   :  { %8528 = vmatprep.mubr.msk.bf16.mxu0 %vm528_vm1, %v11476_v55  ;;  %v1394_v50 = vld [vmem:[#allocation2 + $0x279] sm:$0xff]  ;;  %v1396_v36 = vld [vmem:[#allocation2 + $0x291] sm:$0xff]  ;;  %v1398_v49 = vld [vmem:[#allocation2 + $0x2a9] sm:$0xff] }
 0x1d7   :  { %v1399_v21 = vld [vmem:[#allocation2 + $0x2b9] sm:$0xff]  ;;  %v1400_v17 = vld [vmem:[#allocation2 + $0x2c1] sm:$0xff]  ;;  %v1403_v41 = vld [vmem:[#allocation2 + $0x2e9] sm:$0xff] }
 0x1d8   :  { %v1402_v44 = vld [vmem:[#allocation2 + $0x2d9] sm:$0xff]  ;;  %v1406_v7 = vld [vmem:[#allocation2 + $0x309] sm:$0xff]  ;;  %v1408_v27 = vld [vmem:[#allocation2 + $0x321] sm:$0xff] }
 0x1d9   :  { %v1249_v30 = vld [vmem:[#allocation2 + $0x8] sm:$0xff]  ;;  %v1407_v0 = vld [vmem:[#allocation2 + $0x319] sm:$0xff] }
 0x1da   :  { %8751 = vmatmul.mubr.msk.bf16.gmra.mrb[12].mxu1 %vm528_vm1, %v11466_v2  ;;  %v3350_v18 = vld [vmem:[#allocation2 + $0x181] sm:$0xff]  ;;  %v1250_v29 = vld [vmem:[#allocation2 + $0x18] sm:$0xff] }
 0x1db   :  { %8754 = vmatprep.mubr.msk.bf16.mxu1 %vm528_vm1, %v11468_v1 }
 0x1dd   :  { %8529 = vmatmul.mubr.msk.bf16.gmra.mrb[84].mxu0 %vm528_vm1, %v11490_v35 }
 0x1de   :  { %8532 = vmatprep.mubr.msk.bf16.mxu0 %vm528_vm1, %v11492_v38 }
 0x1e2   :  { %8755 = vmatmul.mubr.msk.bf16.gmra.mrb[16].mxu1 %vm528_vm1, %v11482_v13 }
 0x1e3   :  { %8758 = vmatprep.mubr.msk.bf16.mxu1 %vm528_vm1, %v11484_v25 }
 0x1e5   :  { %8533 = vmatmul.mubr.msk.bf16.gmra.mrb[88].mxu0 %vm528_vm1, %v11506_v4 }
 0x1e6   :  { %8536 = vmatprep.mubr.msk.bf16.mxu0 %vm528_vm1, %v11508_v11 }
 0x1ea   :  { %8759 = vmatmul.mubr.msk.bf16.gmra.mrb[20].mxu1 %vm528_vm1, %v11498_v14 }
 0x1eb   :  { %8762 = vmatprep.mubr.msk.bf16.mxu1 %vm528_vm1, %v11500_v22 }
 0x1ed   :  { %8537 = vmatmul.mubr.msk.bf16.gmra.mrb[92].mxu0 %vm528_vm1, %v11522_v28 }
 0x1ee   :  { %8540 = vmatprep.mubr.msk.bf16.mxu0 %vm528_vm1, %v1425_v31  ;;  %v1404_v31 = vld [vmem:[#allocation2 + $0x2f1] sm:$0xff] }
 0x1f2   :  { %8763 = vmatmul.mubr.msk.bf16.gmra.mrb[24].mxu1 %vm528_vm1, %v11514_v5 }
 0x1f3   :  { %8766 = vmatprep.mubr.msk.bf16.mxu1 %vm528_vm1, %v11516_v57 }
 0x1f5   :  { %8541 = vmatmul.mubr.msk.bf16.gmra.mrb[96].mxu0 %vm528_vm1, %v11530_v15 }
 0x1f6   :  { %8544 = vmatprep.mubr.msk.bf16.mxu0 %vm528_vm1, %v11532_v46 }
 0x1fa   :  { %8767 = vmatmul.mubr.msk.bf16.gmra.mrb[28].mxu1 %vm528_vm1, %v2865_v58  ;;  %v1248_v58 = vld [vmem:[#allocation2] sm:$0xff] }
 0x1fb   :  { %8772 = vmatprep.mubr.msk.bf16.mxu1 %vm528_vm1, %v11386_v3  ;;  %v1385_v3 = vld [vmem:[#allocation2 + $0x211] sm:$0xff] }
 0x1fc   :  { %v11553_v59 = vpack.c.bf16 %v1386_v39, %v1385_v3  ;;  %v1251_v3 = vld [vmem:[#allocation2 + $0x20] sm:$0xff]  ;;  %v1252_v39 = vld [vmem:[#allocation2 + $0x30] sm:$0xff] }
 0x1fd   :  { %8545 = vmatmul.mubr.msk.bf16.gmra.mrb[100].mxu0 %vm528_vm1, %v11549_v63 }
 0x1fe   :  { %8548 = vmatprep.mubr.msk.bf16.mxu0 %vm528_vm1, %v11553_v59 }
 0x202   :  { %8773 = vmatmul.mubr.msk.bf16.vlgmr.msra.gmra.mrb[32].mxu1 %vm528_vm1, %v11388_v23  ;;  %v1387_v23 = vld [vmem:[#allocation2 + $0x229] sm:$0xff] }
 0x203   :  { %8837 = vmatpush3.bf16.msra.mxu1 %v4065_v60  ;;  %8776 = vmatprep.mubr.msk.bf16.mxu1 %vm528_vm1, %v11419_v12  ;;  %v1390_v12 = vld [vmem:[#allocation2 + $0x249] sm:$0xff]  ;;  %v11563_v37 = vpack.c.bf16 %v1388_v20, %v1387_v23  ;;  %v11634_v23 = vpack.c.bf16 %v1251_v3, %v1250_v29 }
 0x204   :  { %9687 = vmatprep.subr.msk.bf16.mxu1 %vm1539_vm3, %v11543_v43  ;;  %v11565_v62 = vpack.c.bf16 %v1390_v12, %v1389_v34  ;;  %v3351_v60 = vld [vmem:[#allocation2 + $0x189] sm:$0xff] }
 0x205   :  { %8549 = vmatmul.mubr.msk.bf16.gmra.mrb[104].mxu0 %vm528_vm1, %v11563_v37  ;;  %v3399_v56 = vpack.c.bf16 %v3351_v60, %v3350_v18  ;;  %v1254_v12 = vld [vmem:[#allocation2 + $0x48] sm:$0xff]  ;;  %v1274_v18 = vld [vmem:[#allocation2 + $0x138] sm:$0xff]  ;;  %v1275_v60 = vld [vmem:[#allocation2 + $0x140] sm:$0xff] }
 0x206   :  { %8552 = vmatprep.mubr.msk.bf16.mxu0 %vm528_vm1, %v11565_v62  ;;  %v1280_v3 = vld [vmem:[#allocation2 + $0x1b0] sm:$0xff] }
 0x20a   :  { %8777 = vmatmul.mubr.msk.bf16.gmra.mrb[36].mxu1 %vm528_vm1, %v11423_v19  ;;  %v1393_v19 = vld [vmem:[#allocation2 + $0x271] sm:$0xff] }
 0x20b   :  { %8780 = vmatprep.mubr.msk.bf16.mxu1 %vm528_vm1, %v11437_v32  ;;  %v11575_v32 = vpack.c.bf16 %v1392_v42, %v1391_v52  ;;  %v11577_v40 = vpack.c.bf16 %v1394_v50, %v1393_v19  ;;  %v1255_v52 = vld [vmem:[#allocation2 + $0x50] sm:$0xff]  ;;  %v1256_v42 = vld [vmem:[#allocation2 + $0x60] sm:$0xff]  ;;  %v1257_v19 = vld [vmem:[#allocation2 + $0x68] sm:$0xff] }
 0x20c   :  { %v11652_v50 = vpack.c.bf16 %v1255_v52, %v1254_v12  ;;  %v3870_v12 = vld [vmem:[#allocation2 + $0x1a] sm:$0xff]  ;;  %v3871_v52 = vld [vmem:[#allocation2 + $0x22] sm:$0xff] }
 0x20d   :  { %8553 = vmatmul.mubr.msk.bf16.gmra.mrb[108].mxu0 %vm528_vm1, %v11575_v32 }
 0x20e   :  { %8556 = vmatprep.mubr.msk.bf16.mxu0 %vm528_vm1, %v11577_v40 }
 0x212   :  { %8781 = vmatmul.mubr.msk.bf16.gmra.mrb[40].mxu1 %vm528_vm1, %v11439_v45  ;;  %v1397_v45 = vld [vmem:[#allocation2 + $0x2a1] sm:$0xff] }
 0x213   :  { %8784 = vmatprep.mubr.msk.bf16.mxu1 %vm528_vm1, %v11453_v24  ;;  %v11587_v24 = vpack.c.bf16 %v1396_v36, %v1395_v47  ;;  %v11589_v8 = vpack.c.bf16 %v1398_v49, %v1397_v45  ;;  %v11654_v47 = vpack.c.bf16 %v1257_v19, %v1256_v42  ;;  %v1258_v36 = vld [vmem:[#allocation2 + $0x78] sm:$0xff]  ;;  %v1259_v45 = vld [vmem:[#allocation2 + $0x80] sm:$0xff]  ;;  %v11729_v19 = vpack.c.bf16 %v3871_v52, %v3870_v12 }
 0x214   :  { %v1261_v49 = vld [vmem:[#allocation2 + $0x98] sm:$0xff]  ;;  %v2220_v52 = vld [vmem:[#allocation2 + $0x2] sm:$0xff] }
 0x215   :  { %8557 = vmatmul.mubr.msk.bf16.gmra.mrb[112].mxu0 %vm528_vm1, %v11587_v24  ;;  %v3899_v12 = vld [vmem:[#allocation2 + $0x172] sm:$0xff] }
 0x216   :  { %8560 = vmatprep.mubr.msk.bf16.mxu0 %vm528_vm1, %v11589_v8 }
 0x21a   :  { %8785 = vmatmul.mubr.msk.bf16.gmra.mrb[44].mxu1 %vm528_vm1, %v11455_v10  ;;  %v1401_v10 = vld [vmem:[#allocation2 + $0x2d1] sm:$0xff] }
 0x21b   :  { %8788 = vmatprep.mubr.msk.bf16.mxu1 %vm528_vm1, %v11474_v53  ;;  %v11599_v53 = vpack.c.bf16 %v1400_v17, %v1399_v21  ;;  %v11601_v26 = vpack.c.bf16 %v1402_v44, %v1401_v10  ;;  %v1262_v17 = vld [vmem:[#allocation2 + $0xa8] sm:$0xff]  ;;  %v1263_v10 = vld [vmem:[#allocation2 + $0xb0] sm:$0xff] }
 0x21c   :  { %v1265_v44 = vld [vmem:[#allocation2 + $0xc8] sm:$0xff] }
 0x21d   :  { %8561 = vmatmul.mubr.msk.bf16.gmra.mrb[116].mxu0 %vm528_vm1, %v11599_v53 }
 0x21e   :  { %8564 = vmatprep.mubr.msk.bf16.mxu0 %vm528_vm1, %v11601_v26 }
 0x222   :  { %8789 = vmatmul.mubr.msk.bf16.gmra.mrb[48].mxu1 %vm528_vm1, %v11476_v55  ;;  %v1405_v55 = vld [vmem:[#allocation2 + $0x301] sm:$0xff] }
 0x223   :  { %8792 = vmatprep.mubr.msk.bf16.mxu1 %vm528_vm1, %v11490_v35  ;;  %v11611_v35 = vpack.c.bf16 %v1404_v31, %v1403_v41  ;;  %v11613_v51 = vpack.c.bf16 %v1406_v7, %v1405_v55  ;;  %v1266_v31 = vld [vmem:[#allocation2 + $0xd8] sm:$0xff]  ;;  %v1267_v55 = vld [vmem:[#allocation2 + $0xe0] sm:$0xff] }
 0x224   :  { %v1269_v7 = vld [vmem:[#allocation2 + $0xf8] sm:$0xff] }
 0x225   :  { %8565 = vmatmul.mubr.msk.bf16.gmra.mrb[120].mxu0 %vm528_vm1, %v11611_v35 }
 0x226   :  { %8568 = vmatprep.mubr.msk.bf16.mxu0 %vm528_vm1, %v11613_v51 }
 0x22a   :  { %8793 = vmatmul.mubr.msk.bf16.gmra.mrb[52].mxu1 %vm528_vm1, %v11492_v38  ;;  %v1312_v38 = vpack.c.bf16 %v1249_v30, %v1248_v58  ;;  %v1270_v30 = vld [vmem:[#allocation2 + $0x108] sm:$0xff] }
 0x22b   :  { %8796 = vmatprep.mubr.msk.bf16.mxu1 %vm528_vm1, %v11506_v4  ;;  %v11623_v4 = vpack.c.bf16 %v1408_v27, %v1407_v0  ;;  %v1271_v0 = vld [vmem:[#allocation2 + $0x110] sm:$0xff]  ;;  %v1273_v27 = vld [vmem:[#allocation2 + $0x128] sm:$0xff] }
 0x22d   :  { %8569 = vmatmul.mubr.msk.bf16.gmra.mrb[124].mxu0 %vm528_vm1, %v11623_v4 }
 0x22e   :  { %8574 = vmatprep.mubr.msk.bf16.mxu0 %vm528_vm1, %v1312_v38 }
 0x232   :  { %8797 = vmatmul.mubr.msk.bf16.gmra.mrb[56].mxu1 %vm528_vm1, %v11508_v11  ;;  %v1253_v11 = vld [vmem:[#allocation2 + $0x38] sm:$0xff] }
 0x233   :  { %8800 = vmatprep.mubr.msk.bf16.mxu1 %vm528_vm1, %v11522_v28  ;;  %v7814_v28 = vld [vmem:[%s15015_s2 + $0x4] sm:$0x3]  ;;  %v11638_v34 = vpack.c.bf16 %v1253_v11, %v1252_v39  ;;  %v1281_v39 = vld [vmem:[#allocation2 + $0x1b8] sm:$0xff]  ;;  %v1278_v11 = vld [vmem:[#allocation2 + $0x168] sm:$0xff] }
 0x234   :  { %9682 = vmatprep.subr.msk.bf16.mxu0 %vm1539_vm3, %v7814_v28  ;;  %v2415_v20 = vsel %vm1539_vm3, %v7814_v28, 0  ;;  %v1279_v28 = vld [vmem:[#allocation2 + $0x170] sm:$0xff] }
 0x235   :  { %8575 = vmatmul.mubr.msk.bf16.vlgmr.msra.gmra.mrb[64].mxu0 %vm528_vm1, %v11634_v23 }
 0x236   :  { %8578 = vmatprep.mubr.msk.bf16.mxu0 %vm528_vm1, %v11638_v34  ;;  %8639 = vmatpush3.bf16.msra.mxu0 %v2415_v20  ;;  %v3382_v20 = vld [vmem:[#allocation2 + $0x331] sm:$0xff] }
 0x23a   :  { %8801 = vmatmul.mubr.msk.bf16.gmra.mrb[60].mxu1 %vm528_vm1, %v3399_v56  ;;  %v1277_v56 = vld [vmem:[#allocation2 + $0x158] sm:$0xff] }
 0x23b   :  { %8804 = vmatprep.mubr.msk.bf16.mxu1 %vm528_vm1, %v11530_v15  ;;  %v9699_v15 = vld [vmem:[%s15015_s2 + $0x6] sm:$0x3] }
 0x23c   :  { %9683 = vmatprep.subr.msk.bf16.mxu0 %vm1539_vm3, %v9699_v15  ;;  %v3383_v15 = vld [vmem:[#allocation2 + $0x339] sm:$0xff] }
 0x23d   :  { %8579 = vmatmul.mubr.msk.bf16.gmra.mrb[68].mxu0 %vm528_vm1, %v11652_v50  ;;  %v3415_v42 = vpack.c.bf16 %v3383_v15, %v3382_v20  ;;  %v3896_v20 = vld [vmem:[#allocation2 + $0x152] sm:$0xff]  ;;  %v3897_v15 = vld [vmem:[#allocation2 + $0x15a] sm:$0xff] }
 0x23e   :  { %8582 = vmatprep.mubr.msk.bf16.mxu0 %vm528_vm1, %v11654_v47 }
 0x242   :  { %8805 = vmatmul.mubr.msk.bf16.gmra.mrb[0].mxu1 %vm528_vm1, %v11532_v46  ;;  %v1260_v46 = vld [vmem:[#allocation2 + $0x90] sm:$0xff] }
 0x243   :  { %8808 = vmatprep.mubr.msk.bf16.mxu1 %vm528_vm1, %v11549_v63  ;;  %v11664_v63 = vpack.c.bf16 %v1259_v45, %v1258_v36  ;;  %v11666_v21 = vpack.c.bf16 %v1261_v49, %v1260_v46  ;;  %v3874_v36 = vld [vmem:[#allocation2 + $0x4a] sm:$0xff]  ;;  %v3875_v45 = vld [vmem:[#allocation2 + $0x52] sm:$0xff]  ;;  %v4616_v49 = vsel %vm1539_vm3, %v11543_v43, 0  ;;  %v3878_v43 = vld [vmem:[#allocation2 + $0x7a] sm:$0xff] }
 0x245   :  { %8583 = vmatmul.mubr.msk.bf16.gmra.mrb[72].mxu0 %vm528_vm1, %v11664_v63 }
 0x246   :  { %8586 = vmatprep.mubr.msk.bf16.mxu0 %vm528_vm1, %v11666_v21 }
 0x24a   :  { %8809 = vmatmul.mubr.msk.bf16.gmra.mrb[4].mxu1 %vm528_vm1, %v11553_v59  ;;  %v1264_v59 = vld [vmem:[#allocation2 + $0xc0] sm:$0xff] }
 0x24b   :  { %8812 = vmatprep.mubr.msk.bf16.mxu1 %vm528_vm1, %v11563_v37  ;;  %v11676_v37 = vpack.c.bf16 %v1263_v10, %v1262_v17  ;;  %v11678_v41 = vpack.c.bf16 %v1265_v44, %v1264_v59  ;;  %v11742_v17 = vpack.c.bf16 %v3875_v45, %v3874_v36  ;;  %v11747_v10 = vld [vmem:[%s15015_s2 + $0xe] sm:$0x3]  ;;  %v3879_v59 = vld [vmem:[#allocation2 + $0x82] sm:$0xff] }
 0x24c   :  { %v3900_v36 = vld [vmem:[#allocation2 + $0x182] sm:$0xff]  ;;  %v3902_v45 = vld [vmem:[#allocation2 + $0x1ca] sm:$0xff] }
 0x24d   :  { %8587 = vmatmul.mubr.msk.bf16.gmra.mrb[76].mxu0 %vm528_vm1, %v11676_v37 }
 0x24e   :  { %8590 = vmatprep.mubr.msk.bf16.mxu0 %vm528_vm1, %v11678_v41 }
 0x252   :  { %8813 = vmatmul.mubr.msk.bf16.gmra.mrb[8].mxu1 %vm528_vm1, %v11565_v62  ;;  %v1268_v62 = vld [vmem:[#allocation2 + $0xf0] sm:$0xff] }
 0x253   :  { %8816 = vmatprep.mubr.msk.bf16.mxu1 %vm528_vm1, %v11575_v32  ;;  %v11688_v32 = vpack.c.bf16 %v1267_v55, %v1266_v31  ;;  %v11690_v58 = vpack.c.bf16 %v1269_v7, %v1268_v62  ;;  %v11761_v31 = vpack.c.bf16 %v3879_v59, %v3878_v43  ;;  %v3880_v55 = vld [vmem:[#allocation2 + $0x92] sm:$0xff]  ;;  %v3881_v62 = vld [vmem:[#allocation2 + $0x9a] sm:$0xff]  ;;  %v3905_v43 = vld [vmem:[#allocation2 + $0x1ea] sm:$0xff] }
 0x254   :  { %v3883_v7 = vld [vmem:[#allocation2 + $0xb2] sm:$0xff]  ;;  %v3906_v59 = vld [vmem:[#allocation2 + $0x1fa] sm:$0xff] }
 0x255   :  { %8591 = vmatmul.mubr.msk.bf16.gmra.mrb[80].mxu0 %vm528_vm1, %v11688_v32 }
 0x256   :  { %8594 = vmatprep.mubr.msk.bf16.mxu0 %vm528_vm1, %v11690_v58 }
 0x25a   :  { %8817 = vmatmul.mubr.msk.bf16.gmra.mrb[12].mxu1 %vm528_vm1, %v11577_v40  ;;  %v1272_v40 = vld [vmem:[#allocation2 + $0x120] sm:$0xff] }
 0x25b   :  { %8820 = vmatprep.mubr.msk.bf16.mxu1 %vm528_vm1, %v11587_v24  ;;  %v11700_v24 = vpack.c.bf16 %v1271_v0, %v1270_v30  ;;  %v11702_v38 = vpack.c.bf16 %v1273_v27, %v1272_v40  ;;  %v3884_v0 = vld [vmem:[#allocation2 + $0xc2] sm:$0xff]  ;;  %v3885_v40 = vld [vmem:[#allocation2 + $0xca] sm:$0xff] }
 0x25c   :  { %v3887_v27 = vld [vmem:[#allocation2 + $0xe2] sm:$0xff] }
 0x25d   :  { %8595 = vmatmul.mubr.msk.bf16.gmra.mrb[84].mxu0 %vm528_vm1, %v11700_v24 }
 0x25e   :  { %8598 = vmatprep.mubr.msk.bf16.mxu0 %vm528_vm1, %v11702_v38 }
 0x262   :  { %8821 = vmatmul.mubr.msk.bf16.gmra.mrb[16].mxu1 %vm528_vm1, %v11589_v8  ;;  %v1276_v8 = vld [vmem:[#allocation2 + $0x150] sm:$0xff] }
 0x263   :  { %8824 = vmatprep.mubr.msk.bf16.mxu1 %vm528_vm1, %v11599_v53  ;;  %v11712_v53 = vpack.c.bf16 %v1275_v60, %v1274_v18  ;;  %v11714_v29 = vpack.c.bf16 %v1277_v56, %v1276_v8  ;;  %v3888_v60 = vld [vmem:[#allocation2 + $0xf2] sm:$0xff]  ;;  %v3889_v8 = vld [vmem:[#allocation2 + $0xfa] sm:$0xff] }
 0x264   :  { %v3891_v56 = vld [vmem:[#allocation2 + $0x112] sm:$0xff] }
 0x265   :  { %8599 = vmatmul.mubr.msk.bf16.gmra.mrb[88].mxu0 %vm528_vm1, %v11712_v53 }
 0x266   :  { %8602 = vmatprep.mubr.msk.bf16.mxu0 %vm528_vm1, %v11714_v29 }
 0x26a   :  { %8825 = vmatmul.mubr.msk.bf16.gmra.mrb[20].mxu1 %vm528_vm1, %v11601_v26  ;;  %v1328_v26 = vpack.c.bf16 %v1281_v39, %v1280_v3  ;;  %v3892_v39 = vld [vmem:[#allocation2 + $0x122] sm:$0xff] }
 0x26b   :  { %8828 = vmatprep.mubr.msk.bf16.mxu1 %vm528_vm1, %v11611_v35  ;;  %v11724_v35 = vpack.c.bf16 %v1279_v28, %v1278_v11  ;;  %v3893_v11 = vld [vmem:[#allocation2 + $0x12a] sm:$0xff]  ;;  %v3895_v28 = vld [vmem:[#allocation2 + $0x142] sm:$0xff] }
 0x26d   :  { %8603 = vmatmul.mubr.msk.bf16.gmra.mrb[92].mxu0 %vm528_vm1, %v11724_v35 }
 0x26e   :  { %8606 = vmatprep.mubr.msk.bf16.mxu0 %vm528_vm1, %v1328_v26 }
 0x272   :  { %8829 = vmatmul.mubr.msk.bf16.gmra.mrb[24].mxu1 %vm528_vm1, %v11613_v51  ;;  %v3872_v51 = vld [vmem:[#allocation2 + $0x32] sm:$0xff] }
 0x273   :  { %8832 = vmatprep.mubr.msk.bf16.mxu1 %vm528_vm1, %v11623_v4  ;;  %v3873_v4 = vld [vmem:[#allocation2 + $0x3a] sm:$0xff] }
 0x274   :  { %v11738_v46 = vpack.c.bf16 %v3873_v4, %v3872_v51 }
 0x275   :  { %8607 = vmatmul.mubr.msk.bf16.gmra.mrb[96].mxu0 %vm528_vm1, %v11398_v33  ;;  %v3876_v33 = vld [vmem:[#allocation2 + $0x62] sm:$0xff] }
 0x276   :  { %8610 = vmatprep.mubr.msk.bf16.mxu0 %vm528_vm1, %v11402_v9  ;;  %v3877_v9 = vld [vmem:[#allocation2 + $0x6a] sm:$0xff] }
 0x277   :  { %v11759_v44 = vpack.c.bf16 %v3877_v9, %v3876_v33  ;;  %v3904_v9 = vld [vmem:[#allocation2 + $0x1e2] sm:$0xff] }
 0x27a   :  { %8833 = vmatmul.mubr.msk.bf16.gmra.mrb[28].mxu1 %vm528_vm1, %v3415_v42  ;;  %v2221_v42 = vld [vmem:[#allocation2 + $0xa] sm:$0xff] }
 0x27b   :  { %8838 = vmatprep.mubr.msk.bf16.mxu1 %vm528_vm1, %v11729_v19  ;;  %v2284_v4 = vpack.c.bf16 %v2221_v42, %v2220_v52  ;;  %v3925_v52 = vld [vmem:[#allocation2 + $0x2da] sm:$0xff]  ;;  %v3926_v42 = vld [vmem:[#allocation2 + $0x2ea] sm:$0xff] }
 0x27d   :  { %8611 = vmatmul.mubr.msk.bf16.gmra.mrb[100].mxu0 %vm528_vm1, %v11408_v54  ;;  %v3882_v54 = vld [vmem:[#allocation2 + $0xaa] sm:$0xff] }
 0x27e   :  { %8614 = vmatprep.mubr.msk.bf16.mxu0 %vm528_vm1, %v11429_v6  ;;  %v11771_v6 = vpack.c.bf16 %v3881_v62, %v3880_v55  ;;  %v11773_v30 = vpack.c.bf16 %v3883_v7, %v3882_v54  ;;  %v3907_v55 = vld [vmem:[#allocation2 + $0x202] sm:$0xff]  ;;  %v11840_v62 = vpack.c.bf16 %v3905_v43, %v3904_v9  ;;  %v3908_v7 = vld [vmem:[#allocation2 + $0x212] sm:$0xff]  ;;  %v2253_v9 = vld [vmem:[#allocation2 + $0x1ba] sm:$0xff] }
 0x27f   :  { %v11842_v54 = vpack.c.bf16 %v3907_v55, %v3906_v59  ;;  %v3932_v59 = vld [vmem:[#allocation2 + $0x332] sm:$0xff]  ;;  %v3933_v55 = vld [vmem:[#allocation2 + $0x33a] sm:$0xff] }
 0x282   :  { %8839 = vmatmul.mubr.msk.bf16.vlgmr.msra.gmra.mrb[32].mxu1 %vm528_vm1, %v11738_v46 }
 0x283   :  { %8903 = vmatpush3.bf16.msra.mxu1 %v4616_v49  ;;  %8842 = vmatprep.mubr.msk.bf16.mxu1 %vm528_vm1, %v11742_v17 }
 0x284   :  { %9688 = vmatprep.subr.msk.bf16.mxu1 %vm1539_vm3, %v11747_v10 }
 0x285   :  { %8615 = vmatmul.mubr.msk.bf16.gmra.mrb[104].mxu0 %vm528_vm1, %v11431_v16  ;;  %v3886_v16 = vld [vmem:[#allocation2 + $0xda] sm:$0xff] }
 0x286   :  { %8618 = vmatprep.mubr.msk.bf16.mxu0 %vm528_vm1, %v11445_v48  ;;  %v11783_v48 = vpack.c.bf16 %v3885_v40, %v3884_v0  ;;  %v11785_v18 = vpack.c.bf16 %v3887_v27, %v3886_v16  ;;  %v3909_v0 = vld [vmem:[#allocation2 + $0x21a] sm:$0xff]  ;;  %v3911_v40 = vld [vmem:[#allocation2 + $0x232] sm:$0xff]  ;;  %v3912_v27 = vld [vmem:[#allocation2 + $0x242] sm:$0xff] }
 0x28a   :  { %8843 = vmatmul.mubr.msk.bf16.gmra.mrb[36].mxu1 %vm528_vm1, %v11759_v44 }
 0x28b   :  { %8846 = vmatprep.mubr.msk.bf16.mxu1 %vm528_vm1, %v11761_v31 }
 0x28d   :  { %8619 = vmatmul.mubr.msk.bf16.gmra.mrb[108].mxu0 %vm528_vm1, %v11447_v61  ;;  %v3890_v61 = vld [vmem:[#allocation2 + $0x10a] sm:$0xff] }
 0x28e   :  { %8622 = vmatprep.mubr.msk.bf16.mxu0 %vm528_vm1, %v11466_v2  ;;  %v11795_v2 = vpack.c.bf16 %v3889_v8, %v3888_v60  ;;  %v11797_v3 = vpack.c.bf16 %v3891_v56, %v3890_v61  ;;  %v3913_v60 = vld [vmem:[#allocation2 + $0x24a] sm:$0xff]  ;;  %v3915_v8 = vld [vmem:[#allocation2 + $0x262] sm:$0xff]  ;;  %v3916_v56 = vld [vmem:[#allocation2 + $0x272] sm:$0xff] }
 0x292   :  { %8847 = vmatmul.mubr.msk.bf16.gmra.mrb[40].mxu1 %vm528_vm1, %v11771_v6 }
 0x293   :  { %8850 = vmatprep.mubr.msk.bf16.mxu1 %vm528_vm1, %v11773_v30 }
 0x295   :  { %8623 = vmatmul.mubr.msk.bf16.gmra.mrb[112].mxu0 %vm528_vm1, %v11468_v1  ;;  %v3894_v1 = vld [vmem:[#allocation2 + $0x13a] sm:$0xff] }
 0x296   :  { %8626 = vmatprep.mubr.msk.bf16.mxu0 %vm528_vm1, %v11482_v13  ;;  %v11807_v13 = vpack.c.bf16 %v3893_v11, %v3892_v39  ;;  %v11809_v26 = vpack.c.bf16 %v3895_v28, %v3894_v1  ;;  %v3917_v39 = vld [vmem:[#allocation2 + $0x27a] sm:$0xff]  ;;  %v3919_v11 = vld [vmem:[#allocation2 + $0x292] sm:$0xff]  ;;  %v3920_v28 = vld [vmem:[#allocation2 + $0x2a2] sm:$0xff] }
 0x29a   :  { %8851 = vmatmul.mubr.msk.bf16.gmra.mrb[44].mxu1 %vm528_vm1, %v11783_v48 }
 0x29b   :  { %8854 = vmatprep.mubr.msk.bf16.mxu1 %vm528_vm1, %v11785_v18 }
 0x29d   :  { %8627 = vmatmul.mubr.msk.bf16.gmra.mrb[116].mxu0 %vm528_vm1, %v11484_v25  ;;  %v3898_v25 = vld [vmem:[#allocation2 + $0x16a] sm:$0xff] }
 0x29e   :  { %8630 = vmatprep.mubr.msk.bf16.mxu0 %vm528_vm1, %v11498_v14  ;;  %v11819_v14 = vpack.c.bf16 %v3897_v15, %v3896_v20  ;;  %v11821_v51 = vpack.c.bf16 %v3899_v12, %v3898_v25  ;;  %v3921_v20 = vld [vmem:[#allocation2 + $0x2aa] sm:$0xff]  ;;  %v3922_v15 = vld [vmem:[#allocation2 + $0x2ba] sm:$0xff]  ;;  %v3924_v12 = vld [vmem:[#allocation2 + $0x2d2] sm:$0xff] }
 0x29f   :  { %v3959_v25 = vpack.c.bf16 %v3921_v20, %v3920_v28  ;;  %v4463_v20 = vld [vmem:[#allocation2 + $0x258] sm:$0xff] }
 0x2a2   :  { %8855 = vmatmul.mubr.msk.bf16.gmra.mrb[48].mxu1 %vm528_vm1, %v11795_v2 }
 0x2a3   :  { %8858 = vmatprep.mubr.msk.bf16.mxu1 %vm528_vm1, %v11797_v3 }
 0x2a5   :  { %8631 = vmatmul.mubr.msk.bf16.gmra.mrb[120].mxu0 %vm528_vm1, %v11500_v22  ;;  %v3901_v22 = vld [vmem:[#allocation2 + $0x18a] sm:$0xff] }
 0x2a6   :  { %8634 = vmatprep.mubr.msk.bf16.mxu0 %vm528_vm1, %v11514_v5  ;;  %v3903_v5 = vld [vmem:[#allocation2 + $0x1d2] sm:$0xff]  ;;  %v3949_v49 = vpack.c.bf16 %v3901_v22, %v3900_v36  ;;  %v3929_v22 = vld [vmem:[#allocation2 + $0x30a] sm:$0xff] }
 0x2a7   :  { %v11830_v33 = vpack.c.bf16 %v3903_v5, %v3902_v45  ;;  %v3930_v45 = vld [vmem:[#allocation2 + $0x31a] sm:$0xff]  ;;  %v3931_v5 = vld [vmem:[#allocation2 + $0x322] sm:$0xff] }
 0x2aa   :  { %8859 = vmatmul.mubr.msk.bf16.gmra.mrb[52].mxu1 %vm528_vm1, %v11807_v13 }
 0x2ab   :  { %8862 = vmatprep.mubr.msk.bf16.mxu1 %vm528_vm1, %v11809_v26 }
 0x2ad   :  { %8635 = vmatmul.mubr.msk.bf16.gmra.mrb[124].mxu0 %vm528_vm1, %v11516_v57  ;;  %v15187_v57 = vld [vmem:[#allocation12_spill] sm:$0xff] }
 0x2ae   :  { %8640 = vmatprep.mubr.msk.bf16.mxu0 %vm528_vm1, %v2284_v4  ;;  %v3927_v4 = vld [vmem:[#allocation2 + $0x2f2] sm:$0xff] }
 0x2af   :  { %v3962_v36 = vpack.c.bf16 %v3927_v4, %v3926_v42  ;;  %v2785_v42 = vld [vmem:[#allocation2 + $0xc8] sm:$0xff]  ;;  %v2786_v4 = vld [vmem:[#allocation2 + $0xd8] sm:$0xff] }
 0x2b2   :  { %8863 = vmatmul.mubr.msk.bf16.gmra.mrb[56].mxu1 %vm528_vm1, %v11819_v14 }
 0x2b3   :  { %8866 = vmatprep.mubr.msk.bf16.mxu1 %vm528_vm1, %v11821_v51 }
 0x2b5   :  { %8641 = vmatmul.mubr.msk.bf16.vlgmr.msra.gmra.mrb[64].mxu0 %vm528_vm1, %v11729_v19  ;;  %v3910_v19 = vld [vmem:[#allocation2 + $0x22a] sm:$0xff] }
 0x2b6   :  { %8644 = vmatprep.mubr.msk.bf16.mxu0 %vm528_vm1, %v11738_v46  ;;  %8705 = vmatpush3.bf16.msra.mxu0 %v15187_v57  ;;  %v11852_v46 = vpack.c.bf16 %v3909_v0, %v3908_v7  ;;  %v11854_v16 = vpack.c.bf16 %v3911_v40, %v3910_v19  ;;  %v4456_v57 = vld [vmem:[#allocation2 + $0x200] sm:$0xff]  ;;  %v2777_v19 = vld [vmem:[#allocation2 + $0x68] sm:$0xff]  ;;  %v2778_v40 = vld [vmem:[#allocation2 + $0x78] sm:$0xff] }
 0x2b7   :  { %v2776_v0 = vld [vmem:[#allocation2 + $0x60] sm:$0xff] }
 0x2ba   :  { %8867 = vmatmul.mubr.msk.bf16.gmra.mrb[60].mxu1 %vm528_vm1, %v3949_v49  ;;  %v2252_v49 = vld [vmem:[#allocation2 + $0x1b2] sm:$0xff] }
 0x2bb   :  { %8870 = vmatprep.mubr.msk.bf16.mxu1 %vm528_vm1, %v11830_v33  ;;  %v2300_v43 = vpack.c.bf16 %v2253_v9, %v2252_v49 }
 0x2bd   :  { %8645 = vmatmul.mubr.msk.bf16.gmra.mrb[68].mxu0 %vm528_vm1, %v11742_v17  ;;  %v3914_v17 = vld [vmem:[#allocation2 + $0x25a] sm:$0xff] }
 0x2be   :  { %8648 = vmatprep.mubr.msk.bf16.mxu0 %vm528_vm1, %v11759_v44  ;;  %v11864_v44 = vpack.c.bf16 %v3913_v60, %v3912_v27  ;;  %v11866_v61 = vpack.c.bf16 %v3915_v8, %v3914_v17  ;;  %v4459_v60 = vld [vmem:[#allocation2 + $0x228] sm:$0xff]  ;;  %v4460_v17 = vld [vmem:[#allocation2 + $0x230] sm:$0xff]  ;;  %v4461_v8 = vld [vmem:[#allocation2 + $0x240] sm:$0xff] }
 0x2c2   :  { %8871 = vmatmul.mubr.msk.bf16.gmra.mrb[0].mxu1 %vm528_vm1, %v11840_v62 }
 0x2c3   :  { %8874 = vmatprep.mubr.msk.bf16.mxu1 %vm528_vm1, %v11842_v54 }
 0x2c5   :  { %8649 = vmatmul.mubr.msk.bf16.gmra.mrb[72].mxu0 %vm528_vm1, %v11761_v31  ;;  %v3918_v31 = vld [vmem:[#allocation2 + $0x28a] sm:$0xff] }
 0x2c6   :  { %8652 = vmatprep.mubr.msk.bf16.mxu0 %vm528_vm1, %v11771_v6  ;;  %v3957_v6 = vpack.c.bf16 %v3917_v39, %v3916_v56  ;;  %v11876_v1 = vpack.c.bf16 %v3919_v11, %v3918_v31  ;;  %v2780_v39 = vld [vmem:[#allocation2 + $0x90] sm:$0xff]  ;;  %v2781_v31 = vld [vmem:[#allocation2 + $0x98] sm:$0xff]  ;;  %v2782_v11 = vld [vmem:[#allocation2 + $0xa8] sm:$0xff] }
 0x2ca   :  { %8875 = vmatmul.mubr.msk.bf16.gmra.mrb[4].mxu1 %vm528_vm1, %v11852_v46 }
 0x2cb   :  { %8878 = vmatprep.mubr.msk.bf16.mxu1 %vm528_vm1, %v11854_v16 }
 0x2cd   :  { %8653 = vmatmul.mubr.msk.bf16.gmra.mrb[76].mxu0 %vm528_vm1, %v11773_v30  ;;  %v3923_v30 = vld [vmem:[#allocation2 + $0x2c2] sm:$0xff] }
 0x2ce   :  { %8656 = vmatprep.mubr.msk.bf16.mxu0 %vm528_vm1, %v11783_v48  ;;  %v3960_v48 = vpack.c.bf16 %v3923_v30, %v3922_v15  ;;  %v4464_v15 = vld [vmem:[#allocation2 + $0x260] sm:$0xff]  ;;  %v4465_v30 = vld [vmem:[#allocation2 + $0x270] sm:$0xff] }
 0x2d2   :  { %8879 = vmatmul.mubr.msk.bf16.gmra.mrb[8].mxu1 %vm528_vm1, %v11864_v44 }
 0x2d3   :  { %8882 = vmatprep.mubr.msk.bf16.mxu1 %vm528_vm1, %v11866_v61 }
 0x2d5   :  { %8657 = vmatmul.mubr.msk.bf16.gmra.mrb[80].mxu0 %vm528_vm1, %v11785_v18  ;;  %v3961_v18 = vpack.c.bf16 %v3925_v52, %v3924_v12  ;;  %v2784_v52 = vld [vmem:[#allocation2 + $0xc0] sm:$0xff] }
 0x2d6   :  { %8660 = vmatprep.mubr.msk.bf16.mxu0 %vm528_vm1, %v11795_v2  ;;  %v3928_v2 = vld [vmem:[#allocation2 + $0x302] sm:$0xff] }
 0x2da   :  { %8883 = vmatmul.mubr.msk.bf16.gmra.mrb[12].mxu1 %vm528_vm1, %v3957_v6 }
 0x2db   :  { %8886 = vmatprep.mubr.msk.bf16.mxu1 %vm528_vm1, %v11876_v1 }
 0x2dd   :  { %8661 = vmatmul.mubr.msk.bf16.gmra.mrb[84].mxu0 %vm528_vm1, %v11797_v3  ;;  %v3963_v3 = vpack.c.bf16 %v3929_v22, %v3928_v2  ;;  %v4467_v22 = vld [vmem:[#allocation2 + $0x288] sm:$0xff] }
 0x2de   :  { %8664 = vmatprep.mubr.msk.bf16.mxu0 %vm528_vm1, %v11807_v13  ;;  %v3964_v13 = vpack.c.bf16 %v3931_v5, %v3930_v45  ;;  %v4468_v45 = vld [vmem:[#allocation2 + $0x290] sm:$0xff]  ;;  %v4469_v5 = vld [vmem:[#allocation2 + $0x2a0] sm:$0xff] }
 0x2df   :  { %v4508_v49 = vpack.c.bf16 %v4468_v45, %v4467_v22  ;;  %v4983_v22 = vld [vmem:[#allocation2 + $0xc1] sm:$0xff] }
 0x2e2   :  { %8887 = vmatmul.mubr.msk.bf16.gmra.mrb[16].mxu1 %vm528_vm1, %v3959_v25 }
 0x2e3   :  { %8890 = vmatprep.mubr.msk.bf16.mxu1 %vm528_vm1, %v3960_v48 }
 0x2e5   :  { %8665 = vmatmul.mubr.msk.bf16.gmra.mrb[88].mxu0 %vm528_vm1, %v11809_v26  ;;  %v3965_v26 = vpack.c.bf16 %v3933_v55, %v3932_v59  ;;  %v2790_v59 = vld [vmem:[#allocation2 + $0x108] sm:$0xff]  ;;  %v2791_v55 = vld [vmem:[#allocation2 + $0x110] sm:$0xff] }
 0x2e6   :  { %8668 = vmatprep.mubr.msk.bf16.mxu0 %vm528_vm1, %v11819_v14  ;;  %v5166_v14 = vsel %vm1539_vm3, %v11747_v10, 0 }
 0x2ea   :  { %8891 = vmatmul.mubr.msk.bf16.gmra.mrb[20].mxu1 %vm528_vm1, %v3961_v18 }
 0x2eb   :  { %8894 = vmatprep.mubr.msk.bf16.mxu1 %vm528_vm1, %v3962_v36 }
 0x2ed   :  { %8669 = vmatmul.mubr.msk.bf16.gmra.mrb[92].mxu0 %vm528_vm1, %v11821_v51  ;;  %v11914_v51 = vld [vmem:[%s15015_s2 + $0x10] sm:$0x3] }
 0x2ee   :  { %8672 = vmatprep.mubr.msk.bf16.mxu0 %vm528_vm1, %v2300_v43  ;;  %v2789_v43 = vld [vmem:[#allocation2 + $0xf8] sm:$0xff] }
 0x2f2   :  { %8895 = vmatmul.mubr.msk.bf16.gmra.mrb[24].mxu1 %vm528_vm1, %v3963_v3 }
 0x2f3   :  { %8898 = vmatprep.mubr.msk.bf16.mxu1 %vm528_vm1, %v3964_v13 }
 0x2f5   :  { %8673 = vmatmul.mubr.msk.bf16.gmra.mrb[96].mxu0 %vm528_vm1, %v11830_v33  ;;  %v4455_v33 = vld [vmem:[#allocation2 + $0x1f8] sm:$0xff] }
 0x2f6   :  { %8676 = vmatprep.mubr.msk.bf16.mxu0 %vm528_vm1, %v11840_v62  ;;  %v4457_v62 = vld [vmem:[#allocation2 + $0x210] sm:$0xff] }
 0x2fa   :  { %8899 = vmatmul.mubr.msk.bf16.gmra.mrb[28].mxu1 %vm528_vm1, %v3965_v26 }
 0x2fb   :  { %8904 = vmatprep.mubr.msk.bf16.mxu1 %vm528_vm1, %v11638_v34  ;;  %v4449_v34 = vld [vmem:[#allocation2 + $0x180] sm:$0xff] }
 0x2fd   :  { %8677 = vmatmul.mubr.msk.bf16.gmra.mrb[100].mxu0 %vm528_vm1, %v11842_v54  ;;  %v4458_v54 = vld [vmem:[#allocation2 + $0x218] sm:$0xff] }
 0x2fe   :  { %8680 = vmatprep.mubr.msk.bf16.mxu0 %vm528_vm1, %v11852_v46  ;;  %v4503_v7 = vpack.c.bf16 %v4458_v54, %v4457_v62  ;;  %v2779_v46 = vld [vmem:[#allocation2 + $0x80] sm:$0xff] }
 0x2ff   :  { %v2838_v27 = vpack.c.bf16 %v2779_v46, %v2778_v40 }
 0x302   :  { %8905 = vmatmul.mubr.msk.bf16.vlgmr.msra.gmra.mrb[32].mxu1 %vm528_vm1, %v11652_v50  ;;  %v4450_v50 = vld [vmem:[#allocation2 + $0x188] sm:$0xff] }
 0x303   :  { %8969 = vmatpush3.bf16.msra.mxu1 %v5166_v14  ;;  %8908 = vmatprep.mubr.msk.bf16.mxu1 %vm528_vm1, %v11654_v47  ;;  %v11960_v47 = vpack.c.bf16 %v4450_v50, %v4449_v34  ;;  %v2844_v14 = vpack.c.bf16 %v2791_v55, %v2790_v59  ;;  %v4471_v34 = vld [vmem:[#allocation2 + $0x2b8] sm:$0xff]  ;;  %v4472_v50 = vld [vmem:[#allocation2 + $0x2c0] sm:$0xff]  ;;  %v4989_v55 = vld [vmem:[#allocation2 + $0x109] sm:$0xff] }
 0x304   :  { %9689 = vmatprep.subr.msk.bf16.mxu1 %vm1539_vm3, %v11914_v51 }
 0x305   :  { %8681 = vmatmul.mubr.msk.bf16.gmra.mrb[104].mxu0 %vm528_vm1, %v11854_v16  ;;  %v2837_v16 = vpack.c.bf16 %v2777_v19, %v2776_v0  ;;  %v2798_v0 = vld [vmem:[#allocation2 + $0x168] sm:$0xff]  ;;  %v2799_v19 = vld [vmem:[#allocation2 + $0x170] sm:$0xff] }
 0x306   :  { %8684 = vmatprep.mubr.msk.bf16.mxu0 %vm528_vm1, %v11864_v44  ;;  %v4462_v44 = vld [vmem:[#allocation2 + $0x248] sm:$0xff]  ;;  %v2848_v46 = vpack.c.bf16 %v2799_v19, %v2798_v0  ;;  %v5005_v19 = vld [vmem:[#allocation2 + $0x1f9] sm:$0xff] }
 0x307   :  { %v4505_v56 = vpack.c.bf16 %v4462_v44, %v4461_v8 }
 0x30a   :  { %8909 = vmatmul.mubr.msk.bf16.gmra.mrb[36].mxu1 %vm528_vm1, %v11664_v63  ;;  %v4451_v63 = vld [vmem:[#allocation2 + $0x198] sm:$0xff] }
 0x30b   :  { %8912 = vmatprep.mubr.msk.bf16.mxu1 %vm528_vm1, %v11666_v21  ;;  %v4452_v21 = vld [vmem:[#allocation2 + $0x1a0] sm:$0xff] }
 0x30d   :  { %8685 = vmatmul.mubr.msk.bf16.gmra.mrb[108].mxu0 %vm528_vm1, %v11866_v61  ;;  %v4504_v61 = vpack.c.bf16 %v4460_v17, %v4459_v60  ;;  %v4481_v60 = vld [vmem:[#allocation2 + $0x330] sm:$0xff]  ;;  %v4482_v17 = vld [vmem:[#allocation2 + $0x338] sm:$0xff] }
 0x30e   :  { %8688 = vmatprep.mubr.msk.bf16.mxu0 %vm528_vm1, %v3957_v6  ;;  %v2783_v6 = vld [vmem:[#allocation2 + $0xb0] sm:$0xff]  ;;  %v4515_v44 = vpack.c.bf16 %v4482_v17, %v4481_v60 }
 0x30f   :  { %v2840_v28 = vpack.c.bf16 %v2783_v6, %v2782_v11  ;;  %v4972_v11 = vld [vmem:[#allocation2 + $0x39] sm:$0xff]  ;;  %v5009_v17 = vld [vmem:[#allocation2 + $0x229] sm:$0xff] }
 0x312   :  { %8913 = vmatmul.mubr.msk.bf16.gmra.mrb[40].mxu1 %vm528_vm1, %v11676_v37  ;;  %v4500_v37 = vpack.c.bf16 %v4452_v21, %v4451_v63  ;;  %v4473_v63 = vld [vmem:[#allocation2 + $0x2d0] sm:$0xff]  ;;  %v4474_v21 = vld [vmem:[#allocation2 + $0x2d8] sm:$0xff] }
 0x313   :  { %8916 = vmatprep.mubr.msk.bf16.mxu1 %vm528_vm1, %v11678_v41  ;;  %v4453_v41 = vld [vmem:[#allocation2 + $0x1e0] sm:$0xff] }
 0x315   :  { %8689 = vmatmul.mubr.msk.bf16.gmra.mrb[112].mxu0 %vm528_vm1, %v11876_v1  ;;  %v2839_v1 = vpack.c.bf16 %v2781_v31, %v2780_v39  ;;  %v4971_v31 = vld [vmem:[#allocation2 + $0x31] sm:$0xff] }
 0x316   :  { %8692 = vmatprep.mubr.msk.bf16.mxu0 %vm528_vm1, %v3959_v25  ;;  %v4466_v25 = vld [vmem:[#allocation2 + $0x278] sm:$0xff]  ;;  %v5035_v6 = vpack.c.bf16 %v4972_v11, %v4971_v31  ;;  %v5014_v11 = vld [vmem:[#allocation2 + $0x261] sm:$0xff] }
 0x317   :  { %v4507_v12 = vpack.c.bf16 %v4466_v25, %v4465_v30  ;;  %v5716_v25 = vsel %vm1539_vm3, %v11914_v51, 0  ;;  %v4984_v51 = vld [vmem:[#allocation2 + $0xc9] sm:$0xff]  ;;  %v5013_v31 = vld [vmem:[#allocation2 + $0x259] sm:$0xff] }
 0x31a   :  { %8917 = vmatmul.mubr.msk.bf16.gmra.mrb[44].mxu1 %vm528_vm1, %v11688_v32  ;;  %v4454_v32 = vld [vmem:[#allocation2 + $0x1e8] sm:$0xff] }
 0x31b   :  { %8920 = vmatprep.mubr.msk.bf16.mxu1 %vm528_vm1, %v11690_v58  ;;  %v4501_v58 = vpack.c.bf16 %v4454_v32, %v4453_v41  ;;  %v4511_v41 = vpack.c.bf16 %v4474_v21, %v4473_v63  ;;  %v2792_v32 = vld [vmem:[#allocation2 + $0x120] sm:$0xff] }
 0x31c   :  { %v4993_v21 = vld [vmem:[#allocation2 + $0x139] sm:$0xff] }
 0x31d   :  { %8693 = vmatmul.mubr.msk.bf16.gmra.mrb[116].mxu0 %vm528_vm1, %v3960_v48  ;;  %v4506_v48 = vpack.c.bf16 %v4464_v15, %v4463_v20  ;;  %v4975_v20 = vld [vmem:[#allocation2 + $0x61] sm:$0xff]  ;;  %v4976_v15 = vld [vmem:[#allocation2 + $0x69] sm:$0xff] }
 0x31e   :  { %8696 = vmatprep.mubr.msk.bf16.mxu0 %vm528_vm1, %v3961_v18  ;;  %v2787_v18 = vld [vmem:[#allocation2 + $0xe0] sm:$0xff] }
 0x31f   :  { %v2842_v2 = vpack.c.bf16 %v2787_v18, %v2786_v4 }
 0x322   :  { %8921 = vmatmul.mubr.msk.bf16.gmra.mrb[48].mxu1 %vm528_vm1, %v11700_v24  ;;  %v2772_v24 = vld [vmem:[#allocation2 + $0x30] sm:$0xff] }
 0x323   :  { %8924 = vmatprep.mubr.msk.bf16.mxu1 %vm528_vm1, %v11702_v38  ;;  %v2773_v38 = vld [vmem:[#allocation2 + $0x38] sm:$0xff] }
 0x325   :  { %8697 = vmatmul.mubr.msk.bf16.gmra.mrb[120].mxu0 %vm528_vm1, %v3962_v36  ;;  %v2841_v36 = vpack.c.bf16 %v2785_v42, %v2784_v52  ;;  %v4979_v52 = vld [vmem:[#allocation2 + $0x91] sm:$0xff]  ;;  %v4980_v42 = vld [vmem:[#allocation2 + $0x99] sm:$0xff] }
 0x326   :  { %8700 = vmatprep.mubr.msk.bf16.mxu0 %vm528_vm1, %v3963_v3  ;;  %v4470_v3 = vld [vmem:[#allocation2 + $0x2a8] sm:$0xff]  ;;  %v5039_v18 = vpack.c.bf16 %v4980_v42, %v4979_v52 }
 0x327   :  { %v4509_v9 = vpack.c.bf16 %v4470_v3, %v4469_v5  ;;  %v5041_v5 = vpack.c.bf16 %v4984_v51, %v4983_v22  ;;  %v4985_v3 = vld [vmem:[#allocation2 + $0xd9] sm:$0xff]  ;;  %v5019_v52 = vld [vmem:[#allocation2 + $0x2a1] sm:$0xff]  ;;  %v5020_v42 = vld [vmem:[#allocation2 + $0x2a9] sm:$0xff] }
 0x32a   :  { %8925 = vmatmul.mubr.msk.bf16.gmra.mrb[52].mxu1 %vm528_vm1, %v11712_v53  ;;  %v2774_v53 = vld [vmem:[#allocation2 + $0x48] sm:$0xff] }
 0x32b   :  { %8928 = vmatprep.mubr.msk.bf16.mxu1 %vm528_vm1, %v11714_v29  ;;  %v2775_v29 = vld [vmem:[#allocation2 + $0x50] sm:$0xff] }
 0x32c   :  { %v2836_v10 = vpack.c.bf16 %v2775_v29, %v2774_v53 }
 0x32d   :  { %8701 = vmatmul.mubr.msk.bf16.gmra.mrb[124].mxu0 %vm528_vm1, %v3964_v13  ;;  %v2788_v13 = vld [vmem:[#allocation2 + $0xf0] sm:$0xff] }
 0x32e   :  { %8706 = vmatprep.mubr.msk.bf16.mxu0 %vm528_vm1, %v11634_v23  ;;  %v4502_v23 = vpack.c.bf16 %v4456_v57, %v4455_v33  ;;  %v2843_v26 = vpack.c.bf16 %v2789_v43, %v2788_v13  ;;  %v4477_v33 = vld [vmem:[#allocation2 + $0x300] sm:$0xff]  ;;  %v4478_v57 = vld [vmem:[#allocation2 + $0x308] sm:$0xff] }
 0x32f   :  { %v4513_v54 = vpack.c.bf16 %v4478_v57, %v4477_v33  ;;  %v4988_v13 = vld [vmem:[#allocation2 + $0xf9] sm:$0xff] }
 0x330   :  { %v5001_v57 = vld [vmem:[#allocation2 + $0x199] sm:$0xff] }
 0x332   :  { %8929 = vmatmul.mubr.msk.bf16.gmra.mrb[56].mxu1 %vm528_vm1, %v11724_v35  ;;  %v2835_v35 = vpack.c.bf16 %v2773_v38, %v2772_v24  ;;  %v2794_v24 = vld [vmem:[#allocation2 + $0x138] sm:$0xff]  ;;  %v2795_v38 = vld [vmem:[#allocation2 + $0x140] sm:$0xff] }
 0x333   :  { %8932 = vmatprep.mubr.msk.bf16.mxu1 %vm528_vm1, %v11960_v47  ;;  %v2846_v29 = vpack.c.bf16 %v2795_v38, %v2794_v24  ;;  %v4997_v38 = vld [vmem:[#allocation2 + $0x169] sm:$0xff] }
 0x335   :  { %8707 = vmatmul.mubr.msk.bf16.vlgmr.msra.gmra.mrb[64].mxu0 %vm528_vm1, %v2835_v35  ;;  %v4475_v35 = vld [vmem:[#allocation2 + $0x2e8] sm:$0xff] }
 0x336   :  { %8710 = vmatprep.mubr.msk.bf16.mxu0 %vm528_vm1, %v2836_v10  ;;  %v4476_v10 = vld [vmem:[#allocation2 + $0x2f0] sm:$0xff] }
 0x337   :  { %v4512_v62 = vpack.c.bf16 %v4476_v10, %v4475_v35  ;;  %v5000_v35 = vld [vmem:[#allocation2 + $0x189] sm:$0xff] }
 0x33a   :  { %8933 = vmatmul.mubr.msk.bf16.gmra.mrb[60].mxu1 %vm528_vm1, %v4500_v37  ;;  %v4510_v37 = vpack.c.bf16 %v4472_v50, %v4471_v34  ;;  %v4992_v34 = vld [vmem:[#allocation2 + $0x129] sm:$0xff] }
 0x33b   :  { %8936 = vmatprep.mubr.msk.bf16.mxu1 %vm528_vm1, %v4501_v58  ;;  %v2793_v58 = vld [vmem:[#allocation2 + $0x128] sm:$0xff] }
 0x33c   :  { %v2845_v53 = vpack.c.bf16 %v2793_v58, %v2792_v32  ;;  %v4996_v32 = vld [vmem:[#allocation2 + $0x159] sm:$0xff] }
 0x33d   :  { %8711 = vmatmul.mubr.msk.bf16.gmra.mrb[68].mxu0 %vm528_vm1, %v2837_v16  ;;  %v4479_v16 = vld [vmem:[#allocation2 + $0x318] sm:$0xff] }
 0x33e   :  { %8714 = vmatprep.mubr.msk.bf16.mxu0 %vm528_vm1, %v2838_v27  ;;  %v4480_v27 = vld [vmem:[#allocation2 + $0x320] sm:$0xff] }
 0x33f   :  { %v4514_v8 = vpack.c.bf16 %v4480_v27, %v4479_v16  ;;  %v5008_v16 = vld [vmem:[#allocation2 + $0x219] sm:$0xff] }
 0x342   :  { %8937 = vmatmul.mubr.msk.bf16.gmra.mrb[0].mxu1 %vm528_vm1, %v4502_v23  ;;  %v2796_v23 = vld [vmem:[#allocation2 + $0x150] sm:$0xff] }
 0x343   :  { %8940 = vmatprep.mubr.msk.bf16.mxu1 %vm528_vm1, %v4503_v7  ;;  %v2797_v7 = vld [vmem:[#allocation2 + $0x158] sm:$0xff] }
 0x344   :  { %v2847_v40 = vpack.c.bf16 %v2797_v7, %v2796_v23  ;;  %v5003_v23 = vld [vmem:[#allocation2 + $0x1e1] sm:$0xff]  ;;  %v5004_v7 = vld [vmem:[#allocation2 + $0x1e9] sm:$0xff] }
 0x345   :  { %8715 = vmatmul.mubr.msk.bf16.gmra.mrb[72].mxu0 %vm528_vm1, %v2839_v1  ;;  %v4973_v1 = vld [vmem:[#allocation2 + $0x49] sm:$0xff]  ;;  %v5051_v0 = vpack.c.bf16 %v5004_v7, %v5003_v23  ;;  %v5034_v7 = vld [vmem:[#allocation2 + $0x351] sm:$0xff] }
 0x346   :  { %8718 = vmatprep.mubr.msk.bf16.mxu0 %vm528_vm1, %v2840_v28  ;;  %v4974_v28 = vld [vmem:[#allocation2 + $0x51] sm:$0xff]  ;;  %v5033_v23 = vld [vmem:[#allocation2 + $0x349] sm:$0xff] }
 0x347   :  { %v5036_v30 = vpack.c.bf16 %v4974_v28, %v4973_v1  ;;  %v5016_v1 = vld [vmem:[#allocation2 + $0x279] sm:$0xff]  ;;  %v5056_v28 = vpack.c.bf16 %v5014_v11, %v5013_v31 }
 0x34a   :  { %8941 = vmatmul.mubr.msk.bf16.gmra.mrb[4].mxu1 %vm528_vm1, %v4504_v61  ;;  %v4483_v61 = vld [vmem:[#allocation2 + $0x348] sm:$0xff] }
 0x34b   :  { %8944 = vmatprep.mubr.msk.bf16.mxu1 %vm528_vm1, %v4505_v56  ;;  %v4484_v56 = vld [vmem:[#allocation2 + $0x350] sm:$0xff] }
 0x34c   :  { %v4516_v39 = vpack.c.bf16 %v4484_v56, %v4483_v61  ;;  %v5012_v61 = vld [vmem:[#allocation2 + $0x249] sm:$0xff] }
 0x34d   :  { %8719 = vmatmul.mubr.msk.bf16.gmra.mrb[76].mxu0 %vm528_vm1, %v2841_v36  ;;  %v4981_v36 = vld [vmem:[#allocation2 + $0xa9] sm:$0xff] }
 0x34e   :  { %8722 = vmatprep.mubr.msk.bf16.mxu0 %vm528_vm1, %v2842_v2  ;;  %v4982_v2 = vld [vmem:[#allocation2 + $0xb1] sm:$0xff] }
 0x34f   :  { %v5040_v45 = vpack.c.bf16 %v4982_v2, %v4981_v36 }
 0x352   :  { %8945 = vmatmul.mubr.msk.bf16.gmra.mrb[8].mxu1 %vm528_vm1, %v4506_v48  ;;  %v5037_v48 = vpack.c.bf16 %v4976_v15, %v4975_v20 }
 0x353   :  { %8948 = vmatprep.mubr.msk.bf16.mxu1 %vm528_vm1, %v4507_v12  ;;  %v4978_v12 = vld [vmem:[#allocation2 + $0x81] sm:$0xff] }
 0x355   :  { %8723 = vmatmul.mubr.msk.bf16.gmra.mrb[80].mxu0 %vm528_vm1, %v2843_v26  ;;  %v4990_v26 = vld [vmem:[#allocation2 + $0x111] sm:$0xff] }
 0x356   :  { %8726 = vmatprep.mubr.msk.bf16.mxu0 %vm528_vm1, %v2844_v14  ;;  %v4991_v14 = vld [vmem:[#allocation2 + $0x121] sm:$0xff]  ;;  %v5044_v50 = vpack.c.bf16 %v4990_v26, %v4989_v55 }
 0x357   :  { %v5045_v63 = vpack.c.bf16 %v4992_v34, %v4991_v14  ;;  %v5025_v14 = vld [vmem:[#allocation2 + $0x2e9] sm:$0xff]  ;;  %v5026_v34 = vld [vmem:[#allocation2 + $0x2f1] sm:$0xff] }
 0x35a   :  { %8949 = vmatmul.mubr.msk.bf16.gmra.mrb[12].mxu1 %vm528_vm1, %v4508_v49  ;;  %v4986_v49 = vld [vmem:[#allocation2 + $0xe1] sm:$0xff] }
 0x35b   :  { %8952 = vmatprep.mubr.msk.bf16.mxu1 %vm528_vm1, %v4509_v9  ;;  %v4987_v9 = vld [vmem:[#allocation2 + $0xf1] sm:$0xff]  ;;  %v5042_v43 = vpack.c.bf16 %v4986_v49, %v4985_v3  ;;  %v5024_v49 = vld [vmem:[#allocation2 + $0x2d9] sm:$0xff] }
 0x35c   :  { %v5043_v59 = vpack.c.bf16 %v4988_v13, %v4987_v9  ;;  %v5023_v3 = vld [vmem:[#allocation2 + $0x2d1] sm:$0xff] }
 0x35d   :  { %8727 = vmatmul.mubr.msk.bf16.gmra.mrb[84].mxu0 %vm528_vm1, %v2845_v53  ;;  %v4998_v53 = vld [vmem:[#allocation2 + $0x171] sm:$0xff]  ;;  %v5061_v13 = vpack.c.bf16 %v5024_v49, %v5023_v3 }
 0x35e   :  { %8730 = vmatprep.mubr.msk.bf16.mxu0 %vm528_vm1, %v2846_v29  ;;  %v4999_v29 = vld [vmem:[#allocation2 + $0x181] sm:$0xff]  ;;  %v5048_v10 = vpack.c.bf16 %v4998_v53, %v4997_v38  ;;  %v5029_v38 = vld [vmem:[#allocation2 + $0x319] sm:$0xff] }
 0x35f   :  { %v5049_v33 = vpack.c.bf16 %v5000_v35, %v4999_v29  ;;  %v5030_v53 = vld [vmem:[#allocation2 + $0x321] sm:$0xff]  ;;  %v5031_v29 = vld [vmem:[#allocation2 + $0x331] sm:$0xff]  ;;  %v5032_v35 = vld [vmem:[#allocation2 + $0x339] sm:$0xff] }
 0x362   :  { %8953 = vmatmul.mubr.msk.bf16.gmra.mrb[16].mxu1 %vm528_vm1, %v4510_v37  ;;  %v4994_v37 = vld [vmem:[#allocation2 + $0x141] sm:$0xff] }
 0x363   :  { %8956 = vmatprep.mubr.msk.bf16.mxu1 %vm528_vm1, %v4511_v41  ;;  %v4995_v41 = vld [vmem:[#allocation2 + $0x151] sm:$0xff]  ;;  %v5046_v58 = vpack.c.bf16 %v4994_v37, %v4993_v21  ;;  %v5062_v21 = vpack.c.bf16 %v5026_v34, %v5025_v14  ;;  %v5533_v14 = vld [vmem:[#allocation2 + $0xc2] sm:$0xff] }
 0x364   :  { %v5047_v24 = vpack.c.bf16 %v4996_v32, %v4995_v41  ;;  %v5534_v34 = vld [vmem:[#allocation2 + $0xca] sm:$0xff] }
 0x365   :  { %8731 = vmatmul.mubr.msk.bf16.gmra.mrb[88].mxu0 %vm528_vm1, %v2847_v40  ;;  %v5006_v40 = vld [vmem:[#allocation2 + $0x201] sm:$0xff] }
 0x366   :  { %8734 = vmatprep.mubr.msk.bf16.mxu0 %vm528_vm1, %v2848_v46  ;;  %v5007_v46 = vld [vmem:[#allocation2 + $0x211] sm:$0xff]  ;;  %v5052_v27 = vpack.c.bf16 %v5006_v40, %v5005_v19  ;;  %v5066_v19 = vpack.c.bf16 %v5034_v7, %v5033_v23 }
 0x367   :  { %v5053_v60 = vpack.c.bf16 %v5008_v16, %v5007_v46  ;;  %v5521_v40 = vld [vmem:[#allocation2 + $0x32] sm:$0xff]  ;;  %v5522_v46 = vld [vmem:[#allocation2 + $0x3a] sm:$0xff] }
 0x368   :  { %v5585_v16 = vpack.c.bf16 %v5522_v46, %v5521_v40 }
 0x36a   :  { %8957 = vmatmul.mubr.msk.bf16.gmra.mrb[20].mxu1 %vm528_vm1, %v4512_v62  ;;  %v5002_v62 = vld [vmem:[#allocation2 + $0x1a1] sm:$0xff] }
 0x36b   :  { %8960 = vmatprep.mubr.msk.bf16.mxu1 %vm528_vm1, %v4513_v54  ;;  %v5050_v54 = vpack.c.bf16 %v5002_v62, %v5001_v57 }
 0x36d   :  { %8735 = vmatmul.mubr.msk.bf16.gmra.mrb[92].mxu0 %vm528_vm1, %v11960_v47  ;;  %v4977_v47 = vld [vmem:[#allocation2 + $0x79] sm:$0xff] }
 0x36e   :  { %v5038_v4 = vpack.c.bf16 %v4978_v12, %v4977_v47  ;;  %v5017_v47 = vld [vmem:[#allocation2 + $0x289] sm:$0xff]  ;;  %v5018_v12 = vld [vmem:[#allocation2 + $0x291] sm:$0xff] }
 0x372   :  { %8961 = vmatmul.mubr.msk.bf16.gmra.mrb[24].mxu1 %vm528_vm1, %v4514_v8  ;;  %v5010_v8 = vld [vmem:[#allocation2 + $0x231] sm:$0xff] }
 0x373   :  { %8964 = vmatprep.mubr.msk.bf16.mxu1 %vm528_vm1, %v4515_v44  ;;  %v5011_v44 = vld [vmem:[#allocation2 + $0x241] sm:$0xff]  ;;  %v5054_v56 = vpack.c.bf16 %v5010_v8, %v5009_v17 }
 0x37a   :  { %8965 = vmatmul.mubr.msk.bf16.gmra.mrb[28].mxu1 %vm528_vm1, %v4516_v39  ;;  %v5055_v39 = vpack.c.bf16 %v5012_v61, %v5011_v44  ;;  %v5523_v44 = vld [vmem:[#allocation2 + $0x4a] sm:$0xff]  ;;  %v5524_v61 = vld [vmem:[#allocation2 + $0x52] sm:$0xff] }
 0x37b   :  { %8970 = vmatprep.mubr.msk.bf16.mxu1 %vm528_vm1, %v5035_v6  ;;  %v5015_v6 = vld [vmem:[#allocation2 + $0x271] sm:$0xff]  ;;  %v5586_v31 = vpack.c.bf16 %v5524_v61, %v5523_v44 }
 0x37c   :  { %v5057_v20 = vpack.c.bf16 %v5016_v1, %v5015_v6  ;;  %v5539_v44 = vld [vmem:[#allocation2 + $0x10a] sm:$0xff]  ;;  %v5540_v61 = vld [vmem:[#allocation2 + $0x112] sm:$0xff] }
 0x382   :  { %8971 = vmatmul.mubr.msk.bf16.vlgmr.msra.gmra.mrb[32].mxu1 %vm528_vm1, %v5036_v30 }
 0x383   :  { %9035 = vmatpush3.bf16.msra.mxu1 %v5716_v25  ;;  %8974 = vmatprep.mubr.msk.bf16.mxu1 %vm528_vm1, %v5037_v48 }
 0x38a   :  { %8975 = vmatmul.mubr.msk.bf16.gmra.mrb[36].mxu1 %vm528_vm1, %v5038_v4  ;;  %v5058_v4 = vpack.c.bf16 %v5018_v12, %v5017_v47  ;;  %v5527_v47 = vld [vmem:[#allocation2 + $0x7a] sm:$0xff]  ;;  %v5528_v12 = vld [vmem:[#allocation2 + $0x82] sm:$0xff] }
 0x38b   :  { %8978 = vmatprep.mubr.msk.bf16.mxu1 %vm528_vm1, %v5039_v18  ;;  %v5059_v18 = vpack.c.bf16 %v5020_v42, %v5019_v52  ;;  %v5529_v52 = vld [vmem:[#allocation2 + $0x92] sm:$0xff]  ;;  %v5530_v42 = vld [vmem:[#allocation2 + $0x9a] sm:$0xff] }
 0x392   :  { %8979 = vmatmul.mubr.msk.bf16.gmra.mrb[40].mxu1 %vm528_vm1, %v5040_v45  ;;  %v5021_v45 = vld [vmem:[#allocation2 + $0x2b9] sm:$0xff] }
 0x393   :  { %8982 = vmatprep.mubr.msk.bf16.mxu1 %vm528_vm1, %v5041_v5  ;;  %v5022_v5 = vld [vmem:[#allocation2 + $0x2c1] sm:$0xff] }
 0x394   :  { %v5060_v9 = vpack.c.bf16 %v5022_v5, %v5021_v45 }
 0x39a   :  { %8983 = vmatmul.mubr.msk.bf16.gmra.mrb[44].mxu1 %vm528_vm1, %v5042_v43 }
 0x39b   :  { %8986 = vmatprep.mubr.msk.bf16.mxu1 %vm528_vm1, %v5043_v59 }
 0x3a2   :  { %8987 = vmatmul.mubr.msk.bf16.gmra.mrb[48].mxu1 %vm528_vm1, %v5044_v50  ;;  %v5027_v50 = vld [vmem:[#allocation2 + $0x301] sm:$0xff] }
 0x3a3   :  { %8990 = vmatprep.mubr.msk.bf16.mxu1 %vm528_vm1, %v5045_v63  ;;  %v5028_v63 = vld [vmem:[#allocation2 + $0x309] sm:$0xff] }
 0x3a4   :  { %v5063_v37 = vpack.c.bf16 %v5028_v63, %v5027_v50  ;;  %v5591_v63 = vpack.c.bf16 %v5534_v34, %v5533_v14 }
 0x3aa   :  { %8991 = vmatmul.mubr.msk.bf16.gmra.mrb[52].mxu1 %vm528_vm1, %v5046_v58 }
 0x3ab   :  { %8994 = vmatprep.mubr.msk.bf16.mxu1 %vm528_vm1, %v5047_v24 }
 0x3b2   :  { %8995 = vmatmul.mubr.msk.bf16.gmra.mrb[56].mxu1 %vm528_vm1, %v5048_v10  ;;  %v5064_v10 = vpack.c.bf16 %v5030_v53, %v5029_v38 }
 0x3b3   :  { %8998 = vmatprep.mubr.msk.bf16.mxu1 %vm528_vm1, %v5049_v33  ;;  %v5065_v33 = vpack.c.bf16 %v5032_v35, %v5031_v29  ;;  %v5535_v29 = vld [vmem:[#allocation2 + $0xda] sm:$0xff]  ;;  %v5536_v35 = vld [vmem:[#allocation2 + $0xe2] sm:$0xff] }
 0x3b4   :  { %v5592_v23 = vpack.c.bf16 %v5536_v35, %v5535_v29 }
 0x3ba   :  { %8999 = vmatmul.mubr.msk.bf16.gmra.mrb[60].mxu1 %vm528_vm1, %v5050_v54 }
 0x3bb   :  { %9002 = vmatprep.mubr.msk.bf16.mxu1 %vm528_vm1, %v5051_v0 }
 0x3c2   :  { %9003 = vmatmul.mubr.msk.bf16.gmra.mrb[0].mxu1 %vm528_vm1, %v5052_v27 }
 0x3c3   :  { %9006 = vmatprep.mubr.msk.bf16.mxu1 %vm528_vm1, %v5053_v60 }
 0x3c8   :  { %v12025_v15 = vpop.f32.mrb[96].mxu0 }
 0x3c9   :  { %v12028_v30 = vpop.f32.mrb[97].mxu0 }
 0x3ca   :  { %9007 = vmatmul.mubr.msk.bf16.gmra.mrb[4].mxu1 %vm528_vm1, %v5054_v56  ;;  %v12031_v25 = vpop.f32.mrb[98].mxu0  ;;  %v5525_v56 = vld [vmem:[#allocation2 + $0x62] sm:$0xff] }
 0x3cb   :  { %9010 = vmatprep.mubr.msk.bf16.mxu1 %vm528_vm1, %v5055_v39  ;;  %v12033_v48 = vpop.f32.mrb[99].mxu0  ;;  %v5526_v39 = vld [vmem:[#allocation2 + $0x6a] sm:$0xff] }
 0x3cc   :  { %v5587_v11 = vpack.c.bf16 %v5526_v39, %v5525_v56  ;;  %v5541_v56 = vld [vmem:[#allocation2 + $0x122] sm:$0xff]  ;;  %v5542_v39 = vld [vmem:[#allocation2 + $0x12a] sm:$0xff] }
 0x3d0   :  { %v12035_v36 = vpop.f32.mrb[100].mxu0 }
 0x3d1   :  { %v12038_v2 = vpop.f32.mrb[101].mxu0 }
 0x3d2   :  { %9011 = vmatmul.mubr.msk.bf16.gmra.mrb[8].mxu1 %vm528_vm1, %v5056_v28  ;;  %v12041_v22 = vpop.f32.mrb[102].mxu0 }
 0x3d3   :  { %9014 = vmatprep.mubr.msk.bf16.mxu1 %vm528_vm1, %v5057_v20  ;;  %v12043_v51 = vpop.f32.mrb[103].mxu0 }
 0x3d8   :  { %v12045_v43 = vpop.f32.mrb[104].mxu0 }
 0x3d9   :  { %v12048_v59 = vpop.f32.mrb[105].mxu0 }
 0x3da   :  { %9015 = vmatmul.mubr.msk.bf16.gmra.mrb[12].mxu1 %vm528_vm1, %v5058_v4  ;;  %v12051_v55 = vpop.f32.mrb[106].mxu0  ;;  %v5588_v4 = vpack.c.bf16 %v5528_v12, %v5527_v47 }
 0x3db   :  { %9018 = vmatprep.mubr.msk.bf16.mxu1 %vm528_vm1, %v5059_v18  ;;  %v12053_v26 = vpop.f32.mrb[107].mxu0  ;;  %v5589_v18 = vpack.c.bf16 %v5530_v42, %v5529_v52 }
 0x3e0   :  { %v12055_v41 = vpop.f32.mrb[108].mxu0 }
 0x3e1   :  { %v12058_v32 = vpop.f32.mrb[109].mxu0 }
 0x3e2   :  { %9019 = vmatmul.mubr.msk.bf16.gmra.mrb[16].mxu1 %vm528_vm1, %v5060_v9  ;;  %v12061_v58 = vpop.f32.mrb[110].mxu0  ;;  %v5531_v9 = vld [vmem:[#allocation2 + $0xaa] sm:$0xff] }
 0x3e3   :  { %9022 = vmatprep.mubr.msk.bf16.mxu1 %vm528_vm1, %v5061_v13  ;;  %v12063_v24 = vpop.f32.mrb[111].mxu0  ;;  %v5532_v13 = vld [vmem:[#allocation2 + $0xb2] sm:$0xff] }
 0x3e4   :  { %v5590_v50 = vpack.c.bf16 %v5532_v13, %v5531_v9  ;;  %v5545_v9 = vld [vmem:[#allocation2 + $0x152] sm:$0xff]  ;;  %v5546_v13 = vld [vmem:[#allocation2 + $0x15a] sm:$0xff] }
 0x3e5   :  { %v5597_v34 = vpack.c.bf16 %v5546_v13, %v5545_v9  ;;  %v5553_v13 = vld [vmem:[#allocation2 + $0x1e2] sm:$0xff] }
 0x3e8   :  { %v12065_v57 = vpop.f32.mrb[112].mxu0 }
 0x3e9   :  { %15188 = vst [vmem:[#allocation20_spill] sm:$0xff] %v12065_v57  ;;  %v12068_v62 = vpop.f32.mrb[113].mxu0  ;;  %v5574_v57 = vld [vmem:[#allocation2 + $0x2da] sm:$0xff] }
 0x3ea   :  { %9023 = vmatmul.mubr.msk.bf16.gmra.mrb[20].mxu1 %vm528_vm1, %v5062_v21  ;;  %15189 = vst [vmem:[#allocation23_spill] sm:$0xff] %v12068_v62  ;;  %v12071_v54 = vpop.f32.mrb[114].mxu0  ;;  %v5573_v62 = vld [vmem:[#allocation2 + $0x2d2] sm:$0xff] }
 0x3eb   :  { %9026 = vmatprep.mubr.msk.bf16.mxu1 %vm528_vm1, %v5063_v37  ;;  %15190 = vst [vmem:[#allocation25_spill] sm:$0xff] %v12071_v54  ;;  %v12073_v0 = vpop.f32.mrb[115].mxu0  ;;  %v5572_v54 = vld [vmem:[#allocation2 + $0x2c2] sm:$0xff] }
 0x3ec   :  { %15191 = vst [vmem:[#allocation22_spill] sm:$0xff] %v12073_v0  ;;  %v5571_v0 = vld [vmem:[#allocation2 + $0x2ba] sm:$0xff] }
 0x3f0   :  { %v12075_v27 = vpop.f32.mrb[116].mxu0 }
 0x3f1   :  { %15192 = vst [vmem:[#allocation24_spill] sm:$0xff] %v12075_v27  ;;  %v12078_v60 = vpop.f32.mrb[117].mxu0 }
 0x3f2   :  { %9027 = vmatmul.mubr.msk.bf16.gmra.mrb[24].mxu1 %vm528_vm1, %v5064_v10  ;;  %15193 = vst [vmem:[#allocation27_spill] sm:$0xff] %v12078_v60  ;;  %v12081_v17 = vpop.f32.mrb[118].mxu0  ;;  %v5537_v10 = vld [vmem:[#allocation2 + $0xf2] sm:$0xff] }
 0x3f3   :  { %9030 = vmatprep.mubr.msk.bf16.mxu1 %vm528_vm1, %v5065_v33  ;;  %15194 = vst [vmem:[#allocation26_spill] sm:$0xff] %v12081_v17  ;;  %v12083_v8 = vpop.f32.mrb[119].mxu0  ;;  %v5538_v33 = vld [vmem:[#allocation2 + $0xfa] sm:$0xff] }
 0x3f4   :  { %15195 = vst [vmem:[#allocation28_spill] sm:$0xff] %v12083_v8  ;;  %v5593_v7 = vpack.c.bf16 %v5538_v33, %v5537_v10  ;;  %v5547_v10 = vld [vmem:[#allocation2 + $0x16a] sm:$0xff]  ;;  %v5548_v33 = vld [vmem:[#allocation2 + $0x172] sm:$0xff]  ;;  %v5566_v17 = vld [vmem:[#allocation2 + $0x27a] sm:$0xff] }
 0x3f5   :  { %v5565_v8 = vld [vmem:[#allocation2 + $0x272] sm:$0xff] }
 0x3f6   :  { %v5607_v27 = vpack.c.bf16 %v5566_v17, %v5565_v8  ;;  %v5611_v17 = vpack.c.bf16 %v5574_v57, %v5573_v62  ;;  %v5577_v8 = vld [vmem:[#allocation2 + $0x302] sm:$0xff]  ;;  %v5583_v62 = vld [vmem:[#allocation2 + $0x34a] sm:$0xff] }
 0x3f8   :  { %v12085_v6 = vpop.f32.mrb[120].mxu0 }
 0x3f9   :  { %15196 = vst [vmem:[#allocation3_spill] sm:$0xff] %v12085_v6  ;;  %v12088_v1 = vpop.f32.mrb[121].mxu0 }
 0x3fa   :  { %9031 = vmatmul.mubr.msk.bf16.gmra.mrb[28].mxu1 %vm528_vm1, %v5066_v19  ;;  %15197 = vst [vmem:[#allocation5_spill] sm:$0xff] %v12088_v1  ;;  %v12091_v28 = vpop.f32.mrb[122].mxu0 }
 0x3fb   :  { %9036 = vmatprep.mubr.msk.bf16.mxu1 %vm528_vm1, %v5585_v16  ;;  %15198 = vst [vmem:[#allocation7_spill] sm:$0xff] %v12091_v28  ;;  %v12093_v20 = vpop.f32.mrb[123].mxu0  ;;  %v5562_v28 = vld [vmem:[#allocation2 + $0x24a] sm:$0xff] }
 0x3fc   :  { %15199 = vst [vmem:[#allocation4_spill] sm:$0xff] %v12093_v20  ;;  %v5561_v20 = vld [vmem:[#allocation2 + $0x242] sm:$0xff] }
 0x3fd   :  { %v5605_v6 = vpack.c.bf16 %v5562_v28, %v5561_v20  ;;  %v5567_v28 = vld [vmem:[#allocation2 + $0x28a] sm:$0xff]  ;;  %v5569_v20 = vld [vmem:[#allocation2 + $0x2a2] sm:$0xff] }
 0x400   :  { %v12095_v45 = vpop.f32.mrb[124].mxu0 }
 0x401   :  { %15200 = vst [vmem:[#allocation6_spill] sm:$0xff] %v12095_v45  ;;  %v12098_v5 = vpop.f32.mrb[125].mxu0  ;;  %v5560_v45 = vld [vmem:[#allocation2 + $0x232] sm:$0xff] }
 0x402   :  { %9037 = vmatmul.mubr.msk.bf16.vlgmr.msra.gmra.mrb[32].mxu1 %vm528_vm1, %v5586_v31  ;;  %15201 = vst [vmem:[#allocation9_spill] sm:$0xff] %v12098_v5  ;;  %v12101_v3 = vpop.f32.mrb[126].mxu0  ;;  %v5594_v31 = vpack.c.bf16 %v5540_v61, %v5539_v44  ;;  %v5598_v44 = vpack.c.bf16 %v5548_v33, %v5547_v10 }
 0x403   :  { %9040 = vmatprep.mubr.msk.bf16.mxu1 %vm528_vm1, %v5587_v11  ;;  %15202 = vst [vmem:[#allocation11_spill] sm:$0xff] %v12101_v3  ;;  %v12103_v49 = vpop.f32.mrb[127].mxu0  ;;  %v5595_v11 = vpack.c.bf16 %v5542_v39, %v5541_v56  ;;  %v5558_v3 = vld [vmem:[#allocation2 + $0x21a] sm:$0xff] }
 0x404   :  { %15203 = vst [vmem:[#allocation8_spill] sm:$0xff] %v12103_v49  ;;  %v5557_v49 = vld [vmem:[#allocation2 + $0x212] sm:$0xff] }
 0x408   :  { %v12105_v21 = vpop.f32.mrb[64].mxu0 }
 0x409   :  { %v12108_v37 = vpop.f32.mrb[65].mxu0 }
 0x40a   :  { %9041 = vmatmul.mubr.msk.bf16.gmra.mrb[36].mxu1 %vm528_vm1, %v5588_v4  ;;  %v12111_v38 = vpop.f32.mrb[66].mxu0  ;;  %v5543_v4 = vld [vmem:[#allocation2 + $0x13a] sm:$0xff] }
 0x40b   :  { %9044 = vmatprep.mubr.msk.bf16.mxu1 %vm528_vm1, %v5589_v18  ;;  %v12113_v53 = vpop.f32.mrb[67].mxu0  ;;  %v5544_v18 = vld [vmem:[#allocation2 + $0x142] sm:$0xff] }
 0x40c   :  { %v5596_v14 = vpack.c.bf16 %v5544_v18, %v5543_v4  ;;  %v5552_v4 = vld [vmem:[#allocation2 + $0x1a2] sm:$0xff] }
 0x410   :  { %v12115_v19 = vpop.f32.mrb[68].mxu0 }
 0x411   :  { %v12118_v40 = vpop.f32.mrb[69].mxu0 }
 0x412   :  { %9045 = vmatmul.mubr.msk.bf16.gmra.mrb[40].mxu1 %vm528_vm1, %v5590_v50  ;;  %v12121_v46 = vpop.f32.mrb[70].mxu0 }
 0x413   :  { %9048 = vmatprep.mubr.msk.bf16.mxu1 %vm528_vm1, %v5591_v63  ;;  %v12123_v16 = vpop.f32.mrb[71].mxu0 }
 0x418   :  { %v12125_v47 = vpop.f32.mrb[72].mxu0 }
 0x419   :  { %v12128_v12 = vpop.f32.mrb[73].mxu0 }
 0x41a   :  { %9049 = vmatmul.mubr.msk.bf16.gmra.mrb[44].mxu1 %vm528_vm1, %v5592_v23  ;;  %v12131_v52 = vpop.f32.mrb[74].mxu0  ;;  %v5549_v23 = vld [vmem:[#allocation2 + $0x182] sm:$0xff] }
 0x41b   :  { %9052 = vmatprep.mubr.msk.bf16.mxu1 %vm528_vm1, %v5593_v7  ;;  %v12133_v42 = vpop.f32.mrb[75].mxu0  ;;  %v5550_v7 = vld [vmem:[#allocation2 + $0x18a] sm:$0xff] }
 0x41c   :  { %v5599_v61 = vpack.c.bf16 %v5550_v7, %v5549_v23 }
 0x420   :  { %v12135_v50 = vpop.f32.mrb[76].mxu0 }
 0x421   :  { %v12138_v63 = vpop.f32.mrb[77].mxu0 }
 0x422   :  { %9053 = vmatmul.mubr.msk.bf16.gmra.mrb[48].mxu1 %vm528_vm1, %v5594_v31  ;;  %v12141_v29 = vpop.f32.mrb[78].mxu0 }
 0x423   :  { %9056 = vmatprep.mubr.msk.bf16.mxu1 %vm528_vm1, %v5595_v11  ;;  %v12143_v35 = vpop.f32.mrb[79].mxu0  ;;  %v5551_v11 = vld [vmem:[#allocation2 + $0x19a] sm:$0xff] }
 0x424   :  { %v5600_v9 = vpack.c.bf16 %v5552_v4, %v5551_v11  ;;  %v5603_v4 = vpack.c.bf16 %v5558_v3, %v5557_v49 }
 0x428   :  { %v12145_v56 = vpop.f32.mrb[80].mxu0 }
 0x429   :  { %v12148_v39 = vpop.f32.mrb[81].mxu0 }
 0x42a   :  { %9057 = vmatmul.mubr.msk.bf16.gmra.mrb[52].mxu1 %vm528_vm1, %v5596_v14  ;;  %v12151_v31 = vpop.f32.mrb[82].mxu0  ;;  %v5554_v14 = vld [vmem:[#allocation2 + $0x1ea] sm:$0xff] }
 0x42b   :  { %9060 = vmatprep.mubr.msk.bf16.mxu1 %vm528_vm1, %v5597_v34  ;;  %v12153_v18 = vpop.f32.mrb[83].mxu0  ;;  %v5601_v34 = vpack.c.bf16 %v5554_v14, %v5553_v13 }
 0x430   :  { %v12155_v10 = vpop.f32.mrb[84].mxu0 }
 0x431   :  { %v12158_v33 = vpop.f32.mrb[85].mxu0 }
 0x432   :  { %9061 = vmatmul.mubr.msk.bf16.gmra.mrb[56].mxu1 %vm528_vm1, %v5598_v44  ;;  %v12161_v23 = vpop.f32.mrb[86].mxu0  ;;  %v5555_v44 = vld [vmem:[#allocation2 + $0x1fa] sm:$0xff] }
 0x433   :  { %9064 = vmatprep.mubr.msk.bf16.mxu1 %vm528_vm1, %v5599_v61  ;;  %v12163_v7 = vpop.f32.mrb[87].mxu0  ;;  %v5556_v61 = vld [vmem:[#allocation2 + $0x202] sm:$0xff] }
 0x434   :  { %v5602_v11 = vpack.c.bf16 %v5556_v61, %v5555_v44 }
 0x438   :  { %v12165_v5 = vpop.f32.mrb[88].mxu0 }
 0x439   :  { %v12168_v13 = vpop.f32.mrb[89].mxu0 }
 0x43a   :  { %9065 = vmatmul.mubr.msk.bf16.gmra.mrb[60].mxu1 %vm528_vm1, %v5600_v9  ;;  %v12171_v9 = vpop.f32.mrb[90].mxu0 }
 0x43b   :  { %9068 = vmatprep.mubr.msk.bf16.mxu1 %vm528_vm1, %v5601_v34  ;;  %v12173_v14 = vpop.f32.mrb[91].mxu0  ;;  %v5559_v34 = vld [vmem:[#allocation2 + $0x22a] sm:$0xff] }
 0x43c   :  { %v5604_v1 = vpack.c.bf16 %v5560_v45, %v5559_v34  ;;  %v5570_v45 = vld [vmem:[#allocation2 + $0x2aa] sm:$0xff] }
 0x440   :  { %v12175_v44 = vpop.f32.mrb[92].mxu0 }
 0x441   :  { %v12178_v3 = vpop.f32.mrb[93].mxu0 }
 0x442   :  { %9069 = vmatmul.mubr.msk.bf16.gmra.mrb[0].mxu1 %vm528_vm1, %v5602_v11  ;;  %v12181_v49 = vpop.f32.mrb[94].mxu0  ;;  %v5563_v11 = vld [vmem:[#allocation2 + $0x25a] sm:$0xff] }
 0x443   :  { %9072 = vmatprep.mubr.msk.bf16.mxu1 %vm528_vm1, %v5603_v4  ;;  %v12183_v61 = vpop.f32.mrb[95].mxu0  ;;  %v5564_v4 = vld [vmem:[#allocation2 + $0x262] sm:$0xff] }
 0x444   :  { %v5606_v60 = vpack.c.bf16 %v5564_v4, %v5563_v11  ;;  %v5610_v11 = vpack.c.bf16 %v5572_v54, %v5571_v0  ;;  %v5578_v4 = vld [vmem:[#allocation2 + $0x30a] sm:$0xff]  ;;  %v5584_v0 = vld [vmem:[#allocation2 + $0x352] sm:$0xff] }
 0x44a   :  { %9073 = vmatmul.mubr.msk.bf16.gmra.mrb[4].mxu1 %vm528_vm1, %v5604_v1  ;;  %v5568_v1 = vld [vmem:[#allocation2 + $0x292] sm:$0xff] }
 0x44b   :  { %9076 = vmatprep.mubr.msk.bf16.mxu1 %vm528_vm1, %v5605_v6  ;;  %v5608_v34 = vpack.c.bf16 %v5568_v1, %v5567_v28  ;;  %v5609_v6 = vpack.c.bf16 %v5570_v45, %v5569_v20  ;;  %v5613_v1 = vpack.c.bf16 %v5578_v4, %v5577_v8  ;;  %v5579_v20 = vld [vmem:[#allocation2 + $0x31a] sm:$0xff]  ;;  %v5580_v45 = vld [vmem:[#allocation2 + $0x322] sm:$0xff] }
 0x44c   :  { %v5614_v54 = vpack.c.bf16 %v5580_v45, %v5579_v20 }
 0x452   :  { %9077 = vmatmul.mubr.msk.bf16.gmra.mrb[8].mxu1 %vm528_vm1, %v5606_v60  ;;  %v5576_v60 = vld [vmem:[#allocation2 + $0x2f2] sm:$0xff] }
 0x453   :  { %9080 = vmatprep.mubr.msk.bf16.mxu1 %vm528_vm1, %v5607_v27  ;;  %v5575_v27 = vld [vmem:[#allocation2 + $0x2ea] sm:$0xff] }
 0x454   :  { %v5612_v28 = vpack.c.bf16 %v5576_v60, %v5575_v27 }
 0x45a   :  { %9081 = vmatmul.mubr.msk.bf16.gmra.mrb[12].mxu1 %vm528_vm1, %v5608_v34  ;;  %v5581_v34 = vld [vmem:[#allocation2 + $0x332] sm:$0xff] }
 0x45b   :  { %9084 = vmatprep.mubr.msk.bf16.mxu1 %vm528_vm1, %v5609_v6  ;;  %v5582_v6 = vld [vmem:[#allocation2 + $0x33a] sm:$0xff] }
 0x45c   :  { %v5615_v57 = vpack.c.bf16 %v5582_v6, %v5581_v34 }
 0x462   :  { %9085 = vmatmul.mubr.msk.bf16.gmra.mrb[16].mxu1 %vm528_vm1, %v5610_v11  ;;  %v5616_v11 = vpack.c.bf16 %v5584_v0, %v5583_v62 }
 0x463   :  { %9088 = vmatprep.mubr.msk.bf16.mxu1 %vm528_vm1, %v5611_v17  ;;  %v6649_v17 = vld [vmem:[%s15018_s3] sm:$0x3] }
 0x464   :  { %9690 = vmatprep.subr.msk.bf16.mxu0 %vm1539_vm3, %v6649_v17  ;;  %v6747_v27 = vsel %vm1539_vm3, %v6649_v17, 0 }
 0x465   :  { %9101 = vmatpush3.bf16.msra.mxu0 %v6747_v27 }
 0x46a   :  { %9089 = vmatmul.mubr.msk.bf16.gmra.mrb[20].mxu1 %vm528_vm1, %v5612_v28 }
 0x46b   :  { %9092 = vmatprep.mubr.msk.bf16.mxu1 %vm528_vm1, %v5613_v1 }
 0x472   :  { %9093 = vmatmul.mubr.msk.bf16.gmra.mrb[24].mxu1 %vm528_vm1, %v5614_v54 }
 0x473   :  { %9096 = vmatprep.mubr.msk.bf16.mxu1 %vm528_vm1, %v5615_v57 }
 0x47a   :  { %9097 = vmatmul.mubr.msk.bf16.gmra.mrb[28].mxu1 %vm528_vm1, %v5616_v11 }
 0x4d5   :  { %v9038_v60 = vpop.f32.mrb[32].mxu1 }
 0x4d6   :  { %v12202_v8 = vadd.f32 %v9038_v60, %v12105_v21  ;;  %v5752_v4 = vpop.f32.mrb[33].mxu1 }
 0x4d7   :  { %v12205_v28 = vadd.f32 %v5752_v4, %v12108_v37  ;;  %v9039_v1 = vpop.f32.mrb[34].mxu1 }
 0x4d8   :  { %15204 = vst [vmem:[#allocation10_spill] sm:$0xff] %v12202_v8  ;;  %v12208_v20 = vadd.f32 %v9039_v1, %v12111_v38  ;;  %v5755_v45 = vpop.f32.mrb[35].mxu1  ;;  %v6209_v54 = vmul.f32 %v12202_v8, %v12202_v8 }
 0x4d9   :  { %15205 = vst [vmem:[#allocation15_spill] sm:$0xff] %v12205_v28  ;;  %v6207_v34 = vmul.f32 %v12205_v28, %v12205_v28  ;;  %v12213_v6 = vadd.f32 %v5755_v45, %v12113_v53  ;;  %v6073_v21 = vsel %vm528_vm1, %v12205_v28, 0.0  ;;  %v6076_v53 = vsel %vm528_vm1, %v12202_v8, 0.0 }
 0x4da   :  { %v6210_v57 = vmul.f32 %v12208_v20, %v12208_v20  ;;  %v6274_v45 = vsel %vm528_vm1, %v6209_v54, 0.0 }
 0x4db   :  { %15206 = vst [vmem:[#allocation17_spill] sm:$0xff] %v12213_v6  ;;  %v6074_v37 = vsel %vm528_vm1, %v12213_v6, 0.0  ;;  %v6208_v38 = vmul.f32 %v12213_v6, %v12213_v6  ;;  %v6271_v0 = vsel %vm528_vm1, %v6207_v34, 0.0  ;;  %v6078_v6 = vsel %vm528_vm1, %v12208_v20, 0.0 }
 0x4dc   :  { %v6075_v62 = vadd.f32 %v6074_v37, %v6073_v21  ;;  %v6276_v34 = vsel %vm528_vm1, %v6210_v57, 0.0 }
 0x4dd   :  { %v6272_v11 = vsel %vm528_vm1, %v6208_v38, 0.0  ;;  %v9042_v17 = vpop.f32.mrb[36].mxu1 }
 0x4de   :  { %v6077_v27 = vadd.f32 %v6076_v53, %v6075_v62  ;;  %v6273_v60 = vadd.f32 %v6272_v11, %v6271_v0  ;;  %v12230_v4 = vadd.f32 %v9042_v17, %v12115_v19  ;;  %v5768_v1 = vpop.f32.mrb[37].mxu1 }
 0x4df   :  { %v12236_v21 = vadd.f32 %v5768_v1, %v12118_v40  ;;  %v9043_v37 = vpop.f32.mrb[38].mxu1 }
 0x4e0   :  { %v6275_v8 = vadd.f32 %v6274_v45, %v6273_v60  ;;  %v6079_v38 = vadd.f32 %v6078_v6, %v6077_v27  ;;  %v5771_v28 = vpop.f32.mrb[39].mxu1  ;;  %v12244_v54 = vadd.f32 %v9043_v37, %v12121_v46  ;;  %v6213_v57 = vmul.f32 %v12230_v4, %v12230_v4 }
 0x4e1   :  { %v6080_v62 = vsel %vm528_vm1, %v12236_v21, 0.0  ;;  %v6211_v19 = vmul.f32 %v12236_v21, %v12236_v21  ;;  %v12247_v53 = vadd.f32 %v5771_v28, %v12123_v16  ;;  %v6084_v46 = vsel %vm528_vm1, %v12230_v4, 0.0 }
 0x4e2   :  { %v6081_v40 = vadd.f32 %v6080_v62, %v6079_v38  ;;  %v6277_v0 = vadd.f32 %v6276_v34, %v6275_v8  ;;  %v6214_v8 = vmul.f32 %v12244_v54, %v12244_v54  ;;  %v6086_v34 = vsel %vm528_vm1, %v12244_v54, 0.0 }
 0x4e3   :  { %v6278_v11 = vsel %vm528_vm1, %v6211_v19, 0.0  ;;  %v6082_v6 = vsel %vm528_vm1, %v12247_v53, 0.0  ;;  %v6212_v60 = vmul.f32 %v12247_v53, %v12247_v53 }
 0x4e4   :  { %v6279_v17 = vadd.f32 %v6278_v11, %v6277_v0  ;;  %v6083_v27 = vadd.f32 %v6082_v6, %v6081_v40  ;;  %v6282_v40 = vsel %vm528_vm1, %v6213_v57, 0.0 }
 0x4e5   :  { %v9046_v16 = vpop.f32.mrb[40].mxu1  ;;  %v6280_v1 = vsel %vm528_vm1, %v6212_v60, 0.0 }
 0x4e6   :  { %v6085_v28 = vadd.f32 %v6084_v46, %v6083_v27  ;;  %v12262_v45 = vadd.f32 %v9046_v16, %v12125_v47  ;;  %v5784_v37 = vpop.f32.mrb[41].mxu1  ;;  %v6281_v38 = vadd.f32 %v6280_v1, %v6279_v17 }
 0x4e7   :  { %v12267_v62 = vadd.f32 %v5784_v37, %v12128_v12  ;;  %v9047_v19 = vpop.f32.mrb[42].mxu1  ;;  %v6284_v12 = vsel %vm528_vm1, %v6214_v8, 0.0 }
 0x4e8   :  { %v6087_v0 = vadd.f32 %v6086_v34, %v6085_v28  ;;  %v12271_v11 = vadd.f32 %v9047_v19, %v12131_v52  ;;  %v5787_v6 = vpop.f32.mrb[43].mxu1  ;;  %v6283_v27 = vadd.f32 %v6282_v40, %v6281_v38  ;;  %v6217_v1 = vmul.f32 %v12262_v45, %v12262_v45 }
 0x4e9   :  { %v6088_v47 = vsel %vm528_vm1, %v12267_v62, 0.0  ;;  %v6215_v60 = vmul.f32 %v12267_v62, %v12267_v62  ;;  %v12278_v17 = vadd.f32 %v5787_v6, %v12133_v42  ;;  %v6092_v42 = vsel %vm528_vm1, %v12262_v45, 0.0 }
 0x4ea   :  { %v6089_v46 = vadd.f32 %v6088_v47, %v6087_v0  ;;  %v6285_v16 = vadd.f32 %v6284_v12, %v6283_v27  ;;  %v6218_v19 = vmul.f32 %v12271_v11, %v12271_v11  ;;  %v6094_v27 = vsel %vm528_vm1, %v12271_v11, 0.0 }
 0x4eb   :  { %v6286_v57 = vsel %vm528_vm1, %v6215_v60, 0.0  ;;  %v6090_v52 = vsel %vm528_vm1, %v12278_v17, 0.0  ;;  %v6216_v28 = vmul.f32 %v12278_v17, %v12278_v17 }
 0x4ec   :  { %v6091_v37 = vadd.f32 %v6090_v52, %v6089_v46  ;;  %v6287_v34 = vadd.f32 %v6286_v57, %v6285_v16  ;;  %v6290_v46 = vsel %vm528_vm1, %v6217_v1, 0.0 }
 0x4ed   :  { %v6288_v8 = vsel %vm528_vm1, %v6216_v28, 0.0  ;;  %v9050_v38 = vpop.f32.mrb[44].mxu1 }
 0x4ee   :  { %v6093_v40 = vadd.f32 %v6092_v42, %v6091_v37  ;;  %v12294_v0 = vadd.f32 %v9050_v38, %v12135_v50  ;;  %v5800_v6 = vpop.f32.mrb[45].mxu1  ;;  %v6289_v47 = vadd.f32 %v6288_v8, %v6287_v34 }
 0x4ef   :  { %v12299_v60 = vadd.f32 %v5800_v6, %v12138_v63  ;;  %v9051_v12 = vpop.f32.mrb[46].mxu1  ;;  %v6292_v63 = vsel %vm528_vm1, %v6218_v19, 0.0 }
 0x4f0   :  { %v6095_v16 = vadd.f32 %v6094_v27, %v6093_v40  ;;  %v12303_v57 = vadd.f32 %v9051_v12, %v12141_v29  ;;  %v5803_v52 = vpop.f32.mrb[47].mxu1  ;;  %v6291_v28 = vadd.f32 %v6290_v46, %v6289_v47  ;;  %v6221_v40 = vmul.f32 %v12294_v0, %v12294_v0 }
 0x4f1   :  { %v6096_v50 = vsel %vm528_vm1, %v12299_v60, 0.0  ;;  %v6219_v37 = vmul.f32 %v12299_v60, %v12299_v60  ;;  %v12310_v42 = vadd.f32 %v5803_v52, %v12143_v35  ;;  %v6100_v35 = vsel %vm528_vm1, %v12294_v0, 0.0 }
 0x4f2   :  { %v6097_v34 = vadd.f32 %v6096_v50, %v6095_v16  ;;  %v6293_v8 = vadd.f32 %v6292_v63, %v6291_v28  ;;  %v6222_v12 = vmul.f32 %v12303_v57, %v12303_v57  ;;  %v6102_v28 = vsel %vm528_vm1, %v12303_v57, 0.0 }
 0x4f3   :  { %v6294_v1 = vsel %vm528_vm1, %v6219_v37, 0.0  ;;  %v6098_v29 = vsel %vm528_vm1, %v12310_v42, 0.0  ;;  %v6220_v38 = vmul.f32 %v12310_v42, %v12310_v42 }
 0x4f4   :  { %v6099_v6 = vadd.f32 %v6098_v29, %v6097_v34  ;;  %v6295_v27 = vadd.f32 %v6294_v1, %v6293_v8  ;;  %v6298_v34 = vsel %vm528_vm1, %v6221_v40, 0.0 }
 0x4f5   :  { %v6296_v19 = vsel %vm528_vm1, %v6220_v38, 0.0  ;;  %v9054_v47 = vpop.f32.mrb[48].mxu1 }
 0x4f6   :  { %v6101_v46 = vadd.f32 %v6100_v35, %v6099_v6  ;;  %v12326_v16 = vadd.f32 %v9054_v47, %v12145_v56  ;;  %v5816_v52 = vpop.f32.mrb[49].mxu1  ;;  %v6297_v50 = vadd.f32 %v6296_v19, %v6295_v27 }
 0x4f7   :  { %v12331_v37 = vadd.f32 %v5816_v52, %v12148_v39  ;;  %v9055_v63 = vpop.f32.mrb[50].mxu1  ;;  %v6300_v39 = vsel %vm528_vm1, %v6222_v12, 0.0 }
 0x4f8   :  { %v6103_v8 = vadd.f32 %v6102_v28, %v6101_v46  ;;  %v12335_v1 = vadd.f32 %v9055_v63, %v12151_v31  ;;  %v5819_v29 = vpop.f32.mrb[51].mxu1  ;;  %v6299_v38 = vadd.f32 %v6298_v34, %v6297_v50  ;;  %v6225_v46 = vmul.f32 %v12326_v16, %v12326_v16 }
 0x4f9   :  { %v6104_v56 = vsel %vm528_vm1, %v12331_v37, 0.0  ;;  %v6223_v6 = vmul.f32 %v12331_v37, %v12331_v37  ;;  %v12342_v35 = vadd.f32 %v5819_v29, %v12153_v18  ;;  %v6108_v18 = vsel %vm528_vm1, %v12326_v16, 0.0 }
 0x4fa   :  { %v6105_v27 = vadd.f32 %v6104_v56, %v6103_v8  ;;  %v6301_v19 = vadd.f32 %v6300_v39, %v6299_v38  ;;  %v6226_v63 = vmul.f32 %v12335_v1, %v12335_v1  ;;  %v6110_v38 = vsel %vm528_vm1, %v12335_v1, 0.0 }
 0x4fb   :  { %v6302_v40 = vsel %vm528_vm1, %v6223_v6, 0.0  ;;  %v6106_v31 = vsel %vm528_vm1, %v12342_v35, 0.0  ;;  %v6224_v47 = vmul.f32 %v12342_v35, %v12342_v35 }
 0x4fc   :  { %v6107_v52 = vadd.f32 %v6106_v31, %v6105_v27  ;;  %v6303_v28 = vadd.f32 %v6302_v40, %v6301_v19  ;;  %v6306_v27 = vsel %vm528_vm1, %v6225_v46, 0.0 }
 0x4fd   :  { %v6304_v12 = vsel %vm528_vm1, %v6224_v47, 0.0  ;;  %v9058_v50 = vpop.f32.mrb[52].mxu1 }
 0x4fe   :  { %v6109_v34 = vadd.f32 %v6108_v18, %v6107_v52  ;;  %v12358_v8 = vadd.f32 %v9058_v50, %v12155_v10  ;;  %v5832_v29 = vpop.f32.mrb[53].mxu1  ;;  %v6305_v56 = vadd.f32 %v6304_v12, %v6303_v28 }
 0x4ff   :  { %v12363_v6 = vadd.f32 %v5832_v29, %v12158_v33  ;;  %v9059_v39 = vpop.f32.mrb[54].mxu1  ;;  %v6308_v33 = vsel %vm528_vm1, %v6226_v63, 0.0 }
 0x500   :  { %v6111_v19 = vadd.f32 %v6110_v38, %v6109_v34  ;;  %v12367_v40 = vadd.f32 %v9059_v39, %v12161_v23  ;;  %v5835_v31 = vpop.f32.mrb[55].mxu1  ;;  %v6307_v47 = vadd.f32 %v6306_v27, %v6305_v56  ;;  %v6229_v34 = vmul.f32 %v12358_v8, %v12358_v8 }
 0x501   :  { %v6112_v10 = vsel %vm528_vm1, %v12363_v6, 0.0  ;;  %v6227_v52 = vmul.f32 %v12363_v6, %v12363_v6  ;;  %v12374_v18 = vadd.f32 %v5835_v31, %v12163_v7  ;;  %v6116_v7 = vsel %vm528_vm1, %v12358_v8, 0.0 }
 0x502   :  { %v6113_v28 = vadd.f32 %v6112_v10, %v6111_v19  ;;  %v6309_v12 = vadd.f32 %v6308_v33, %v6307_v47  ;;  %v6230_v39 = vmul.f32 %v12367_v40, %v12367_v40  ;;  %v6118_v47 = vsel %vm528_vm1, %v12367_v40, 0.0 }
 0x503   :  { %v6310_v46 = vsel %vm528_vm1, %v6227_v52, 0.0  ;;  %v6114_v23 = vsel %vm528_vm1, %v12374_v18, 0.0  ;;  %v6228_v50 = vmul.f32 %v12374_v18, %v12374_v18 }
 0x504   :  { %v6115_v29 = vadd.f32 %v6114_v23, %v6113_v28  ;;  %v6311_v38 = vadd.f32 %v6310_v46, %v6309_v12  ;;  %v6314_v28 = vsel %vm528_vm1, %v6229_v34, 0.0 }
 0x505   :  { %v6312_v63 = vsel %vm528_vm1, %v6228_v50, 0.0  ;;  %v9062_v56 = vpop.f32.mrb[56].mxu1 }
 0x506   :  { %v6117_v27 = vadd.f32 %v6116_v7, %v6115_v29  ;;  %v12390_v19 = vadd.f32 %v9062_v56, %v12165_v5  ;;  %v5848_v31 = vpop.f32.mrb[57].mxu1  ;;  %v6313_v10 = vadd.f32 %v6312_v63, %v6311_v38 }
 0x507   :  { %v12395_v52 = vadd.f32 %v5848_v31, %v12168_v13  ;;  %v9063_v33 = vpop.f32.mrb[58].mxu1  ;;  %v6316_v13 = vsel %vm528_vm1, %v6230_v39, 0.0 }
 0x508   :  { %v6119_v12 = vadd.f32 %v6118_v47, %v6117_v27  ;;  %v12399_v46 = vadd.f32 %v9063_v33, %v12171_v9  ;;  %v5851_v23 = vpop.f32.mrb[59].mxu1  ;;  %v6315_v50 = vadd.f32 %v6314_v28, %v6313_v10  ;;  %v6233_v27 = vmul.f32 %v12390_v19, %v12390_v19 }
 0x509   :  { %v6120_v5 = vsel %vm528_vm1, %v12395_v52, 0.0  ;;  %v6231_v29 = vmul.f32 %v12395_v52, %v12395_v52  ;;  %v12406_v7 = vadd.f32 %v5851_v23, %v12173_v14  ;;  %v6124_v14 = vsel %vm528_vm1, %v12390_v19, 0.0 }
 0x50a   :  { %v6121_v38 = vadd.f32 %v6120_v5, %v6119_v12  ;;  %v6317_v63 = vadd.f32 %v6316_v13, %v6315_v50  ;;  %v6234_v33 = vmul.f32 %v12399_v46, %v12399_v46  ;;  %v6126_v50 = vsel %vm528_vm1, %v12399_v46, 0.0 }
 0x50b   :  { %v6318_v34 = vsel %vm528_vm1, %v6231_v29, 0.0  ;;  %v6122_v9 = vsel %vm528_vm1, %v12406_v7, 0.0  ;;  %v6232_v56 = vmul.f32 %v12406_v7, %v12406_v7 }
 0x50c   :  { %v6123_v31 = vadd.f32 %v6122_v9, %v6121_v38  ;;  %v6319_v47 = vadd.f32 %v6318_v34, %v6317_v63  ;;  %v6322_v38 = vsel %vm528_vm1, %v6233_v27, 0.0 }
 0x50d   :  { %v6320_v39 = vsel %vm528_vm1, %v6232_v56, 0.0  ;;  %v9066_v10 = vpop.f32.mrb[60].mxu1 }
 0x50e   :  { %v6125_v28 = vadd.f32 %v6124_v14, %v6123_v31  ;;  %v12422_v12 = vadd.f32 %v9066_v10, %v12175_v44  ;;  %v5864_v23 = vpop.f32.mrb[61].mxu1  ;;  %v6321_v5 = vadd.f32 %v6320_v39, %v6319_v47 }
 0x50f   :  { %v12427_v29 = vadd.f32 %v5864_v23, %v12178_v3  ;;  %v9067_v13 = vpop.f32.mrb[62].mxu1  ;;  %v6324_v3 = vsel %vm528_vm1, %v6234_v33, 0.0 }
 0x510   :  { %v6127_v63 = vadd.f32 %v6126_v50, %v6125_v28  ;;  %v12431_v34 = vadd.f32 %v9067_v13, %v12181_v49  ;;  %v5867_v9 = vpop.f32.mrb[63].mxu1  ;;  %v6323_v56 = vadd.f32 %v6322_v38, %v6321_v5  ;;  %v6237_v28 = vmul.f32 %v12422_v12, %v12422_v12 }
 0x511   :  { %v6128_v44 = vsel %vm528_vm1, %v12427_v29, 0.0  ;;  %v6235_v31 = vmul.f32 %v12427_v29, %v12427_v29  ;;  %v12438_v14 = vadd.f32 %v5867_v9, %v12183_v61  ;;  %v6132_v61 = vsel %vm528_vm1, %v12422_v12, 0.0 }
 0x512   :  { %v6129_v47 = vadd.f32 %v6128_v44, %v6127_v63  ;;  %v6325_v39 = vadd.f32 %v6324_v3, %v6323_v56  ;;  %v6238_v13 = vmul.f32 %v12431_v34, %v12431_v34  ;;  %v6134_v56 = vsel %vm528_vm1, %v12431_v34, 0.0 }
 0x513   :  { %v6326_v27 = vsel %vm528_vm1, %v6235_v31, 0.0  ;;  %v6130_v49 = vsel %vm528_vm1, %v12438_v14, 0.0  ;;  %v6236_v10 = vmul.f32 %v12438_v14, %v12438_v14 }
 0x514   :  { %v6131_v23 = vadd.f32 %v6130_v49, %v6129_v47  ;;  %v6327_v50 = vadd.f32 %v6326_v27, %v6325_v39  ;;  %v6330_v47 = vsel %vm528_vm1, %v6237_v28, 0.0 }
 0x515   :  { %v6328_v33 = vsel %vm528_vm1, %v6236_v10, 0.0  ;;  %v9070_v5 = vpop.f32.mrb[0].mxu1 }
 0x516   :  { %v6133_v38 = vadd.f32 %v6132_v61, %v6131_v23  ;;  %v12454_v63 = vadd.f32 %v9070_v5, %v12025_v15  ;;  %v5880_v9 = vpop.f32.mrb[1].mxu1  ;;  %v6329_v44 = vadd.f32 %v6328_v33, %v6327_v50 }
 0x517   :  { %v12459_v31 = vadd.f32 %v5880_v9, %v12028_v30  ;;  %v9071_v3 = vpop.f32.mrb[2].mxu1  ;;  %v6332_v30 = vsel %vm528_vm1, %v6238_v13, 0.0 }
 0x518   :  { %v6135_v39 = vadd.f32 %v6134_v56, %v6133_v38  ;;  %v12463_v27 = vadd.f32 %v9071_v3, %v12031_v25  ;;  %v5883_v49 = vpop.f32.mrb[3].mxu1  ;;  %v6331_v10 = vadd.f32 %v6330_v47, %v6329_v44  ;;  %v6241_v38 = vmul.f32 %v12454_v63, %v12454_v63 }
 0x519   :  { %v6136_v15 = vsel %vm528_vm1, %v12459_v31, 0.0  ;;  %v6239_v23 = vmul.f32 %v12459_v31, %v12459_v31  ;;  %v12470_v61 = vadd.f32 %v5883_v49, %v12033_v48  ;;  %v6140_v48 = vsel %vm528_vm1, %v12454_v63, 0.0 }
 0x51a   :  { %v6137_v50 = vadd.f32 %v6136_v15, %v6135_v39  ;;  %v6333_v33 = vadd.f32 %v6332_v30, %v6331_v10  ;;  %v6242_v3 = vmul.f32 %v12463_v27, %v12463_v27  ;;  %v6142_v10 = vsel %vm528_vm1, %v12463_v27, 0.0 }
 0x51b   :  { %v6334_v28 = vsel %vm528_vm1, %v6239_v23, 0.0  ;;  %v6138_v25 = vsel %vm528_vm1, %v12470_v61, 0.0  ;;  %v6240_v5 = vmul.f32 %v12470_v61, %v12470_v61 }
 0x51c   :  { %v6139_v9 = vadd.f32 %v6138_v25, %v6137_v50  ;;  %v6335_v56 = vadd.f32 %v6334_v28, %v6333_v33  ;;  %v6338_v50 = vsel %vm528_vm1, %v6241_v38, 0.0 }
 0x51d   :  { %v6336_v13 = vsel %vm528_vm1, %v6240_v5, 0.0  ;;  %v9074_v44 = vpop.f32.mrb[4].mxu1 }
 0x51e   :  { %v6141_v47 = vadd.f32 %v6140_v48, %v6139_v9  ;;  %v12486_v39 = vadd.f32 %v9074_v44, %v12035_v36  ;;  %v5896_v49 = vpop.f32.mrb[5].mxu1  ;;  %v6337_v15 = vadd.f32 %v6336_v13, %v6335_v56 }
 0x51f   :  { %v12491_v23 = vadd.f32 %v5896_v49, %v12038_v2  ;;  %v9075_v30 = vpop.f32.mrb[6].mxu1  ;;  %v6340_v2 = vsel %vm528_vm1, %v6242_v3, 0.0 }
 0x520   :  { %v6143_v33 = vadd.f32 %v6142_v10, %v6141_v47  ;;  %v12495_v28 = vadd.f32 %v9075_v30, %v12041_v22  ;;  %v5899_v25 = vpop.f32.mrb[7].mxu1  ;;  %v6339_v5 = vadd.f32 %v6338_v50, %v6337_v15  ;;  %v6245_v47 = vmul.f32 %v12486_v39, %v12486_v39 }
 0x521   :  { %v6144_v36 = vsel %vm528_vm1, %v12491_v23, 0.0  ;;  %v6243_v9 = vmul.f32 %v12491_v23, %v12491_v23  ;;  %v12502_v48 = vadd.f32 %v5899_v25, %v12043_v51  ;;  %v6148_v51 = vsel %vm528_vm1, %v12486_v39, 0.0 }
 0x522   :  { %v6145_v56 = vadd.f32 %v6144_v36, %v6143_v33  ;;  %v6341_v13 = vadd.f32 %v6340_v2, %v6339_v5  ;;  %v6246_v30 = vmul.f32 %v12495_v28, %v12495_v28  ;;  %v6150_v5 = vsel %vm528_vm1, %v12495_v28, 0.0 }
 0x523   :  { %v6342_v38 = vsel %vm528_vm1, %v6243_v9, 0.0  ;;  %v6146_v22 = vsel %vm528_vm1, %v12502_v48, 0.0  ;;  %v6244_v44 = vmul.f32 %v12502_v48, %v12502_v48 }
 0x524   :  { %v6147_v49 = vadd.f32 %v6146_v22, %v6145_v56  ;;  %v6343_v10 = vadd.f32 %v6342_v38, %v6341_v13  ;;  %v6346_v56 = vsel %vm528_vm1, %v6245_v47, 0.0 }
 0x525   :  { %v6344_v3 = vsel %vm528_vm1, %v6244_v44, 0.0  ;;  %v9078_v15 = vpop.f32.mrb[8].mxu1 }
 0x526   :  { %v6149_v50 = vadd.f32 %v6148_v51, %v6147_v49  ;;  %v12518_v33 = vadd.f32 %v9078_v15, %v12045_v43  ;;  %v5912_v25 = vpop.f32.mrb[9].mxu1  ;;  %v6345_v36 = vadd.f32 %v6344_v3, %v6343_v10 }
 0x527   :  { %v12523_v9 = vadd.f32 %v5912_v25, %v12048_v59  ;;  %v9079_v2 = vpop.f32.mrb[10].mxu1  ;;  %v6348_v59 = vsel %vm528_vm1, %v6246_v30, 0.0 }
 0x528   :  { %15207 = vst [vmem:[#allocation14_spill] sm:$0xff] %v12518_v33  ;;  %v6151_v13 = vadd.f32 %v6150_v5, %v6149_v50  ;;  %v12527_v38 = vadd.f32 %v9079_v2, %v12051_v55  ;;  %v5915_v22 = vpop.f32.mrb[11].mxu1  ;;  %v6347_v44 = vadd.f32 %v6346_v56, %v6345_v36  ;;  %v6249_v50 = vmul.f32 %v12518_v33, %v12518_v33 }
 0x529   :  { %v6152_v43 = vsel %vm528_vm1, %v12523_v9, 0.0  ;;  %v6247_v49 = vmul.f32 %v12523_v9, %v12523_v9  ;;  %v12534_v51 = vadd.f32 %v5915_v22, %v12053_v26  ;;  %v6156_v26 = vsel %vm528_vm1, %v12518_v33, 0.0 }
 0x52a   :  { %15208 = vst [vmem:[#allocation16_spill] sm:$0xff] %v12527_v38  ;;  %v6153_v10 = vadd.f32 %v6152_v43, %v6151_v13  ;;  %v6349_v3 = vadd.f32 %v6348_v59, %v6347_v44  ;;  %v6250_v2 = vmul.f32 %v12527_v38, %v12527_v38  ;;  %v6158_v44 = vsel %vm528_vm1, %v12527_v38, 0.0 }
 0x52b   :  { %v6350_v47 = vsel %vm528_vm1, %v6247_v49, 0.0  ;;  %v6154_v55 = vsel %vm528_vm1, %v12534_v51, 0.0  ;;  %v6248_v15 = vmul.f32 %v12534_v51, %v12534_v51 }
 0x52c   :  { %v6155_v25 = vadd.f32 %v6154_v55, %v6153_v10  ;;  %v6351_v5 = vadd.f32 %v6350_v47, %v6349_v3  ;;  %v6354_v10 = vsel %vm528_vm1, %v6249_v50, 0.0 }
 0x52d   :  { %v6352_v30 = vsel %vm528_vm1, %v6248_v15, 0.0  ;;  %v9082_v36 = vpop.f32.mrb[12].mxu1 }
 0x52e   :  { %v6157_v56 = vadd.f32 %v6156_v26, %v6155_v25  ;;  %v12550_v13 = vadd.f32 %v9082_v36, %v12055_v41  ;;  %v5928_v22 = vpop.f32.mrb[13].mxu1  ;;  %v6353_v43 = vadd.f32 %v6352_v30, %v6351_v5 }
 0x52f   :  { %v12555_v49 = vadd.f32 %v5928_v22, %v12058_v32  ;;  %v9083_v59 = vpop.f32.mrb[14].mxu1  ;;  %v6356_v32 = vsel %vm528_vm1, %v6250_v2, 0.0 }
 0x530   :  { %15209 = vst [vmem:[#allocation19_spill] sm:$0xff] %v12550_v13  ;;  %v6159_v3 = vadd.f32 %v6158_v44, %v6157_v56  ;;  %v12559_v47 = vadd.f32 %v9083_v59, %v12061_v58  ;;  %v5931_v55 = vpop.f32.mrb[15].mxu1  ;;  %v6355_v15 = vadd.f32 %v6354_v10, %v6353_v43  ;;  %v6253_v56 = vmul.f32 %v12550_v13, %v12550_v13 }
 0x531   :  { %15210 = vst [vmem:[#allocation21_spill] sm:$0xff] %v12555_v49  ;;  %v6160_v41 = vsel %vm528_vm1, %v12555_v49, 0.0  ;;  %v6251_v25 = vmul.f32 %v12555_v49, %v12555_v49  ;;  %v12566_v26 = vadd.f32 %v5931_v55, %v12063_v24  ;;  %v6164_v24 = vsel %vm528_vm1, %v12550_v13, 0.0 }
 0x532   :  { %15211 = vst [vmem:[#allocation18_spill] sm:$0xff] %v12559_v47  ;;  %v6161_v5 = vadd.f32 %v6160_v41, %v6159_v3  ;;  %v6357_v30 = vadd.f32 %v6356_v32, %v6355_v15  ;;  %v6254_v59 = vmul.f32 %v12559_v47, %v12559_v47  ;;  %v15213_v3 = vld [vmem:[#allocation20_spill] sm:$0xff]  ;;  %v6166_v41 = vsel %vm528_vm1, %v12559_v47, 0.0  ;;  %v15215_v32 = vld [vmem:[#allocation23_spill] sm:$0xff] }
 0x533   :  { %15212 = vst [vmem:[#allocation13_spill] sm:$0xff] %v12566_v26  ;;  %v6358_v50 = vsel %vm528_vm1, %v6251_v25, 0.0  ;;  %v6162_v58 = vsel %vm528_vm1, %v12566_v26, 0.0  ;;  %v6252_v36 = vmul.f32 %v12566_v26, %v12566_v26 }
 0x534   :  { %v6163_v22 = vadd.f32 %v6162_v58, %v6161_v5  ;;  %v6359_v44 = vadd.f32 %v6358_v50, %v6357_v30  ;;  %v6362_v30 = vsel %vm528_vm1, %v6253_v56, 0.0 }
 0x535   :  { %v6360_v2 = vsel %vm528_vm1, %v6252_v36, 0.0  ;;  %v9086_v43 = vpop.f32.mrb[16].mxu1  ;;  %v15217_v36 = vld [vmem:[#allocation25_spill] sm:$0xff] }
 0x536   :  { %v6165_v10 = vadd.f32 %v6164_v24, %v6163_v22  ;;  %v12582_v55 = vadd.f32 %v9086_v43, %v15213_v3  ;;  %v5944_v15 = vpop.f32.mrb[17].mxu1  ;;  %v6361_v25 = vadd.f32 %v6360_v2, %v6359_v44  ;;  %v15219_v3 = vld [vmem:[#allocation22_spill] sm:$0xff]  ;;  %v6364_v2 = vsel %vm528_vm1, %v6254_v59, 0.0 }
 0x537   :  { %v12587_v5 = vadd.f32 %v5944_v15, %v15215_v32  ;;  %v9087_v58 = vpop.f32.mrb[18].mxu1 }
 0x538   :  { %15214 = vst [vmem:[#allocation12_spill] sm:$0xff] %v12582_v55  ;;  %v6167_v50 = vadd.f32 %v6166_v41, %v6165_v10  ;;  %v12591_v13 = vadd.f32 %v9087_v58, %v15217_v36  ;;  %v5947_v26 = vpop.f32.mrb[19].mxu1  ;;  %v6363_v22 = vadd.f32 %v6362_v30, %v6361_v25  ;;  %v6257_v25 = vmul.f32 %v12582_v55, %v12582_v55 }
 0x539   :  { %15216 = vst [vmem:[#allocation20_spill] sm:$0xff] %v12587_v5  ;;  %v6168_v24 = vsel %vm528_vm1, %v12587_v5, 0.0  ;;  %v6255_v43 = vmul.f32 %v12587_v5, %v12587_v5  ;;  %v12598_v44 = vadd.f32 %v5947_v26, %v15219_v3  ;;  %v6172_v26 = vsel %vm528_vm1, %v12582_v55, 0.0 }
 0x53a   :  { %15218 = vst [vmem:[#allocation23_spill] sm:$0xff] %v12591_v13  ;;  %v6169_v15 = vadd.f32 %v6168_v24, %v6167_v50  ;;  %v6365_v32 = vadd.f32 %v6364_v2, %v6363_v22  ;;  %v6258_v36 = vmul.f32 %v12591_v13, %v12591_v13  ;;  %v15221_v24 = vld [vmem:[#allocation24_spill] sm:$0xff]  ;;  %v6174_v2 = vsel %vm528_vm1, %v12591_v13, 0.0 }
 0x53b   :  { %15220 = vst [vmem:[#allocation25_spill] sm:$0xff] %v12598_v44  ;;  %v6366_v56 = vsel %vm528_vm1, %v6255_v43, 0.0  ;;  %v6170_v10 = vsel %vm528_vm1, %v12598_v44, 0.0  ;;  %v6256_v41 = vmul.f32 %v12598_v44, %v12598_v44 }
 0x53c   :  { %v6171_v58 = vadd.f32 %v6170_v10, %v6169_v15  ;;  %v6367_v30 = vadd.f32 %v6366_v56, %v6365_v32  ;;  %v15223_v15 = vld [vmem:[#allocation27_spill] sm:$0xff]  ;;  %v6370_v32 = vsel %vm528_vm1, %v6257_v25, 0.0 }
 0x53d   :  { %v6368_v59 = vsel %vm528_vm1, %v6256_v41, 0.0  ;;  %v9090_v50 = vpop.f32.mrb[20].mxu1  ;;  %v15225_v41 = vld [vmem:[#allocation26_spill] sm:$0xff] }
 0x53e   :  { %v6173_v22 = vadd.f32 %v6172_v26, %v6171_v58  ;;  %v12614_v43 = vadd.f32 %v9090_v50, %v15221_v24  ;;  %v5960_v3 = vpop.f32.mrb[21].mxu1  ;;  %v6369_v44 = vadd.f32 %v6368_v59, %v6367_v30  ;;  %v15227_v24 = vld [vmem:[#allocation28_spill] sm:$0xff]  ;;  %v6372_v59 = vsel %vm528_vm1, %v6258_v36, 0.0 }
 0x53f   :  { %v12619_v10 = vadd.f32 %v5960_v3, %v15223_v15  ;;  %v9091_v55 = vpop.f32.mrb[22].mxu1 }
 0x540   :  { %15222 = vst [vmem:[#allocation22_spill] sm:$0xff] %v12614_v43  ;;  %v6175_v56 = vadd.f32 %v6174_v2, %v6173_v22  ;;  %v12623_v5 = vadd.f32 %v9091_v55, %v15225_v41  ;;  %v5963_v47 = vpop.f32.mrb[23].mxu1  ;;  %v6371_v58 = vadd.f32 %v6370_v32, %v6369_v44  ;;  %v6261_v22 = vmul.f32 %v12614_v43, %v12614_v43 }
 0x541   :  { %15224 = vst [vmem:[#allocation24_spill] sm:$0xff] %v12619_v10  ;;  %v6176_v26 = vsel %vm528_vm1, %v12619_v10, 0.0  ;;  %v6259_v50 = vmul.f32 %v12619_v10, %v12619_v10  ;;  %v12630_v30 = vadd.f32 %v5963_v47, %v15227_v24  ;;  %v6180_v47 = vsel %vm528_vm1, %v12614_v43, 0.0 }
 0x542   :  { %15226 = vst [vmem:[#allocation27_spill] sm:$0xff] %v12623_v5  ;;  %v6177_v3 = vadd.f32 %v6176_v26, %v6175_v56  ;;  %v6373_v15 = vadd.f32 %v6372_v59, %v6371_v58  ;;  %v6262_v41 = vmul.f32 %v12623_v5, %v12623_v5  ;;  %v15229_v26 = vld [vmem:[#allocation3_spill] sm:$0xff]  ;;  %v6182_v59 = vsel %vm528_vm1, %v12623_v5, 0.0 }
 0x543   :  { %15228 = vst [vmem:[#allocation26_spill] sm:$0xff] %v12630_v30  ;;  %v6374_v25 = vsel %vm528_vm1, %v6259_v50, 0.0  ;;  %v6178_v55 = vsel %vm528_vm1, %v12630_v30, 0.0  ;;  %v6260_v44 = vmul.f32 %v12630_v30, %v12630_v30 }
 0x544   :  { %v6179_v2 = vadd.f32 %v6178_v55, %v6177_v3  ;;  %v6375_v32 = vadd.f32 %v6374_v25, %v6373_v15  ;;  %v15231_v3 = vld [vmem:[#allocation5_spill] sm:$0xff]  ;;  %v6378_v15 = vsel %vm528_vm1, %v6261_v22, 0.0 }
 0x545   :  { %v6376_v36 = vsel %vm528_vm1, %v6260_v44, 0.0  ;;  %v9094_v56 = vpop.f32.mrb[24].mxu1  ;;  %v15233_v44 = vld [vmem:[#allocation7_spill] sm:$0xff] }
 0x546   :  { %v6181_v58 = vadd.f32 %v6180_v47, %v6179_v2  ;;  %v12646_v50 = vadd.f32 %v9094_v56, %v15229_v26  ;;  %v5976_v24 = vpop.f32.mrb[25].mxu1  ;;  %v6377_v30 = vadd.f32 %v6376_v36, %v6375_v32  ;;  %v15235_v26 = vld [vmem:[#allocation4_spill] sm:$0xff]  ;;  %v6380_v36 = vsel %vm528_vm1, %v6262_v41, 0.0 }
 0x547   :  { %v12651_v55 = vadd.f32 %v5976_v24, %v15231_v3  ;;  %v9095_v43 = vpop.f32.mrb[26].mxu1 }
 0x548   :  { %15230 = vst [vmem:[#allocation28_spill] sm:$0xff] %v12646_v50  ;;  %v6183_v25 = vadd.f32 %v6182_v59, %v6181_v58  ;;  %v12655_v10 = vadd.f32 %v9095_v43, %v15233_v44  ;;  %v5979_v13 = vpop.f32.mrb[27].mxu1  ;;  %v6379_v2 = vadd.f32 %v6378_v15, %v6377_v30  ;;  %v6265_v58 = vmul.f32 %v12646_v50, %v12646_v50 }
 0x549   :  { %15232 = vst [vmem:[#allocation3_spill] sm:$0xff] %v12651_v55  ;;  %v6184_v47 = vsel %vm528_vm1, %v12651_v55, 0.0  ;;  %v6263_v56 = vmul.f32 %v12651_v55, %v12651_v55  ;;  %v12662_v32 = vadd.f32 %v5979_v13, %v15235_v26  ;;  %v6188_v13 = vsel %vm528_vm1, %v12646_v50, 0.0 }
 0x54a   :  { %15234 = vst [vmem:[#allocation5_spill] sm:$0xff] %v12655_v10  ;;  %v6185_v24 = vadd.f32 %v6184_v47, %v6183_v25  ;;  %v6381_v3 = vadd.f32 %v6380_v36, %v6379_v2  ;;  %v6266_v44 = vmul.f32 %v12655_v10, %v12655_v10  ;;  %v15237_v47 = vld [vmem:[#allocation6_spill] sm:$0xff]  ;;  %v6190_v36 = vsel %vm528_vm1, %v12655_v10, 0.0 }
 0x54b   :  { %15236 = vst [vmem:[#allocation7_spill] sm:$0xff] %v12662_v32  ;;  %v6382_v22 = vsel %vm528_vm1, %v6263_v56, 0.0  ;;  %v6186_v43 = vsel %vm528_vm1, %v12662_v32, 0.0  ;;  %v6264_v30 = vmul.f32 %v12662_v32, %v12662_v32 }
 0x54c   :  { %v6187_v59 = vadd.f32 %v6186_v43, %v6185_v24  ;;  %v6383_v15 = vadd.f32 %v6382_v22, %v6381_v3  ;;  %v15239_v24 = vld [vmem:[#allocation9_spill] sm:$0xff]  ;;  %v6386_v3 = vsel %vm528_vm1, %v6265_v58, 0.0 }
 0x54d   :  { %v6384_v41 = vsel %vm528_vm1, %v6264_v30, 0.0  ;;  %v9098_v25 = vpop.f32.mrb[28].mxu1  ;;  %v15241_v30 = vld [vmem:[#allocation11_spill] sm:$0xff] }
 0x54e   :  { %v6189_v2 = vadd.f32 %v6188_v13, %v6187_v59  ;;  %v12678_v56 = vadd.f32 %v9098_v25, %v15237_v47  ;;  %v5992_v26 = vpop.f32.mrb[29].mxu1  ;;  %v6385_v32 = vadd.f32 %v6384_v41, %v6383_v15  ;;  %v15243_v47 = vld [vmem:[#allocation8_spill] sm:$0xff]  ;;  %v6388_v41 = vsel %vm528_vm1, %v6266_v44, 0.0 }
 0x54f   :  { %v12683_v43 = vadd.f32 %v5992_v26, %v15239_v24  ;;  %v9099_v50 = vpop.f32.mrb[30].mxu1 }
 0x550   :  { %15238 = vst [vmem:[#allocation4_spill] sm:$0xff] %v12678_v56  ;;  %v6191_v22 = vadd.f32 %v6190_v36, %v6189_v2  ;;  %v12687_v55 = vadd.f32 %v9099_v50, %v15241_v30  ;;  %v5995_v5 = vpop.f32.mrb[31].mxu1  ;;  %v6387_v59 = vadd.f32 %v6386_v3, %v6385_v32  ;;  %v6269_v32 = vmul.f32 %v12678_v56, %v12678_v56 }
 0x551   :  { %15240 = vst [vmem:[#allocation6_spill] sm:$0xff] %v12683_v43  ;;  %v6192_v13 = vsel %vm528_vm1, %v12683_v43, 0.0  ;;  %v6267_v25 = vmul.f32 %v12683_v43, %v12683_v43  ;;  %v9231_v15 = vadd.f32 %v5995_v5, %v15243_v47  ;;  %v6196_v3 = vsel %vm528_vm1, %v12678_v56, 0.0 }
 0x552   :  { %15242 = vst [vmem:[#allocation9_spill] sm:$0xff] %v12687_v55  ;;  %v6193_v26 = vadd.f32 %v6192_v13, %v6191_v22  ;;  %v6389_v24 = vadd.f32 %v6388_v41, %v6387_v59  ;;  %v6270_v5 = vmul.f32 %v12687_v55, %v12687_v55  ;;  %v6198_v22 = vsel %vm528_vm1, %v12687_v55, 0.0 }
 0x553   :  { %v6390_v58 = vsel %vm528_vm1, %v6267_v25, 0.0  ;;  %v6194_v2 = vsel %vm528_vm1, %v9231_v15, 0.0  ;;  %v6268_v50 = vmul.f32 %v9231_v15, %v9231_v15  ;;  %v6394_v13 = vsel %vm528_vm1, %v6269_v32, 0.0 }
 0x554   :  { %v6195_v36 = vadd.f32 %v6194_v2, %v6193_v26  ;;  %v6391_v30 = vadd.f32 %v6390_v58, %v6389_v24  ;;  %v6396_v41 = vsel %vm528_vm1, %v6270_v5, 0.0  ;;  %v6071_v5 = vld [vmem:[%s15019_s6] sm:$0x1] }
 0x555   :  { %v6392_v43 = vsel %vm528_vm1, %v6268_v50, 0.0 }
 0x556   :  { %v6197_v44 = vadd.f32 %v6196_v3, %v6195_v36  ;;  %v6393_v59 = vadd.f32 %v6392_v43, %v6391_v30 }
 0x558   :  { %v6199_v25 = vadd.f32 %v6198_v22, %v6197_v44  ;;  %v6395_v47 = vadd.f32 %v6394_v13, %v6393_v59 }
 0x55a   :  { %v6200_v26 = vrot.slane %v6199_v25, 4  ;;  %v6397_v2 = vadd.f32 %v6396_v41, %v6395_v47  ;;  %v15245_v41 = vld [vmem:[#allocation15_spill] sm:$0xff] }
 0x55c   :  { %v6201_v56 = vadd.f32 %v6200_v26, %v6199_v25  ;;  %v6398_v24 = vrot.slane %v6397_v2, 4 }
 0x55e   :  { %v6202_v58 = vrot.slane %v6201_v56, 2  ;;  %v6399_v50 = vadd.f32 %v6398_v24, %v6397_v2  ;;  %v15246_v2 = vld [vmem:[#allocation17_spill] sm:$0xff] }
 0x560   :  { %v6203_v10 = vadd.f32 %v6202_v58, %v6201_v56  ;;  %v6400_v49 = vrot.slane %v6399_v50, 2  ;;  %v15247_v58 = vld [vmem:[#allocation10_spill] sm:$0xff] }
 0x562   :  { %v6204_v38 = vrot.slane %v6203_v10, 1  ;;  %v6401_v36 = vadd.f32 %v6400_v49, %v6399_v50  ;;  %v6072_v49 = vld [vmem:[%s15020_s7] sm:$0x1] }
 0x564   :  { %v6205_v3 = vadd.f32 %v6204_v38, %v6203_v10  ;;  %v6402_v33 = vrot.slane %v6401_v36, 1  ;;  %v15244_v10 = vld [vmem:[#allocation29_spill] sm:$0xff] }
 0x566   :  { %v6206_v55 = vmul.f32 0.001953125, %v6205_v3  ;;  %v6403_v43 = vadd.f32 %v6402_v33, %v6401_v36 }
 0x568   :  { %v6405_v30 = vmul.f32 %v6206_v55, %v6206_v55  ;;  %v6404_v32 = vmul.f32 0.001953125, %v6403_v43 }
 0x56a   :  { %v6406_v44 = vsub.f32 %v6404_v32, %v6405_v30 }
 0x56c   :  { %v6407_v22 = vmax.f32 %v6406_v44, 0.0  ;;  %v15264_v44 = vld [vmem:[#allocation22_spill] sm:$0xff] }
 0x56e   :  { %v6408_v59 = vadd.f32 1e-05, %v6407_v22  ;;  %v15249_v22 = vld [vmem:[#allocation14_spill] sm:$0xff] }
 0x570   :  { %9695 = vrsqrt.f32 %v6408_v59  ;;  %v15250_v59 = vld [vmem:[#allocation16_spill] sm:$0xff] }
 0x57a   :  { %v9696_v13 = vpop.eup %9695 }
 0x57b   :  { %v6410_v25 = vmul.f32 %v9696_v13, %v6071_v5  ;;  %v15251_v5 = vld [vmem:[#allocation21_spill] sm:$0xff] }
 0x57c   :  { %v15252_v13 = vld [vmem:[#allocation13_spill] sm:$0xff] }
 0x57d   :  { %v6411_v38 = vmul.f32 %v6410_v25, %v6206_v55  ;;  %v12715_v56 = vrot.slane %v6410_v25, %v15244_v10  ;;  %v15253_v25 = vld [vmem:[#allocation19_spill] sm:$0xff] }
 0x57f   :  { %v6412_v33 = vsub.f32 %v6072_v49, %v6411_v38  ;;  %v6480_v47 = vmul.f32 %v9231_v15, %v12715_v56  ;;  %v12720_v26 = vmul.f32 %v15245_v41, %v12715_v56  ;;  %v12724_v24 = vmul.f32 %v15246_v2, %v12715_v56  ;;  %v15254_v49 = vld [vmem:[#allocation18_spill] sm:$0xff]  ;;  %v15256_v41 = vld [vmem:[#allocation25_spill] sm:$0xff] }
 0x580   :  { %v12728_v50 = vmul.f32 %v15247_v58, %v12715_v56  ;;  %v12732_v55 = vmul.f32 %v12208_v20, %v12715_v56  ;;  %v12736_v36 = vmul.f32 %v12236_v21, %v12715_v56  ;;  %v12740_v15 = vmul.f32 %v12247_v53, %v12715_v56  ;;  %v15257_v58 = vld [vmem:[#allocation12_spill] sm:$0xff] }
 0x581   :  { %v12743_v3 = vrot.slane %v6412_v33, %v15244_v10  ;;  %v12747_v43 = vmul.f32 %v12230_v4, %v12715_v56  ;;  %v12751_v30 = vmul.f32 %v12244_v54, %v12715_v56  ;;  %v12755_v20 = vmul.f32 %v12267_v62, %v12715_v56  ;;  %v15255_v33 = vld [vmem:[#allocation20_spill] sm:$0xff]  ;;  %v15266_v10 = vld [vmem:[#allocation27_spill] sm:$0xff] }
 0x582   :  { %v12759_v21 = vmul.f32 %v12278_v17, %v12715_v56  ;;  %v12763_v53 = vmul.f32 %v12262_v45, %v12715_v56  ;;  %v12767_v4 = vmul.f32 %v12271_v11, %v12715_v56  ;;  %v12771_v54 = vmul.f32 %v12299_v60, %v12715_v56 }
 0x583   :  { %v12774_v32 = vadd.f32 %v12743_v3, %v6480_v47  ;;  %v12778_v62 = vmul.f32 %v12310_v42, %v12715_v56  ;;  %v12782_v17 = vmul.f32 %v12294_v0, %v12715_v56  ;;  %v12786_v45 = vmul.f32 %v12303_v57, %v12715_v56 }
 0x584   :  { %v12790_v11 = vmul.f32 %v12331_v37, %v12715_v56  ;;  %v12794_v60 = vmul.f32 %v12342_v35, %v12715_v56  ;;  %v12798_v42 = vmul.f32 %v12326_v16, %v12715_v56  ;;  %v12802_v0 = vmul.f32 %v12335_v1, %v12715_v56 }
 0x585   :  { %15248 = vst [vmem:[#allocation11_spill] sm:$0xff] %v12774_v32  ;;  %v12807_v57 = vmul.f32 %v12363_v6, %v12715_v56  ;;  %v12811_v37 = vmul.f32 %v12374_v18, %v12715_v56  ;;  %v12815_v35 = vmul.f32 %v12358_v8, %v12715_v56  ;;  %v12819_v16 = vmul.f32 %v12367_v40, %v12715_v56  ;;  %v15268_v32 = vld [vmem:[#allocation3_spill] sm:$0xff] }
 0x586   :  { %v12823_v1 = vmul.f32 %v12395_v52, %v12715_v56  ;;  %v12827_v6 = vmul.f32 %v12406_v7, %v12715_v56  ;;  %v12831_v18 = vmul.f32 %v12390_v19, %v12715_v56  ;;  %v12835_v8 = vmul.f32 %v12399_v46, %v12715_v56 }
 0x587   :  { %v12839_v40 = vmul.f32 %v12427_v29, %v12715_v56  ;;  %v12843_v52 = vmul.f32 %v12438_v14, %v12715_v56  ;;  %v12847_v7 = vmul.f32 %v12422_v12, %v12715_v56  ;;  %v12851_v19 = vmul.f32 %v12431_v34, %v12715_v56 }
 0x588   :  { %v12855_v46 = vmul.f32 %v12459_v31, %v12715_v56  ;;  %v12859_v29 = vmul.f32 %v12470_v61, %v12715_v56  ;;  %v12863_v14 = vmul.f32 %v12454_v63, %v12715_v56  ;;  %v12867_v12 = vmul.f32 %v12463_v27, %v12715_v56 }
 0x589   :  { %v12871_v34 = vmul.f32 %v12491_v23, %v12715_v56  ;;  %v12875_v31 = vmul.f32 %v12502_v48, %v12715_v56  ;;  %v12879_v61 = vmul.f32 %v12486_v39, %v12715_v56  ;;  %v12883_v63 = vmul.f32 %v12495_v28, %v12715_v56 }
 0x58a   :  { %v12887_v27 = vmul.f32 %v12523_v9, %v12715_v56  ;;  %v12891_v23 = vmul.f32 %v12534_v51, %v12715_v56  ;;  %v12895_v48 = vmul.f32 %v15249_v22, %v12715_v56  ;;  %v12899_v39 = vmul.f32 %v15250_v59, %v12715_v56  ;;  %v15258_v59 = vld [vmem:[#allocation23_spill] sm:$0xff] }
 0x58b   :  { %v12903_v28 = vmul.f32 %v15251_v5, %v12715_v56  ;;  %v12907_v9 = vmul.f32 %v15252_v13, %v12715_v56  ;;  %v12911_v51 = vmul.f32 %v15253_v25, %v12715_v56  ;;  %v12915_v38 = vmul.f32 %v15254_v49, %v12715_v56  ;;  %v15260_v13 = vld [vmem:[#allocation24_spill] sm:$0xff]  ;;  %v15262_v49 = vld [vmem:[#allocation26_spill] sm:$0xff] }
 0x58c   :  { %v12919_v47 = vmul.f32 %v15255_v33, %v12715_v56  ;;  %v12923_v2 = vmul.f32 %v15256_v41, %v12715_v56  ;;  %v12927_v22 = vmul.f32 %v15257_v58, %v12715_v56  ;;  %v12931_v5 = vmul.f32 %v15258_v59, %v12715_v56 }
 0x58d   :  { %v12935_v25 = vmul.f32 %v15260_v13, %v12715_v56  ;;  %v12939_v33 = vmul.f32 %v15262_v49, %v12715_v56  ;;  %v12943_v41 = vmul.f32 %v15264_v44, %v12715_v56  ;;  %v12947_v58 = vmul.f32 %v15266_v10, %v12715_v56 }
 0x58e   :  { %15259 = vst [vmem:[#allocation8_spill] sm:$0xff] %v12931_v5  ;;  %v12951_v59 = vmul.f32 %v15268_v32, %v12715_v56  ;;  %v15270_v5 = vld [vmem:[#allocation7_spill] sm:$0xff] }
 0x58f   :  { %15261 = vst [vmem:[#allocation15_spill] sm:$0xff] %v12935_v25  ;;  %15263 = vst [vmem:[#allocation17_spill] sm:$0xff] %v12939_v33  ;;  %v12955_v13 = vmul.f32 %v15270_v5, %v12715_v56  ;;  %v15271_v25 = vld [vmem:[#allocation28_spill] sm:$0xff]  ;;  %v15272_v33 = vld [vmem:[#allocation5_spill] sm:$0xff] }
 0x590   :  { %15265 = vst [vmem:[#allocation10_spill] sm:$0xff] %v12943_v41  ;;  %15267 = vst [vmem:[#allocation14_spill] sm:$0xff] %v12947_v58  ;;  %v12959_v49 = vmul.f32 %v15271_v25, %v12715_v56  ;;  %v12963_v44 = vmul.f32 %v15272_v33, %v12715_v56  ;;  %v15273_v41 = vld [vmem:[#allocation6_spill] sm:$0xff]  ;;  %v15274_v58 = vld [vmem:[#allocation4_spill] sm:$0xff]  ;;  %v12979_v25 = vadd.f32 %v12743_v3, %v12720_v26 }
 0x591   :  { %15269 = vst [vmem:[#allocation16_spill] sm:$0xff] %v12951_v59  ;;  %v12967_v10 = vmul.f32 %v15273_v41, %v12715_v56  ;;  %v12971_v32 = vmul.f32 %v15274_v58, %v12715_v56  ;;  %v15275_v59 = vld [vmem:[#allocation9_spill] sm:$0xff]  ;;  %v12983_v33 = vadd.f32 %v12743_v3, %v12724_v24  ;;  %v12987_v41 = vadd.f32 %v12743_v3, %v12728_v50 }
 0x592   :  { %v12975_v5 = vmul.f32 %v15275_v59, %v12715_v56  ;;  %15276 = vst [vmem:[#allocation21_spill] sm:$0xff] %v12979_v25  ;;  %v12991_v58 = vadd.f32 %v12743_v3, %v12732_v55  ;;  %v12995_v56 = vadd.f32 %v12743_v3, %v12736_v36  ;;  %v12999_v26 = vadd.f32 %v12743_v3, %v12740_v15 }
 0x593   :  { %v13003_v24 = vadd.f32 %v12743_v3, %v12747_v43  ;;  %v13007_v50 = vadd.f32 %v12743_v3, %v12751_v30  ;;  %v13011_v55 = vadd.f32 %v12743_v3, %v12755_v20  ;;  %v13015_v36 = vadd.f32 %v12743_v3, %v12759_v21 }
 0x594   :  { %v13019_v15 = vadd.f32 %v12743_v3, %v12763_v53  ;;  %v13023_v43 = vadd.f32 %v12743_v3, %v12767_v4  ;;  %v13027_v30 = vadd.f32 %v12743_v3, %v12771_v54  ;;  %v13031_v20 = vadd.f32 %v12743_v3, %v12778_v62 }
 0x595   :  { %v13035_v21 = vadd.f32 %v12743_v3, %v12782_v17  ;;  %v13039_v53 = vadd.f32 %v12743_v3, %v12786_v45  ;;  %v13043_v4 = vadd.f32 %v12743_v3, %v12790_v11  ;;  %v13047_v54 = vadd.f32 %v12743_v3, %v12794_v60  ;;  %v15282_v59 = vld [vmem:[#allocation8_spill] sm:$0xff] }
 0x596   :  { %v13051_v62 = vadd.f32 %v12743_v3, %v12798_v42  ;;  %v13055_v17 = vadd.f32 %v12743_v3, %v12802_v0  ;;  %v13059_v45 = vadd.f32 %v12743_v3, %v12807_v57  ;;  %v13063_v11 = vadd.f32 %v12743_v3, %v12811_v37 }
 0x597   :  { %v13067_v60 = vadd.f32 %v12743_v3, %v12815_v35  ;;  %v13071_v42 = vadd.f32 %v12743_v3, %v12819_v16  ;;  %v13075_v0 = vadd.f32 %v12743_v3, %v12823_v1  ;;  %v13079_v57 = vadd.f32 %v12743_v3, %v12827_v6 }
 0x598   :  { %v13083_v37 = vadd.f32 %v12743_v3, %v12831_v18  ;;  %v13087_v35 = vadd.f32 %v12743_v3, %v12835_v8  ;;  %v13091_v16 = vadd.f32 %v12743_v3, %v12839_v40  ;;  %v13095_v1 = vadd.f32 %v12743_v3, %v12843_v52 }
 0x599   :  { %v13099_v6 = vadd.f32 %v12743_v3, %v12847_v7  ;;  %v13103_v18 = vadd.f32 %v12743_v3, %v12851_v19  ;;  %v13107_v8 = vadd.f32 %v12743_v3, %v12855_v46  ;;  %v13111_v40 = vadd.f32 %v12743_v3, %v12859_v29 }
 0x59a   :  { %v13115_v52 = vadd.f32 %v12743_v3, %v12863_v14  ;;  %v13119_v7 = vadd.f32 %v12743_v3, %v12867_v12  ;;  %v13123_v19 = vadd.f32 %v12743_v3, %v12871_v34  ;;  %v13127_v46 = vadd.f32 %v12743_v3, %v12875_v31 }
 0x59b   :  { %v13131_v29 = vadd.f32 %v12743_v3, %v12879_v61  ;;  %v13135_v14 = vadd.f32 %v12743_v3, %v12883_v63  ;;  %v13139_v12 = vadd.f32 %v12743_v3, %v12887_v27  ;;  %v13143_v34 = vadd.f32 %v12743_v3, %v12891_v23 }
 0x59c   :  { %v13147_v31 = vadd.f32 %v12743_v3, %v12895_v48  ;;  %v13151_v61 = vadd.f32 %v12743_v3, %v12899_v39  ;;  %v13155_v63 = vadd.f32 %v12743_v3, %v12903_v28  ;;  %v13159_v27 = vadd.f32 %v12743_v3, %v12907_v9 }
 0x59d   :  { %v13163_v23 = vadd.f32 %v12743_v3, %v12911_v51  ;;  %v13167_v48 = vadd.f32 %v12743_v3, %v12915_v38  ;;  %v13171_v39 = vadd.f32 %v12743_v3, %v12919_v47  ;;  %v13175_v28 = vadd.f32 %v12743_v3, %v12923_v2 }
 0x59e   :  { %v13179_v9 = vadd.f32 %v12743_v3, %v12927_v22  ;;  %v13183_v51 = vadd.f32 %v12743_v3, %v15282_v59 }
 0x59f   :  { %15277 = vst [vmem:[#allocation13_spill] sm:$0xff] %v13163_v23  ;;  %15278 = vst [vmem:[#allocation19_spill] sm:$0xff] %v13167_v48  ;;  %v15283_v23 = vld [vmem:[#allocation15_spill] sm:$0xff]  ;;  %v15284_v48 = vld [vmem:[#allocation17_spill] sm:$0xff] }
 0x5a0   :  { %15279 = vst [vmem:[#allocation18_spill] sm:$0xff] %v13171_v39  ;;  %15280 = vst [vmem:[#allocation20_spill] sm:$0xff] %v13175_v28  ;;  %v13187_v38 = vadd.f32 %v12743_v3, %v15283_v23  ;;  %v13191_v47 = vadd.f32 %v12743_v3, %v15284_v48  ;;  %v15285_v39 = vld [vmem:[#allocation10_spill] sm:$0xff]  ;;  %v13207_v23 = vadd.f32 %v12743_v3, %v12955_v13 }
 0x5a1   :  { %15281 = vst [vmem:[#allocation25_spill] sm:$0xff] %v13179_v9  ;;  %v13195_v2 = vadd.f32 %v12743_v3, %v15285_v39  ;;  %v15286_v28 = vld [vmem:[#allocation14_spill] sm:$0xff]  ;;  %v15288_v9 = vld [vmem:[#allocation16_spill] sm:$0xff]  ;;  %v13211_v48 = vadd.f32 %v12743_v3, %v12959_v49  ;;  %v13215_v39 = vadd.f32 %v12743_v3, %v12963_v44  ;;  %v13227_v13 = vadd.f32 %v12743_v3, %v12975_v5 }
 0x5a2   :  { %v13199_v22 = vadd.f32 %v12743_v3, %v15286_v28  ;;  %v13203_v59 = vadd.f32 %v12743_v3, %v15288_v9  ;;  %15290 = vst [vmem:[#allocation24_spill] sm:$0xff] %v13207_v23  ;;  %v13219_v28 = vadd.f32 %v12743_v3, %v12967_v10  ;;  %v13223_v9 = vadd.f32 %v12743_v3, %v12971_v32 }
 0x5a3   :  { %15291 = vst [vmem:[#allocation26_spill] sm:$0xff] %v13211_v48  ;;  %15292 = vst [vmem:[#allocation22_spill] sm:$0xff] %v13215_v39  ;;  %v6554_v49 = vmax.f32 %v12983_v33, 0.0  ;;  %v6555_v48 = vmax.f32 %v12987_v41, 0.0  ;;  %v6556_v44 = vmax.f32 %v12991_v58, 0.0  ;;  %v6557_v39 = vmax.f32 %v12995_v56, 0.0 }
 0x5a4   :  { %15287 = vst [vmem:[#allocation12_spill] sm:$0xff] %v13199_v22  ;;  %15289 = vst [vmem:[#allocation23_spill] sm:$0xff] %v13203_v59  ;;  %v6558_v10 = vmax.f32 %v12999_v26, 0.0  ;;  %v6560_v32 = vmax.f32 %v13007_v50, 0.0  ;;  %v6562_v3 = vmax.f32 %v13015_v36, 0.0  ;;  %v6563_v5 = vmax.f32 %v13019_v15, 0.0 }
 0x5a5   :  { %15293 = vst [vmem:[#allocation27_spill] sm:$0xff] %v13219_v28  ;;  %15294 = vst [vmem:[#allocation3_spill] sm:$0xff] %v13223_v9  ;;  %v6559_v28 = vmax.f32 %v13003_v24, 0.0  ;;  %v6561_v9 = vmax.f32 %v13011_v55, 0.0  ;;  %v6564_v33 = vmax.f32 %v13023_v43, 0.0  ;;  %v6565_v41 = vmax.f32 %v13027_v30, 0.0 }
 0x5a6   :  { %15295 = vst [vmem:[#allocation7_spill] sm:$0xff] %v13227_v13  ;;  %v6566_v58 = vmax.f32 %v13031_v20, 0.0  ;;  %v6567_v56 = vmax.f32 %v13035_v21, 0.0  ;;  %v6568_v26 = vmax.f32 %v13039_v53, 0.0  ;;  %v6569_v24 = vmax.f32 %v13043_v4, 0.0  ;;  %v15296_v23 = vld [vmem:[#allocation13_spill] sm:$0xff] }
 0x5a7   :  { %v6570_v50 = vmax.f32 %v13047_v54, 0.0  ;;  %v6571_v55 = vmax.f32 %v13051_v62, 0.0  ;;  %v6572_v36 = vmax.f32 %v13055_v17, 0.0  ;;  %v6573_v15 = vmax.f32 %v13059_v45, 0.0  ;;  %v15297_v25 = vld [vmem:[#allocation19_spill] sm:$0xff]  ;;  %v15298_v13 = vld [vmem:[#allocation18_spill] sm:$0xff] }
 0x5a8   :  { %v6574_v43 = vmax.f32 %v13063_v11, 0.0  ;;  %v6575_v30 = vmax.f32 %v13067_v60, 0.0  ;;  %v6576_v20 = vmax.f32 %v13071_v42, 0.0  ;;  %v6577_v21 = vmax.f32 %v13075_v0, 0.0  ;;  %v15299_v59 = vld [vmem:[#allocation20_spill] sm:$0xff]  ;;  %v15300_v22 = vld [vmem:[#allocation25_spill] sm:$0xff] }
 0x5a9   :  { %v6578_v53 = vmax.f32 %v13079_v57, 0.0  ;;  %v6579_v4 = vmax.f32 %v13083_v37, 0.0  ;;  %v6580_v54 = vmax.f32 %v13087_v35, 0.0  ;;  %v6581_v62 = vmax.f32 %v13091_v16, 0.0 }
 0x5aa   :  { %v6582_v17 = vmax.f32 %v13095_v1, 0.0  ;;  %v6583_v45 = vmax.f32 %v13099_v6, 0.0  ;;  %v6584_v11 = vmax.f32 %v13103_v18, 0.0  ;;  %v6585_v60 = vmax.f32 %v13107_v8, 0.0 }
 0x5ab   :  { %v6586_v42 = vmax.f32 %v13111_v40, 0.0  ;;  %v6587_v0 = vmax.f32 %v13115_v52, 0.0  ;;  %v6588_v57 = vmax.f32 %v13119_v7, 0.0  ;;  %v6589_v37 = vmax.f32 %v13123_v19, 0.0 }
 0x5ac   :  { %v6590_v35 = vmax.f32 %v13127_v46, 0.0  ;;  %v6591_v16 = vmax.f32 %v13131_v29, 0.0  ;;  %v6592_v1 = vmax.f32 %v13135_v14, 0.0  ;;  %v6593_v6 = vmax.f32 %v13139_v12, 0.0 }
 0x5ad   :  { %v6594_v18 = vmax.f32 %v13143_v34, 0.0  ;;  %v6595_v8 = vmax.f32 %v13147_v31, 0.0  ;;  %v6596_v40 = vmax.f32 %v13151_v61, 0.0  ;;  %v6597_v52 = vmax.f32 %v13155_v63, 0.0 }
 0x5ae   :  { %v6598_v7 = vmax.f32 %v13159_v27, 0.0  ;;  %v6599_v19 = vmax.f32 %v15296_v23, 0.0  ;;  %v6600_v46 = vmax.f32 %v15297_v25, 0.0  ;;  %v6601_v29 = vmax.f32 %v15298_v13, 0.0  ;;  %v15301_v27 = vld [vmem:[#allocation12_spill] sm:$0xff]  ;;  %v15302_v25 = vld [vmem:[#allocation23_spill] sm:$0xff] }
 0x5af   :  { %v6602_v14 = vmax.f32 %v15299_v59, 0.0  ;;  %v6603_v12 = vmax.f32 %v15300_v22, 0.0  ;;  %v6604_v34 = vmax.f32 %v13183_v51, 0.0  ;;  %v6605_v31 = vmax.f32 %v13187_v38, 0.0  ;;  %v15303_v59 = vld [vmem:[#allocation24_spill] sm:$0xff]  ;;  %v15304_v51 = vld [vmem:[#allocation26_spill] sm:$0xff] }
 0x5b0   :  { %v6606_v61 = vmax.f32 %v13191_v47, 0.0  ;;  %v6607_v63 = vmax.f32 %v13195_v2, 0.0  ;;  %v6608_v23 = vmax.f32 %v15301_v27, 0.0  ;;  %v6609_v13 = vmax.f32 %v15302_v25, 0.0  ;;  %v15305_v47 = vld [vmem:[#allocation22_spill] sm:$0xff]  ;;  %v15306_v27 = vld [vmem:[#allocation27_spill] sm:$0xff] }
 0x5b1   :  { %v6610_v22 = vmax.f32 %v15303_v59, 0.0  ;;  %v6611_v38 = vmax.f32 %v15304_v51, 0.0  ;;  %v6612_v2 = vmax.f32 %v15305_v47, 0.0  ;;  %v6613_v25 = vmax.f32 %v15306_v27, 0.0  ;;  %v15307_v59 = vld [vmem:[#allocation3_spill] sm:$0xff] }
 0x5b2   :  { %v6615_v51 = vmax.f32 %v15307_v59, 0.0  ;;  %v15308_v47 = vld [vmem:[#allocation7_spill] sm:$0xff]  ;;  %v15309_v59 = vld [vmem:[#allocation21_spill] sm:$0xff] }
 0x5b3   :  { %v6616_v27 = vmax.f32 %v15308_v47, 0.0  ;;  %v15310_v47 = vmax.f32 %v15309_v59, 0.0 }
 0x5b5   :  { %v6617_v59 = vpack.c.bf16 %v6554_v49, %v15310_v47  ;;  %v6618_v47 = vpack.c.bf16 %v6556_v44, %v6555_v48  ;;  %v6619_v49 = vpack.c.bf16 %v6558_v10, %v6557_v39  ;;  %v6620_v44 = vpack.c.bf16 %v6560_v32, %v6559_v28 }
 0x5b6   :  { %v6621_v48 = vpack.c.bf16 %v6562_v3, %v6561_v9  ;;  %v6622_v10 = vpack.c.bf16 %v6564_v33, %v6563_v5  ;;  %v6623_v39 = vpack.c.bf16 %v6566_v58, %v6565_v41  ;;  %v6624_v28 = vpack.c.bf16 %v6568_v26, %v6567_v56 }
 0x5b7   :  { %9102 = vmatprep.mubr.msk.bf16.mxu0 %vm528_vm1, %v6617_v59  ;;  %v6625_v32 = vpack.c.bf16 %v6570_v50, %v6569_v24  ;;  %v6626_v3 = vpack.c.bf16 %v6572_v36, %v6571_v55  ;;  %v6627_v9 = vpack.c.bf16 %v6574_v43, %v6573_v15  ;;  %v6628_v5 = vpack.c.bf16 %v6576_v20, %v6575_v30 }
 0x5b8   :  { %9103 = vmatmul.mubr.msk.bf16.vlgmr.msra.gmra.mrb[128].mxu0 %vm528_vm1, %v6618_v47  ;;  %v6629_v33 = vpack.c.bf16 %v6578_v53, %v6577_v21  ;;  %v6630_v59 = vpack.c.bf16 %v6580_v54, %v6579_v4  ;;  %v6631_v41 = vpack.c.bf16 %v6582_v17, %v6581_v62  ;;  %v6632_v58 = vpack.c.bf16 %v6584_v11, %v6583_v45  ;;  %v15311_v54 = vld [vmem:[#allocation11_spill] sm:$0xff] }
 0x5b9   :  { %9106 = vmatprep.mubr.msk.bf16.mxu0 %vm528_vm1, %v6619_v49  ;;  %v6633_v26 = vpack.c.bf16 %v6586_v42, %v6585_v60  ;;  %v6634_v56 = vpack.c.bf16 %v6588_v57, %v6587_v0  ;;  %v6635_v24 = vpack.c.bf16 %v6590_v35, %v6589_v37  ;;  %v6636_v50 = vpack.c.bf16 %v6592_v1, %v6591_v16 }
 0x5ba   :  { %v6637_v36 = vpack.c.bf16 %v6594_v18, %v6593_v6  ;;  %v6638_v55 = vpack.c.bf16 %v6596_v40, %v6595_v8  ;;  %v6639_v47 = vpack.c.bf16 %v6598_v7, %v6597_v52  ;;  %v6640_v15 = vpack.c.bf16 %v6600_v46, %v6599_v19 }
 0x5bb   :  { %v6641_v43 = vpack.c.bf16 %v6602_v14, %v6601_v29  ;;  %v6642_v20 = vpack.c.bf16 %v6604_v34, %v6603_v12  ;;  %v6643_v30 = vpack.c.bf16 %v6606_v61, %v6605_v31  ;;  %v6644_v21 = vpack.c.bf16 %v6608_v23, %v6607_v63 }
 0x5bc   :  { %v6645_v53 = vpack.c.bf16 %v6610_v22, %v6609_v13  ;;  %v6646_v4 = vpack.c.bf16 %v6612_v2, %v6611_v38  ;;  %v15312_v49 = vmax.f32 %v15311_v54, 0.0  ;;  %v6648_v62 = vpack.c.bf16 %v6616_v27, %v6615_v51 }
 0x5be   :  { %v6647_v17 = vpack.c.bf16 %v15312_v49, %v6613_v25 }
 0x5c0   :  { %9107 = vmatmul.mubr.msk.bf16.gmra.mrb[132].mxu0 %vm528_vm1, %v6620_v44 }
 0x5c1   :  { %9110 = vmatprep.mubr.msk.bf16.mxu0 %vm528_vm1, %v6621_v48 }
 0x5c8   :  { %9111 = vmatmul.mubr.msk.bf16.gmra.mrb[136].mxu0 %vm528_vm1, %v6622_v10 }
 0x5c9   :  { %9114 = vmatprep.mubr.msk.bf16.mxu0 %vm528_vm1, %v6623_v39 }
 0x5d0   :  { %9115 = vmatmul.mubr.msk.bf16.gmra.mrb[140].mxu0 %vm528_vm1, %v6624_v28 }
 0x5d1   :  { %9118 = vmatprep.mubr.msk.bf16.mxu0 %vm528_vm1, %v6625_v32 }
 0x5d8   :  { %9119 = vmatmul.mubr.msk.bf16.gmra.mrb[144].mxu0 %vm528_vm1, %v6626_v3 }
 0x5d9   :  { %9122 = vmatprep.mubr.msk.bf16.mxu0 %vm528_vm1, %v6627_v9 }
 0x5e0   :  { %9123 = vmatmul.mubr.msk.bf16.gmra.mrb[148].mxu0 %vm528_vm1, %v6628_v5 }
 0x5e1   :  { %9126 = vmatprep.mubr.msk.bf16.mxu0 %vm528_vm1, %v6629_v33 }
 0x5e8   :  { %9127 = vmatmul.mubr.msk.bf16.gmra.mrb[152].mxu0 %vm528_vm1, %v6630_v59 }
 0x5e9   :  { %9130 = vmatprep.mubr.msk.bf16.mxu0 %vm528_vm1, %v6631_v41 }
 0x5f0   :  { %9131 = vmatmul.mubr.msk.bf16.gmra.mrb[156].mxu0 %vm528_vm1, %v6632_v58 }
 0x5f1   :  { %9134 = vmatprep.mubr.msk.bf16.mxu0 %vm528_vm1, %v6633_v26 }
 0x5f8   :  { %9135 = vmatmul.mubr.msk.bf16.gmra.mrb[160].mxu0 %vm528_vm1, %v6634_v56 }
 0x5f9   :  { %9138 = vmatprep.mubr.msk.bf16.mxu0 %vm528_vm1, %v6635_v24 }
 0x600   :  { %9139 = vmatmul.mubr.msk.bf16.gmra.mrb[164].mxu0 %vm528_vm1, %v6636_v50 }
 0x601   :  { %9142 = vmatprep.mubr.msk.bf16.mxu0 %vm528_vm1, %v6637_v36 }
 0x608   :  { %9143 = vmatmul.mubr.msk.bf16.gmra.mrb[168].mxu0 %vm528_vm1, %v6638_v55 }
 0x609   :  { %9146 = vmatprep.mubr.msk.bf16.mxu0 %vm528_vm1, %v6639_v47 }
 0x610   :  { %9147 = vmatmul.mubr.msk.bf16.gmra.mrb[172].mxu0 %vm528_vm1, %v6640_v15 }
 0x611   :  { %9150 = vmatprep.mubr.msk.bf16.mxu0 %vm528_vm1, %v6641_v43 }
 0x618   :  { %9151 = vmatmul.mubr.msk.bf16.gmra.mrb[176].mxu0 %vm528_vm1, %v6642_v20 }
 0x619   :  { %9154 = vmatprep.mubr.msk.bf16.mxu0 %vm528_vm1, %v6643_v30 }
 0x620   :  { %9155 = vmatmul.mubr.msk.bf16.gmra.mrb[180].mxu0 %vm528_vm1, %v6644_v21 }
 0x621   :  { %9158 = vmatprep.mubr.msk.bf16.mxu0 %vm528_vm1, %v6645_v53 }
 0x628   :  { %9159 = vmatmul.mubr.msk.bf16.gmra.mrb[184].mxu0 %vm528_vm1, %v6646_v4 }
 0x629   :  { %9162 = vmatprep.mubr.msk.bf16.mxu0 %vm528_vm1, %v6647_v17 }
 0x630   :  { %9163 = vmatmul.mubr.msk.bf16.gmra.mrb[188].mxu0 %vm528_vm1, %v6648_v62 }
 0x68b   :  { %v13328_v45 = vpop.f32.mrb[128].mxu0 }
 0x68c   :  { %v13330_v11 = vpop.f32.mrb[129].mxu0  ;;  %v7176_v57 = vmul.f32 %v13328_v45, %v13328_v45  ;;  %v7043_v6 = vsel %vm140_vm0, %v13328_v45, 0.0 }
 0x68d   :  { %v7174_v60 = vmul.f32 %v13330_v11, %v13330_v11  ;;  %v13334_v42 = vpop.f32.mrb[130].mxu0  ;;  %v7040_v37 = vsel %vm140_vm0, %v13330_v11, 0.0 }
 0x68e   :  { %v13336_v0 = vpop.f32.mrb[131].mxu0  ;;  %v7177_v8 = vmul.f32 %v13334_v42, %v13334_v42  ;;  %v7241_v19 = vsel %vm140_vm0, %v7176_v57, 0.0  ;;  %v7045_v46 = vsel %vm140_vm0, %v13334_v42, 0.0 }
 0x68f   :  { %v7041_v35 = vsel %vm140_vm0, %v13336_v0, 0.0  ;;  %v7175_v16 = vmul.f32 %v13336_v0, %v13336_v0  ;;  %v7238_v18 = vsel %vm140_vm0, %v7174_v60, 0.0 }
 0x690   :  { %v7042_v1 = vadd.f32 %v7041_v35, %v7040_v37  ;;  %v7243_v31 = vsel %vm140_vm0, %v7177_v8, 0.0 }
 0x691   :  { %v7239_v40 = vsel %vm140_vm0, %v7175_v16, 0.0 }
 0x692   :  { %v7044_v52 = vadd.f32 %v7043_v6, %v7042_v1  ;;  %v7240_v7 = vadd.f32 %v7239_v40, %v7238_v18 }
 0x693   :  { %v13355_v29 = vpop.f32.mrb[132].mxu0 }
 0x694   :  { %v7242_v14 = vadd.f32 %v7241_v19, %v7240_v7  ;;  %v13357_v12 = vpop.f32.mrb[133].mxu0  ;;  %v7046_v34 = vadd.f32 %v7045_v46, %v7044_v52  ;;  %v7180_v2 = vmul.f32 %v13355_v29, %v13355_v29  ;;  %v7051_v10 = vsel %vm140_vm0, %v13355_v29, 0.0 }
 0x695   :  { %v7047_v61 = vsel %vm140_vm0, %v13357_v12, 0.0  ;;  %v7178_v63 = vmul.f32 %v13357_v12, %v13357_v12  ;;  %v13364_v23 = vpop.f32.mrb[134].mxu0 }
 0x696   :  { %v7048_v13 = vadd.f32 %v7047_v61, %v7046_v34  ;;  %v7244_v22 = vadd.f32 %v7243_v31, %v7242_v14  ;;  %v13366_v38 = vpop.f32.mrb[135].mxu0  ;;  %v7181_v39 = vmul.f32 %v13364_v23, %v13364_v23  ;;  %v7249_v9 = vsel %vm140_vm0, %v7180_v2, 0.0 }
 0x697   :  { %v7245_v25 = vsel %vm140_vm0, %v7178_v63, 0.0  ;;  %v7049_v51 = vsel %vm140_vm0, %v13366_v38, 0.0  ;;  %v7179_v27 = vmul.f32 %v13366_v38, %v13366_v38  ;;  %v7053_v5 = vsel %vm140_vm0, %v13364_v23, 0.0 }
 0x698   :  { %v7246_v44 = vadd.f32 %v7245_v25, %v7244_v22  ;;  %v7050_v48 = vadd.f32 %v7049_v51, %v7048_v13  ;;  %v7251_v26 = vsel %vm140_vm0, %v7181_v39, 0.0 }
 0x699   :  { %v7247_v28 = vsel %vm140_vm0, %v7179_v27, 0.0 }
 0x69a   :  { %v7052_v32 = vadd.f32 %v7051_v10, %v7050_v48  ;;  %v7248_v3 = vadd.f32 %v7247_v28, %v7246_v44 }
 0x69b   :  { %v13383_v33 = vpop.f32.mrb[136].mxu0 }
 0x69c   :  { %v7250_v59 = vadd.f32 %v7249_v9, %v7248_v3  ;;  %v13385_v41 = vpop.f32.mrb[137].mxu0  ;;  %v7054_v58 = vadd.f32 %v7053_v5, %v7052_v32  ;;  %v7184_v15 = vmul.f32 %v13383_v33, %v13383_v33  ;;  %v7059_v4 = vsel %vm140_vm0, %v13383_v33, 0.0 }
 0x69d   :  { %v7055_v56 = vsel %vm140_vm0, %v13385_v41, 0.0  ;;  %v7182_v24 = vmul.f32 %v13385_v41, %v13385_v41  ;;  %v13392_v50 = vpop.f32.mrb[138].mxu0 }
 0x69e   :  { %v7056_v36 = vadd.f32 %v7055_v56, %v7054_v58  ;;  %v7252_v55 = vadd.f32 %v7251_v26, %v7250_v59  ;;  %v13394_v47 = vpop.f32.mrb[139].mxu0  ;;  %v7185_v54 = vmul.f32 %v13392_v50, %v13392_v50  ;;  %v7257_v60 = vsel %vm140_vm0, %v7184_v15, 0.0 }
 0x69f   :  { %v7253_v43 = vsel %vm140_vm0, %v7182_v24, 0.0  ;;  %v7057_v20 = vsel %vm140_vm0, %v13394_v47, 0.0  ;;  %v7183_v30 = vmul.f32 %v13394_v47, %v13394_v47  ;;  %v7061_v57 = vsel %vm140_vm0, %v13392_v50, 0.0 }
 0x6a0   :  { %v7254_v21 = vadd.f32 %v7253_v43, %v7252_v55  ;;  %v7058_v53 = vadd.f32 %v7057_v20, %v7056_v36  ;;  %v7259_v6 = vsel %vm140_vm0, %v7185_v54, 0.0 }
 0x6a1   :  { %v7255_v49 = vsel %vm140_vm0, %v7183_v30, 0.0 }
 0x6a2   :  { %v7060_v17 = vadd.f32 %v7059_v4, %v7058_v53  ;;  %v7256_v62 = vadd.f32 %v7255_v49, %v7254_v21 }
 0x6a3   :  { %v13411_v37 = vpop.f32.mrb[140].mxu0 }
 0x6a4   :  { %v7258_v35 = vadd.f32 %v7257_v60, %v7256_v62  ;;  %v13413_v16 = vpop.f32.mrb[141].mxu0  ;;  %v7062_v1 = vadd.f32 %v7061_v57, %v7060_v17  ;;  %v7188_v46 = vmul.f32 %v13411_v37, %v13411_v37  ;;  %v7067_v13 = vsel %vm140_vm0, %v13411_v37, 0.0 }
 0x6a5   :  { %v7063_v18 = vsel %vm140_vm0, %v13413_v16, 0.0  ;;  %v7186_v8 = vmul.f32 %v13413_v16, %v13413_v16  ;;  %v13420_v40 = vpop.f32.mrb[142].mxu0 }
 0x6a6   :  { %v7064_v52 = vadd.f32 %v7063_v18, %v7062_v1  ;;  %v7260_v7 = vadd.f32 %v7259_v6, %v7258_v35  ;;  %v13422_v19 = vpop.f32.mrb[143].mxu0  ;;  %v7189_v22 = vmul.f32 %v13420_v40, %v13420_v40  ;;  %v7265_v27 = vsel %vm140_vm0, %v7188_v46, 0.0 }
 0x6a7   :  { %v7261_v14 = vsel %vm140_vm0, %v7186_v8, 0.0  ;;  %v7065_v34 = vsel %vm140_vm0, %v13422_v19, 0.0  ;;  %v7187_v31 = vmul.f32 %v13422_v19, %v13422_v19  ;;  %v7069_v44 = vsel %vm140_vm0, %v13420_v40, 0.0 }
 0x6a8   :  { %v7262_v61 = vadd.f32 %v7261_v14, %v7260_v7  ;;  %v7066_v63 = vadd.f32 %v7065_v34, %v7064_v52  ;;  %v7267_v32 = vsel %vm140_vm0, %v7189_v22, 0.0 }
 0x6a9   :  { %v7263_v2 = vsel %vm140_vm0, %v7187_v31, 0.0 }
 0x6aa   :  { %v7068_v25 = vadd.f32 %v7067_v13, %v7066_v63  ;;  %v7264_v51 = vadd.f32 %v7263_v2, %v7262_v61 }
 0x6ab   :  { %v13439_v48 = vpop.f32.mrb[144].mxu0 }
 0x6ac   :  { %v7266_v10 = vadd.f32 %v7265_v27, %v7264_v51  ;;  %v13441_v39 = vpop.f32.mrb[145].mxu0  ;;  %v7070_v28 = vadd.f32 %v7069_v44, %v7068_v25  ;;  %v7192_v56 = vmul.f32 %v13439_v48, %v13439_v48  ;;  %v7075_v20 = vsel %vm140_vm0, %v13439_v48, 0.0 }
 0x6ad   :  { %v7071_v3 = vsel %vm140_vm0, %v13441_v39, 0.0  ;;  %v7190_v9 = vmul.f32 %v13441_v39, %v13441_v39  ;;  %v13448_v5 = vpop.f32.mrb[146].mxu0 }
 0x6ae   :  { %v7072_v59 = vadd.f32 %v7071_v3, %v7070_v28  ;;  %v7268_v58 = vadd.f32 %v7267_v32, %v7266_v10  ;;  %v13450_v26 = vpop.f32.mrb[147].mxu0  ;;  %v7193_v30 = vmul.f32 %v13448_v5, %v13448_v5  ;;  %v7273_v54 = vsel %vm140_vm0, %v7192_v56, 0.0 }
 0x6af   :  { %v7269_v24 = vsel %vm140_vm0, %v7190_v9, 0.0  ;;  %v7073_v36 = vsel %vm140_vm0, %v13450_v26, 0.0  ;;  %v7191_v55 = vmul.f32 %v13450_v26, %v13450_v26  ;;  %v7077_v49 = vsel %vm140_vm0, %v13448_v5, 0.0 }
 0x6b0   :  { %v7270_v15 = vadd.f32 %v7269_v24, %v7268_v58  ;;  %v7074_v43 = vadd.f32 %v7073_v36, %v7072_v59  ;;  %v7275_v35 = vsel %vm140_vm0, %v7193_v30, 0.0 }
 0x6b1   :  { %v7271_v21 = vsel %vm140_vm0, %v7191_v55, 0.0 }
 0x6b2   :  { %v7076_v53 = vadd.f32 %v7075_v20, %v7074_v43  ;;  %v7272_v4 = vadd.f32 %v7271_v21, %v7270_v15 }
 0x6b3   :  { %v13467_v17 = vpop.f32.mrb[148].mxu0 }
 0x6b4   :  { %v7274_v62 = vadd.f32 %v7273_v54, %v7272_v4  ;;  %v13469_v60 = vpop.f32.mrb[149].mxu0  ;;  %v7078_v57 = vadd.f32 %v7077_v49, %v7076_v53  ;;  %v7196_v46 = vmul.f32 %v13467_v17, %v13467_v17  ;;  %v7083_v13 = vsel %vm140_vm0, %v13467_v17, 0.0 }
 0x6b5   :  { %v7079_v1 = vsel %vm140_vm0, %v13469_v60, 0.0  ;;  %v7194_v6 = vmul.f32 %v13469_v60, %v13469_v60  ;;  %v13476_v18 = vpop.f32.mrb[150].mxu0 }
 0x6b6   :  { %v7080_v8 = vadd.f32 %v7079_v1, %v7078_v57  ;;  %v7276_v52 = vadd.f32 %v7275_v35, %v7274_v62  ;;  %v13478_v7 = vpop.f32.mrb[151].mxu0  ;;  %v7197_v22 = vmul.f32 %v13476_v18, %v13476_v18  ;;  %v7281_v27 = vsel %vm140_vm0, %v7196_v46, 0.0 }
 0x6b7   :  { %v7277_v14 = vsel %vm140_vm0, %v7194_v6, 0.0  ;;  %v7081_v34 = vsel %vm140_vm0, %v13478_v7, 0.0  ;;  %v7195_v31 = vmul.f32 %v13478_v7, %v13478_v7  ;;  %v7085_v44 = vsel %vm140_vm0, %v13476_v18, 0.0 }
 0x6b8   :  { %v7278_v61 = vadd.f32 %v7277_v14, %v7276_v52  ;;  %v7082_v63 = vadd.f32 %v7081_v34, %v7080_v8  ;;  %v7283_v9 = vsel %vm140_vm0, %v7197_v22, 0.0 }
 0x6b9   :  { %v7279_v2 = vsel %vm140_vm0, %v7195_v31, 0.0 }
 0x6ba   :  { %v7084_v25 = vadd.f32 %v7083_v13, %v7082_v63  ;;  %v7280_v51 = vadd.f32 %v7279_v2, %v7278_v61 }
 0x6bb   :  { %v13495_v10 = vpop.f32.mrb[152].mxu0 }
 0x6bc   :  { %v7282_v28 = vadd.f32 %v7281_v27, %v7280_v51  ;;  %v13497_v32 = vpop.f32.mrb[153].mxu0  ;;  %v7086_v3 = vadd.f32 %v7085_v44, %v7084_v25  ;;  %v7200_v15 = vmul.f32 %v13495_v10, %v13495_v10  ;;  %v7091_v4 = vsel %vm140_vm0, %v13495_v10, 0.0 }
 0x6bd   :  { %v7087_v59 = vsel %vm140_vm0, %v13497_v32, 0.0  ;;  %v7198_v58 = vmul.f32 %v13497_v32, %v13497_v32  ;;  %v13504_v56 = vpop.f32.mrb[154].mxu0 }
 0x6be   :  { %v7088_v24 = vadd.f32 %v7087_v59, %v7086_v3  ;;  %v7284_v36 = vadd.f32 %v7283_v9, %v7282_v28  ;;  %v13506_v55 = vpop.f32.mrb[155].mxu0  ;;  %v7201_v54 = vmul.f32 %v13504_v56, %v13504_v56  ;;  %v7289_v35 = vsel %vm140_vm0, %v7200_v15, 0.0 }
 0x6bf   :  { %v7285_v43 = vsel %vm140_vm0, %v7198_v58, 0.0  ;;  %v7089_v20 = vsel %vm140_vm0, %v13506_v55, 0.0  ;;  %v7199_v30 = vmul.f32 %v13506_v55, %v13506_v55  ;;  %v7093_v1 = vsel %vm140_vm0, %v13504_v56, 0.0 }
 0x6c0   :  { %v7286_v21 = vadd.f32 %v7285_v43, %v7284_v36  ;;  %v7090_v53 = vadd.f32 %v7089_v20, %v7088_v24  ;;  %v7291_v14 = vsel %vm140_vm0, %v7201_v54, 0.0 }
 0x6c1   :  { %v7287_v49 = vsel %vm140_vm0, %v7199_v30, 0.0 }
 0x6c2   :  { %v7092_v62 = vadd.f32 %v7091_v4, %v7090_v53  ;;  %v7288_v57 = vadd.f32 %v7287_v49, %v7286_v21 }
 0x6c3   :  { %v13523_v6 = vpop.f32.mrb[156].mxu0 }
 0x6c4   :  { %v7290_v8 = vadd.f32 %v7289_v35, %v7288_v57  ;;  %v13525_v52 = vpop.f32.mrb[157].mxu0  ;;  %v7094_v46 = vadd.f32 %v7093_v1, %v7092_v62  ;;  %v7204_v2 = vmul.f32 %v13523_v6, %v13523_v6  ;;  %v7099_v3 = vsel %vm140_vm0, %v13523_v6, 0.0 }
 0x6c5   :  { %v7095_v34 = vsel %vm140_vm0, %v13525_v52, 0.0  ;;  %v7202_v31 = vmul.f32 %v13525_v52, %v13525_v52  ;;  %v13532_v61 = vpop.f32.mrb[158].mxu0 }
 0x6c6   :  { %v7096_v63 = vadd.f32 %v7095_v34, %v7094_v46  ;;  %v7292_v13 = vadd.f32 %v7291_v14, %v7290_v8  ;;  %v13534_v22 = vpop.f32.mrb[159].mxu0  ;;  %v7205_v9 = vmul.f32 %v13532_v61, %v13532_v61  ;;  %v7297_v36 = vsel %vm140_vm0, %v7204_v2, 0.0 }
 0x6c7   :  { %v7293_v25 = vsel %vm140_vm0, %v7202_v31, 0.0  ;;  %v7097_v51 = vsel %vm140_vm0, %v13534_v22, 0.0  ;;  %v7203_v27 = vmul.f32 %v13534_v22, %v13534_v22  ;;  %v7101_v15 = vsel %vm140_vm0, %v13532_v61, 0.0 }
 0x6c8   :  { %v7294_v44 = vadd.f32 %v7293_v25, %v7292_v13  ;;  %v7098_v28 = vadd.f32 %v7097_v51, %v7096_v63  ;;  %v7299_v53 = vsel %vm140_vm0, %v7205_v9, 0.0 }
 0x6c9   :  { %v7295_v59 = vsel %vm140_vm0, %v7203_v27, 0.0 }
 0x6ca   :  { %v7100_v58 = vadd.f32 %v7099_v3, %v7098_v28  ;;  %v7296_v24 = vadd.f32 %v7295_v59, %v7294_v44 }
 0x6cb   :  { %v13551_v43 = vpop.f32.mrb[160].mxu0 }
 0x6cc   :  { %v7298_v20 = vadd.f32 %v7297_v36, %v7296_v24  ;;  %v13553_v30 = vpop.f32.mrb[161].mxu0  ;;  %v7102_v21 = vadd.f32 %v7101_v15, %v7100_v58  ;;  %v7208_v1 = vmul.f32 %v13551_v43, %v13551_v43  ;;  %v7107_v63 = vsel %vm140_vm0, %v13551_v43, 0.0 }
 0x6cd   :  { %v7103_v4 = vsel %vm140_vm0, %v13553_v30, 0.0  ;;  %v7206_v54 = vmul.f32 %v13553_v30, %v13553_v30  ;;  %v13560_v49 = vpop.f32.mrb[162].mxu0 }
 0x6ce   :  { %v7104_v62 = vadd.f32 %v7103_v4, %v7102_v21  ;;  %v7300_v57 = vadd.f32 %v7299_v53, %v7298_v20  ;;  %v13562_v35 = vpop.f32.mrb[163].mxu0  ;;  %v7209_v13 = vmul.f32 %v13560_v49, %v13560_v49  ;;  %v7305_v27 = vsel %vm140_vm0, %v7208_v1, 0.0 }
 0x6cf   :  { %v7301_v8 = vsel %vm140_vm0, %v7206_v54, 0.0  ;;  %v7105_v46 = vsel %vm140_vm0, %v13562_v35, 0.0  ;;  %v7207_v14 = vmul.f32 %v13562_v35, %v13562_v35  ;;  %v7109_v44 = vsel %vm140_vm0, %v13560_v49, 0.0 }
 0x6d0   :  { %v7302_v34 = vadd.f32 %v7301_v8, %v7300_v57  ;;  %v7106_v31 = vadd.f32 %v7105_v46, %v7104_v62  ;;  %v7307_v58 = vsel %vm140_vm0, %v7209_v13, 0.0 }
 0x6d1   :  { %v7303_v2 = vsel %vm140_vm0, %v7207_v14, 0.0 }
 0x6d2   :  { %v7108_v25 = vadd.f32 %v7107_v63, %v7106_v31  ;;  %v7304_v51 = vadd.f32 %v7303_v2, %v7302_v34 }
 0x6d3   :  { %v13579_v28 = vpop.f32.mrb[164].mxu0 }
 0x6d4   :  { %v7306_v3 = vadd.f32 %v7305_v27, %v7304_v51  ;;  %v13581_v9 = vpop.f32.mrb[165].mxu0  ;;  %v7110_v59 = vadd.f32 %v7109_v44, %v7108_v25  ;;  %v7212_v4 = vmul.f32 %v13579_v28, %v13579_v28  ;;  %v7115_v46 = vsel %vm140_vm0, %v13579_v28, 0.0 }
 0x6d5   :  { %v7111_v24 = vsel %vm140_vm0, %v13581_v9, 0.0  ;;  %v7210_v36 = vmul.f32 %v13581_v9, %v13581_v9  ;;  %v13588_v15 = vpop.f32.mrb[166].mxu0 }
 0x6d6   :  { %v7112_v20 = vadd.f32 %v7111_v24, %v7110_v59  ;;  %v7308_v21 = vadd.f32 %v7307_v58, %v7306_v3  ;;  %v13590_v53 = vpop.f32.mrb[167].mxu0  ;;  %v7213_v14 = vmul.f32 %v13588_v15, %v13588_v15  ;;  %v7313_v13 = vsel %vm140_vm0, %v7212_v4, 0.0 }
 0x6d7   :  { %v7309_v54 = vsel %vm140_vm0, %v7210_v36, 0.0  ;;  %v7113_v62 = vsel %vm140_vm0, %v13590_v53, 0.0  ;;  %v7211_v57 = vmul.f32 %v13590_v53, %v13590_v53  ;;  %v7117_v2 = vsel %vm140_vm0, %v13588_v15, 0.0 }
 0x6d8   :  { %v7310_v1 = vadd.f32 %v7309_v54, %v7308_v21  ;;  %v7114_v8 = vadd.f32 %v7113_v62, %v7112_v20  ;;  %v7315_v3 = vsel %vm140_vm0, %v7213_v14, 0.0 }
 0x6d9   :  { %v7311_v34 = vsel %vm140_vm0, %v7211_v57, 0.0 }
 0x6da   :  { %v7116_v31 = vadd.f32 %v7115_v46, %v7114_v8  ;;  %v7312_v63 = vadd.f32 %v7311_v34, %v7310_v1 }
 0x6db   :  { %v13607_v25 = vpop.f32.mrb[168].mxu0 }
 0x6dc   :  { %15313 = vst [vmem:[#allocation28_spill] sm:$0xff] %v13607_v25  ;;  %v7314_v51 = vadd.f32 %v7313_v13, %v7312_v63  ;;  %v13609_v27 = vpop.f32.mrb[169].mxu0  ;;  %v7118_v44 = vadd.f32 %v7117_v2, %v7116_v31  ;;  %v7216_v4 = vmul.f32 %v13607_v25, %v13607_v25  ;;  %v7123_v46 = vsel %vm140_vm0, %v13607_v25, 0.0 }
 0x6dd   :  { %15314 = vst [vmem:[#allocation5_spill] sm:$0xff] %v13609_v27  ;;  %v7119_v59 = vsel %vm140_vm0, %v13609_v27, 0.0  ;;  %v7214_v58 = vmul.f32 %v13609_v27, %v13609_v27  ;;  %v13616_v24 = vpop.f32.mrb[170].mxu0 }
 0x6de   :  { %15315 = vst [vmem:[#allocation6_spill] sm:$0xff] %v13616_v24  ;;  %v7120_v36 = vadd.f32 %v7119_v59, %v7118_v44  ;;  %v7316_v20 = vadd.f32 %v7315_v3, %v7314_v51  ;;  %v13618_v21 = vpop.f32.mrb[171].mxu0  ;;  %v7217_v14 = vmul.f32 %v13616_v24, %v13616_v24  ;;  %v7321_v13 = vsel %vm140_vm0, %v7216_v4, 0.0 }
 0x6df   :  { %15316 = vst [vmem:[#allocation4_spill] sm:$0xff] %v13618_v21  ;;  %v7317_v54 = vsel %vm140_vm0, %v7214_v58, 0.0  ;;  %v7121_v62 = vsel %vm140_vm0, %v13618_v21, 0.0  ;;  %v7215_v57 = vmul.f32 %v13618_v21, %v13618_v21  ;;  %v7125_v2 = vsel %vm140_vm0, %v13616_v24, 0.0 }
 0x6e0   :  { %v7318_v1 = vadd.f32 %v7317_v54, %v7316_v20  ;;  %v7122_v8 = vadd.f32 %v7121_v62, %v7120_v36  ;;  %v7323_v58 = vsel %vm140_vm0, %v7217_v14, 0.0 }
 0x6e1   :  { %v7319_v34 = vsel %vm140_vm0, %v7215_v57, 0.0 }
 0x6e2   :  { %v7124_v31 = vadd.f32 %v7123_v46, %v7122_v8  ;;  %v7320_v63 = vadd.f32 %v7319_v34, %v7318_v1 }
 0x6e3   :  { %v13635_v51 = vpop.f32.mrb[172].mxu0 }
 0x6e4   :  { %15317 = vst [vmem:[#allocation9_spill] sm:$0xff] %v13635_v51  ;;  %v7322_v44 = vadd.f32 %v7321_v13, %v7320_v63  ;;  %v13637_v3 = vpop.f32.mrb[173].mxu0  ;;  %v7126_v59 = vadd.f32 %v7125_v2, %v7124_v31  ;;  %v7220_v1 = vmul.f32 %v13635_v51, %v13635_v51  ;;  %v7131_v63 = vsel %vm140_vm0, %v13635_v51, 0.0 }
 0x6e5   :  { %15318 = vst [vmem:[#allocation8_spill] sm:$0xff] %v13637_v3  ;;  %v7127_v36 = vsel %vm140_vm0, %v13637_v3, 0.0  ;;  %v7218_v20 = vmul.f32 %v13637_v3, %v13637_v3  ;;  %v13644_v54 = vpop.f32.mrb[174].mxu0 }
 0x6e6   :  { %15319 = vst [vmem:[#allocation15_spill] sm:$0xff] %v13644_v54  ;;  %v7128_v4 = vadd.f32 %v7127_v36, %v7126_v59  ;;  %v7324_v62 = vadd.f32 %v7323_v58, %v7322_v44  ;;  %v13646_v57 = vpop.f32.mrb[175].mxu0  ;;  %v7221_v13 = vmul.f32 %v13644_v54, %v13644_v54  ;;  %v7329_v58 = vsel %vm140_vm0, %v7220_v1, 0.0 }
 0x6e7   :  { %15320 = vst [vmem:[#allocation17_spill] sm:$0xff] %v13646_v57  ;;  %v7325_v8 = vsel %vm140_vm0, %v7218_v20, 0.0  ;;  %v7129_v46 = vsel %vm140_vm0, %v13646_v57, 0.0  ;;  %v7219_v14 = vmul.f32 %v13646_v57, %v13646_v57  ;;  %v7133_v36 = vsel %vm140_vm0, %v13644_v54, 0.0 }
 0x6e8   :  { %v7326_v34 = vadd.f32 %v7325_v8, %v7324_v62  ;;  %v7130_v31 = vadd.f32 %v7129_v46, %v7128_v4  ;;  %v7331_v8 = vsel %vm140_vm0, %v7221_v13, 0.0 }
 0x6e9   :  { %v7327_v2 = vsel %vm140_vm0, %v7219_v14, 0.0 }
 0x6ea   :  { %v7132_v44 = vadd.f32 %v7131_v63, %v7130_v31  ;;  %v7328_v59 = vadd.f32 %v7327_v2, %v7326_v34 }
 0x6eb   :  { %v13663_v20 = vpop.f32.mrb[176].mxu0 }
 0x6ec   :  { %15321 = vst [vmem:[#allocation10_spill] sm:$0xff] %v13663_v20  ;;  %v7330_v57 = vadd.f32 %v7329_v58, %v7328_v59  ;;  %v13665_v62 = vpop.f32.mrb[177].mxu0  ;;  %v7134_v4 = vadd.f32 %v7133_v36, %v7132_v44  ;;  %v7224_v2 = vmul.f32 %v13663_v20, %v13663_v20 }
 0x6ed   :  { %15322 = vst [vmem:[#allocation14_spill] sm:$0xff] %v13665_v62  ;;  %v7135_v46 = vsel %vm140_vm0, %v13665_v62, 0.0  ;;  %v7222_v14 = vmul.f32 %v13665_v62, %v13665_v62  ;;  %v13672_v34 = vpop.f32.mrb[178].mxu0  ;;  %v7139_v62 = vsel %vm140_vm0, %v13663_v20, 0.0 }
 0x6ee   :  { %15323 = vst [vmem:[#allocation16_spill] sm:$0xff] %v13672_v34  ;;  %v7136_v1 = vadd.f32 %v7135_v46, %v7134_v4  ;;  %v7332_v31 = vadd.f32 %v7331_v8, %v7330_v57  ;;  %v13674_v63 = vpop.f32.mrb[179].mxu0  ;;  %v7225_v57 = vmul.f32 %v13672_v34, %v13672_v34  ;;  %v7141_v54 = vsel %vm140_vm0, %v13672_v34, 0.0 }
 0x6ef   :  { %15324 = vst [vmem:[#allocation13_spill] sm:$0xff] %v13674_v63  ;;  %v7333_v59 = vsel %vm140_vm0, %v7222_v14, 0.0  ;;  %v7137_v13 = vsel %vm140_vm0, %v13674_v63, 0.0  ;;  %v7223_v44 = vmul.f32 %v13674_v63, %v13674_v63  ;;  %v7337_v14 = vsel %vm140_vm0, %v7224_v2, 0.0 }
 0x6f0   :  { %v7334_v58 = vadd.f32 %v7333_v59, %v7332_v31  ;;  %v7138_v36 = vadd.f32 %v7137_v13, %v7136_v1  ;;  %v7339_v59 = vsel %vm140_vm0, %v7225_v57, 0.0 }
 0x6f1   :  { %v7335_v4 = vsel %vm140_vm0, %v7223_v44, 0.0 }
 0x6f2   :  { %v7140_v8 = vadd.f32 %v7139_v62, %v7138_v36  ;;  %v7336_v46 = vadd.f32 %v7335_v4, %v7334_v58 }
 0x6f3   :  { %v13691_v51 = vpop.f32.mrb[180].mxu0 }
 0x6f4   :  { %15325 = vst [vmem:[#allocation19_spill] sm:$0xff] %v13691_v51  ;;  %v7338_v63 = vadd.f32 %v7337_v14, %v7336_v46  ;;  %v13693_v31 = vpop.f32.mrb[181].mxu0  ;;  %v7142_v1 = vadd.f32 %v7141_v54, %v7140_v8  ;;  %v7228_v4 = vmul.f32 %v13691_v51, %v13691_v51 }
 0x6f5   :  { %15326 = vst [vmem:[#allocation18_spill] sm:$0xff] %v13693_v31  ;;  %v7143_v13 = vsel %vm140_vm0, %v13693_v31, 0.0  ;;  %v7226_v62 = vmul.f32 %v13693_v31, %v13693_v31  ;;  %v13700_v44 = vpop.f32.mrb[182].mxu0  ;;  %v7147_v31 = vsel %vm140_vm0, %v13691_v51, 0.0 }
 0x6f6   :  { %15327 = vst [vmem:[#allocation20_spill] sm:$0xff] %v13700_v44  ;;  %v7144_v2 = vadd.f32 %v7143_v13, %v7142_v1  ;;  %v7340_v58 = vadd.f32 %v7339_v59, %v7338_v63  ;;  %v13702_v36 = vpop.f32.mrb[183].mxu0  ;;  %v7229_v63 = vmul.f32 %v13700_v44, %v13700_v44  ;;  %v7149_v34 = vsel %vm140_vm0, %v13700_v44, 0.0 }
 0x6f7   :  { %15328 = vst [vmem:[#allocation25_spill] sm:$0xff] %v13702_v36  ;;  %v7341_v46 = vsel %vm140_vm0, %v7226_v62, 0.0  ;;  %v7145_v54 = vsel %vm140_vm0, %v13702_v36, 0.0  ;;  %v7227_v57 = vmul.f32 %v13702_v36, %v13702_v36  ;;  %v7345_v62 = vsel %vm140_vm0, %v7228_v4, 0.0 }
 0x6f8   :  { %v7342_v8 = vadd.f32 %v7341_v46, %v7340_v58  ;;  %v7146_v14 = vadd.f32 %v7145_v54, %v7144_v2  ;;  %v7347_v46 = vsel %vm140_vm0, %v7229_v63, 0.0 }
 0x6f9   :  { %v7343_v1 = vsel %vm140_vm0, %v7227_v57, 0.0 }
 0x6fa   :  { %v7148_v59 = vadd.f32 %v7147_v31, %v7146_v14  ;;  %v7344_v13 = vadd.f32 %v7343_v1, %v7342_v8 }
 0x6fb   :  { %v13719_v20 = vpop.f32.mrb[184].mxu0 }
 0x6fc   :  { %15329 = vst [vmem:[#allocation12_spill] sm:$0xff] %v13719_v20  ;;  %v7346_v36 = vadd.f32 %v7345_v62, %v7344_v13  ;;  %v13721_v58 = vpop.f32.mrb[185].mxu0  ;;  %v7150_v2 = vadd.f32 %v7149_v34, %v7148_v59  ;;  %v7232_v1 = vmul.f32 %v13719_v20, %v13719_v20 }
 0x6fd   :  { %15330 = vst [vmem:[#allocation23_spill] sm:$0xff] %v13721_v58  ;;  %v7151_v54 = vsel %vm140_vm0, %v13721_v58, 0.0  ;;  %v7230_v31 = vmul.f32 %v13721_v58, %v13721_v58  ;;  %v13728_v57 = vpop.f32.mrb[186].mxu0  ;;  %v7155_v58 = vsel %vm140_vm0, %v13719_v20, 0.0 }
 0x6fe   :  { %15331 = vst [vmem:[#allocation24_spill] sm:$0xff] %v13728_v57  ;;  %v7152_v4 = vadd.f32 %v7151_v54, %v7150_v2  ;;  %v7348_v8 = vadd.f32 %v7347_v46, %v7346_v36  ;;  %v13730_v14 = vpop.f32.mrb[187].mxu0  ;;  %v7233_v36 = vmul.f32 %v13728_v57, %v13728_v57  ;;  %v7157_v44 = vsel %vm140_vm0, %v13728_v57, 0.0 }
 0x6ff   :  { %15332 = vst [vmem:[#allocation26_spill] sm:$0xff] %v13730_v14  ;;  %v7349_v13 = vsel %vm140_vm0, %v7230_v31, 0.0  ;;  %v7153_v34 = vsel %vm140_vm0, %v13730_v14, 0.0  ;;  %v7231_v63 = vmul.f32 %v13730_v14, %v13730_v14  ;;  %v7353_v31 = vsel %vm140_vm0, %v7232_v1, 0.0 }
 0x700   :  { %v7350_v59 = vadd.f32 %v7349_v13, %v7348_v8  ;;  %v7154_v62 = vadd.f32 %v7153_v34, %v7152_v4  ;;  %v7355_v13 = vsel %vm140_vm0, %v7233_v36, 0.0 }
 0x701   :  { %v7351_v2 = vsel %vm140_vm0, %v7231_v63, 0.0 }
 0x702   :  { %v7156_v46 = vadd.f32 %v7155_v58, %v7154_v62  ;;  %v7352_v54 = vadd.f32 %v7351_v2, %v7350_v59 }
 0x703   :  { %v13747_v51 = vpop.f32.mrb[188].mxu0 }
 0x704   :  { %15333 = vst [vmem:[#allocation22_spill] sm:$0xff] %v13747_v51  ;;  %v7354_v14 = vadd.f32 %v7353_v31, %v7352_v54  ;;  %v13749_v8 = vpop.f32.mrb[189].mxu0  ;;  %v7158_v4 = vadd.f32 %v7157_v44, %v7156_v46  ;;  %v7236_v2 = vmul.f32 %v13747_v51, %v13747_v51 }
 0x705   :  { %15334 = vst [vmem:[#allocation27_spill] sm:$0xff] %v13749_v8  ;;  %v7159_v34 = vsel %vm140_vm0, %v13749_v8, 0.0  ;;  %v7234_v58 = vmul.f32 %v13749_v8, %v13749_v8  ;;  %v13756_v63 = vpop.f32.mrb[190].mxu0  ;;  %v7163_v8 = vsel %vm140_vm0, %v13747_v51, 0.0 }
 0x706   :  { %15335 = vst [vmem:[#allocation3_spill] sm:$0xff] %v13756_v63  ;;  %v7160_v1 = vadd.f32 %v7159_v34, %v7158_v4  ;;  %v7356_v59 = vadd.f32 %v7355_v13, %v7354_v14  ;;  %v13758_v62 = vpop.f32.mrb[191].mxu0  ;;  %v7237_v14 = vmul.f32 %v13756_v63, %v13756_v63  ;;  %v7165_v57 = vsel %vm140_vm0, %v13756_v63, 0.0 }
 0x707   :  { %15336 = vst [vmem:[#allocation7_spill] sm:$0xff] %v13758_v62  ;;  %v7357_v54 = vsel %vm140_vm0, %v7234_v58, 0.0  ;;  %v7161_v44 = vsel %vm140_vm0, %v13758_v62, 0.0  ;;  %v7235_v36 = vmul.f32 %v13758_v62, %v13758_v62  ;;  %v7361_v58 = vsel %vm140_vm0, %v7236_v2, 0.0 }
 0x708   :  { %v7358_v46 = vadd.f32 %v7357_v54, %v7356_v59  ;;  %v7162_v31 = vadd.f32 %v7161_v44, %v7160_v1  ;;  %v7363_v59 = vsel %vm140_vm0, %v7237_v14, 0.0 }
 0x709   :  { %v7359_v4 = vsel %vm140_vm0, %v7235_v36, 0.0 }
 0x70a   :  { %v7164_v13 = vadd.f32 %v7163_v8, %v7162_v31  ;;  %v7360_v34 = vadd.f32 %v7359_v4, %v7358_v46 }
 0x70c   :  { %v7166_v20 = vadd.f32 %v7165_v57, %v7164_v13  ;;  %v7362_v3 = vadd.f32 %v7361_v58, %v7360_v34 }
 0x70e   :  { %v7167_v1 = vrot.slane %v7166_v20, 4  ;;  %v7364_v54 = vadd.f32 %v7363_v59, %v7362_v3  ;;  %v7038_v3 = vld [vmem:[%s15021_s8] sm:$0x1] }
 0x710   :  { %v7168_v44 = vadd.f32 %v7167_v1, %v7166_v20  ;;  %v7365_v51 = vrot.slane %v7364_v54, 4 }
 0x712   :  { %v7169_v62 = vrot.slane %v7168_v44, 2  ;;  %v7366_v24 = vadd.f32 %v7365_v51, %v7364_v54  ;;  %v15338_v54 = vld [vmem:[#allocation5_spill] sm:$0xff] }
 0x714   :  { %v7170_v25 = vadd.f32 %v7169_v62, %v7168_v44  ;;  %v7367_v21 = vrot.slane %v7366_v24, 2  ;;  %v15339_v44 = vld [vmem:[#allocation4_spill] sm:$0xff] }
 0x716   :  { %v7171_v36 = vrot.slane %v7170_v25, 1  ;;  %v7368_v8 = vadd.f32 %v7367_v21, %v7366_v24  ;;  %v13782_v24 = vld [vmem:[%s15022_s9] sm:$0x1]  ;;  %v15337_v21 = vld [vmem:[#allocation29_spill] sm:$0xff] }
 0x718   :  { %v7172_v46 = vadd.f32 %v7171_v36, %v7170_v25  ;;  %v7369_v31 = vrot.slane %v7368_v8, 1  ;;  %v15340_v36 = vld [vmem:[#allocation28_spill] sm:$0xff] }
 0x71a   :  { %v7173_v2 = vmul.f32 0.001953125, %v7172_v46  ;;  %v7370_v4 = vadd.f32 %v7369_v31, %v7368_v8  ;;  %v15341_v8 = vld [vmem:[#allocation6_spill] sm:$0xff]  ;;  %v15342_v46 = vld [vmem:[#allocation8_spill] sm:$0xff]  ;;  %v15343_v31 = vld [vmem:[#allocation17_spill] sm:$0xff] }
 0x71c   :  { %v7371_v27 = vmul.f32 0.001953125, %v7370_v4  ;;  %v7372_v63 = vmul.f32 %v7173_v2, %v7173_v2  ;;  %v15344_v4 = vld [vmem:[#allocation9_spill] sm:$0xff] }
 0x71e   :  { %v7373_v57 = vsub.f32 %v7371_v27, %v7372_v63  ;;  %v15357_v27 = vld [vmem:[#allocation19_spill] sm:$0xff] }
 0x720   :  { %v7374_v13 = vmax.f32 %v7373_v57, 0.0 }
 0x722   :  { %v7375_v34 = vadd.f32 1e-05, %v7374_v13  ;;  %v15345_v13 = vld [vmem:[#allocation15_spill] sm:$0xff] }
 0x724   :  { %9697 = vrsqrt.f32 %v7375_v34 }
 0x72e   :  { %v9698_v20 = vpop.eup %9697 }
 0x72f   :  { %v7377_v51 = vmul.f32 %v9698_v20, %v7038_v3  ;;  %v15346_v3 = vld [vmem:[#allocation14_spill] sm:$0xff] }
 0x731   :  { %v13784_v25 = vmul.f32 %v7377_v51, %v7173_v2  ;;  %v13787_v62 = vrot.slane %v7377_v51, %v15337_v21  ;;  %v15347_v51 = vld [vmem:[#allocation13_spill] sm:$0xff] }
 0x733   :  { %v13793_v63 = vmul.f32 %v13787_v62, %v13330_v11  ;;  %v13797_v14 = vmul.f32 %v13787_v62, %v13336_v0  ;;  %v13801_v58 = vmul.f32 %v13328_v45, %v13787_v62  ;;  %v13805_v59 = vmul.f32 %v13334_v42, %v13787_v62 }
 0x734   :  { %v13809_v1 = vmul.f32 %v13787_v62, %v13357_v12  ;;  %v13813_v11 = vmul.f32 %v13787_v62, %v13366_v38  ;;  %v13817_v0 = vmul.f32 %v13355_v29, %v13787_v62  ;;  %v13821_v45 = vmul.f32 %v13364_v23, %v13787_v62 }
 0x735   :  { %v13825_v42 = vmul.f32 %v13787_v62, %v13385_v41  ;;  %v13829_v12 = vmul.f32 %v13787_v62, %v13394_v47  ;;  %v13833_v38 = vmul.f32 %v13383_v33, %v13787_v62  ;;  %v13837_v29 = vmul.f32 %v13392_v50, %v13787_v62 }
 0x736   :  { %v13841_v23 = vmul.f32 %v13787_v62, %v13413_v16  ;;  %v13845_v41 = vmul.f32 %v13787_v62, %v13422_v19  ;;  %v13849_v47 = vmul.f32 %v13411_v37, %v13787_v62  ;;  %v13853_v33 = vmul.f32 %v13420_v40, %v13787_v62 }
 0x737   :  { %v13857_v50 = vmul.f32 %v13787_v62, %v13441_v39  ;;  %v13861_v16 = vmul.f32 %v13787_v62, %v13450_v26  ;;  %v13865_v19 = vmul.f32 %v13439_v48, %v13787_v62  ;;  %v13869_v37 = vmul.f32 %v13448_v5, %v13787_v62 }
 0x738   :  { %v13873_v40 = vmul.f32 %v13787_v62, %v13469_v60  ;;  %v13877_v39 = vmul.f32 %v13787_v62, %v13478_v7  ;;  %v13881_v26 = vmul.f32 %v13467_v17, %v13787_v62  ;;  %v13885_v48 = vmul.f32 %v13476_v18, %v13787_v62 }
 0x739   :  { %v13889_v5 = vmul.f32 %v13787_v62, %v13497_v32  ;;  %v13893_v60 = vmul.f32 %v13787_v62, %v13506_v55  ;;  %v13897_v7 = vmul.f32 %v13495_v10, %v13787_v62  ;;  %v13901_v17 = vmul.f32 %v13504_v56, %v13787_v62 }
 0x73a   :  { %v13905_v18 = vmul.f32 %v13787_v62, %v13525_v52  ;;  %v13909_v32 = vmul.f32 %v13787_v62, %v13534_v22  ;;  %v13913_v55 = vmul.f32 %v13523_v6, %v13787_v62  ;;  %v13917_v10 = vmul.f32 %v13532_v61, %v13787_v62 }
 0x73b   :  { %v13921_v56 = vmul.f32 %v13787_v62, %v13553_v30  ;;  %v13925_v52 = vmul.f32 %v13787_v62, %v13562_v35  ;;  %v13929_v22 = vmul.f32 %v13551_v43, %v13787_v62  ;;  %v13933_v6 = vmul.f32 %v13560_v49, %v13787_v62 }
 0x73c   :  { %v13937_v61 = vmul.f32 %v13787_v62, %v13581_v9  ;;  %v13941_v30 = vmul.f32 %v13787_v62, %v13590_v53  ;;  %v13945_v35 = vmul.f32 %v13579_v28, %v13787_v62  ;;  %v13949_v43 = vmul.f32 %v13588_v15, %v13787_v62 }
 0x73d   :  { %v13953_v49 = vmul.f32 %v13787_v62, %v15338_v54  ;;  %v13957_v9 = vmul.f32 %v13787_v62, %v15339_v44  ;;  %v13961_v53 = vmul.f32 %v15340_v36, %v13787_v62  ;;  %v13965_v28 = vmul.f32 %v15341_v8, %v13787_v62  ;;  %v15349_v44 = vld [vmem:[#allocation10_spill] sm:$0xff]  ;;  %v15351_v8 = vld [vmem:[#allocation16_spill] sm:$0xff] }
 0x73e   :  { %v13969_v15 = vmul.f32 %v13787_v62, %v15342_v46  ;;  %v13973_v2 = vmul.f32 %v13787_v62, %v15343_v31  ;;  %v13977_v57 = vmul.f32 %v15344_v4, %v13787_v62  ;;  %v13981_v34 = vmul.f32 %v15345_v13, %v13787_v62  ;;  %v15353_v31 = vld [vmem:[#allocation18_spill] sm:$0xff]  ;;  %v15355_v13 = vld [vmem:[#allocation25_spill] sm:$0xff] }
 0x73f   :  { %v13985_v20 = vmul.f32 %v13787_v62, %v15346_v3  ;;  %v13989_v54 = vmul.f32 %v13787_v62, %v15347_v51  ;;  %v13993_v36 = vmul.f32 %v15349_v44, %v13787_v62  ;;  %v13997_v46 = vmul.f32 %v15351_v8, %v13787_v62 }
 0x740   :  { %v14001_v4 = vmul.f32 %v13787_v62, %v15353_v31  ;;  %v14005_v3 = vmul.f32 %v13787_v62, %v15355_v13  ;;  %v14009_v51 = vmul.f32 %v15357_v27, %v13787_v62 }
 0x741   :  { %15348 = vst [vmem:[#allocation21_spill] sm:$0xff] %v13989_v54  ;;  %15350 = vst [vmem:[#allocation11_spill] sm:$0xff] %v13993_v36  ;;  %v15359_v54 = vld [vmem:[#allocation20_spill] sm:$0xff]  ;;  %v15361_v36 = vld [vmem:[#allocation23_spill] sm:$0xff] }
 0x742   :  { %15352 = vst [vmem:[#allocation29_spill] sm:$0xff] %v13997_v46  ;;  %15354 = vst [vmem:[#allocation5_spill] sm:$0xff] %v14001_v4  ;;  %v14013_v44 = vmul.f32 %v15359_v54, %v13787_v62  ;;  %v14017_v8 = vmul.f32 %v13787_v62, %v15361_v36  ;;  %v15363_v46 = vld [vmem:[#allocation26_spill] sm:$0xff]  ;;  %v15365_v4 = vld [vmem:[#allocation12_spill] sm:$0xff] }
 0x743   :  { %15356 = vst [vmem:[#allocation4_spill] sm:$0xff] %v14005_v3  ;;  %15358 = vst [vmem:[#allocation28_spill] sm:$0xff] %v14009_v51  ;;  %v14021_v31 = vmul.f32 %v13787_v62, %v15363_v46  ;;  %v14025_v13 = vmul.f32 %v15365_v4, %v13787_v62  ;;  %v15366_v3 = vld [vmem:[#allocation24_spill] sm:$0xff]  ;;  %v15368_v51 = vld [vmem:[#allocation27_spill] sm:$0xff] }
 0x744   :  { %15360 = vst [vmem:[#allocation6_spill] sm:$0xff] %v14013_v44  ;;  %15362 = vst [vmem:[#allocation8_spill] sm:$0xff] %v14017_v8  ;;  %v14029_v27 = vmul.f32 %v15366_v3, %v13787_v62  ;;  %v14033_v54 = vmul.f32 %v13787_v62, %v15368_v51  ;;  %v15369_v44 = vld [vmem:[#allocation7_spill] sm:$0xff]  ;;  %v15370_v8 = vld [vmem:[#allocation22_spill] sm:$0xff]  ;;  %v15372_v3 = vsub.f32 %v13782_v24, %v13784_v25 }
 0x745   :  { %15364 = vst [vmem:[#allocation17_spill] sm:$0xff] %v14021_v31  ;;  %v14037_v36 = vmul.f32 %v13787_v62, %v15369_v44  ;;  %v14041_v46 = vmul.f32 %v15370_v8, %v13787_v62  ;;  %v15371_v31 = vld [vmem:[#allocation3_spill] sm:$0xff] }
 0x746   :  { %15367 = vst [vmem:[#allocation9_spill] sm:$0xff] %v14029_v27  ;;  %v14045_v4 = vmul.f32 %v15371_v31, %v13787_v62  ;;  %v14051_v27 = vrot.slane %v15372_v3, %v15337_v21 }
 0x748   :  { %v14055_v51 = vadd.f32 %v14051_v27, %v13793_v63  ;;  %v14059_v44 = vadd.f32 %v14051_v27, %v13797_v14  ;;  %v14063_v8 = vadd.f32 %v14051_v27, %v13801_v58  ;;  %v14067_v62 = vadd.f32 %v14051_v27, %v13805_v59 }
 0x749   :  { %v14071_v24 = vadd.f32 %v14051_v27, %v13809_v1  ;;  %v14075_v25 = vadd.f32 %v14051_v27, %v13813_v11  ;;  %v14079_v21 = vadd.f32 %v14051_v27, %v13817_v0  ;;  %v14083_v63 = vadd.f32 %v14051_v27, %v13821_v45  ;;  %v15379_v31 = vld [vmem:[#allocation29_spill] sm:$0xff] }
 0x74a   :  { %v14087_v14 = vadd.f32 %v14051_v27, %v13825_v42  ;;  %v14091_v58 = vadd.f32 %v14051_v27, %v13829_v12  ;;  %v14095_v59 = vadd.f32 %v14051_v27, %v13833_v38  ;;  %v14099_v1 = vadd.f32 %v14051_v27, %v13837_v29  ;;  %v15381_v3 = vld [vmem:[#allocation5_spill] sm:$0xff] }
 0x74b   :  { %v14103_v11 = vadd.f32 %v14051_v27, %v13841_v23  ;;  %v14107_v0 = vadd.f32 %v14051_v27, %v13845_v41  ;;  %v14111_v45 = vadd.f32 %v14051_v27, %v13849_v47  ;;  %v14115_v42 = vadd.f32 %v14051_v27, %v13853_v33 }
 0x74c   :  { %v14119_v12 = vadd.f32 %v14051_v27, %v13857_v50  ;;  %v14123_v38 = vadd.f32 %v14051_v27, %v13861_v16  ;;  %v14127_v29 = vadd.f32 %v14051_v27, %v13865_v19  ;;  %v14131_v23 = vadd.f32 %v14051_v27, %v13869_v37 }
 0x74d   :  { %v14135_v41 = vadd.f32 %v14051_v27, %v13873_v40  ;;  %v14139_v47 = vadd.f32 %v14051_v27, %v13877_v39  ;;  %v14143_v33 = vadd.f32 %v14051_v27, %v13881_v26  ;;  %v14147_v50 = vadd.f32 %v14051_v27, %v13885_v48 }
 0x74e   :  { %v14151_v16 = vadd.f32 %v14051_v27, %v13889_v5  ;;  %v14155_v19 = vadd.f32 %v14051_v27, %v13893_v60  ;;  %v14159_v37 = vadd.f32 %v14051_v27, %v13897_v7  ;;  %v14163_v40 = vadd.f32 %v14051_v27, %v13901_v17 }
 0x74f   :  { %v14167_v39 = vadd.f32 %v14051_v27, %v13905_v18  ;;  %v14171_v26 = vadd.f32 %v14051_v27, %v13909_v32  ;;  %v14175_v48 = vadd.f32 %v14051_v27, %v13913_v55  ;;  %v14179_v5 = vadd.f32 %v14051_v27, %v13917_v10 }
 0x750   :  { %v14183_v60 = vadd.f32 %v14051_v27, %v13921_v56  ;;  %v14187_v7 = vadd.f32 %v14051_v27, %v13925_v52  ;;  %v14191_v17 = vadd.f32 %v14051_v27, %v13929_v22  ;;  %v14195_v18 = vadd.f32 %v14051_v27, %v13933_v6 }
 0x751   :  { %v14199_v32 = vadd.f32 %v14051_v27, %v13937_v61  ;;  %v14203_v55 = vadd.f32 %v14051_v27, %v13941_v30  ;;  %v14207_v10 = vadd.f32 %v14051_v27, %v13945_v35  ;;  %v14211_v56 = vadd.f32 %v14051_v27, %v13949_v43 }
 0x752   :  { %v14215_v52 = vadd.f32 %v14051_v27, %v13953_v49  ;;  %v14219_v22 = vadd.f32 %v14051_v27, %v13957_v9  ;;  %v14223_v6 = vadd.f32 %v14051_v27, %v13961_v53  ;;  %v14227_v61 = vadd.f32 %v14051_v27, %v13965_v28  ;;  %v15375_v53 = vld [vmem:[#allocation21_spill] sm:$0xff] }
 0x753   :  { %v14231_v30 = vadd.f32 %v14051_v27, %v13969_v15  ;;  %v14235_v35 = vadd.f32 %v14051_v27, %v13973_v2  ;;  %v14239_v43 = vadd.f32 %v14051_v27, %v13977_v57  ;;  %v14243_v49 = vadd.f32 %v14051_v27, %v13981_v34  ;;  %v15377_v15 = vld [vmem:[#allocation11_spill] sm:$0xff] }
 0x754   :  { %v14247_v9 = vadd.f32 %v14051_v27, %v13985_v20  ;;  %v14251_v28 = vadd.f32 %v14051_v27, %v15375_v53  ;;  %v14255_v2 = vadd.f32 %v14051_v27, %v15377_v15  ;;  %v14259_v57 = vadd.f32 %v14051_v27, %v15379_v31 }
 0x755   :  { %15373 = vst [vmem:[#allocation15_spill] sm:$0xff] %v14243_v49  ;;  %v14263_v34 = vadd.f32 %v14051_v27, %v15381_v3  ;;  %v15382_v49 = vld [vmem:[#allocation4_spill] sm:$0xff] }
 0x756   :  { %15374 = vst [vmem:[#allocation14_spill] sm:$0xff] %v14247_v9  ;;  %15376 = vst [vmem:[#allocation13_spill] sm:$0xff] %v14251_v28  ;;  %v14267_v20 = vadd.f32 %v14051_v27, %v15382_v49  ;;  %v15384_v9 = vld [vmem:[#allocation28_spill] sm:$0xff]  ;;  %v15385_v28 = vld [vmem:[#allocation6_spill] sm:$0xff]  ;;  %v14287_v49 = vadd.f32 %v14051_v27, %v14025_v13  ;;  %v14307_v13 = vadd.f32 %v14051_v27, %v14045_v4 }
 0x757   :  { %15378 = vst [vmem:[#allocation10_spill] sm:$0xff] %v14255_v2  ;;  %15380 = vst [vmem:[#allocation16_spill] sm:$0xff] %v14259_v57  ;;  %v14271_v53 = vadd.f32 %v14051_v27, %v15384_v9  ;;  %v14275_v15 = vadd.f32 %v14051_v27, %v15385_v28  ;;  %v15386_v2 = vld [vmem:[#allocation8_spill] sm:$0xff]  ;;  %v15387_v57 = vld [vmem:[#allocation17_spill] sm:$0xff]  ;;  %v14295_v28 = vadd.f32 %v14051_v27, %v14033_v54 }
 0x758   :  { %15383 = vst [vmem:[#allocation18_spill] sm:$0xff] %v14267_v20  ;;  %v14279_v31 = vadd.f32 %v14051_v27, %v15386_v2  ;;  %v14283_v3 = vadd.f32 %v14051_v27, %v15387_v57  ;;  %v15388_v20 = vld [vmem:[#allocation9_spill] sm:$0xff]  ;;  %v14299_v2 = vadd.f32 %v14051_v27, %v14037_v36  ;;  %v14303_v57 = vadd.f32 %v14051_v27, %v14041_v46  ;;  %v9701_v54 = vld [vmem:[%s15014_s0 + $0x8] sm:$0xff]  ;;  %v9703_v4 = vld [vmem:[%s15014_s0 + $0x18] sm:$0xff] }
 0x759   :  { %v14291_v9 = vadd.f32 %v14051_v27, %v15388_v20  ;;  %v9700_v20 = vld [vmem:[%s15014_s0] sm:$0xff]  ;;  %v14319_v36 = vadd.f32 %v9701_v54, %v14059_v44  ;;  %v9702_v46 = vld [vmem:[%s15014_s0 + $0x10] sm:$0xff]  ;;  %v9705_v54 = vld [vmem:[%s15014_s0 + $0x28] sm:$0xff] }
 0x75a   :  { %v14325_v27 = vadd.f32 %v9702_v46, %v14063_v8  ;;  %v14343_v8 = vadd.f32 %v9705_v54, %v14075_v25  ;;  %v9706_v46 = vld [vmem:[%s15014_s0 + $0x30] sm:$0xff]  ;;  %v9709_v54 = vld [vmem:[%s15014_s0 + $0x48] sm:$0xff] }
 0x75b   :  { %15389 = vst [vmem:[#allocation25_spill] sm:$0xff] %v14291_v9  ;;  %v14313_v9 = vadd.f32 %v9700_v20, %v14055_v51  ;;  %v14331_v51 = vadd.f32 %v9703_v4, %v14067_v62  ;;  %v9704_v20 = vld [vmem:[%s15014_s0 + $0x20] sm:$0xff]  ;;  %v14349_v62 = vadd.f32 %v9706_v46, %v14079_v21  ;;  %v9707_v4 = vld [vmem:[%s15014_s0 + $0x38] sm:$0xff]  ;;  %v14367_v21 = vadd.f32 %v9709_v54, %v14091_v58  ;;  %v9710_v46 = vld [vmem:[%s15014_s0 + $0x50] sm:$0xff] }
 0x75c   :  { %v14337_v44 = vadd.f32 %v9704_v20, %v14071_v24  ;;  %v14355_v24 = vadd.f32 %v9707_v4, %v14083_v63  ;;  %v9708_v20 = vld [vmem:[%s15014_s0 + $0x40] sm:$0xff]  ;;  %v14373_v63 = vadd.f32 %v9710_v46, %v14095_v59  ;;  %v9711_v4 = vld [vmem:[%s15014_s0 + $0x58] sm:$0xff]  ;;  %v9713_v54 = vld [vmem:[%s15014_s0 + $0x68] sm:$0xff] }
 0x75d   :  { %v14361_v25 = vadd.f32 %v9708_v20, %v14087_v14  ;;  %v14379_v14 = vadd.f32 %v9711_v4, %v14099_v1  ;;  %v9712_v20 = vld [vmem:[%s15014_s0 + $0x60] sm:$0xff]  ;;  %v14391_v59 = vadd.f32 %v9713_v54, %v14107_v0  ;;  %v9714_v46 = vld [vmem:[%s15014_s0 + $0x70] sm:$0xff]  ;;  %v9715_v4 = vld [vmem:[%s15014_s0 + $0x78] sm:$0xff] }
 0x75e   :  { %v14385_v58 = vadd.f32 %v9712_v20, %v14103_v11  ;;  %v14397_v1 = vadd.f32 %v9714_v46, %v14111_v45  ;;  %v14403_v11 = vadd.f32 %v9715_v4, %v14115_v42  ;;  %v9716_v20 = vld [vmem:[%s15014_s0 + $0x80] sm:$0xff]  ;;  %v9717_v54 = vld [vmem:[%s15014_s0 + $0x88] sm:$0xff]  ;;  %v9718_v46 = vld [vmem:[%s15014_s0 + $0x90] sm:$0xff] }
 0x75f   :  { %v14409_v0 = vadd.f32 %v9716_v20, %v14119_v12  ;;  %v14415_v45 = vadd.f32 %v9717_v54, %v14123_v38  ;;  %v14421_v42 = vadd.f32 %v9718_v46, %v14127_v29  ;;  %v9719_v4 = vld [vmem:[%s15014_s0 + $0x98] sm:$0xff]  ;;  %v9720_v20 = vld [vmem:[%s15014_s0 + $0xa0] sm:$0xff]  ;;  %v9721_v54 = vld [vmem:[%s15014_s0 + $0xa8] sm:$0xff] }
 0x760   :  { %v14427_v12 = vadd.f32 %v9719_v4, %v14131_v23  ;;  %v14433_v38 = vadd.f32 %v9720_v20, %v14135_v41  ;;  %v14439_v29 = vadd.f32 %v9721_v54, %v14139_v47  ;;  %v9722_v46 = vld [vmem:[%s15014_s0 + $0xb0] sm:$0xff]  ;;  %v9723_v4 = vld [vmem:[%s15014_s0 + $0xb8] sm:$0xff]  ;;  %v9724_v20 = vld [vmem:[%s15014_s0 + $0xc0] sm:$0xff] }
 0x761   :  { %v14445_v23 = vadd.f32 %v9722_v46, %v14143_v33  ;;  %v14451_v41 = vadd.f32 %v9723_v4, %v14147_v50  ;;  %v14457_v47 = vadd.f32 %v9724_v20, %v14151_v16  ;;  %v9725_v54 = vld [vmem:[%s15014_s0 + $0xc8] sm:$0xff]  ;;  %v9726_v46 = vld [vmem:[%s15014_s0 + $0xd0] sm:$0xff]  ;;  %v9727_v4 = vld [vmem:[%s15014_s0 + $0xd8] sm:$0xff] }
 0x762   :  { %v14463_v33 = vadd.f32 %v9725_v54, %v14155_v19  ;;  %v14469_v50 = vadd.f32 %v9726_v46, %v14159_v37  ;;  %v14475_v16 = vadd.f32 %v9727_v4, %v14163_v40  ;;  %v9728_v20 = vld [vmem:[%s15014_s0 + $0xe0] sm:$0xff]  ;;  %v9729_v54 = vld [vmem:[%s15014_s0 + $0xe8] sm:$0xff]  ;;  %v9730_v46 = vld [vmem:[%s15014_s0 + $0xf0] sm:$0xff] }
 0x763   :  { %v14481_v19 = vadd.f32 %v9728_v20, %v14167_v39  ;;  %v14487_v37 = vadd.f32 %v9729_v54, %v14171_v26  ;;  %v14493_v40 = vadd.f32 %v9730_v46, %v14175_v48  ;;  %v9731_v4 = vld [vmem:[%s15014_s0 + $0xf8] sm:$0xff]  ;;  %v9732_v20 = vld [vmem:[%s15014_s0 + $0x100] sm:$0xff]  ;;  %v9733_v54 = vld [vmem:[%s15014_s0 + $0x108] sm:$0xff] }
 0x764   :  { %v14499_v39 = vadd.f32 %v9731_v4, %v14179_v5  ;;  %v14505_v26 = vadd.f32 %v9732_v20, %v14183_v60  ;;  %v14511_v48 = vadd.f32 %v9733_v54, %v14187_v7  ;;  %v9734_v46 = vld [vmem:[%s15014_s0 + $0x110] sm:$0xff]  ;;  %v9735_v4 = vld [vmem:[%s15014_s0 + $0x118] sm:$0xff]  ;;  %v9736_v20 = vld [vmem:[%s15014_s0 + $0x120] sm:$0xff] }
 0x765   :  { %v14517_v5 = vadd.f32 %v9734_v46, %v14191_v17  ;;  %v14523_v60 = vadd.f32 %v9735_v4, %v14195_v18  ;;  %v14529_v7 = vadd.f32 %v9736_v20, %v14199_v32  ;;  %v9737_v54 = vld [vmem:[%s15014_s0 + $0x128] sm:$0xff]  ;;  %v9738_v46 = vld [vmem:[%s15014_s0 + $0x130] sm:$0xff]  ;;  %v9739_v4 = vld [vmem:[%s15014_s0 + $0x138] sm:$0xff] }
 0x766   :  { %v14535_v17 = vadd.f32 %v9737_v54, %v14203_v55  ;;  %v14541_v18 = vadd.f32 %v9738_v46, %v14207_v10  ;;  %v14547_v32 = vadd.f32 %v9739_v4, %v14211_v56  ;;  %v9740_v20 = vld [vmem:[%s15014_s0 + $0x140] sm:$0xff]  ;;  %v9741_v54 = vld [vmem:[%s15014_s0 + $0x148] sm:$0xff]  ;;  %v9742_v46 = vld [vmem:[%s15014_s0 + $0x150] sm:$0xff] }
 0x767   :  { %v14553_v55 = vadd.f32 %v9740_v20, %v14215_v52  ;;  %v14559_v10 = vadd.f32 %v9741_v54, %v14219_v22  ;;  %v14565_v56 = vadd.f32 %v9742_v46, %v14223_v6  ;;  %v9743_v4 = vld [vmem:[%s15014_s0 + $0x158] sm:$0xff]  ;;  %v9744_v20 = vld [vmem:[%s15014_s0 + $0x160] sm:$0xff]  ;;  %v9745_v54 = vld [vmem:[%s15014_s0 + $0x168] sm:$0xff] }
 0x768   :  { %v14571_v52 = vadd.f32 %v9743_v4, %v14227_v61  ;;  %v14577_v22 = vadd.f32 %v9744_v20, %v14231_v30  ;;  %v14583_v6 = vadd.f32 %v9745_v54, %v14235_v35  ;;  %v9746_v46 = vld [vmem:[%s15014_s0 + $0x170] sm:$0xff]  ;;  %v9747_v4 = vld [vmem:[%s15014_s0 + $0x178] sm:$0xff]  ;;  %v15393_v30 = vld [vmem:[#allocation15_spill] sm:$0xff] }
 0x769   :  { %v14589_v61 = vadd.f32 %v9746_v46, %v14239_v43  ;;  %v14595_v20 = vadd.f32 %v9747_v4, %v15393_v30  ;;  %v15395_v35 = vld [vmem:[#allocation14_spill] sm:$0xff]  ;;  %v15397_v43 = vld [vmem:[#allocation13_spill] sm:$0xff] }
 0x76a   :  { %15390 = vst [vmem:[#allocation19_spill] sm:$0xff] %v14577_v22  ;;  %15391 = vst [vmem:[#allocation20_spill] sm:$0xff] %v14583_v6  ;;  %v9748_v22 = vld [vmem:[%s15014_s0 + $0x180] sm:$0xff]  ;;  %v9749_v6 = vld [vmem:[%s15014_s0 + $0x188] sm:$0xff] }
 0x76b   :  { %15392 = vst [vmem:[#allocation23_spill] sm:$0xff] %v14589_v61  ;;  %15394 = vst [vmem:[#allocation26_spill] sm:$0xff] %v14595_v20  ;;  %v14601_v54 = vadd.f32 %v9748_v22, %v15395_v35  ;;  %v14607_v46 = vadd.f32 %v9749_v6, %v15397_v43  ;;  %v9750_v61 = vld [vmem:[%s15014_s0 + $0x190] sm:$0xff]  ;;  %v15398_v4 = vld [vmem:[#allocation10_spill] sm:$0xff] }
 0x76c   :  { %v14613_v30 = vadd.f32 %v9750_v61, %v15398_v4  ;;  %v9751_v20 = vld [vmem:[%s15014_s0 + $0x198] sm:$0xff]  ;;  %v15400_v22 = vld [vmem:[#allocation16_spill] sm:$0xff] }
 0x76d   :  { %15396 = vst [vmem:[#allocation12_spill] sm:$0xff] %v14601_v54  ;;  %v14619_v35 = vadd.f32 %v9751_v20, %v15400_v22  ;;  %v9752_v54 = vld [vmem:[%s15014_s0 + $0x1a0] sm:$0xff]  ;;  %v9753_v43 = vld [vmem:[%s15014_s0 + $0x1a8] sm:$0xff]  ;;  %v15401_v61 = vld [vmem:[#allocation18_spill] sm:$0xff] }
 0x76e   :  { %15399 = vst [vmem:[#allocation24_spill] sm:$0xff] %v14613_v30  ;;  %v14625_v6 = vadd.f32 %v9752_v54, %v14263_v34  ;;  %v14631_v4 = vadd.f32 %v9753_v43, %v15401_v61  ;;  %v9754_v30 = vld [vmem:[%s15014_s0 + $0x1b0] sm:$0xff]  ;;  %v9755_v22 = vld [vmem:[%s15014_s0 + $0x1b8] sm:$0xff]  ;;  %v9756_v54 = vld [vmem:[%s15014_s0 + $0x1c0] sm:$0xff] }
 0x76f   :  { %v14637_v20 = vadd.f32 %v9754_v30, %v14271_v53  ;;  %v14643_v34 = vadd.f32 %v9755_v22, %v14275_v15  ;;  %v14649_v43 = vadd.f32 %v9756_v54, %v14279_v31  ;;  %v9757_v61 = vld [vmem:[%s15014_s0 + $0x1c8] sm:$0xff]  ;;  %v9758_v30 = vld [vmem:[%s15014_s0 + $0x1d0] sm:$0xff]  ;;  %v9759_v22 = vld [vmem:[%s15014_s0 + $0x1d8] sm:$0xff] }
 0x770   :  { %v14655_v53 = vadd.f32 %v9757_v61, %v14283_v3  ;;  %v14661_v15 = vadd.f32 %v9758_v30, %v14287_v49  ;;  %v15403_v31 = vld [vmem:[#allocation25_spill] sm:$0xff]  ;;  %v9761_v61 = vld [vmem:[%s15014_s0 + $0x1e8] sm:$0xff] }
 0x771   :  { %15402 = vst [vmem:[#allocation27_spill] sm:$0xff] %v14649_v43  ;;  %v14667_v54 = vadd.f32 %v9759_v22, %v15403_v31  ;;  %v9760_v43 = vld [vmem:[%s15014_s0 + $0x1e0] sm:$0xff]  ;;  %v14679_v49 = vadd.f32 %v9761_v61, %v14299_v2  ;;  %v9762_v30 = vld [vmem:[%s15014_s0 + $0x1f0] sm:$0xff]  ;;  %v9763_v31 = vld [vmem:[%s15014_s0 + $0x1f8] sm:$0xff]  ;;  %v7586_v2 = vmax.f32 %v14325_v27, 0.0  ;;  %v7587_v61 = vmax.f32 %v14331_v51, 0.0 }
 0x772   :  { %v14673_v3 = vadd.f32 %v9760_v43, %v14295_v28  ;;  %v14685_v22 = vadd.f32 %v9762_v30, %v14303_v57  ;;  %v14691_v28 = vadd.f32 %v9763_v31, %v14307_v13  ;;  %v7584_v43 = vmax.f32 %v14313_v9, 0.0 }
 0x773   :  { %15404 = vst [vmem:[#allocation7_spill] sm:$0xff] %v14667_v54  ;;  %15406 = vst [vmem:[#allocation3_spill] sm:$0xff] %v14679_v49  ;;  %v7588_v49 = vmax.f32 %v14337_v44, 0.0  ;;  %v7589_v57 = vmax.f32 %v14343_v8, 0.0  ;;  %v7590_v30 = vmax.f32 %v14349_v62, 0.0  ;;  %v7592_v54 = vmax.f32 %v14361_v25, 0.0 }
 0x774   :  { %15405 = vst [vmem:[#allocation22_spill] sm:$0xff] %v14673_v3  ;;  %15407 = vst [vmem:[#allocation21_spill] sm:$0xff] %v14685_v22  ;;  %v7585_v3 = vmax.f32 %v14319_v36, 0.0  ;;  %v7591_v22 = vmax.f32 %v14355_v24, 0.0  ;;  %v7593_v13 = vmax.f32 %v14367_v21, 0.0  ;;  %v7594_v9 = vmax.f32 %v14373_v63, 0.0 }
 0x775   :  { %v7595_v36 = vmax.f32 %v14379_v14, 0.0  ;;  %7648 = vst.msk [vmem:[%s15023_s10] sm:$0xff] %vm140_vm0, %v7584_v43  ;;  %7650 = vst.msk [vmem:[%s15023_s10 + $0x10] sm:$0xff] %vm140_vm0, %v7586_v2  ;;  %v7596_v27 = vmax.f32 %v14385_v58, 0.0  ;;  %v7597_v51 = vmax.f32 %v14391_v59, 0.0  ;;  %v7598_v44 = vmax.f32 %v14397_v1, 0.0 }
 0x776   :  { %7649 = vst.msk [vmem:[%s15023_s10 + $0x8] sm:$0xff] %vm140_vm0, %v7585_v3  ;;  %7651 = vst.msk [vmem:[%s15023_s10 + $0x18] sm:$0xff] %vm140_vm0, %v7587_v61  ;;  %v7599_v8 = vmax.f32 %v14403_v11, 0.0  ;;  %v7600_v62 = vmax.f32 %v14409_v0, 0.0  ;;  %v7601_v24 = vmax.f32 %v14415_v45, 0.0  ;;  %v7602_v25 = vmax.f32 %v14421_v42, 0.0 }
 0x777   :  { %7652 = vst.msk [vmem:[%s15023_s10 + $0x20] sm:$0xff] %vm140_vm0, %v7588_v49  ;;  %7653 = vst.msk [vmem:[%s15023_s10 + $0x28] sm:$0xff] %vm140_vm0, %v7589_v57  ;;  %v7603_v21 = vmax.f32 %v14427_v12, 0.0  ;;  %v7604_v63 = vmax.f32 %v14433_v38, 0.0  ;;  %v7605_v14 = vmax.f32 %v14439_v29, 0.0  ;;  %v7606_v58 = vmax.f32 %v14445_v23, 0.0 }
 0x778   :  { %7654 = vst.msk [vmem:[%s15023_s10 + $0x30] sm:$0xff] %vm140_vm0, %v7590_v30  ;;  %7655 = vst.msk [vmem:[%s15023_s10 + $0x38] sm:$0xff] %vm140_vm0, %v7591_v22  ;;  %v7607_v59 = vmax.f32 %v14451_v41, 0.0  ;;  %v7608_v1 = vmax.f32 %v14457_v47, 0.0  ;;  %v7609_v11 = vmax.f32 %v14463_v33, 0.0  ;;  %v7610_v0 = vmax.f32 %v14469_v50, 0.0 }
 0x779   :  { %7656 = vst.msk [vmem:[%s15023_s10 + $0x40] sm:$0xff] %vm140_vm0, %v7592_v54  ;;  %7657 = vst.msk [vmem:[%s15023_s10 + $0x48] sm:$0xff] %vm140_vm0, %v7593_v13  ;;  %v7611_v45 = vmax.f32 %v14475_v16, 0.0  ;;  %v7612_v42 = vmax.f32 %v14481_v19, 0.0  ;;  %v7613_v12 = vmax.f32 %v14487_v37, 0.0  ;;  %v7614_v38 = vmax.f32 %v14493_v40, 0.0 }
 0x77a   :  { %7658 = vst.msk [vmem:[%s15023_s10 + $0x50] sm:$0xff] %vm140_vm0, %v7594_v9  ;;  %7659 = vst.msk [vmem:[%s15023_s10 + $0x58] sm:$0xff] %vm140_vm0, %v7595_v36  ;;  %v7615_v29 = vmax.f32 %v14499_v39, 0.0  ;;  %v7616_v23 = vmax.f32 %v14505_v26, 0.0  ;;  %v7617_v41 = vmax.f32 %v14511_v48, 0.0  ;;  %v7618_v47 = vmax.f32 %v14517_v5, 0.0 }
 0x77b   :  { %7660 = vst.msk [vmem:[%s15023_s10 + $0x60] sm:$0xff] %vm140_vm0, %v7596_v27  ;;  %7661 = vst.msk [vmem:[%s15023_s10 + $0x68] sm:$0xff] %vm140_vm0, %v7597_v51  ;;  %v7619_v33 = vmax.f32 %v14523_v60, 0.0  ;;  %v7620_v50 = vmax.f32 %v14529_v7, 0.0  ;;  %v7621_v16 = vmax.f32 %v14535_v17, 0.0  ;;  %v7622_v19 = vmax.f32 %v14541_v18, 0.0 }
 0x77c   :  { %7662 = vst.msk [vmem:[%s15023_s10 + $0x70] sm:$0xff] %vm140_vm0, %v7598_v44  ;;  %7663 = vst.msk [vmem:[%s15023_s10 + $0x78] sm:$0xff] %vm140_vm0, %v7599_v8  ;;  %v7623_v37 = vmax.f32 %v14547_v32, 0.0  ;;  %v7624_v40 = vmax.f32 %v14553_v55, 0.0  ;;  %v7625_v39 = vmax.f32 %v14559_v10, 0.0  ;;  %v7626_v26 = vmax.f32 %v14565_v56, 0.0 }
 0x77d   :  { %7664 = vst.msk [vmem:[%s15023_s10 + $0x80] sm:$0xff] %vm140_vm0, %v7600_v62  ;;  %7665 = vst.msk [vmem:[%s15023_s10 + $0x88] sm:$0xff] %vm140_vm0, %v7601_v24  ;;  %v7627_v48 = vmax.f32 %v14571_v52, 0.0  ;;  %v15408_v5 = vld [vmem:[#allocation19_spill] sm:$0xff]  ;;  %v15409_v7 = vld [vmem:[#allocation20_spill] sm:$0xff]  ;;  %v7633_v54 = vmax.f32 %v14607_v46, 0.0 }
 0x77e   :  { %7666 = vst.msk [vmem:[%s15023_s10 + $0x90] sm:$0xff] %vm140_vm0, %v7602_v25  ;;  %7667 = vst.msk [vmem:[%s15023_s10 + $0x98] sm:$0xff] %vm140_vm0, %v7603_v21  ;;  %v7628_v60 = vmax.f32 %v15408_v5, 0.0  ;;  %v7629_v17 = vmax.f32 %v15409_v7, 0.0  ;;  %v15410_v18 = vld [vmem:[#allocation23_spill] sm:$0xff]  ;;  %v15411_v55 = vld [vmem:[#allocation26_spill] sm:$0xff] }
 0x77f   :  { %7668 = vst.msk [vmem:[%s15023_s10 + $0xa0] sm:$0xff] %vm140_vm0, %v7604_v63  ;;  %7669 = vst.msk [vmem:[%s15023_s10 + $0xa8] sm:$0xff] %vm140_vm0, %v7605_v14  ;;  %v7630_v32 = vmax.f32 %v15410_v18, 0.0  ;;  %v7631_v10 = vmax.f32 %v15411_v55, 0.0  ;;  %v15412_v56 = vld [vmem:[#allocation12_spill] sm:$0xff]  ;;  %v7635_v22 = vmax.f32 %v14619_v35, 0.0 }
 0x780   :  { %7670 = vst.msk [vmem:[%s15023_s10 + $0xb0] sm:$0xff] %vm140_vm0, %v7606_v58  ;;  %7671 = vst.msk [vmem:[%s15023_s10 + $0xb8] sm:$0xff] %vm140_vm0, %v7607_v59  ;;  %v7632_v52 = vmax.f32 %v15412_v56, 0.0  ;;  %v15413_v3 = vld [vmem:[#allocation24_spill] sm:$0xff]  ;;  %v7636_v46 = vmax.f32 %v14625_v6, 0.0  ;;  %v7637_v35 = vmax.f32 %v14631_v4, 0.0 }
 0x781   :  { %7672 = vst.msk [vmem:[%s15023_s10 + $0xc0] sm:$0xff] %vm140_vm0, %v7608_v1  ;;  %7673 = vst.msk [vmem:[%s15023_s10 + $0xc8] sm:$0xff] %vm140_vm0, %v7609_v11  ;;  %v7634_v49 = vmax.f32 %v15413_v3, 0.0  ;;  %v7638_v31 = vmax.f32 %v14637_v20, 0.0  ;;  %v7639_v43 = vmax.f32 %v14643_v34, 0.0  ;;  %v15414_v6 = vld [vmem:[#allocation27_spill] sm:$0xff] }
 0x782   :  { %7674 = vst.msk [vmem:[%s15023_s10 + $0xd0] sm:$0xff] %vm140_vm0, %v7610_v0  ;;  %7675 = vst.msk [vmem:[%s15023_s10 + $0xd8] sm:$0xff] %vm140_vm0, %v7611_v45  ;;  %v7640_v4 = vmax.f32 %v15414_v6, 0.0  ;;  %v7641_v20 = vmax.f32 %v14655_v53, 0.0  ;;  %v7642_v34 = vmax.f32 %v14661_v15, 0.0  ;;  %v15415_v2 = vld [vmem:[#allocation7_spill] sm:$0xff] }
 0x783   :  { %7676 = vst.msk [vmem:[%s15023_s10 + $0xe0] sm:$0xff] %vm140_vm0, %v7612_v42  ;;  %7677 = vst.msk [vmem:[%s15023_s10 + $0xe8] sm:$0xff] %vm140_vm0, %v7613_v12  ;;  %v7643_v61 = vmax.f32 %v15415_v2, 0.0  ;;  %v15416_v53 = vld [vmem:[#allocation22_spill] sm:$0xff]  ;;  %v15417_v57 = vld [vmem:[#allocation3_spill] sm:$0xff]  ;;  %v7647_v36 = vmax.f32 %v14691_v28, 0.0 }
 0x784   :  { %7678 = vst.msk [vmem:[%s15023_s10 + $0xf0] sm:$0xff] %vm140_vm0, %v7614_v38  ;;  %7679 = vst.msk [vmem:[%s15023_s10 + $0xf8] sm:$0xff] %vm140_vm0, %v7615_v29  ;;  %v7644_v15 = vmax.f32 %v15416_v53, 0.0  ;;  %v7645_v30 = vmax.f32 %v15417_v57, 0.0  ;;  %v15418_v13 = vld [vmem:[#allocation21_spill] sm:$0xff] }
 0x785   :  { %7680 = vst.msk [vmem:[%s15023_s10 + $0x100] sm:$0xff] %vm140_vm0, %v7616_v23  ;;  %7681 = vst.msk [vmem:[%s15023_s10 + $0x108] sm:$0xff] %vm140_vm0, %v7617_v41  ;;  %v7646_v9 = vmax.f32 %v15418_v13, 0.0 }
 0x786   :  { %7682 = vst.msk [vmem:[%s15023_s10 + $0x110] sm:$0xff] %vm140_vm0, %v7618_v47  ;;  %7683 = vst.msk [vmem:[%s15023_s10 + $0x118] sm:$0xff] %vm140_vm0, %v7619_v33 }
 0x787   :  { %7684 = vst.msk [vmem:[%s15023_s10 + $0x120] sm:$0xff] %vm140_vm0, %v7620_v50  ;;  %7685 = vst.msk [vmem:[%s15023_s10 + $0x128] sm:$0xff] %vm140_vm0, %v7621_v16 }
 0x788   :  { %7686 = vst.msk [vmem:[%s15023_s10 + $0x130] sm:$0xff] %vm140_vm0, %v7622_v19  ;;  %7687 = vst.msk [vmem:[%s15023_s10 + $0x138] sm:$0xff] %vm140_vm0, %v7623_v37 }
 0x789   :  { %7688 = vst.msk [vmem:[%s15023_s10 + $0x140] sm:$0xff] %vm140_vm0, %v7624_v40  ;;  %7689 = vst.msk [vmem:[%s15023_s10 + $0x148] sm:$0xff] %vm140_vm0, %v7625_v39 }
 0x78a   :  { %7690 = vst.msk [vmem:[%s15023_s10 + $0x150] sm:$0xff] %vm140_vm0, %v7626_v26  ;;  %7691 = vst.msk [vmem:[%s15023_s10 + $0x158] sm:$0xff] %vm140_vm0, %v7627_v48 }
 0x78b   :  { %7692 = vst.msk [vmem:[%s15023_s10 + $0x160] sm:$0xff] %vm140_vm0, %v7628_v60  ;;  %7693 = vst.msk [vmem:[%s15023_s10 + $0x168] sm:$0xff] %vm140_vm0, %v7629_v17 }
 0x78c   :  { %7694 = vst.msk [vmem:[%s15023_s10 + $0x170] sm:$0xff] %vm140_vm0, %v7630_v32  ;;  %7695 = vst.msk [vmem:[%s15023_s10 + $0x178] sm:$0xff] %vm140_vm0, %v7631_v10 }
 0x78d   :  { %7696 = vst.msk [vmem:[%s15023_s10 + $0x180] sm:$0xff] %vm140_vm0, %v7632_v52  ;;  %7697 = vst.msk [vmem:[%s15023_s10 + $0x188] sm:$0xff] %vm140_vm0, %v7633_v54 }
 0x78e   :  { %7698 = vst.msk [vmem:[%s15023_s10 + $0x190] sm:$0xff] %vm140_vm0, %v7634_v49  ;;  %7699 = vst.msk [vmem:[%s15023_s10 + $0x198] sm:$0xff] %vm140_vm0, %v7635_v22 }
 0x78f   :  { %7700 = vst.msk [vmem:[%s15023_s10 + $0x1a0] sm:$0xff] %vm140_vm0, %v7636_v46  ;;  %7701 = vst.msk [vmem:[%s15023_s10 + $0x1a8] sm:$0xff] %vm140_vm0, %v7637_v35 }
 0x790   :  { %7702 = vst.msk [vmem:[%s15023_s10 + $0x1b0] sm:$0xff] %vm140_vm0, %v7638_v31  ;;  %7703 = vst.msk [vmem:[%s15023_s10 + $0x1b8] sm:$0xff] %vm140_vm0, %v7639_v43 }
 0x791   :  { %7704 = vst.msk [vmem:[%s15023_s10 + $0x1c0] sm:$0xff] %vm140_vm0, %v7640_v4  ;;  %7705 = vst.msk [vmem:[%s15023_s10 + $0x1c8] sm:$0xff] %vm140_vm0, %v7641_v20 }
 0x792   :  { %7706 = vst.msk [vmem:[%s15023_s10 + $0x1d0] sm:$0xff] %vm140_vm0, %v7642_v34  ;;  %7707 = vst.msk [vmem:[%s15023_s10 + $0x1d8] sm:$0xff] %vm140_vm0, %v7643_v61 }
 0x793   :  { %7708 = vst.msk [vmem:[%s15023_s10 + $0x1e0] sm:$0xff] %vm140_vm0, %v7644_v15  ;;  %7709 = vst.msk [vmem:[%s15023_s10 + $0x1e8] sm:$0xff] %vm140_vm0, %v7645_v30 }
 0x794   :  { %7710 = vst.msk [vmem:[%s15023_s10 + $0x1f0] sm:$0xff] %vm140_vm0, %v7646_v9  ;;  %7711 = vst.msk [vmem:[%s15023_s10 + $0x1f8] sm:$0xff] %vm140_vm0, %v7647_v36 }

</bundles_post_ra>
